<compile_context>
chip_gen: v6e
topology: v6e:2x2x1
jax: 0.10.0
libtpu: 0.0.40
codegen_flags: <defaults>
</compile_context>

<pallas_src>
import functools

import jax
import jax.numpy as jnp
from jax.experimental import pallas as pl
from jax.experimental.pallas import tpu as pltpu

_LANE = 128   # channel padding target (lane width)
_SUB = 8      # sublane multiple for padded output spatial dims


def _round_up(v, m):
    return (v + m - 1) // m * m


# ------------------------------ Pallas kernels ------------------------------ #
def _conv_s1_kernel(x_ref, w_ref, b_ref, o_ref, xa_ref, *,
                    kh, kw, hout, wout, apply_abs, apply_relu):
    """Stride-1 conv: KH*KW shifted matmuls on a zero-padded VMEM tile."""
    x = x_ref[0]                                   # (hp, wp, cin_p) f32
    xa_ref[...] = jnp.abs(x) if apply_abs else x   # abs applied once per tile
    cin = xa_ref.shape[-1]
    acc = jnp.zeros((hout * wout, o_ref.shape[-1]), jnp.float32)
    for i in range(kh):
        for j in range(kw):
            tap = xa_ref[i:i + hout, j:j + wout, :]         # (hout, wout, cin_p)
            lhs = tap.reshape(hout * wout, cin).astype(jnp.bfloat16)
            acc = acc + jnp.dot(lhs, w_ref[i * kw + j],
                                preferred_element_type=jnp.float32)
    acc = acc + b_ref[...]                                   # (M, C) + (1, C)
    if apply_relu:
        acc = jnp.maximum(acc, 0.0)
    o_ref[0] = acc.astype(o_ref.dtype)


def _conv_s2_kernel(x_ref, w_ref, b_ref, o_ref, *,
                    kh, kw, hout, wout, apply_relu):
    """Stride-2 conv on a phase-split (4 parity planes) padded input."""
    cin = x_ref.shape[-1]
    acc = jnp.zeros((hout * wout, o_ref.shape[-1]), jnp.float32)
    for p in range(2):
        for q in range(2):
            ph = p * 2 + q
            for i in range(p, kh, 2):          # taps with row parity p
                for j in range(q, kw, 2):      # taps with col parity q
                    r0, c0 = i // 2, j // 2
                    tap = x_ref[0, ph, r0:r0 + hout, c0:c0 + wout, :]
                    lhs = tap.reshape(hout * wout, cin).astype(jnp.bfloat16)
                    acc = acc + jnp.dot(lhs, w_ref[i * kw + j],
                                        preferred_element_type=jnp.float32)
    acc = acc + b_ref[...]
    if apply_relu:
        acc = jnp.maximum(acc, 0.0)
    o_ref[0] = acc.astype(o_ref.dtype)


# ------------------------------ JAX-side glue ------------------------------- #
def _prep_weight(w_oihw, cin_p, cout_p):
    cout, cin, kh, kw = w_oihw.shape
    w = jnp.transpose(w_oihw, (2, 3, 1, 0))                     # (kh, kw, cin, cout)
    w = jnp.pad(w, ((0, 0), (0, 0), (0, cin_p - cin), (0, cout_p - cout)))
    return w.reshape(kh * kw, cin_p, cout_p).astype(jnp.bfloat16)


def _prep_bias(b, cout_p):
    return jnp.pad(b, (0, cout_p - b.shape[0])).reshape(1, cout_p).astype(jnp.float32)


def conv3x3_s1_pallas(x_nhwc, w_oihw, bias, *, apply_abs, apply_relu):
    """nn.Conv2d(k=3, s=1, pad=1) semantics; returns NHWC with padded channels."""
    N, H, W, Cin = x_nhwc.shape
    Cout, _, kh, kw = w_oihw.shape
    pad = kh // 2
    cin_p, cout_p = _round_up(Cin, _LANE), _round_up(Cout, _LANE)
    hout_p, wout_p = _round_up(H, _SUB), _round_up(W, _SUB)
    hp, wp = hout_p + kh - 1, wout_p + kw - 1
    x_p = jnp.pad(x_nhwc.astype(jnp.float32),
                  ((0, 0), (pad, hp - pad - H), (pad, wp - pad - W),
                   (0, cin_p - Cin)))
    w2 = _prep_weight(w_oihw, cin_p, cout_p)
    b2 = _prep_bias(bias, cout_p)
    m = hout_p * wout_p
    kernel = functools.partial(_conv_s1_kernel, kh=kh, kw=kw,
                               hout=hout_p, wout=wout_p,
                               apply_abs=apply_abs, apply_relu=apply_relu)
    flops = 2 * N * m * (kh * kw * cin_p) * cout_p
    bytes_accessed = (x_p.size + N * m * cout_p) * 4 + w2.size * 2 + b2.size * 4
    out = pl.pallas_call(
        kernel,
        out_shape=jax.ShapeDtypeStruct((N, m, cout_p), jnp.float32),
        grid=(N,),
        in_specs=[
            pl.BlockSpec((1, hp, wp, cin_p), lambda n: (n, 0, 0, 0)),
            pl.BlockSpec((kh * kw, cin_p, cout_p), lambda n: (0, 0, 0)),
            pl.BlockSpec((1, cout_p), lambda n: (0, 0)),
        ],
        out_specs=pl.BlockSpec((1, m, cout_p), lambda n: (n, 0, 0)),
        scratch_shapes=[pltpu.VMEM((hp, wp, cin_p), jnp.float32)],
        compiler_params=pltpu.CompilerParams(dimension_semantics=("parallel",)),
        cost_estimate=pl.CostEstimate(flops=flops, transcendentals=0,
                                      bytes_accessed=bytes_accessed),
    )(x_p, w2, b2)
    # crop padded output rows/cols; keep (zero) channel padding for the next layer
    return out.reshape(N, hout_p, wout_p, cout_p)[:, :H, :W, :]


def conv5x5_s2_pallas(x_nhwc, w_oihw, bias, *, apply_relu):
    """nn.Conv2d(k=5, s=2, pad=2) semantics; returns NHWC with padded channels."""
    N, H, W, Cin = x_nhwc.shape
    Cout, _, kh, kw = w_oihw.shape
    pad, stride = kh // 2, 2
    cin_p, cout_p = _round_up(Cin, _LANE), _round_up(Cout, _LANE)
    hout = (H + 2 * pad - kh) // stride + 1
    wout = (W + 2 * pad - kw) // stride + 1
    hout_p, wout_p = _round_up(hout, _SUB), _round_up(wout, _SUB)
    # padded input extent (even, so the parity split gives equal phase planes)
    hp = _round_up(stride * (hout_p - 1) + kh, 2)
    wp = _round_up(stride * (wout_p - 1) + kw, 2)
    x_p = jnp.pad(x_nhwc.astype(jnp.float32),
                  ((0, 0), (pad, hp - pad - H), (pad, wp - pad - W),
                   (0, cin_p - Cin)))
    hh, wh = hp // 2, wp // 2
    # (N, hp, wp, C) -> (N, 4, hp//2, wp//2, C): parity phases (row%2, col%2)
    x_ph = x_p.reshape(N, hh, 2, wh, 2, cin_p)
    x_ph = x_ph.transpose(0, 2, 4, 1, 3, 5).reshape(N, 4, hh, wh, cin_p)
    w2 = _prep_weight(w_oihw, cin_p, cout_p)
    b2 = _prep_bias(bias, cout_p)
    m = hout_p * wout_p
    kernel = functools.partial(_conv_s2_kernel, kh=kh, kw=kw,
                               hout=hout_p, wout=wout_p, apply_relu=apply_relu)
    flops = 2 * N * m * (kh * kw * cin_p) * cout_p
    bytes_accessed = (x_ph.size + N * m * cout_p) * 4 + w2.size * 2 + b2.size * 4
    out = pl.pallas_call(
        kernel,
        out_shape=jax.ShapeDtypeStruct((N, m, cout_p), jnp.float32),
        grid=(N,),
        in_specs=[
            pl.BlockSpec((1, 4, hh, wh, cin_p), lambda n: (n, 0, 0, 0, 0)),
            pl.BlockSpec((kh * kw, cin_p, cout_p), lambda n: (0, 0, 0)),
            pl.BlockSpec((1, cout_p), lambda n: (0, 0)),
        ],
        out_specs=pl.BlockSpec((1, m, cout_p), lambda n: (n, 0, 0)),
        compiler_params=pltpu.CompilerParams(dimension_semantics=("parallel",)),
        cost_estimate=pl.CostEstimate(flops=flops, transcendentals=0,
                                      bytes_accessed=bytes_accessed),
    )(x_ph, w2, b2)
    return out.reshape(N, hout_p, wout_p, cout_p)[:, :hout, :wout, :]


# --------------------------- HyperAnalysis module --------------------------- #
def init_hyper_analysis_params(key, network_channels, compression_channels):
    """Deterministic init mimicking nn.Conv2d default (uniform +/- 1/sqrt(fan_in))."""
    params = {}
    specs = [
        ("conv1", compression_channels, network_channels, 3),
        ("conv2", network_channels, network_channels, 5),
        ("conv3", network_channels, network_channels, 5),
    ]
    for name, cin, cout, k in specs:
        key, kw_, kb_ = jax.random.split(key, 3)
        bound = 1.0 / jnp.sqrt(cin * k * k)
        params[name + "_w"] = jax.random.uniform(
            kw_, (cout, cin, k, k), jnp.float32, -bound, bound)
        params[name + "_b"] = jax.random.uniform(
            kb_, (cout,), jnp.float32, -bound, bound)
    return params


def hyper_analysis_forward(params, x_nchw):
    """x: (N, compression_channels, H, W) NCHW -> (N, network_channels, H//4, W//4)."""
    net_ch = params["conv2_w"].shape[0]
    x = jnp.transpose(x_nchw, (0, 2, 3, 1)).astype(jnp.float32)   # NCHW -> NHWC
    x = conv3x3_s1_pallas(x, params["conv1_w"], params["conv1_b"],
                          apply_abs=True, apply_relu=True)
    x = conv5x5_s2_pallas(x, params["conv2_w"], params["conv2_b"], apply_relu=True)
    x = conv5x5_s2_pallas(x, params["conv3_w"], params["conv3_b"], apply_relu=False)
    x = x[..., :net_ch]                                           # drop channel padding
    return jnp.transpose(x, (0, 3, 1, 2))                         # NHWC -> NCHW


# -------------------------------- references -------------------------------- #
def _ref_conv(x_nchw, w_oihw, b, stride, *, bf16_operands):
    pad = w_oihw.shape[-1] // 2
    lhs, rhs = x_nchw, w_oihw
    if bf16_operands:
        lhs, rhs = lhs.astype(jnp.bfloat16), rhs.astype(jnp.bfloat16)
    y = jax.lax.conv_general_dilated(
        lhs, rhs, window_strides=(stride, stride),
        padding=[(pad, pad), (pad, pad)],
        dimension_numbers=("NCHW", "OIHW", "NCHW"),
        preferred_element_type=jnp.float32)
    return y + b.reshape(1, -1, 1, 1)


def hyper_analysis_reference(params, x_nchw, *, bf16_operands=False):
    x = jnp.abs(x_nchw.astype(jnp.float32))
    x = jax.nn.relu(_ref_conv(x, params["conv1_w"], params["conv1_b"], 1,
                              bf16_operands=bf16_operands))
    x = jax.nn.relu(_ref_conv(x, params["conv2_w"], params["conv2_b"], 2,
                              bf16_operands=bf16_operands))
    return _ref_conv(x, params["conv3_w"], params["conv3_b"], 2,
                     bf16_operands=bf16_operands)


# ----------------------------------- main ------------------------------------ #
if __name__ == "__main__":
    network_channels = 8
    compression_channels = 4

    key = jax.random.PRNGKey(0)
    key_p, key_x = jax.random.split(key)
    params = init_hyper_analysis_params(key_p, network_channels, compression_channels)
    x = jax.random.normal(key_x, (2, compression_channels, 16, 16), jnp.float32)

    fwd = jax.jit(hyper_analysis_forward)
    out = jax.block_until_ready(fwd(params, x))
    assert out.shape == (2, network_channels, 4, 4), out.shape

    # strict check vs a reference using the same operand precision
    # (bf16 MXU operands, f32 accumulation)
    ref_bf16 = jax.block_until_ready(
        hyper_analysis_reference(params, x, bf16_operands=True))
    assert jnp.allclose(out, ref_bf16, atol=1e-2, rtol=1e-2), (
        float(jnp.max(jnp.abs(out - ref_bf16))))

    # loose sanity check vs the pure-f32 reference of the original module
    ref_f32 = jax.block_until_ready(hyper_analysis_reference(params, x))
    rel_l2 = float(jnp.linalg.norm(out - ref_f32) / jnp.linalg.norm(ref_f32))
    assert rel_l2 < 5e-2, rel_l2

    print("KERNEL_OK")
</pallas_src>

<mosaic_0001>
module attributes {stable_mosaic.version = 11 : i64} {
  func.func @_conv_s1_kernel(%arg0: i32, %arg1: memref<1x18x18x128xf32, #tpu.memory_space<vmem>>, %arg2: memref<9x128x128xbf16, #tpu.memory_space<vmem>>, %arg3: memref<1x128xf32, #tpu.memory_space<vmem>>, %arg4: memref<1x256x128xf32, #tpu.memory_space<vmem>>, %arg5: memref<18x18x128xf32, #tpu.memory_space<vmem>>) attributes {dimension_semantics = [#tpu.dimension_semantics<parallel>], iteration_bounds = array<i64: 2>, scalar_prefetch = 0 : i64, scratch_operands = 1 : i64, tpu.core_type = #tpu.core_type<tc>, window_params = [{transform_indices = @transform_0, window_bounds = array<i64: 1, 18, 18, 128>}, {pipeline_mode = #tpu.pipeline_mode<synchronous>, transform_indices = @transform_1, window_bounds = array<i64: 9, 128, 128>}, {pipeline_mode = #tpu.pipeline_mode<synchronous>, transform_indices = @transform_2, window_bounds = array<i64: 1, 128>}, {transform_indices = @transform_3, window_bounds = array<i64: 1, 256, 128>}]} {
    %c0 = arith.constant 0 : index
    %c0_0 = arith.constant 0 : index
    %c0_1 = arith.constant 0 : index
    %c0_2 = arith.constant 0 : index
    %0 = vector.load %arg1[%c0, %c0_0, %c0_1, %c0_2] : memref<1x18x18x128xf32, #tpu.memory_space<vmem>>, vector<1x18x18x128xf32>
    %1 = vector.shape_cast %0 : vector<1x18x18x128xf32> to vector<18x18x128xf32>
    %2 = math.absf %1 : vector<18x18x128xf32>
    %c0_3 = arith.constant 0 : index
    %c0_4 = arith.constant 0 : index
    %c0_5 = arith.constant 0 : index
    %3 = vector.load %arg5[%c0_3, %c0_4, %c0_5] : memref<18x18x128xf32, #tpu.memory_space<vmem>>, vector<18x18x128xf32>
    tpu.vector_store %arg5[%c0_3, %c0_4, %c0_5], %2 {strides = array<i32>} : memref<18x18x128xf32, #tpu.memory_space<vmem>>, vector<18x18x128xf32>,
    %cst = arith.constant 0.000000e+00 : f32
    %4 = vector.broadcast %cst : f32 to vector<256x128xf32>
    %c0_6 = arith.constant 0 : index
    %c0_7 = arith.constant 0 : index
    %c0_8 = arith.constant 0 : index
    %5 = vector.load %arg5[%c0_6, %c0_7, %c0_8] : memref<18x18x128xf32, #tpu.memory_space<vmem>>, vector<16x16x128xf32>
    %6 = vector.shape_cast %5 : vector<16x16x128xf32> to vector<256x128xf32>
    %7 = arith.truncf %6 : vector<256x128xf32> to vector<256x128xbf16>
    %c0_9 = arith.constant 0 : index
    %c0_10 = arith.constant 0 : index
    %c0_11 = arith.constant 0 : index
    %8 = vector.load %arg2[%c0_9, %c0_10, %c0_11] : memref<9x128x128xbf16, #tpu.memory_space<vmem>>, vector<1x128x128xbf16>
    %9 = vector.shape_cast %8 : vector<1x128x128xbf16> to vector<128x128xbf16>
    %cst_12 = arith.constant dense<0.000000e+00> : vector<256x128xf32>
    %10 = tpu.matmul %7, %9, %cst_12 {dimension_numbers = #tpu.dot_dimension_numbers<[1], [0], [0], [1], [0, 0, 1, 1], [], []>} : vector<256x128xbf16>, vector<128x128xbf16>, vector<256x128xf32> -> vector<256x128xf32>
    %11 = arith.addf %4, %10 : vector<256x128xf32>
    %c0_13 = arith.constant 0 : index
    %c1 = arith.constant 1 : index
    %c0_14 = arith.constant 0 : index
    %12 = vector.load %arg5[%c0_13, %c1, %c0_14] : memref<18x18x128xf32, #tpu.memory_space<vmem>>, vector<16x16x128xf32>
    %13 = vector.shape_cast %12 : vector<16x16x128xf32> to vector<256x128xf32>
    %14 = arith.truncf %13 : vector<256x128xf32> to vector<256x128xbf16>
    %c1_15 = arith.constant 1 : index
    %c0_16 = arith.constant 0 : index
    %c0_17 = arith.constant 0 : index
    %15 = vector.load %arg2[%c1_15, %c0_16, %c0_17] : memref<9x128x128xbf16, #tpu.memory_space<vmem>>, vector<1x128x128xbf16>
    %16 = vector.shape_cast %15 : vector<1x128x128xbf16> to vector<128x128xbf16>
    %cst_18 = arith.constant dense<0.000000e+00> : vector<256x128xf32>
    %17 = tpu.matmul %14, %16, %cst_18 {dimension_numbers = #tpu.dot_dimension_numbers<[1], [0], [0], [1], [0, 0, 1, 1], [], []>} : vector<256x128xbf16>, vector<128x128xbf16>, vector<256x128xf32> -> vector<256x128xf32>
    %18 = arith.addf %11, %17 : vector<256x128xf32>
    %c0_19 = arith.constant 0 : index
    %c2 = arith.constant 2 : index
    %c0_20 = arith.constant 0 : index
    %19 = vector.load %arg5[%c0_19, %c2, %c0_20] : memref<18x18x128xf32, #tpu.memory_space<vmem>>, vector<16x16x128xf32>
    %20 = vector.shape_cast %19 : vector<16x16x128xf32> to vector<256x128xf32>
    %21 = arith.truncf %20 : vector<256x128xf32> to vector<256x128xbf16>
    %c2_21 = arith.constant 2 : index
    %c0_22 = arith.constant 0 : index
    %c0_23 = arith.constant 0 : index
    %22 = vector.load %arg2[%c2_21, %c0_22, %c0_23] : memref<9x128x128xbf16, #tpu.memory_space<vmem>>, vector<1x128x128xbf16>
    %23 = vector.shape_cast %22 : vector<1x128x128xbf16> to vector<128x128xbf16>
    %cst_24 = arith.constant dense<0.000000e+00> : vector<256x128xf32>
    %24 = tpu.matmul %21, %23, %cst_24 {dimension_numbers = #tpu.dot_dimension_numbers<[1], [0], [0], [1], [0, 0, 1, 1], [], []>} : vector<256x128xbf16>, vector<128x128xbf16>, vector<256x128xf32> -> vector<256x128xf32>
    %25 = arith.addf %18, %24 : vector<256x128xf32>
    %c1_25 = arith.constant 1 : index
    %c0_26 = arith.constant 0 : index
    %c0_27 = arith.constant 0 : index
    %26 = vector.load %arg5[%c1_25, %c0_26, %c0_27] : memref<18x18x128xf32, #tpu.memory_space<vmem>>, vector<16x16x128xf32>
    %27 = vector.shape_cast %26 : vector<16x16x128xf32> to vector<256x128xf32>
    %28 = arith.truncf %27 : vector<256x128xf32> to vector<256x128xbf16>
    %c3 = arith.constant 3 : index
    %c0_28 = arith.constant 0 : index
    %c0_29 = arith.constant 0 : index
    %29 = vector.load %arg2[%c3, %c0_28, %c0_29] : memref<9x128x128xbf16, #tpu.memory_space<vmem>>, vector<1x128x128xbf16>
    %30 = vector.shape_cast %29 : vector<1x128x128xbf16> to vector<128x128xbf16>
    %cst_30 = arith.constant dense<0.000000e+00> : vector<256x128xf32>
    %31 = tpu.matmul %28, %30, %cst_30 {dimension_numbers = #tpu.dot_dimension_numbers<[1], [0], [0], [1], [0, 0, 1, 1], [], []>} : vector<256x128xbf16>, vector<128x128xbf16>, vector<256x128xf32> -> vector<256x128xf32>
    %32 = arith.addf %25, %31 : vector<256x128xf32>
    %c1_31 = arith.constant 1 : index
    %c1_32 = arith.constant 1 : index
    %c0_33 = arith.constant 0 : index
    %33 = vector.load %arg5[%c1_31, %c1_32, %c0_33] : memref<18x18x128xf32, #tpu.memory_space<vmem>>, vector<16x16x128xf32>
    %34 = vector.shape_cast %33 : vector<16x16x128xf32> to vector<256x128xf32>
    %35 = arith.truncf %34 : vector<256x128xf32> to vector<256x128xbf16>
    %c4 = arith.constant 4 : index
    %c0_34 = arith.constant 0 : index
    %c0_35 = arith.constant 0 : index
    %36 = vector.load %arg2[%c4, %c0_34, %c0_35] : memref<9x128x128xbf16, #tpu.memory_space<vmem>>, vector<1x128x128xbf16>
    %37 = vector.shape_cast %36 : vector<1x128x128xbf16> to vector<128x128xbf16>
    %cst_36 = arith.constant dense<0.000000e+00> : vector<256x128xf32>
    %38 = tpu.matmul %35, %37, %cst_36 {dimension_numbers = #tpu.dot_dimension_numbers<[1], [0], [0], [1], [0, 0, 1, 1], [], []>} : vector<256x128xbf16>, vector<128x128xbf16>, vector<256x128xf32> -> vector<256x128xf32>
    %39 = arith.addf %32, %38 : vector<256x128xf32>
    %c1_37 = arith.constant 1 : index
    %c2_38 = arith.constant 2 : index
    %c0_39 = arith.constant 0 : index
    %40 = vector.load %arg5[%c1_37, %c2_38, %c0_39] : memref<18x18x128xf32, #tpu.memory_space<vmem>>, vector<16x16x128xf32>
    %41 = vector.shape_cast %40 : vector<16x16x128xf32> to vector<256x128xf32>
    %42 = arith.truncf %41 : vector<256x128xf32> to vector<256x128xbf16>
    %c5 = arith.constant 5 : index
    %c0_40 = arith.constant 0 : index
    %c0_41 = arith.constant 0 : index
    %43 = vector.load %arg2[%c5, %c0_40, %c0_41] : memref<9x128x128xbf16, #tpu.memory_space<vmem>>, vector<1x128x128xbf16>
    %44 = vector.shape_cast %43 : vector<1x128x128xbf16> to vector<128x128xbf16>
    %cst_42 = arith.constant dense<0.000000e+00> : vector<256x128xf32>
    %45 = tpu.matmul %42, %44, %cst_42 {dimension_numbers = #tpu.dot_dimension_numbers<[1], [0], [0], [1], [0, 0, 1, 1], [], []>} : vector<256x128xbf16>, vector<128x128xbf16>, vector<256x128xf32> -> vector<256x128xf32>
    %46 = arith.addf %39, %45 : vector<256x128xf32>
    %c2_43 = arith.constant 2 : index
    %c0_44 = arith.constant 0 : index
    %c0_45 = arith.constant 0 : index
    %47 = vector.load %arg5[%c2_43, %c0_44, %c0_45] : memref<18x18x128xf32, #tpu.memory_space<vmem>>, vector<16x16x128xf32>
    %48 = vector.shape_cast %47 : vector<16x16x128xf32> to vector<256x128xf32>
    %49 = arith.truncf %48 : vector<256x128xf32> to vector<256x128xbf16>
    %c6 = arith.constant 6 : index
    %c0_46 = arith.constant 0 : index
    %c0_47 = arith.constant 0 : index
    %50 = vector.load %arg2[%c6, %c0_46, %c0_47] : memref<9x128x128xbf16, #tpu.memory_space<vmem>>, vector<1x128x128xbf16>
    %51 = vector.shape_cast %50 : vector<1x128x128xbf16> to vector<128x128xbf16>
    %cst_48 = arith.constant dense<0.000000e+00> : vector<256x128xf32>
    %52 = tpu.matmul %49, %51, %cst_48 {dimension_numbers = #tpu.dot_dimension_numbers<[1], [0], [0], [1], [0, 0, 1, 1], [], []>} : vector<256x128xbf16>, vector<128x128xbf16>, vector<256x128xf32> -> vector<256x128xf32>
    %53 = arith.addf %46, %52 : vector<256x128xf32>
    %c2_49 = arith.constant 2 : index
    %c1_50 = arith.constant 1 : index
    %c0_51 = arith.constant 0 : index
    %54 = vector.load %arg5[%c2_49, %c1_50, %c0_51] : memref<18x18x128xf32, #tpu.memory_space<vmem>>, vector<16x16x128xf32>
    %55 = vector.shape_cast %54 : vector<16x16x128xf32> to vector<256x128xf32>
    %56 = arith.truncf %55 : vector<256x128xf32> to vector<256x128xbf16>
    %c7 = arith.constant 7 : index
    %c0_52 = arith.constant 0 : index
    %c0_53 = arith.constant 0 : index
    %57 = vector.load %arg2[%c7, %c0_52, %c0_53] : memref<9x128x128xbf16, #tpu.memory_space<vmem>>, vector<1x128x128xbf16>
    %58 = vector.shape_cast %57 : vector<1x128x128xbf16> to vector<128x128xbf16>
    %cst_54 = arith.constant dense<0.000000e+00> : vector<256x128xf32>
    %59 = tpu.matmul %56, %58, %cst_54 {dimension_numbers = #tpu.dot_dimension_numbers<[1], [0], [0], [1], [0, 0, 1, 1], [], []>} : vector<256x128xbf16>, vector<128x128xbf16>, vector<256x128xf32> -> vector<256x128xf32>
    %60 = arith.addf %53, %59 : vector<256x128xf32>
    %c2_55 = arith.constant 2 : index
    %c2_56 = arith.constant 2 : index
    %c0_57 = arith.constant 0 : index
    %61 = vector.load %arg5[%c2_55, %c2_56, %c0_57] : memref<18x18x128xf32, #tpu.memory_space<vmem>>, vector<16x16x128xf32>
    %62 = vector.shape_cast %61 : vector<16x16x128xf32> to vector<256x128xf32>
    %63 = arith.truncf %62 : vector<256x128xf32> to vector<256x128xbf16>
    %c8 = arith.constant 8 : index
    %c0_58 = arith.constant 0 : index
    %c0_59 = arith.constant 0 : index
    %64 = vector.load %arg2[%c8, %c0_58, %c0_59] : memref<9x128x128xbf16, #tpu.memory_space<vmem>>, vector<1x128x128xbf16>
    %65 = vector.shape_cast %64 : vector<1x128x128xbf16> to vector<128x128xbf16>
    %cst_60 = arith.constant dense<0.000000e+00> : vector<256x128xf32>
    %66 = tpu.matmul %63, %65, %cst_60 {dimension_numbers = #tpu.dot_dimension_numbers<[1], [0], [0], [1], [0, 0, 1, 1], [], []>} : vector<256x128xbf16>, vector<128x128xbf16>, vector<256x128xf32> -> vector<256x128xf32>
    %67 = arith.addf %60, %66 : vector<256x128xf32>
    %c0_61 = arith.constant 0 : index
    %c0_62 = arith.constant 0 : index
    %68 = vector.load %arg3[%c0_61, %c0_62] : memref<1x128xf32, #tpu.memory_space<vmem>>, vector<1x128xf32>
    %69 = vector.broadcast %68 : vector<1x128xf32> to vector<256x128xf32>
    %70 = arith.addf %67, %69 : vector<256x128xf32>
    %cst_63 = arith.constant 0.000000e+00 : f32
    %71 = vector.broadcast %cst_63 : f32 to vector<256x128xf32>
    %72 = arith.maximumf %70, %71 : vector<256x128xf32>
    %c0_64 = arith.constant 0 : index
    %c0_65 = arith.constant 0 : index
    %c0_66 = arith.constant 0 : index
    %73 = vector.load %arg4[%c0_64, %c0_65, %c0_66] : memref<1x256x128xf32, #tpu.memory_space<vmem>>, vector<1x256x128xf32>
    %74 = vector.shape_cast %73 : vector<1x256x128xf32> to vector<256x128xf32>
    %75 = vector.shape_cast %72 : vector<256x128xf32> to vector<1x256x128xf32>
    tpu.vector_store %arg4[%c0_64, %c0_65, %c0_66], %75 {strides = array<i32>} : memref<1x256x128xf32, #tpu.memory_space<vmem>>, vector<1x256x128xf32>,
    return
  }
  func.func @transform_0(%arg0: i32) -> (i32, i32, i32, i32) {
    %c0_i32 = arith.constant 0 : i32
    %c0_i32_0 = arith.constant 0 : i32
    %c0_i32_1 = arith.constant 0 : i32
    %c0_i32_2 = arith.constant 0 : i32
    return %arg0, %c0_i32, %c0_i32_0, %c0_i32_1 : i32, i32, i32, i32
  }
  func.func @transform_1(%arg0: i32) -> (i32, i32, i32) {
    %c0_i32 = arith.constant 0 : i32
    %c0_i32_0 = arith.constant 0 : i32
    %c0_i32_1 = arith.constant 0 : i32
    %c0_i32_2 = arith.constant 0 : i32
    return %c0_i32, %c0_i32_0, %c0_i32_1 : i32, i32, i32
  }
  func.func @transform_2(%arg0: i32) -> (i32, i32) {
    %c0_i32 = arith.constant 0 : i32
    %c0_i32_0 = arith.constant 0 : i32
    %c0_i32_1 = arith.constant 0 : i32
    return %c0_i32, %c0_i32_0 : i32, i32
  }
  func.func @transform_3(%arg0: i32) -> (i32, i32, i32) {
    %c0_i32 = arith.constant 0 : i32
    %c0_i32_0 = arith.constant 0 : i32
    %c0_i32_1 = arith.constant 0 : i32
    return %arg0, %c0_i32, %c0_i32_0 : i32, i32, i32
  }
}

module attributes {stable_mosaic.version = 11 : i64} {
  func.func @_conv_s2_kernel(%arg0: i32, %arg1: memref<1x4x10x10x128xf32, #tpu.memory_space<vmem>>, %arg2: memref<25x128x128xbf16, #tpu.memory_space<vmem>>, %arg3: memref<1x128xf32, #tpu.memory_space<vmem>>, %arg4: memref<1x64x128xf32, #tpu.memory_space<vmem>>) attributes {dimension_semantics = [#tpu.dimension_semantics<parallel>], iteration_bounds = array<i64: 2>, scalar_prefetch = 0 : i64, scratch_operands = 0 : i64, tpu.core_type = #tpu.core_type<tc>, window_params = [{transform_indices = @transform_0, window_bounds = array<i64: 1, 4, 10, 10, 128>}, {pipeline_mode = #tpu.pipeline_mode<synchronous>, transform_indices = @transform_1, window_bounds = array<i64: 25, 128, 128>}, {pipeline_mode = #tpu.pipeline_mode<synchronous>, transform_indices = @transform_2, window_bounds = array<i64: 1, 128>}, {transform_indices = @transform_3, window_bounds = array<i64: 1, 64, 128>}]} {
    %cst = arith.constant 0.000000e+00 : f32
    %0 = vector.broadcast %cst : f32 to vector<64x128xf32>
    %c0 = arith.constant 0 : index
    %c0_0 = arith.constant 0 : index
    %c0_1 = arith.constant 0 : index
    %c0_2 = arith.constant 0 : index
    %c0_3 = arith.constant 0 : index
    %1 = vector.load %arg1[%c0, %c0_0, %c0_1, %c0_2, %c0_3] : memref<1x4x10x10x128xf32, #tpu.memory_space<vmem>>, vector<1x1x8x8x128xf32>
    %2 = vector.shape_cast %1 : vector<1x1x8x8x128xf32> to vector<8x8x128xf32>
    %3 = vector.shape_cast %2 : vector<8x8x128xf32> to vector<64x128xf32>
    %4 = arith.truncf %3 : vector<64x128xf32> to vector<64x128xbf16>
    %c0_4 = arith.constant 0 : index
    %c0_5 = arith.constant 0 : index
    %c0_6 = arith.constant 0 : index
    %5 = vector.load %arg2[%c0_4, %c0_5, %c0_6] : memref<25x128x128xbf16, #tpu.memory_space<vmem>>, vector<1x128x128xbf16>
    %6 = vector.shape_cast %5 : vector<1x128x128xbf16> to vector<128x128xbf16>
    %cst_7 = arith.constant dense<0.000000e+00> : vector<64x128xf32>
    %7 = tpu.matmul %4, %6, %cst_7 {dimension_numbers = #tpu.dot_dimension_numbers<[1], [0], [0], [1], [0, 0, 1, 1], [], []>} : vector<64x128xbf16>, vector<128x128xbf16>, vector<64x128xf32> -> vector<64x128xf32>
    %8 = arith.addf %0, %7 : vector<64x128xf32>
    %c0_8 = arith.constant 0 : index
    %c0_9 = arith.constant 0 : index
    %c0_10 = arith.constant 0 : index
    %c1 = arith.constant 1 : index
    %c0_11 = arith.constant 0 : index
    %9 = vector.load %arg1[%c0_8, %c0_9, %c0_10, %c1, %c0_11] : memref<1x4x10x10x128xf32, #tpu.memory_space<vmem>>, vector<1x1x8x8x128xf32>
    %10 = vector.shape_cast %9 : vector<1x1x8x8x128xf32> to vector<8x8x128xf32>
    %11 = vector.shape_cast %10 : vector<8x8x128xf32> to vector<64x128xf32>
    %12 = arith.truncf %11 : vector<64x128xf32> to vector<64x128xbf16>
    %c2 = arith.constant 2 : index
    %c0_12 = arith.constant 0 : index
    %c0_13 = arith.constant 0 : index
    %13 = vector.load %arg2[%c2, %c0_12, %c0_13] : memref<25x128x128xbf16, #tpu.memory_space<vmem>>, vector<1x128x128xbf16>
    %14 = vector.shape_cast %13 : vector<1x128x128xbf16> to vector<128x128xbf16>
    %cst_14 = arith.constant dense<0.000000e+00> : vector<64x128xf32>
    %15 = tpu.matmul %12, %14, %cst_14 {dimension_numbers = #tpu.dot_dimension_numbers<[1], [0], [0], [1], [0, 0, 1, 1], [], []>} : vector<64x128xbf16>, vector<128x128xbf16>, vector<64x128xf32> -> vector<64x128xf32>
    %16 = arith.addf %8, %15 : vector<64x128xf32>
    %c0_15 = arith.constant 0 : index
    %c0_16 = arith.constant 0 : index
    %c0_17 = arith.constant 0 : index
    %c2_18 = arith.constant 2 : index
    %c0_19 = arith.constant 0 : index
    %17 = vector.load %arg1[%c0_15, %c0_16, %c0_17, %c2_18, %c0_19] : memref<1x4x10x10x128xf32, #tpu.memory_space<vmem>>, vector<1x1x8x8x128xf32>
    %18 = vector.shape_cast %17 : vector<1x1x8x8x128xf32> to vector<8x8x128xf32>
    %19 = vector.shape_cast %18 : vector<8x8x128xf32> to vector<64x128xf32>
    %20 = arith.truncf %19 : vector<64x128xf32> to vector<64x128xbf16>
    %c4 = arith.constant 4 : index
    %c0_20 = arith.constant 0 : index
    %c0_21 = arith.constant 0 : index
    %21 = vector.load %arg2[%c4, %c0_20, %c0_21] : memref<25x128x128xbf16, #tpu.memory_space<vmem>>, vector<1x128x128xbf16>
    %22 = vector.shape_cast %21 : vector<1x128x128xbf16> to vector<128x128xbf16>
    %cst_22 = arith.constant dense<0.000000e+00> : vector<64x128xf32>
    %23 = tpu.matmul %20, %22, %cst_22 {dimension_numbers = #tpu.dot_dimension_numbers<[1], [0], [0], [1], [0, 0, 1, 1], [], []>} : vector<64x128xbf16>, vector<128x128xbf16>, vector<64x128xf32> -> vector<64x128xf32>
    %24 = arith.addf %16, %23 : vector<64x128xf32>
    %c0_23 = arith.constant 0 : index
    %c0_24 = arith.constant 0 : index
    %c1_25 = arith.constant 1 : index
    %c0_26 = arith.constant 0 : index
    %c0_27 = arith.constant 0 : index
    %25 = vector.load %arg1[%c0_23, %c0_24, %c1_25, %c0_26, %c0_27] : memref<1x4x10x10x128xf32, #tpu.memory_space<vmem>>, vector<1x1x8x8x128xf32>
    %26 = vector.shape_cast %25 : vector<1x1x8x8x128xf32> to vector<8x8x128xf32>
    %27 = vector.shape_cast %26 : vector<8x8x128xf32> to vector<64x128xf32>
    %28 = arith.truncf %27 : vector<64x128xf32> to vector<64x128xbf16>
    %c10 = arith.constant 10 : index
    %c0_28 = arith.constant 0 : index
    %c0_29 = arith.constant 0 : index
    %29 = vector.load %arg2[%c10, %c0_28, %c0_29] : memref<25x128x128xbf16, #tpu.memory_space<vmem>>, vector<1x128x128xbf16>
    %30 = vector.shape_cast %29 : vector<1x128x128xbf16> to vector<128x128xbf16>
    %cst_30 = arith.constant dense<0.000000e+00> : vector<64x128xf32>
    %31 = tpu.matmul %28, %30, %cst_30 {dimension_numbers = #tpu.dot_dimension_numbers<[1], [0], [0], [1], [0, 0, 1, 1], [], []>} : vector<64x128xbf16>, vector<128x128xbf16>, vector<64x128xf32> -> vector<64x128xf32>
    %32 = arith.addf %24, %31 : vector<64x128xf32>
    %c0_31 = arith.constant 0 : index
    %c0_32 = arith.constant 0 : index
    %c1_33 = arith.constant 1 : index
    %c1_34 = arith.constant 1 : index
    %c0_35 = arith.constant 0 : index
    %33 = vector.load %arg1[%c0_31, %c0_32, %c1_33, %c1_34, %c0_35] : memref<1x4x10x10x128xf32, #tpu.memory_space<vmem>>, vector<1x1x8x8x128xf32>
    %34 = vector.shape_cast %33 : vector<1x1x8x8x128xf32> to vector<8x8x128xf32>
    %35 = vector.shape_cast %34 : vector<8x8x128xf32> to vector<64x128xf32>
    %36 = arith.truncf %35 : vector<64x128xf32> to vector<64x128xbf16>
    %c12 = arith.constant 12 : index
    %c0_36 = arith.constant 0 : index
    %c0_37 = arith.constant 0 : index
    %37 = vector.load %arg2[%c12, %c0_36, %c0_37] : memref<25x128x128xbf16, #tpu.memory_space<vmem>>, vector<1x128x128xbf16>
    %38 = vector.shape_cast %37 : vector<1x128x128xbf16> to vector<128x128xbf16>
    %cst_38 = arith.constant dense<0.000000e+00> : vector<64x128xf32>
    %39 = tpu.matmul %36, %38, %cst_38 {dimension_numbers = #tpu.dot_dimension_numbers<[1], [0], [0], [1], [0, 0, 1, 1], [], []>} : vector<64x128xbf16>, vector<128x128xbf16>, vector<64x128xf32> -> vector<64x128xf32>
    %40 = arith.addf %32, %39 : vector<64x128xf32>
    %c0_39 = arith.constant 0 : index
    %c0_40 = arith.constant 0 : index
    %c1_41 = arith.constant 1 : index
    %c2_42 = arith.constant 2 : index
    %c0_43 = arith.constant 0 : index
    %41 = vector.load %arg1[%c0_39, %c0_40, %c1_41, %c2_42, %c0_43] : memref<1x4x10x10x128xf32, #tpu.memory_space<vmem>>, vector<1x1x8x8x128xf32>
    %42 = vector.shape_cast %41 : vector<1x1x8x8x128xf32> to vector<8x8x128xf32>
    %43 = vector.shape_cast %42 : vector<8x8x128xf32> to vector<64x128xf32>
    %44 = arith.truncf %43 : vector<64x128xf32> to vector<64x128xbf16>
    %c14 = arith.constant 14 : index
    %c0_44 = arith.constant 0 : index
    %c0_45 = arith.constant 0 : index
    %45 = vector.load %arg2[%c14, %c0_44, %c0_45] : memref<25x128x128xbf16, #tpu.memory_space<vmem>>, vector<1x128x128xbf16>
    %46 = vector.shape_cast %45 : vector<1x128x128xbf16> to vector<128x128xbf16>
    %cst_46 = arith.constant dense<0.000000e+00> : vector<64x128xf32>
    %47 = tpu.matmul %44, %46, %cst_46 {dimension_numbers = #tpu.dot_dimension_numbers<[1], [0], [0], [1], [0, 0, 1, 1], [], []>} : vector<64x128xbf16>, vector<128x128xbf16>, vector<64x128xf32> -> vector<64x128xf32>
    %48 = arith.addf %40, %47 : vector<64x128xf32>
    %c0_47 = arith.constant 0 : index
    %c0_48 = arith.constant 0 : index
    %c2_49 = arith.constant 2 : index
    %c0_50 = arith.constant 0 : index
    %c0_51 = arith.constant 0 : index
    %49 = vector.load %arg1[%c0_47, %c0_48, %c2_49, %c0_50, %c0_51] : memref<1x4x10x10x128xf32, #tpu.memory_space<vmem>>, vector<1x1x8x8x128xf32>
    %50 = vector.shape_cast %49 : vector<1x1x8x8x128xf32> to vector<8x8x128xf32>
    %51 = vector.shape_cast %50 : vector<8x8x128xf32> to vector<64x128xf32>
    %52 = arith.truncf %51 : vector<64x128xf32> to vector<64x128xbf16>
    %c20 = arith.constant 20 : index
    %c0_52 = arith.constant 0 : index
    %c0_53 = arith.constant 0 : index
    %53 = vector.load %arg2[%c20, %c0_52, %c0_53] : memref<25x128x128xbf16, #tpu.memory_space<vmem>>, vector<1x128x128xbf16>
    %54 = vector.shape_cast %53 : vector<1x128x128xbf16> to vector<128x128xbf16>
    %cst_54 = arith.constant dense<0.000000e+00> : vector<64x128xf32>
    %55 = tpu.matmul %52, %54, %cst_54 {dimension_numbers = #tpu.dot_dimension_numbers<[1], [0], [0], [1], [0, 0, 1, 1], [], []>} : vector<64x128xbf16>, vector<128x128xbf16>, vector<64x128xf32> -> vector<64x128xf32>
    %56 = arith.addf %48, %55 : vector<64x128xf32>
    %c0_55 = arith.constant 0 : index
    %c0_56 = arith.constant 0 : index
    %c2_57 = arith.constant 2 : index
    %c1_58 = arith.constant 1 : index
    %c0_59 = arith.constant 0 : index
    %57 = vector.load %arg1[%c0_55, %c0_56, %c2_57, %c1_58, %c0_59] : memref<1x4x10x10x128xf32, #tpu.memory_space<vmem>>, vector<1x1x8x8x128xf32>
    %58 = vector.shape_cast %57 : vector<1x1x8x8x128xf32> to vector<8x8x128xf32>
    %59 = vector.shape_cast %58 : vector<8x8x128xf32> to vector<64x128xf32>
    %60 = arith.truncf %59 : vector<64x128xf32> to vector<64x128xbf16>
    %c22 = arith.constant 22 : index
    %c0_60 = arith.constant 0 : index
    %c0_61 = arith.constant 0 : index
    %61 = vector.load %arg2[%c22, %c0_60, %c0_61] : memref<25x128x128xbf16, #tpu.memory_space<vmem>>, vector<1x128x128xbf16>
    %62 = vector.shape_cast %61 : vector<1x128x128xbf16> to vector<128x128xbf16>
    %cst_62 = arith.constant dense<0.000000e+00> : vector<64x128xf32>
    %63 = tpu.matmul %60, %62, %cst_62 {dimension_numbers = #tpu.dot_dimension_numbers<[1], [0], [0], [1], [0, 0, 1, 1], [], []>} : vector<64x128xbf16>, vector<128x128xbf16>, vector<64x128xf32> -> vector<64x128xf32>
    %64 = arith.addf %56, %63 : vector<64x128xf32>
    %c0_63 = arith.constant 0 : index
    %c0_64 = arith.constant 0 : index
    %c2_65 = arith.constant 2 : index
    %c2_66 = arith.constant 2 : index
    %c0_67 = arith.constant 0 : index
    %65 = vector.load %arg1[%c0_63, %c0_64, %c2_65, %c2_66, %c0_67] : memref<1x4x10x10x128xf32, #tpu.memory_space<vmem>>, vector<1x1x8x8x128xf32>
    %66 = vector.shape_cast %65 : vector<1x1x8x8x128xf32> to vector<8x8x128xf32>
    %67 = vector.shape_cast %66 : vector<8x8x128xf32> to vector<64x128xf32>
    %68 = arith.truncf %67 : vector<64x128xf32> to vector<64x128xbf16>
    %c24 = arith.constant 24 : index
    %c0_68 = arith.constant 0 : index
    %c0_69 = arith.constant 0 : index
    %69 = vector.load %arg2[%c24, %c0_68, %c0_69] : memref<25x128x128xbf16, #tpu.memory_space<vmem>>, vector<1x128x128xbf16>
    %70 = vector.shape_cast %69 : vector<1x128x128xbf16> to vector<128x128xbf16>
    %cst_70 = arith.constant dense<0.000000e+00> : vector<64x128xf32>
    %71 = tpu.matmul %68, %70, %cst_70 {dimension_numbers = #tpu.dot_dimension_numbers<[1], [0], [0], [1], [0, 0, 1, 1], [], []>} : vector<64x128xbf16>, vector<128x128xbf16>, vector<64x128xf32> -> vector<64x128xf32>
    %72 = arith.addf %64, %71 : vector<64x128xf32>
    %c0_71 = arith.constant 0 : index
    %c1_72 = arith.constant 1 : index
    %c0_73 = arith.constant 0 : index
    %c0_74 = arith.constant 0 : index
    %c0_75 = arith.constant 0 : index
    %73 = vector.load %arg1[%c0_71, %c1_72, %c0_73, %c0_74, %c0_75] : memref<1x4x10x10x128xf32, #tpu.memory_space<vmem>>, vector<1x1x8x8x128xf32>
    %74 = vector.shape_cast %73 : vector<1x1x8x8x128xf32> to vector<8x8x128xf32>
    %75 = vector.shape_cast %74 : vector<8x8x128xf32> to vector<64x128xf32>
    %76 = arith.truncf %75 : vector<64x128xf32> to vector<64x128xbf16>
    %c1_76 = arith.constant 1 : index
    %c0_77 = arith.constant 0 : index
    %c0_78 = arith.constant 0 : index
    %77 = vector.load %arg2[%c1_76, %c0_77, %c0_78] : memref<25x128x128xbf16, #tpu.memory_space<vmem>>, vector<1x128x128xbf16>
    %78 = vector.shape_cast %77 : vector<1x128x128xbf16> to vector<128x128xbf16>
    %cst_79 = arith.constant dense<0.000000e+00> : vector<64x128xf32>
    %79 = tpu.matmul %76, %78, %cst_79 {dimension_numbers = #tpu.dot_dimension_numbers<[1], [0], [0], [1], [0, 0, 1, 1], [], []>} : vector<64x128xbf16>, vector<128x128xbf16>, vector<64x128xf32> -> vector<64x128xf32>
    %80 = arith.addf %72, %79 : vector<64x128xf32>
    %c0_80 = arith.constant 0 : index
    %c1_81 = arith.constant 1 : index
    %c0_82 = arith.constant 0 : index
    %c1_83 = arith.constant 1 : index
    %c0_84 = arith.constant 0 : index
    %81 = vector.load %arg1[%c0_80, %c1_81, %c0_82, %c1_83, %c0_84] : memref<1x4x10x10x128xf32, #tpu.memory_space<vmem>>, vector<1x1x8x8x128xf32>
    %82 = vector.shape_cast %81 : vector<1x1x8x8x128xf32> to vector<8x8x128xf32>
    %83 = vector.shape_cast %82 : vector<8x8x128xf32> to vector<64x128xf32>
    %84 = arith.truncf %83 : vector<64x128xf32> to vector<64x128xbf16>
    %c3 = arith.constant 3 : index
    %c0_85 = arith.constant 0 : index
    %c0_86 = arith.constant 0 : index
    %85 = vector.load %arg2[%c3, %c0_85, %c0_86] : memref<25x128x128xbf16, #tpu.memory_space<vmem>>, vector<1x128x128xbf16>
    %86 = vector.shape_cast %85 : vector<1x128x128xbf16> to vector<128x128xbf16>
    %cst_87 = arith.constant dense<0.000000e+00> : vector<64x128xf32>
    %87 = tpu.matmul %84, %86, %cst_87 {dimension_numbers = #tpu.dot_dimension_numbers<[1], [0], [0], [1], [0, 0, 1, 1], [], []>} : vector<64x128xbf16>, vector<128x128xbf16>, vector<64x128xf32> -> vector<64x128xf32>
    %88 = arith.addf %80, %87 : vector<64x128xf32>
    %c0_88 = arith.constant 0 : index
    %c1_89 = arith.constant 1 : index
    %c1_90 = arith.constant 1 : index
    %c0_91 = arith.constant 0 : index
    %c0_92 = arith.constant 0 : index
    %89 = vector.load %arg1[%c0_88, %c1_89, %c1_90, %c0_91, %c0_92] : memref<1x4x10x10x128xf32, #tpu.memory_space<vmem>>, vector<1x1x8x8x128xf32>
    %90 = vector.shape_cast %89 : vector<1x1x8x8x128xf32> to vector<8x8x128xf32>
    %91 = vector.shape_cast %90 : vector<8x8x128xf32> to vector<64x128xf32>
    %92 = arith.truncf %91 : vector<64x128xf32> to vector<64x128xbf16>
    %c11 = arith.constant 11 : index
    %c0_93 = arith.constant 0 : index
    %c0_94 = arith.constant 0 : index
    %93 = vector.load %arg2[%c11, %c0_93, %c0_94] : memref<25x128x128xbf16, #tpu.memory_space<vmem>>, vector<1x128x128xbf16>
    %94 = vector.shape_cast %93 : vector<1x128x128xbf16> to vector<128x128xbf16>
    %cst_95 = arith.constant dense<0.000000e+00> : vector<64x128xf32>
    %95 = tpu.matmul %92, %94, %cst_95 {dimension_numbers = #tpu.dot_dimension_numbers<[1], [0], [0], [1], [0, 0, 1, 1], [], []>} : vector<64x128xbf16>, vector<128x128xbf16>, vector<64x128xf32> -> vector<64x128xf32>
    %96 = arith.addf %88, %95 : vector<64x128xf32>
    %c0_96 = arith.constant 0 : index
    %c1_97 = arith.constant 1 : index
    %c1_98 = arith.constant 1 : index
    %c1_99 = arith.constant 1 : index
    %c0_100 = arith.constant 0 : index
    %97 = vector.load %arg1[%c0_96, %c1_97, %c1_98, %c1_99, %c0_100] : memref<1x4x10x10x128xf32, #tpu.memory_space<vmem>>, vector<1x1x8x8x128xf32>
    %98 = vector.shape_cast %97 : vector<1x1x8x8x128xf32> to vector<8x8x128xf32>
    %99 = vector.shape_cast %98 : vector<8x8x128xf32> to vector<64x128xf32>
    %100 = arith.truncf %99 : vector<64x128xf32> to vector<64x128xbf16>
    %c13 = arith.constant 13 : index
    %c0_101 = arith.constant 0 : index
    %c0_102 = arith.constant 0 : index
    %101 = vector.load %arg2[%c13, %c0_101, %c0_102] : memref<25x128x128xbf16, #tpu.memory_space<vmem>>, vector<1x128x128xbf16>
    %102 = vector.shape_cast %101 : vector<1x128x128xbf16> to vector<128x128xbf16>
    %cst_103 = arith.constant dense<0.000000e+00> : vector<64x128xf32>
    %103 = tpu.matmul %100, %102, %cst_103 {dimension_numbers = #tpu.dot_dimension_numbers<[1], [0], [0], [1], [0, 0, 1, 1], [], []>} : vector<64x128xbf16>, vector<128x128xbf16>, vector<64x128xf32> -> vector<64x128xf32>
    %104 = arith.addf %96, %103 : vector<64x128xf32>
    %c0_104 = arith.constant 0 : index
    %c1_105 = arith.constant 1 : index
    %c2_106 = arith.constant 2 : index
    %c0_107 = arith.constant 0 : index
    %c0_108 = arith.constant 0 : index
    %105 = vector.load %arg1[%c0_104, %c1_105, %c2_106, %c0_107, %c0_108] : memref<1x4x10x10x128xf32, #tpu.memory_space<vmem>>, vector<1x1x8x8x128xf32>
    %106 = vector.shape_cast %105 : vector<1x1x8x8x128xf32> to vector<8x8x128xf32>
    %107 = vector.shape_cast %106 : vector<8x8x128xf32> to vector<64x128xf32>
    %108 = arith.truncf %107 : vector<64x128xf32> to vector<64x128xbf16>
    %c21 = arith.constant 21 : index
    %c0_109 = arith.constant 0 : index
    %c0_110 = arith.constant 0 : index
    %109 = vector.load %arg2[%c21, %c0_109, %c0_110] : memref<25x128x128xbf16, #tpu.memory_space<vmem>>, vector<1x128x128xbf16>
    %110 = vector.shape_cast %109 : vector<1x128x128xbf16> to vector<128x128xbf16>
    %cst_111 = arith.constant dense<0.000000e+00> : vector<64x128xf32>
    %111 = tpu.matmul %108, %110, %cst_111 {dimension_numbers = #tpu.dot_dimension_numbers<[1], [0], [0], [1], [0, 0, 1, 1], [], []>} : vector<64x128xbf16>, vector<128x128xbf16>, vector<64x128xf32> -> vector<64x128xf32>
    %112 = arith.addf %104, %111 : vector<64x128xf32>
    %c0_112 = arith.constant 0 : index
    %c1_113 = arith.constant 1 : index
    %c2_114 = arith.constant 2 : index
    %c1_115 = arith.constant 1 : index
    %c0_116 = arith.constant 0 : index
    %113 = vector.load %arg1[%c0_112, %c1_113, %c2_114, %c1_115, %c0_116] : memref<1x4x10x10x128xf32, #tpu.memory_space<vmem>>, vector<1x1x8x8x128xf32>
    %114 = vector.shape_cast %113 : vector<1x1x8x8x128xf32> to vector<8x8x128xf32>
    %115 = vector.shape_cast %114 : vector<8x8x128xf32> to vector<64x128xf32>
    %116 = arith.truncf %115 : vector<64x128xf32> to vector<64x128xbf16>
    %c23 = arith.constant 23 : index
    %c0_117 = arith.constant 0 : index
    %c0_118 = arith.constant 0 : index
    %117 = vector.load %arg2[%c23, %c0_117, %c0_118] : memref<25x128x128xbf16, #tpu.memory_space<vmem>>, vector<1x128x128xbf16>
    %118 = vector.shape_cast %117 : vector<1x128x128xbf16> to vector<128x128xbf16>
    %cst_119 = arith.constant dense<0.000000e+00> : vector<64x128xf32>
    %119 = tpu.matmul %116, %118, %cst_119 {dimension_numbers = #tpu.dot_dimension_numbers<[1], [0], [0], [1], [0, 0, 1, 1], [], []>} : vector<64x128xbf16>, vector<128x128xbf16>, vector<64x128xf32> -> vector<64x128xf32>
    %120 = arith.addf %112, %119 : vector<64x128xf32>
    %c0_120 = arith.constant 0 : index
    %c2_121 = arith.constant 2 : index
    %c0_122 = arith.constant 0 : index
    %c0_123 = arith.constant 0 : index
    %c0_124 = arith.constant 0 : index
    %121 = vector.load %arg1[%c0_120, %c2_121, %c0_122, %c0_123, %c0_124] : memref<1x4x10x10x128xf32, #tpu.memory_space<vmem>>, vector<1x1x8x8x128xf32>
    %122 = vector.shape_cast %121 : vector<1x1x8x8x128xf32> to vector<8x8x128xf32>
    %123 = vector.shape_cast %122 : vector<8x8x128xf32> to vector<64x128xf32>
    %124 = arith.truncf %123 : vector<64x128xf32> to vector<64x128xbf16>
    %c5 = arith.constant 5 : index
    %c0_125 = arith.constant 0 : index
    %c0_126 = arith.constant 0 : index
    %125 = vector.load %arg2[%c5, %c0_125, %c0_126] : memref<25x128x128xbf16, #tpu.memory_space<vmem>>, vector<1x128x128xbf16>
    %126 = vector.shape_cast %125 : vector<1x128x128xbf16> to vector<128x128xbf16>
    %cst_127 = arith.constant dense<0.000000e+00> : vector<64x128xf32>
    %127 = tpu.matmul %124, %126, %cst_127 {dimension_numbers = #tpu.dot_dimension_numbers<[1], [0], [0], [1], [0, 0, 1, 1], [], []>} : vector<64x128xbf16>, vector<128x128xbf16>, vector<64x128xf32> -> vector<64x128xf32>
    %128 = arith.addf %120, %127 : vector<64x128xf32>
    %c0_128 = arith.constant 0 : index
    %c2_129 = arith.constant 2 : index
    %c0_130 = arith.constant 0 : index
    %c1_131 = arith.constant 1 : index
    %c0_132 = arith.constant 0 : index
    %129 = vector.load %arg1[%c0_128, %c2_129, %c0_130, %c1_131, %c0_132] : memref<1x4x10x10x128xf32, #tpu.memory_space<vmem>>, vector<1x1x8x8x128xf32>
    %130 = vector.shape_cast %129 : vector<1x1x8x8x128xf32> to vector<8x8x128xf32>
    %131 = vector.shape_cast %130 : vector<8x8x128xf32> to vector<64x128xf32>
    %132 = arith.truncf %131 : vector<64x128xf32> to vector<64x128xbf16>
    %c7 = arith.constant 7 : index
    %c0_133 = arith.constant 0 : index
    %c0_134 = arith.constant 0 : index
    %133 = vector.load %arg2[%c7, %c0_133, %c0_134] : memref<25x128x128xbf16, #tpu.memory_space<vmem>>, vector<1x128x128xbf16>
    %134 = vector.shape_cast %133 : vector<1x128x128xbf16> to vector<128x128xbf16>
    %cst_135 = arith.constant dense<0.000000e+00> : vector<64x128xf32>
    %135 = tpu.matmul %132, %134, %cst_135 {dimension_numbers = #tpu.dot_dimension_numbers<[1], [0], [0], [1], [0, 0, 1, 1], [], []>} : vector<64x128xbf16>, vector<128x128xbf16>, vector<64x128xf32> -> vector<64x128xf32>
    %136 = arith.addf %128, %135 : vector<64x128xf32>
    %c0_136 = arith.constant 0 : index
    %c2_137 = arith.constant 2 : index
    %c0_138 = arith.constant 0 : index
    %c2_139 = arith.constant 2 : index
    %c0_140 = arith.constant 0 : index
    %137 = vector.load %arg1[%c0_136, %c2_137, %c0_138, %c2_139, %c0_140] : memref<1x4x10x10x128xf32, #tpu.memory_space<vmem>>, vector<1x1x8x8x128xf32>
    %138 = vector.shape_cast %137 : vector<1x1x8x8x128xf32> to vector<8x8x128xf32>
    %139 = vector.shape_cast %138 : vector<8x8x128xf32> to vector<64x128xf32>
    %140 = arith.truncf %139 : vector<64x128xf32> to vector<64x128xbf16>
    %c9 = arith.constant 9 : index
    %c0_141 = arith.constant 0 : index
    %c0_142 = arith.constant 0 : index
    %141 = vector.load %arg2[%c9, %c0_141, %c0_142] : memref<25x128x128xbf16, #tpu.memory_space<vmem>>, vector<1x128x128xbf16>
    %142 = vector.shape_cast %141 : vector<1x128x128xbf16> to vector<128x128xbf16>
    %cst_143 = arith.constant dense<0.000000e+00> : vector<64x128xf32>
    %143 = tpu.matmul %140, %142, %cst_143 {dimension_numbers = #tpu.dot_dimension_numbers<[1], [0], [0], [1], [0, 0, 1, 1], [], []>} : vector<64x128xbf16>, vector<128x128xbf16>, vector<64x128xf32> -> vector<64x128xf32>
    %144 = arith.addf %136, %143 : vector<64x128xf32>
    %c0_144 = arith.constant 0 : index
    %c2_145 = arith.constant 2 : index
    %c1_146 = arith.constant 1 : index
    %c0_147 = arith.constant 0 : index
    %c0_148 = arith.constant 0 : index
    %145 = vector.load %arg1[%c0_144, %c2_145, %c1_146, %c0_147, %c0_148] : memref<1x4x10x10x128xf32, #tpu.memory_space<vmem>>, vector<1x1x8x8x128xf32>
    %146 = vector.shape_cast %145 : vector<1x1x8x8x128xf32> to vector<8x8x128xf32>
    %147 = vector.shape_cast %146 : vector<8x8x128xf32> to vector<64x128xf32>
    %148 = arith.truncf %147 : vector<64x128xf32> to vector<64x128xbf16>
    %c15 = arith.constant 15 : index
    %c0_149 = arith.constant 0 : index
    %c0_150 = arith.constant 0 : index
    %149 = vector.load %arg2[%c15, %c0_149, %c0_150] : memref<25x128x128xbf16, #tpu.memory_space<vmem>>, vector<1x128x128xbf16>
    %150 = vector.shape_cast %149 : vector<1x128x128xbf16> to vector<128x128xbf16>
    %cst_151 = arith.constant dense<0.000000e+00> : vector<64x128xf32>
    %151 = tpu.matmul %148, %150, %cst_151 {dimension_numbers = #tpu.dot_dimension_numbers<[1], [0], [0], [1], [0, 0, 1, 1], [], []>} : vector<64x128xbf16>, vector<128x128xbf16>, vector<64x128xf32> -> vector<64x128xf32>
    %152 = arith.addf %144, %151 : vector<64x128xf32>
    %c0_152 = arith.constant 0 : index
    %c2_153 = arith.constant 2 : index
    %c1_154 = arith.constant 1 : index
    %c1_155 = arith.constant 1 : index
    %c0_156 = arith.constant 0 : index
    %153 = vector.load %arg1[%c0_152, %c2_153, %c1_154, %c1_155, %c0_156] : memref<1x4x10x10x128xf32, #tpu.memory_space<vmem>>, vector<1x1x8x8x128xf32>
    %154 = vector.shape_cast %153 : vector<1x1x8x8x128xf32> to vector<8x8x128xf32>
    %155 = vector.shape_cast %154 : vector<8x8x128xf32> to vector<64x128xf32>
    %156 = arith.truncf %155 : vector<64x128xf32> to vector<64x128xbf16>
    %c17 = arith.constant 17 : index
    %c0_157 = arith.constant 0 : index
    %c0_158 = arith.constant 0 : index
    %157 = vector.load %arg2[%c17, %c0_157, %c0_158] : memref<25x128x128xbf16, #tpu.memory_space<vmem>>, vector<1x128x128xbf16>
    %158 = vector.shape_cast %157 : vector<1x128x128xbf16> to vector<128x128xbf16>
    %cst_159 = arith.constant dense<0.000000e+00> : vector<64x128xf32>
    %159 = tpu.matmul %156, %158, %cst_159 {dimension_numbers = #tpu.dot_dimension_numbers<[1], [0], [0], [1], [0, 0, 1, 1], [], []>} : vector<64x128xbf16>, vector<128x128xbf16>, vector<64x128xf32> -> vector<64x128xf32>
    %160 = arith.addf %152, %159 : vector<64x128xf32>
    %c0_160 = arith.constant 0 : index
    %c2_161 = arith.constant 2 : index
    %c1_162 = arith.constant 1 : index
    %c2_163 = arith.constant 2 : index
    %c0_164 = arith.constant 0 : index
    %161 = vector.load %arg1[%c0_160, %c2_161, %c1_162, %c2_163, %c0_164] : memref<1x4x10x10x128xf32, #tpu.memory_space<vmem>>, vector<1x1x8x8x128xf32>
    %162 = vector.shape_cast %161 : vector<1x1x8x8x128xf32> to vector<8x8x128xf32>
    %163 = vector.shape_cast %162 : vector<8x8x128xf32> to vector<64x128xf32>
    %164 = arith.truncf %163 : vector<64x128xf32> to vector<64x128xbf16>
    %c19 = arith.constant 19 : index
    %c0_165 = arith.constant 0 : index
    %c0_166 = arith.constant 0 : index
    %165 = vector.load %arg2[%c19, %c0_165, %c0_166] : memref<25x128x128xbf16, #tpu.memory_space<vmem>>, vector<1x128x128xbf16>
    %166 = vector.shape_cast %165 : vector<1x128x128xbf16> to vector<128x128xbf16>
    %cst_167 = arith.constant dense<0.000000e+00> : vector<64x128xf32>
    %167 = tpu.matmul %164, %166, %cst_167 {dimension_numbers = #tpu.dot_dimension_numbers<[1], [0], [0], [1], [0, 0, 1, 1], [], []>} : vector<64x128xbf16>, vector<128x128xbf16>, vector<64x128xf32> -> vector<64x128xf32>
    %168 = arith.addf %160, %167 : vector<64x128xf32>
    %c0_168 = arith.constant 0 : index
    %c3_169 = arith.constant 3 : index
    %c0_170 = arith.constant 0 : index
    %c0_171 = arith.constant 0 : index
    %c0_172 = arith.constant 0 : index
    %169 = vector.load %arg1[%c0_168, %c3_169, %c0_170, %c0_171, %c0_172] : memref<1x4x10x10x128xf32, #tpu.memory_space<vmem>>, vector<1x1x8x8x128xf32>
    %170 = vector.shape_cast %169 : vector<1x1x8x8x128xf32> to vector<8x8x128xf32>
    %171 = vector.shape_cast %170 : vector<8x8x128xf32> to vector<64x128xf32>
    %172 = arith.truncf %171 : vector<64x128xf32> to vector<64x128xbf16>
    %c6 = arith.constant 6 : index
    %c0_173 = arith.constant 0 : index
    %c0_174 = arith.constant 0 : index
    %173 = vector.load %arg2[%c6, %c0_173, %c0_174] : memref<25x128x128xbf16, #tpu.memory_space<vmem>>, vector<1x128x128xbf16>
    %174 = vector.shape_cast %173 : vector<1x128x128xbf16> to vector<128x128xbf16>
    %cst_175 = arith.constant dense<0.000000e+00> : vector<64x128xf32>
    %175 = tpu.matmul %172, %174, %cst_175 {dimension_numbers = #tpu.dot_dimension_numbers<[1], [0], [0], [1], [0, 0, 1, 1], [], []>} : vector<64x128xbf16>, vector<128x128xbf16>, vector<64x128xf32> -> vector<64x128xf32>
    %176 = arith.addf %168, %175 : vector<64x128xf32>
    %c0_176 = arith.constant 0 : index
    %c3_177 = arith.constant 3 : index
    %c0_178 = arith.constant 0 : index
    %c1_179 = arith.constant 1 : index
    %c0_180 = arith.constant 0 : index
    %177 = vector.load %arg1[%c0_176, %c3_177, %c0_178, %c1_179, %c0_180] : memref<1x4x10x10x128xf32, #tpu.memory_space<vmem>>, vector<1x1x8x8x128xf32>
    %178 = vector.shape_cast %177 : vector<1x1x8x8x128xf32> to vector<8x8x128xf32>
    %179 = vector.shape_cast %178 : vector<8x8x128xf32> to vector<64x128xf32>
    %180 = arith.truncf %179 : vector<64x128xf32> to vector<64x128xbf16>
    %c8 = arith.constant 8 : index
    %c0_181 = arith.constant 0 : index
    %c0_182 = arith.constant 0 : index
    %181 = vector.load %arg2[%c8, %c0_181, %c0_182] : memref<25x128x128xbf16, #tpu.memory_space<vmem>>, vector<1x128x128xbf16>
    %182 = vector.shape_cast %181 : vector<1x128x128xbf16> to vector<128x128xbf16>
    %cst_183 = arith.constant dense<0.000000e+00> : vector<64x128xf32>
    %183 = tpu.matmul %180, %182, %cst_183 {dimension_numbers = #tpu.dot_dimension_numbers<[1], [0], [0], [1], [0, 0, 1, 1], [], []>} : vector<64x128xbf16>, vector<128x128xbf16>, vector<64x128xf32> -> vector<64x128xf32>
    %184 = arith.addf %176, %183 : vector<64x128xf32>
    %c0_184 = arith.constant 0 : index
    %c3_185 = arith.constant 3 : index
    %c1_186 = arith.constant 1 : index
    %c0_187 = arith.constant 0 : index
    %c0_188 = arith.constant 0 : index
    %185 = vector.load %arg1[%c0_184, %c3_185, %c1_186, %c0_187, %c0_188] : memref<1x4x10x10x128xf32, #tpu.memory_space<vmem>>, vector<1x1x8x8x128xf32>
    %186 = vector.shape_cast %185 : vector<1x1x8x8x128xf32> to vector<8x8x128xf32>
    %187 = vector.shape_cast %186 : vector<8x8x128xf32> to vector<64x128xf32>
    %188 = arith.truncf %187 : vector<64x128xf32> to vector<64x128xbf16>
    %c16 = arith.constant 16 : index
    %c0_189 = arith.constant 0 : index
    %c0_190 = arith.constant 0 : index
    %189 = vector.load %arg2[%c16, %c0_189, %c0_190] : memref<25x128x128xbf16, #tpu.memory_space<vmem>>, vector<1x128x128xbf16>
    %190 = vector.shape_cast %189 : vector<1x128x128xbf16> to vector<128x128xbf16>
    %cst_191 = arith.constant dense<0.000000e+00> : vector<64x128xf32>
    %191 = tpu.matmul %188, %190, %cst_191 {dimension_numbers = #tpu.dot_dimension_numbers<[1], [0], [0], [1], [0, 0, 1, 1], [], []>} : vector<64x128xbf16>, vector<128x128xbf16>, vector<64x128xf32> -> vector<64x128xf32>
    %192 = arith.addf %184, %191 : vector<64x128xf32>
    %c0_192 = arith.constant 0 : index
    %c3_193 = arith.constant 3 : index
    %c1_194 = arith.constant 1 : index
    %c1_195 = arith.constant 1 : index
    %c0_196 = arith.constant 0 : index
    %193 = vector.load %arg1[%c0_192, %c3_193, %c1_194, %c1_195, %c0_196] : memref<1x4x10x10x128xf32, #tpu.memory_space<vmem>>, vector<1x1x8x8x128xf32>
    %194 = vector.shape_cast %193 : vector<1x1x8x8x128xf32> to vector<8x8x128xf32>
    %195 = vector.shape_cast %194 : vector<8x8x128xf32> to vector<64x128xf32>
    %196 = arith.truncf %195 : vector<64x128xf32> to vector<64x128xbf16>
    %c18 = arith.constant 18 : index
    %c0_197 = arith.constant 0 : index
    %c0_198 = arith.constant 0 : index
    %197 = vector.load %arg2[%c18, %c0_197, %c0_198] : memref<25x128x128xbf16, #tpu.memory_space<vmem>>, vector<1x128x128xbf16>
    %198 = vector.shape_cast %197 : vector<1x128x128xbf16> to vector<128x128xbf16>
    %cst_199 = arith.constant dense<0.000000e+00> : vector<64x128xf32>
    %199 = tpu.matmul %196, %198, %cst_199 {dimension_numbers = #tpu.dot_dimension_numbers<[1], [0], [0], [1], [0, 0, 1, 1], [], []>} : vector<64x128xbf16>, vector<128x128xbf16>, vector<64x128xf32> -> vector<64x128xf32>
    %200 = arith.addf %192, %199 : vector<64x128xf32>
    %c0_200 = arith.constant 0 : index
    %c0_201 = arith.constant 0 : index
    %201 = vector.load %arg3[%c0_200, %c0_201] : memref<1x128xf32, #tpu.memory_space<vmem>>, vector<1x128xf32>
    %202 = vector.broadcast %201 : vector<1x128xf32> to vector<64x128xf32>
    %203 = arith.addf %200, %202 : vector<64x128xf32>
    %cst_202 = arith.constant 0.000000e+00 : f32
    %204 = vector.broadcast %cst_202 : f32 to vector<64x128xf32>
    %205 = arith.maximumf %203, %204 : vector<64x128xf32>
    %c0_203 = arith.constant 0 : index
    %c0_204 = arith.constant 0 : index
    %c0_205 = arith.constant 0 : index
    %206 = vector.load %arg4[%c0_203, %c0_204, %c0_205] : memref<1x64x128xf32, #tpu.memory_space<vmem>>, vector<1x64x128xf32>
    %207 = vector.shape_cast %206 : vector<1x64x128xf32> to vector<64x128xf32>
    %208 = vector.shape_cast %205 : vector<64x128xf32> to vector<1x64x128xf32>
    tpu.vector_store %arg4[%c0_203, %c0_204, %c0_205], %208 {strides = array<i32>} : memref<1x64x128xf32, #tpu.memory_space<vmem>>, vector<1x64x128xf32>,
    return
  }
  func.func @transform_0(%arg0: i32) -> (i32, i32, i32, i32, i32) {
    %c0_i32 = arith.constant 0 : i32
    %c0_i32_0 = arith.constant 0 : i32
    %c0_i32_1 = arith.constant 0 : i32
    %c0_i32_2 = arith.constant 0 : i32
    %c0_i32_3 = arith.constant 0 : i32
    return %arg0, %c0_i32, %c0_i32_0, %c0_i32_1, %c0_i32_2 : i32, i32, i32, i32, i32
  }
  func.func @transform_1(%arg0: i32) -> (i32, i32, i32) {
    %c0_i32 = arith.constant 0 : i32
    %c0_i32_0 = arith.constant 0 : i32
    %c0_i32_1 = arith.constant 0 : i32
    %c0_i32_2 = arith.constant 0 : i32
    return %c0_i32, %c0_i32_0, %c0_i32_1 : i32, i32, i32
  }
  func.func @transform_2(%arg0: i32) -> (i32, i32) {
    %c0_i32 = arith.constant 0 : i32
    %c0_i32_0 = arith.constant 0 : i32
    %c0_i32_1 = arith.constant 0 : i32
    return %c0_i32, %c0_i32_0 : i32, i32
  }
  func.func @transform_3(%arg0: i32) -> (i32, i32, i32) {
    %c0_i32 = arith.constant 0 : i32
    %c0_i32_0 = arith.constant 0 : i32
    %c0_i32_1 = arith.constant 0 : i32
    return %arg0, %c0_i32, %c0_i32_0 : i32, i32, i32
  }
}

module attributes {stable_mosaic.version = 11 : i64} {
  func.func @_conv_s2_kernel(%arg0: i32, %arg1: memref<1x4x10x10x128xf32, #tpu.memory_space<vmem>>, %arg2: memref<25x128x128xbf16, #tpu.memory_space<vmem>>, %arg3: memref<1x128xf32, #tpu.memory_space<vmem>>, %arg4: memref<1x64x128xf32, #tpu.memory_space<vmem>>) attributes {dimension_semantics = [#tpu.dimension_semantics<parallel>], iteration_bounds = array<i64: 2>, scalar_prefetch = 0 : i64, scratch_operands = 0 : i64, tpu.core_type = #tpu.core_type<tc>, window_params = [{transform_indices = @transform_0, window_bounds = array<i64: 1, 4, 10, 10, 128>}, {pipeline_mode = #tpu.pipeline_mode<synchronous>, transform_indices = @transform_1, window_bounds = array<i64: 25, 128, 128>}, {pipeline_mode = #tpu.pipeline_mode<synchronous>, transform_indices = @transform_2, window_bounds = array<i64: 1, 128>}, {transform_indices = @transform_3, window_bounds = array<i64: 1, 64, 128>}]} {
    %cst = arith.constant 0.000000e+00 : f32
    %0 = vector.broadcast %cst : f32 to vector<64x128xf32>
    %c0 = arith.constant 0 : index
    %c0_0 = arith.constant 0 : index
    %c0_1 = arith.constant 0 : index
    %c0_2 = arith.constant 0 : index
    %c0_3 = arith.constant 0 : index
    %1 = vector.load %arg1[%c0, %c0_0, %c0_1, %c0_2, %c0_3] : memref<1x4x10x10x128xf32, #tpu.memory_space<vmem>>, vector<1x1x8x8x128xf32>
    %2 = vector.shape_cast %1 : vector<1x1x8x8x128xf32> to vector<8x8x128xf32>
    %3 = vector.shape_cast %2 : vector<8x8x128xf32> to vector<64x128xf32>
    %4 = arith.truncf %3 : vector<64x128xf32> to vector<64x128xbf16>
    %c0_4 = arith.constant 0 : index
    %c0_5 = arith.constant 0 : index
    %c0_6 = arith.constant 0 : index
    %5 = vector.load %arg2[%c0_4, %c0_5, %c0_6] : memref<25x128x128xbf16, #tpu.memory_space<vmem>>, vector<1x128x128xbf16>
    %6 = vector.shape_cast %5 : vector<1x128x128xbf16> to vector<128x128xbf16>
    %cst_7 = arith.constant dense<0.000000e+00> : vector<64x128xf32>
    %7 = tpu.matmul %4, %6, %cst_7 {dimension_numbers = #tpu.dot_dimension_numbers<[1], [0], [0], [1], [0, 0, 1, 1], [], []>} : vector<64x128xbf16>, vector<128x128xbf16>, vector<64x128xf32> -> vector<64x128xf32>
    %8 = arith.addf %0, %7 : vector<64x128xf32>
    %c0_8 = arith.constant 0 : index
    %c0_9 = arith.constant 0 : index
    %c0_10 = arith.constant 0 : index
    %c1 = arith.constant 1 : index
    %c0_11 = arith.constant 0 : index
    %9 = vector.load %arg1[%c0_8, %c0_9, %c0_10, %c1, %c0_11] : memref<1x4x10x10x128xf32, #tpu.memory_space<vmem>>, vector<1x1x8x8x128xf32>
    %10 = vector.shape_cast %9 : vector<1x1x8x8x128xf32> to vector<8x8x128xf32>
    %11 = vector.shape_cast %10 : vector<8x8x128xf32> to vector<64x128xf32>
    %12 = arith.truncf %11 : vector<64x128xf32> to vector<64x128xbf16>
    %c2 = arith.constant 2 : index
    %c0_12 = arith.constant 0 : index
    %c0_13 = arith.constant 0 : index
    %13 = vector.load %arg2[%c2, %c0_12, %c0_13] : memref<25x128x128xbf16, #tpu.memory_space<vmem>>, vector<1x128x128xbf16>
    %14 = vector.shape_cast %13 : vector<1x128x128xbf16> to vector<128x128xbf16>
    %cst_14 = arith.constant dense<0.000000e+00> : vector<64x128xf32>
    %15 = tpu.matmul %12, %14, %cst_14 {dimension_numbers = #tpu.dot_dimension_numbers<[1], [0], [0], [1], [0, 0, 1, 1], [], []>} : vector<64x128xbf16>, vector<128x128xbf16>, vector<64x128xf32> -> vector<64x128xf32>
    %16 = arith.addf %8, %15 : vector<64x128xf32>
    %c0_15 = arith.constant 0 : index
    %c0_16 = arith.constant 0 : index
    %c0_17 = arith.constant 0 : index
    %c2_18 = arith.constant 2 : index
    %c0_19 = arith.constant 0 : index
    %17 = vector.load %arg1[%c0_15, %c0_16, %c0_17, %c2_18, %c0_19] : memref<1x4x10x10x128xf32, #tpu.memory_space<vmem>>, vector<1x1x8x8x128xf32>
    %18 = vector.shape_cast %17 : vector<1x1x8x8x128xf32> to vector<8x8x128xf32>
    %19 = vector.shape_cast %18 : vector<8x8x128xf32> to vector<64x128xf32>
    %20 = arith.truncf %19 : vector<64x128xf32> to vector<64x128xbf16>
    %c4 = arith.constant 4 : index
    %c0_20 = arith.constant 0 : index
    %c0_21 = arith.constant 0 : index
    %21 = vector.load %arg2[%c4, %c0_20, %c0_21] : memref<25x128x128xbf16, #tpu.memory_space<vmem>>, vector<1x128x128xbf16>
    %22 = vector.shape_cast %21 : vector<1x128x128xbf16> to vector<128x128xbf16>
    %cst_22 = arith.constant dense<0.000000e+00> : vector<64x128xf32>
    %23 = tpu.matmul %20, %22, %cst_22 {dimension_numbers = #tpu.dot_dimension_numbers<[1], [0], [0], [1], [0, 0, 1, 1], [], []>} : vector<64x128xbf16>, vector<128x128xbf16>, vector<64x128xf32> -> vector<64x128xf32>
    %24 = arith.addf %16, %23 : vector<64x128xf32>
    %c0_23 = arith.constant 0 : index
    %c0_24 = arith.constant 0 : index
    %c1_25 = arith.constant 1 : index
    %c0_26 = arith.constant 0 : index
    %c0_27 = arith.constant 0 : index
    %25 = vector.load %arg1[%c0_23, %c0_24, %c1_25, %c0_26, %c0_27] : memref<1x4x10x10x128xf32, #tpu.memory_space<vmem>>, vector<1x1x8x8x128xf32>
    %26 = vector.shape_cast %25 : vector<1x1x8x8x128xf32> to vector<8x8x128xf32>
    %27 = vector.shape_cast %26 : vector<8x8x128xf32> to vector<64x128xf32>
    %28 = arith.truncf %27 : vector<64x128xf32> to vector<64x128xbf16>
    %c10 = arith.constant 10 : index
    %c0_28 = arith.constant 0 : index
    %c0_29 = arith.constant 0 : index
    %29 = vector.load %arg2[%c10, %c0_28, %c0_29] : memref<25x128x128xbf16, #tpu.memory_space<vmem>>, vector<1x128x128xbf16>
    %30 = vector.shape_cast %29 : vector<1x128x128xbf16> to vector<128x128xbf16>
    %cst_30 = arith.constant dense<0.000000e+00> : vector<64x128xf32>
    %31 = tpu.matmul %28, %30, %cst_30 {dimension_numbers = #tpu.dot_dimension_numbers<[1], [0], [0], [1], [0, 0, 1, 1], [], []>} : vector<64x128xbf16>, vector<128x128xbf16>, vector<64x128xf32> -> vector<64x128xf32>
    %32 = arith.addf %24, %31 : vector<64x128xf32>
    %c0_31 = arith.constant 0 : index
    %c0_32 = arith.constant 0 : index
    %c1_33 = arith.constant 1 : index
    %c1_34 = arith.constant 1 : index
    %c0_35 = arith.constant 0 : index
    %33 = vector.load %arg1[%c0_31, %c0_32, %c1_33, %c1_34, %c0_35] : memref<1x4x10x10x128xf32, #tpu.memory_space<vmem>>, vector<1x1x8x8x128xf32>
    %34 = vector.shape_cast %33 : vector<1x1x8x8x128xf32> to vector<8x8x128xf32>
    %35 = vector.shape_cast %34 : vector<8x8x128xf32> to vector<64x128xf32>
    %36 = arith.truncf %35 : vector<64x128xf32> to vector<64x128xbf16>
    %c12 = arith.constant 12 : index
    %c0_36 = arith.constant 0 : index
    %c0_37 = arith.constant 0 : index
    %37 = vector.load %arg2[%c12, %c0_36, %c0_37] : memref<25x128x128xbf16, #tpu.memory_space<vmem>>, vector<1x128x128xbf16>
    %38 = vector.shape_cast %37 : vector<1x128x128xbf16> to vector<128x128xbf16>
    %cst_38 = arith.constant dense<0.000000e+00> : vector<64x128xf32>
    %39 = tpu.matmul %36, %38, %cst_38 {dimension_numbers = #tpu.dot_dimension_numbers<[1], [0], [0], [1], [0, 0, 1, 1], [], []>} : vector<64x128xbf16>, vector<128x128xbf16>, vector<64x128xf32> -> vector<64x128xf32>
    %40 = arith.addf %32, %39 : vector<64x128xf32>
    %c0_39 = arith.constant 0 : index
    %c0_40 = arith.constant 0 : index
    %c1_41 = arith.constant 1 : index
    %c2_42 = arith.constant 2 : index
    %c0_43 = arith.constant 0 : index
    %41 = vector.load %arg1[%c0_39, %c0_40, %c1_41, %c2_42, %c0_43] : memref<1x4x10x10x128xf32, #tpu.memory_space<vmem>>, vector<1x1x8x8x128xf32>
    %42 = vector.shape_cast %41 : vector<1x1x8x8x128xf32> to vector<8x8x128xf32>
    %43 = vector.shape_cast %42 : vector<8x8x128xf32> to vector<64x128xf32>
    %44 = arith.truncf %43 : vector<64x128xf32> to vector<64x128xbf16>
    %c14 = arith.constant 14 : index
    %c0_44 = arith.constant 0 : index
    %c0_45 = arith.constant 0 : index
    %45 = vector.load %arg2[%c14, %c0_44, %c0_45] : memref<25x128x128xbf16, #tpu.memory_space<vmem>>, vector<1x128x128xbf16>
    %46 = vector.shape_cast %45 : vector<1x128x128xbf16> to vector<128x128xbf16>
    %cst_46 = arith.constant dense<0.000000e+00> : vector<64x128xf32>
    %47 = tpu.matmul %44, %46, %cst_46 {dimension_numbers = #tpu.dot_dimension_numbers<[1], [0], [0], [1], [0, 0, 1, 1], [], []>} : vector<64x128xbf16>, vector<128x128xbf16>, vector<64x128xf32> -> vector<64x128xf32>
    %48 = arith.addf %40, %47 : vector<64x128xf32>
    %c0_47 = arith.constant 0 : index
    %c0_48 = arith.constant 0 : index
    %c2_49 = arith.constant 2 : index
    %c0_50 = arith.constant 0 : index
    %c0_51 = arith.constant 0 : index
    %49 = vector.load %arg1[%c0_47, %c0_48, %c2_49, %c0_50, %c0_51] : memref<1x4x10x10x128xf32, #tpu.memory_space<vmem>>, vector<1x1x8x8x128xf32>
    %50 = vector.shape_cast %49 : vector<1x1x8x8x128xf32> to vector<8x8x128xf32>
    %51 = vector.shape_cast %50 : vector<8x8x128xf32> to vector<64x128xf32>
    %52 = arith.truncf %51 : vector<64x128xf32> to vector<64x128xbf16>
    %c20 = arith.constant 20 : index
    %c0_52 = arith.constant 0 : index
    %c0_53 = arith.constant 0 : index
    %53 = vector.load %arg2[%c20, %c0_52, %c0_53] : memref<25x128x128xbf16, #tpu.memory_space<vmem>>, vector<1x128x128xbf16>
    %54 = vector.shape_cast %53 : vector<1x128x128xbf16> to vector<128x128xbf16>
    %cst_54 = arith.constant dense<0.000000e+00> : vector<64x128xf32>
    %55 = tpu.matmul %52, %54, %cst_54 {dimension_numbers = #tpu.dot_dimension_numbers<[1], [0], [0], [1], [0, 0, 1, 1], [], []>} : vector<64x128xbf16>, vector<128x128xbf16>, vector<64x128xf32> -> vector<64x128xf32>
    %56 = arith.addf %48, %55 : vector<64x128xf32>
    %c0_55 = arith.constant 0 : index
    %c0_56 = arith.constant 0 : index
    %c2_57 = arith.constant 2 : index
    %c1_58 = arith.constant 1 : index
    %c0_59 = arith.constant 0 : index
    %57 = vector.load %arg1[%c0_55, %c0_56, %c2_57, %c1_58, %c0_59] : memref<1x4x10x10x128xf32, #tpu.memory_space<vmem>>, vector<1x1x8x8x128xf32>
    %58 = vector.shape_cast %57 : vector<1x1x8x8x128xf32> to vector<8x8x128xf32>
    %59 = vector.shape_cast %58 : vector<8x8x128xf32> to vector<64x128xf32>
    %60 = arith.truncf %59 : vector<64x128xf32> to vector<64x128xbf16>
    %c22 = arith.constant 22 : index
    %c0_60 = arith.constant 0 : index
    %c0_61 = arith.constant 0 : index
    %61 = vector.load %arg2[%c22, %c0_60, %c0_61] : memref<25x128x128xbf16, #tpu.memory_space<vmem>>, vector<1x128x128xbf16>
    %62 = vector.shape_cast %61 : vector<1x128x128xbf16> to vector<128x128xbf16>
    %cst_62 = arith.constant dense<0.000000e+00> : vector<64x128xf32>
    %63 = tpu.matmul %60, %62, %cst_62 {dimension_numbers = #tpu.dot_dimension_numbers<[1], [0], [0], [1], [0, 0, 1, 1], [], []>} : vector<64x128xbf16>, vector<128x128xbf16>, vector<64x128xf32> -> vector<64x128xf32>
    %64 = arith.addf %56, %63 : vector<64x128xf32>
    %c0_63 = arith.constant 0 : index
    %c0_64 = arith.constant 0 : index
    %c2_65 = arith.constant 2 : index
    %c2_66 = arith.constant 2 : index
    %c0_67 = arith.constant 0 : index
    %65 = vector.load %arg1[%c0_63, %c0_64, %c2_65, %c2_66, %c0_67] : memref<1x4x10x10x128xf32, #tpu.memory_space<vmem>>, vector<1x1x8x8x128xf32>
    %66 = vector.shape_cast %65 : vector<1x1x8x8x128xf32> to vector<8x8x128xf32>
    %67 = vector.shape_cast %66 : vector<8x8x128xf32> to vector<64x128xf32>
    %68 = arith.truncf %67 : vector<64x128xf32> to vector<64x128xbf16>
    %c24 = arith.constant 24 : index
    %c0_68 = arith.constant 0 : index
    %c0_69 = arith.constant 0 : index
    %69 = vector.load %arg2[%c24, %c0_68, %c0_69] : memref<25x128x128xbf16, #tpu.memory_space<vmem>>, vector<1x128x128xbf16>
    %70 = vector.shape_cast %69 : vector<1x128x128xbf16> to vector<128x128xbf16>
    %cst_70 = arith.constant dense<0.000000e+00> : vector<64x128xf32>
    %71 = tpu.matmul %68, %70, %cst_70 {dimension_numbers = #tpu.dot_dimension_numbers<[1], [0], [0], [1], [0, 0, 1, 1], [], []>} : vector<64x128xbf16>, vector<128x128xbf16>, vector<64x128xf32> -> vector<64x128xf32>
    %72 = arith.addf %64, %71 : vector<64x128xf32>
    %c0_71 = arith.constant 0 : index
    %c1_72 = arith.constant 1 : index
    %c0_73 = arith.constant 0 : index
    %c0_74 = arith.constant 0 : index
    %c0_75 = arith.constant 0 : index
    %73 = vector.load %arg1[%c0_71, %c1_72, %c0_73, %c0_74, %c0_75] : memref<1x4x10x10x128xf32, #tpu.memory_space<vmem>>, vector<1x1x8x8x128xf32>
    %74 = vector.shape_cast %73 : vector<1x1x8x8x128xf32> to vector<8x8x128xf32>
    %75 = vector.shape_cast %74 : vector<8x8x128xf32> to vector<64x128xf32>
    %76 = arith.truncf %75 : vector<64x128xf32> to vector<64x128xbf16>
    %c1_76 = arith.constant 1 : index
    %c0_77 = arith.constant 0 : index
    %c0_78 = arith.constant 0 : index
    %77 = vector.load %arg2[%c1_76, %c0_77, %c0_78] : memref<25x128x128xbf16, #tpu.memory_space<vmem>>, vector<1x128x128xbf16>
    %78 = vector.shape_cast %77 : vector<1x128x128xbf16> to vector<128x128xbf16>
    %cst_79 = arith.constant dense<0.000000e+00> : vector<64x128xf32>
    %79 = tpu.matmul %76, %78, %cst_79 {dimension_numbers = #tpu.dot_dimension_numbers<[1], [0], [0], [1], [0, 0, 1, 1], [], []>} : vector<64x128xbf16>, vector<128x128xbf16>, vector<64x128xf32> -> vector<64x128xf32>
    %80 = arith.addf %72, %79 : vector<64x128xf32>
    %c0_80 = arith.constant 0 : index
    %c1_81 = arith.constant 1 : index
    %c0_82 = arith.constant 0 : index
    %c1_83 = arith.constant 1 : index
    %c0_84 = arith.constant 0 : index
    %81 = vector.load %arg1[%c0_80, %c1_81, %c0_82, %c1_83, %c0_84] : memref<1x4x10x10x128xf32, #tpu.memory_space<vmem>>, vector<1x1x8x8x128xf32>
    %82 = vector.shape_cast %81 : vector<1x1x8x8x128xf32> to vector<8x8x128xf32>
    %83 = vector.shape_cast %82 : vector<8x8x128xf32> to vector<64x128xf32>
    %84 = arith.truncf %83 : vector<64x128xf32> to vector<64x128xbf16>
    %c3 = arith.constant 3 : index
    %c0_85 = arith.constant 0 : index
    %c0_86 = arith.constant 0 : index
    %85 = vector.load %arg2[%c3, %c0_85, %c0_86] : memref<25x128x128xbf16, #tpu.memory_space<vmem>>, vector<1x128x128xbf16>
    %86 = vector.shape_cast %85 : vector<1x128x128xbf16> to vector<128x128xbf16>
    %cst_87 = arith.constant dense<0.000000e+00> : vector<64x128xf32>
    %87 = tpu.matmul %84, %86, %cst_87 {dimension_numbers = #tpu.dot_dimension_numbers<[1], [0], [0], [1], [0, 0, 1, 1], [], []>} : vector<64x128xbf16>, vector<128x128xbf16>, vector<64x128xf32> -> vector<64x128xf32>
    %88 = arith.addf %80, %87 : vector<64x128xf32>
    %c0_88 = arith.constant 0 : index
    %c1_89 = arith.constant 1 : index
    %c1_90 = arith.constant 1 : index
    %c0_91 = arith.constant 0 : index
    %c0_92 = arith.constant 0 : index
    %89 = vector.load %arg1[%c0_88, %c1_89, %c1_90, %c0_91, %c0_92] : memref<1x4x10x10x128xf32, #tpu.memory_space<vmem>>, vector<1x1x8x8x128xf32>
    %90 = vector.shape_cast %89 : vector<1x1x8x8x128xf32> to vector<8x8x128xf32>
    %91 = vector.shape_cast %90 : vector<8x8x128xf32> to vector<64x128xf32>
    %92 = arith.truncf %91 : vector<64x128xf32> to vector<64x128xbf16>
    %c11 = arith.constant 11 : index
    %c0_93 = arith.constant 0 : index
    %c0_94 = arith.constant 0 : index
    %93 = vector.load %arg2[%c11, %c0_93, %c0_94] : memref<25x128x128xbf16, #tpu.memory_space<vmem>>, vector<1x128x128xbf16>
    %94 = vector.shape_cast %93 : vector<1x128x128xbf16> to vector<128x128xbf16>
    %cst_95 = arith.constant dense<0.000000e+00> : vector<64x128xf32>
    %95 = tpu.matmul %92, %94, %cst_95 {dimension_numbers = #tpu.dot_dimension_numbers<[1], [0], [0], [1], [0, 0, 1, 1], [], []>} : vector<64x128xbf16>, vector<128x128xbf16>, vector<64x128xf32> -> vector<64x128xf32>
    %96 = arith.addf %88, %95 : vector<64x128xf32>
    %c0_96 = arith.constant 0 : index
    %c1_97 = arith.constant 1 : index
    %c1_98 = arith.constant 1 : index
    %c1_99 = arith.constant 1 : index
    %c0_100 = arith.constant 0 : index
    %97 = vector.load %arg1[%c0_96, %c1_97, %c1_98, %c1_99, %c0_100] : memref<1x4x10x10x128xf32, #tpu.memory_space<vmem>>, vector<1x1x8x8x128xf32>
    %98 = vector.shape_cast %97 : vector<1x1x8x8x128xf32> to vector<8x8x128xf32>
    %99 = vector.shape_cast %98 : vector<8x8x128xf32> to vector<64x128xf32>
    %100 = arith.truncf %99 : vector<64x128xf32> to vector<64x128xbf16>
    %c13 = arith.constant 13 : index
    %c0_101 = arith.constant 0 : index
    %c0_102 = arith.constant 0 : index
    %101 = vector.load %arg2[%c13, %c0_101, %c0_102] : memref<25x128x128xbf16, #tpu.memory_space<vmem>>, vector<1x128x128xbf16>
    %102 = vector.shape_cast %101 : vector<1x128x128xbf16> to vector<128x128xbf16>
    %cst_103 = arith.constant dense<0.000000e+00> : vector<64x128xf32>
    %103 = tpu.matmul %100, %102, %cst_103 {dimension_numbers = #tpu.dot_dimension_numbers<[1], [0], [0], [1], [0, 0, 1, 1], [], []>} : vector<64x128xbf16>, vector<128x128xbf16>, vector<64x128xf32> -> vector<64x128xf32>
    %104 = arith.addf %96, %103 : vector<64x128xf32>
    %c0_104 = arith.constant 0 : index
    %c1_105 = arith.constant 1 : index
    %c2_106 = arith.constant 2 : index
    %c0_107 = arith.constant 0 : index
    %c0_108 = arith.constant 0 : index
    %105 = vector.load %arg1[%c0_104, %c1_105, %c2_106, %c0_107, %c0_108] : memref<1x4x10x10x128xf32, #tpu.memory_space<vmem>>, vector<1x1x8x8x128xf32>
    %106 = vector.shape_cast %105 : vector<1x1x8x8x128xf32> to vector<8x8x128xf32>
    %107 = vector.shape_cast %106 : vector<8x8x128xf32> to vector<64x128xf32>
    %108 = arith.truncf %107 : vector<64x128xf32> to vector<64x128xbf16>
    %c21 = arith.constant 21 : index
    %c0_109 = arith.constant 0 : index
    %c0_110 = arith.constant 0 : index
    %109 = vector.load %arg2[%c21, %c0_109, %c0_110] : memref<25x128x128xbf16, #tpu.memory_space<vmem>>, vector<1x128x128xbf16>
    %110 = vector.shape_cast %109 : vector<1x128x128xbf16> to vector<128x128xbf16>
    %cst_111 = arith.constant dense<0.000000e+00> : vector<64x128xf32>
    %111 = tpu.matmul %108, %110, %cst_111 {dimension_numbers = #tpu.dot_dimension_numbers<[1], [0], [0], [1], [0, 0, 1, 1], [], []>} : vector<64x128xbf16>, vector<128x128xbf16>, vector<64x128xf32> -> vector<64x128xf32>
    %112 = arith.addf %104, %111 : vector<64x128xf32>
    %c0_112 = arith.constant 0 : index
    %c1_113 = arith.constant 1 : index
    %c2_114 = arith.constant 2 : index
    %c1_115 = arith.constant 1 : index
    %c0_116 = arith.constant 0 : index
    %113 = vector.load %arg1[%c0_112, %c1_113, %c2_114, %c1_115, %c0_116] : memref<1x4x10x10x128xf32, #tpu.memory_space<vmem>>, vector<1x1x8x8x128xf32>
    %114 = vector.shape_cast %113 : vector<1x1x8x8x128xf32> to vector<8x8x128xf32>
    %115 = vector.shape_cast %114 : vector<8x8x128xf32> to vector<64x128xf32>
    %116 = arith.truncf %115 : vector<64x128xf32> to vector<64x128xbf16>
    %c23 = arith.constant 23 : index
    %c0_117 = arith.constant 0 : index
    %c0_118 = arith.constant 0 : index
    %117 = vector.load %arg2[%c23, %c0_117, %c0_118] : memref<25x128x128xbf16, #tpu.memory_space<vmem>>, vector<1x128x128xbf16>
    %118 = vector.shape_cast %117 : vector<1x128x128xbf16> to vector<128x128xbf16>
    %cst_119 = arith.constant dense<0.000000e+00> : vector<64x128xf32>
    %119 = tpu.matmul %116, %118, %cst_119 {dimension_numbers = #tpu.dot_dimension_numbers<[1], [0], [0], [1], [0, 0, 1, 1], [], []>} : vector<64x128xbf16>, vector<128x128xbf16>, vector<64x128xf32> -> vector<64x128xf32>
    %120 = arith.addf %112, %119 : vector<64x128xf32>
    %c0_120 = arith.constant 0 : index
    %c2_121 = arith.constant 2 : index
    %c0_122 = arith.constant 0 : index
    %c0_123 = arith.constant 0 : index
    %c0_124 = arith.constant 0 : index
    %121 = vector.load %arg1[%c0_120, %c2_121, %c0_122, %c0_123, %c0_124] : memref<1x4x10x10x128xf32, #tpu.memory_space<vmem>>, vector<1x1x8x8x128xf32>
    %122 = vector.shape_cast %121 : vector<1x1x8x8x128xf32> to vector<8x8x128xf32>
    %123 = vector.shape_cast %122 : vector<8x8x128xf32> to vector<64x128xf32>
    %124 = arith.truncf %123 : vector<64x128xf32> to vector<64x128xbf16>
    %c5 = arith.constant 5 : index
    %c0_125 = arith.constant 0 : index
    %c0_126 = arith.constant 0 : index
    %125 = vector.load %arg2[%c5, %c0_125, %c0_126] : memref<25x128x128xbf16, #tpu.memory_space<vmem>>, vector<1x128x128xbf16>
    %126 = vector.shape_cast %125 : vector<1x128x128xbf16> to vector<128x128xbf16>
    %cst_127 = arith.constant dense<0.000000e+00> : vector<64x128xf32>
    %127 = tpu.matmul %124, %126, %cst_127 {dimension_numbers = #tpu.dot_dimension_numbers<[1], [0], [0], [1], [0, 0, 1, 1], [], []>} : vector<64x128xbf16>, vector<128x128xbf16>, vector<64x128xf32> -> vector<64x128xf32>
    %128 = arith.addf %120, %127 : vector<64x128xf32>
    %c0_128 = arith.constant 0 : index
    %c2_129 = arith.constant 2 : index
    %c0_130 = arith.constant 0 : index
    %c1_131 = arith.constant 1 : index
    %c0_132 = arith.constant 0 : index
    %129 = vector.load %arg1[%c0_128, %c2_129, %c0_130, %c1_131, %c0_132] : memref<1x4x10x10x128xf32, #tpu.memory_space<vmem>>, vector<1x1x8x8x128xf32>
    %130 = vector.shape_cast %129 : vector<1x1x8x8x128xf32> to vector<8x8x128xf32>
    %131 = vector.shape_cast %130 : vector<8x8x128xf32> to vector<64x128xf32>
    %132 = arith.truncf %131 : vector<64x128xf32> to vector<64x128xbf16>
    %c7 = arith.constant 7 : index
    %c0_133 = arith.constant 0 : index
    %c0_134 = arith.constant 0 : index
    %133 = vector.load %arg2[%c7, %c0_133, %c0_134] : memref<25x128x128xbf16, #tpu.memory_space<vmem>>, vector<1x128x128xbf16>
    %134 = vector.shape_cast %133 : vector<1x128x128xbf16> to vector<128x128xbf16>
    %cst_135 = arith.constant dense<0.000000e+00> : vector<64x128xf32>
    %135 = tpu.matmul %132, %134, %cst_135 {dimension_numbers = #tpu.dot_dimension_numbers<[1], [0], [0], [1], [0, 0, 1, 1], [], []>} : vector<64x128xbf16>, vector<128x128xbf16>, vector<64x128xf32> -> vector<64x128xf32>
    %136 = arith.addf %128, %135 : vector<64x128xf32>
    %c0_136 = arith.constant 0 : index
    %c2_137 = arith.constant 2 : index
    %c0_138 = arith.constant 0 : index
    %c2_139 = arith.constant 2 : index
    %c0_140 = arith.constant 0 : index
    %137 = vector.load %arg1[%c0_136, %c2_137, %c0_138, %c2_139, %c0_140] : memref<1x4x10x10x128xf32, #tpu.memory_space<vmem>>, vector<1x1x8x8x128xf32>
    %138 = vector.shape_cast %137 : vector<1x1x8x8x128xf32> to vector<8x8x128xf32>
    %139 = vector.shape_cast %138 : vector<8x8x128xf32> to vector<64x128xf32>
    %140 = arith.truncf %139 : vector<64x128xf32> to vector<64x128xbf16>
    %c9 = arith.constant 9 : index
    %c0_141 = arith.constant 0 : index
    %c0_142 = arith.constant 0 : index
    %141 = vector.load %arg2[%c9, %c0_141, %c0_142] : memref<25x128x128xbf16, #tpu.memory_space<vmem>>, vector<1x128x128xbf16>
    %142 = vector.shape_cast %141 : vector<1x128x128xbf16> to vector<128x128xbf16>
    %cst_143 = arith.constant dense<0.000000e+00> : vector<64x128xf32>
    %143 = tpu.matmul %140, %142, %cst_143 {dimension_numbers = #tpu.dot_dimension_numbers<[1], [0], [0], [1], [0, 0, 1, 1], [], []>} : vector<64x128xbf16>, vector<128x128xbf16>, vector<64x128xf32> -> vector<64x128xf32>
    %144 = arith.addf %136, %143 : vector<64x128xf32>
    %c0_144 = arith.constant 0 : index
    %c2_145 = arith.constant 2 : index
    %c1_146 = arith.constant 1 : index
    %c0_147 = arith.constant 0 : index
    %c0_148 = arith.constant 0 : index
    %145 = vector.load %arg1[%c0_144, %c2_145, %c1_146, %c0_147, %c0_148] : memref<1x4x10x10x128xf32, #tpu.memory_space<vmem>>, vector<1x1x8x8x128xf32>
    %146 = vector.shape_cast %145 : vector<1x1x8x8x128xf32> to vector<8x8x128xf32>
    %147 = vector.shape_cast %146 : vector<8x8x128xf32> to vector<64x128xf32>
    %148 = arith.truncf %147 : vector<64x128xf32> to vector<64x128xbf16>
    %c15 = arith.constant 15 : index
    %c0_149 = arith.constant 0 : index
    %c0_150 = arith.constant 0 : index
    %149 = vector.load %arg2[%c15, %c0_149, %c0_150] : memref<25x128x128xbf16, #tpu.memory_space<vmem>>, vector<1x128x128xbf16>
    %150 = vector.shape_cast %149 : vector<1x128x128xbf16> to vector<128x128xbf16>
    %cst_151 = arith.constant dense<0.000000e+00> : vector<64x128xf32>
    %151 = tpu.matmul %148, %150, %cst_151 {dimension_numbers = #tpu.dot_dimension_numbers<[1], [0], [0], [1], [0, 0, 1, 1], [], []>} : vector<64x128xbf16>, vector<128x128xbf16>, vector<64x128xf32> -> vector<64x128xf32>
    %152 = arith.addf %144, %151 : vector<64x128xf32>
    %c0_152 = arith.constant 0 : index
    %c2_153 = arith.constant 2 : index
    %c1_154 = arith.constant 1 : index
    %c1_155 = arith.constant 1 : index
    %c0_156 = arith.constant 0 : index
    %153 = vector.load %arg1[%c0_152, %c2_153, %c1_154, %c1_155, %c0_156] : memref<1x4x10x10x128xf32, #tpu.memory_space<vmem>>, vector<1x1x8x8x128xf32>
    %154 = vector.shape_cast %153 : vector<1x1x8x8x128xf32> to vector<8x8x128xf32>
    %155 = vector.shape_cast %154 : vector<8x8x128xf32> to vector<64x128xf32>
    %156 = arith.truncf %155 : vector<64x128xf32> to vector<64x128xbf16>
    %c17 = arith.constant 17 : index
    %c0_157 = arith.constant 0 : index
    %c0_158 = arith.constant 0 : index
    %157 = vector.load %arg2[%c17, %c0_157, %c0_158] : memref<25x128x128xbf16, #tpu.memory_space<vmem>>, vector<1x128x128xbf16>
    %158 = vector.shape_cast %157 : vector<1x128x128xbf16> to vector<128x128xbf16>
    %cst_159 = arith.constant dense<0.000000e+00> : vector<64x128xf32>
    %159 = tpu.matmul %156, %158, %cst_159 {dimension_numbers = #tpu.dot_dimension_numbers<[1], [0], [0], [1], [0, 0, 1, 1], [], []>} : vector<64x128xbf16>, vector<128x128xbf16>, vector<64x128xf32> -> vector<64x128xf32>
    %160 = arith.addf %152, %159 : vector<64x128xf32>
    %c0_160 = arith.constant 0 : index
    %c2_161 = arith.constant 2 : index
    %c1_162 = arith.constant 1 : index
    %c2_163 = arith.constant 2 : index
    %c0_164 = arith.constant 0 : index
    %161 = vector.load %arg1[%c0_160, %c2_161, %c1_162, %c2_163, %c0_164] : memref<1x4x10x10x128xf32, #tpu.memory_space<vmem>>, vector<1x1x8x8x128xf32>
    %162 = vector.shape_cast %161 : vector<1x1x8x8x128xf32> to vector<8x8x128xf32>
    %163 = vector.shape_cast %162 : vector<8x8x128xf32> to vector<64x128xf32>
    %164 = arith.truncf %163 : vector<64x128xf32> to vector<64x128xbf16>
    %c19 = arith.constant 19 : index
    %c0_165 = arith.constant 0 : index
    %c0_166 = arith.constant 0 : index
    %165 = vector.load %arg2[%c19, %c0_165, %c0_166] : memref<25x128x128xbf16, #tpu.memory_space<vmem>>, vector<1x128x128xbf16>
    %166 = vector.shape_cast %165 : vector<1x128x128xbf16> to vector<128x128xbf16>
    %cst_167 = arith.constant dense<0.000000e+00> : vector<64x128xf32>
    %167 = tpu.matmul %164, %166, %cst_167 {dimension_numbers = #tpu.dot_dimension_numbers<[1], [0], [0], [1], [0, 0, 1, 1], [], []>} : vector<64x128xbf16>, vector<128x128xbf16>, vector<64x128xf32> -> vector<64x128xf32>
    %168 = arith.addf %160, %167 : vector<64x128xf32>
    %c0_168 = arith.constant 0 : index
    %c3_169 = arith.constant 3 : index
    %c0_170 = arith.constant 0 : index
    %c0_171 = arith.constant 0 : index
    %c0_172 = arith.constant 0 : index
    %169 = vector.load %arg1[%c0_168, %c3_169, %c0_170, %c0_171, %c0_172] : memref<1x4x10x10x128xf32, #tpu.memory_space<vmem>>, vector<1x1x8x8x128xf32>
    %170 = vector.shape_cast %169 : vector<1x1x8x8x128xf32> to vector<8x8x128xf32>
    %171 = vector.shape_cast %170 : vector<8x8x128xf32> to vector<64x128xf32>
    %172 = arith.truncf %171 : vector<64x128xf32> to vector<64x128xbf16>
    %c6 = arith.constant 6 : index
    %c0_173 = arith.constant 0 : index
    %c0_174 = arith.constant 0 : index
    %173 = vector.load %arg2[%c6, %c0_173, %c0_174] : memref<25x128x128xbf16, #tpu.memory_space<vmem>>, vector<1x128x128xbf16>
    %174 = vector.shape_cast %173 : vector<1x128x128xbf16> to vector<128x128xbf16>
    %cst_175 = arith.constant dense<0.000000e+00> : vector<64x128xf32>
    %175 = tpu.matmul %172, %174, %cst_175 {dimension_numbers = #tpu.dot_dimension_numbers<[1], [0], [0], [1], [0, 0, 1, 1], [], []>} : vector<64x128xbf16>, vector<128x128xbf16>, vector<64x128xf32> -> vector<64x128xf32>
    %176 = arith.addf %168, %175 : vector<64x128xf32>
    %c0_176 = arith.constant 0 : index
    %c3_177 = arith.constant 3 : index
    %c0_178 = arith.constant 0 : index
    %c1_179 = arith.constant 1 : index
    %c0_180 = arith.constant 0 : index
    %177 = vector.load %arg1[%c0_176, %c3_177, %c0_178, %c1_179, %c0_180] : memref<1x4x10x10x128xf32, #tpu.memory_space<vmem>>, vector<1x1x8x8x128xf32>
    %178 = vector.shape_cast %177 : vector<1x1x8x8x128xf32> to vector<8x8x128xf32>
    %179 = vector.shape_cast %178 : vector<8x8x128xf32> to vector<64x128xf32>
    %180 = arith.truncf %179 : vector<64x128xf32> to vector<64x128xbf16>
    %c8 = arith.constant 8 : index
    %c0_181 = arith.constant 0 : index
    %c0_182 = arith.constant 0 : index
    %181 = vector.load %arg2[%c8, %c0_181, %c0_182] : memref<25x128x128xbf16, #tpu.memory_space<vmem>>, vector<1x128x128xbf16>
    %182 = vector.shape_cast %181 : vector<1x128x128xbf16> to vector<128x128xbf16>
    %cst_183 = arith.constant dense<0.000000e+00> : vector<64x128xf32>
    %183 = tpu.matmul %180, %182, %cst_183 {dimension_numbers = #tpu.dot_dimension_numbers<[1], [0], [0], [1], [0, 0, 1, 1], [], []>} : vector<64x128xbf16>, vector<128x128xbf16>, vector<64x128xf32> -> vector<64x128xf32>
    %184 = arith.addf %176, %183 : vector<64x128xf32>
    %c0_184 = arith.constant 0 : index
    %c3_185 = arith.constant 3 : index
    %c1_186 = arith.constant 1 : index
    %c0_187 = arith.constant 0 : index
    %c0_188 = arith.constant 0 : index
    %185 = vector.load %arg1[%c0_184, %c3_185, %c1_186, %c0_187, %c0_188] : memref<1x4x10x10x128xf32, #tpu.memory_space<vmem>>, vector<1x1x8x8x128xf32>
    %186 = vector.shape_cast %185 : vector<1x1x8x8x128xf32> to vector<8x8x128xf32>
    %187 = vector.shape_cast %186 : vector<8x8x128xf32> to vector<64x128xf32>
    %188 = arith.truncf %187 : vector<64x128xf32> to vector<64x128xbf16>
    %c16 = arith.constant 16 : index
    %c0_189 = arith.constant 0 : index
    %c0_190 = arith.constant 0 : index
    %189 = vector.load %arg2[%c16, %c0_189, %c0_190] : memref<25x128x128xbf16, #tpu.memory_space<vmem>>, vector<1x128x128xbf16>
    %190 = vector.shape_cast %189 : vector<1x128x128xbf16> to vector<128x128xbf16>
    %cst_191 = arith.constant dense<0.000000e+00> : vector<64x128xf32>
    %191 = tpu.matmul %188, %190, %cst_191 {dimension_numbers = #tpu.dot_dimension_numbers<[1], [0], [0], [1], [0, 0, 1, 1], [], []>} : vector<64x128xbf16>, vector<128x128xbf16>, vector<64x128xf32> -> vector<64x128xf32>
    %192 = arith.addf %184, %191 : vector<64x128xf32>
    %c0_192 = arith.constant 0 : index
    %c3_193 = arith.constant 3 : index
    %c1_194 = arith.constant 1 : index
    %c1_195 = arith.constant 1 : index
    %c0_196 = arith.constant 0 : index
    %193 = vector.load %arg1[%c0_192, %c3_193, %c1_194, %c1_195, %c0_196] : memref<1x4x10x10x128xf32, #tpu.memory_space<vmem>>, vector<1x1x8x8x128xf32>
    %194 = vector.shape_cast %193 : vector<1x1x8x8x128xf32> to vector<8x8x128xf32>
    %195 = vector.shape_cast %194 : vector<8x8x128xf32> to vector<64x128xf32>
    %196 = arith.truncf %195 : vector<64x128xf32> to vector<64x128xbf16>
    %c18 = arith.constant 18 : index
    %c0_197 = arith.constant 0 : index
    %c0_198 = arith.constant 0 : index
    %197 = vector.load %arg2[%c18, %c0_197, %c0_198] : memref<25x128x128xbf16, #tpu.memory_space<vmem>>, vector<1x128x128xbf16>
    %198 = vector.shape_cast %197 : vector<1x128x128xbf16> to vector<128x128xbf16>
    %cst_199 = arith.constant dense<0.000000e+00> : vector<64x128xf32>
    %199 = tpu.matmul %196, %198, %cst_199 {dimension_numbers = #tpu.dot_dimension_numbers<[1], [0], [0], [1], [0, 0, 1, 1], [], []>} : vector<64x128xbf16>, vector<128x128xbf16>, vector<64x128xf32> -> vector<64x128xf32>
    %200 = arith.addf %192, %199 : vector<64x128xf32>
    %c0_200 = arith.constant 0 : index
    %c0_201 = arith.constant 0 : index
    %201 = vector.load %arg3[%c0_200, %c0_201] : memref<1x128xf32, #tpu.memory_space<vmem>>, vector<1x128xf32>
    %202 = vector.broadcast %201 : vector<1x128xf32> to vector<64x128xf32>
    %203 = arith.addf %200, %202 : vector<64x128xf32>
    %c0_202 = arith.constant 0 : index
    %c0_203 = arith.constant 0 : index
    %c0_204 = arith.constant 0 : index
    %204 = vector.load %arg4[%c0_202, %c0_203, %c0_204] : memref<1x64x128xf32, #tpu.memory_space<vmem>>, vector<1x64x128xf32>
    %205 = vector.shape_cast %204 : vector<1x64x128xf32> to vector<64x128xf32>
    %206 = vector.shape_cast %203 : vector<64x128xf32> to vector<1x64x128xf32>
    tpu.vector_store %arg4[%c0_202, %c0_203, %c0_204], %206 {strides = array<i32>} : memref<1x64x128xf32, #tpu.memory_space<vmem>>, vector<1x64x128xf32>,
    return
  }
  func.func @transform_0(%arg0: i32) -> (i32, i32, i32, i32, i32) {
    %c0_i32 = arith.constant 0 : i32
    %c0_i32_0 = arith.constant 0 : i32
    %c0_i32_1 = arith.constant 0 : i32
    %c0_i32_2 = arith.constant 0 : i32
    %c0_i32_3 = arith.constant 0 : i32
    return %arg0, %c0_i32, %c0_i32_0, %c0_i32_1, %c0_i32_2 : i32, i32, i32, i32, i32
  }
  func.func @transform_1(%arg0: i32) -> (i32, i32, i32) {
    %c0_i32 = arith.constant 0 : i32
    %c0_i32_0 = arith.constant 0 : i32
    %c0_i32_1 = arith.constant 0 : i32
    %c0_i32_2 = arith.constant 0 : i32
    return %c0_i32, %c0_i32_0, %c0_i32_1 : i32, i32, i32
  }
  func.func @transform_2(%arg0: i32) -> (i32, i32) {
    %c0_i32 = arith.constant 0 : i32
    %c0_i32_0 = arith.constant 0 : i32
    %c0_i32_1 = arith.constant 0 : i32
    return %c0_i32, %c0_i32_0 : i32, i32
  }
  func.func @transform_3(%arg0: i32) -> (i32, i32, i32) {
    %c0_i32 = arith.constant 0 : i32
    %c0_i32_0 = arith.constant 0 : i32
    %c0_i32_1 = arith.constant 0 : i32
    return %arg0, %c0_i32, %c0_i32_0 : i32, i32, i32
  }
}

</mosaic_0001>

<bundles_post_ra>
// kernel: hyper_analysis_forward.3
= control target key start
LH: loop header
LB: loop body
LE: loop exit
PB: predicated region body
PF: predicated region fallthrough
CT: control target
= control target key end

     0   :  { %s4168_s12 = smov 0   ;;  %s5319_s0 = inlined_call_operand.vmem [shape: f32[2,18,18,128], index: 0, kind: input, shape index: {}]   ;;  %s5320_s1 = inlined_call_operand.vmem [shape: bf16[9,128,128], index: 1, kind: input, shape index: {}]   ;;  %s5321_s2 = inlined_call_operand.vmem [shape: f32[1,128], index: 2, kind: input, shape index: {}]   ;;  %s5322_s3 = inlined_call_operand.vmem [shape: f32[2,256,128], index: 3, kind: output, shape index: {}]  }
   0x1 LB: > { %s3183_s13 = sadd.s32 4294967295, %s4146_s12   ;;  %p3187_p0 = scmp.ge.s32.totalorder %s4146_s12, 1  ;;  %s4146_s12 = sphi %s4168_s12, %s13_s12  }
   0x2   : > { %p137_p1 = scmp.lt.s32.totalorder %s4146_s12, 3 }
   0x4   : > { %p138_p2 = pnand %p3187_p0, %p137_p1 }
   0x6   : > { %141 = sbr.rel (%p138_p2) target bundleno = 539 (0x21b), region = 32 }
   0xb   : > { %v4068_v0 = vld [vmem:[%s5320_s1 + $0x78] sm:$0xff]   ;;  %p161_p3 = scmp.lt.s32.totalorder %s3183_s13, 1  ;;  %v4069_v1 = vld [vmem:[%s5320_s1 + $0x70] sm:$0xff]   ;;  %v4070_v2 = vld [vmem:[%s5320_s1 + $0x68] sm:$0xff]  }
   0xc   : > { %3611 = vmatprep.subr.bf16.mxu0 %v4068_v0  ;;  %4043 = vmatprep.subr.bf16.mxu1 %v4068_v0  ;;  %v4071_v3 = vld [vmem:[%s5320_s1 + $0x60] sm:$0xff]   ;;  %v4072_v10 = vld [vmem:[%s5320_s1 + $0x58] sm:$0xff]   ;;  %v4073_v30 = vld [vmem:[%s5320_s1 + $0x50] sm:$0xff]  }
   0xd   : > { %s5406_s13 = smov (!%p161_p3, %s3183_s13), 1  ;;  %3612 = vmatpush3.bf16.msra.mxu0 %v4068_v0  ;;  %4051 = vmatpush3.bf16.msra.mxu1 %v4068_v0  ;;  %v4074_v34 = vld [vmem:[%s5320_s1 + $0x48] sm:$0xff]   ;;  %v4075_v47 = vld [vmem:[%s5320_s1 + $0x40] sm:$0xff]   ;;  %v4076_v58 = vld [vmem:[%s5320_s1 + $0x38] sm:$0xff]  }
   0xe   : > { %3613 = vmatprep.subr.bf16.mxu0 %v4069_v1  ;;  %4044 = vmatprep.subr.bf16.mxu1 %v4069_v1  ;;  %s4059_s20 = smul.u32 432, %s5406_s13  ;;  %v4077_v59 = vld [vmem:[%s5320_s1 + $0xb8] sm:$0xff]   ;;  %s3394_s17 = sshll.u32 %s5406_s13, 8 }
   0xf   : > { %s5174_s19 = scalar_lea.vmem %s5322_s3, %s3394_s17 }
  0x10   : > { %s4191_s23 = scalar_lea.vmem %s5319_s0, %s4059_s20 }
  0x11   : > { %3614 = vmatpush3.bf16.msra.mxu0 %v4069_v1  ;;  %4052 = vmatpush3.bf16.msra.mxu1 %v4069_v1  ;;  %v4197_v4 = vld [vmem:[%s4191_s23] sm:$0xff]  ;;  %v4200_v5 = vld [vmem:[%s4191_s23 + $0x8] sm:$0xff]  ;;  %v174_v6 = vld [vmem:[%s4191_s23 + $0x10] sm:$0x3] }
  0x12   : > { %3615 = vmatprep.subr.bf16.mxu0 %v4070_v2  ;;  %4045 = vmatprep.subr.bf16.mxu1 %v4070_v2  ;;  %v226_v7 = vand.u32 2147483647, %v4197_v4  ;;  %v227_v8 = vand.u32 2147483647, %v4200_v5  ;;  %v228_v9 = vand.u32 2147483647, %v174_v6 }
  0x13   : > { %v196_v11 = vld [vmem:[%s4191_s23 + $0xc0] sm:$0xff]  ;;  %v197_v12 = vld [vmem:[%s4191_s23 + $0xc8] sm:$0xff]  ;;  %v198_v13 = vld [vmem:[%s4191_s23 + $0xd0] sm:$0x3] }
  0x14   : > { %280 = vst [vmem:[#allocation2] sm:$0xff] %v226_v7  ;;  %281 = vst [vmem:[#allocation2 + $0x8] sm:$0xff] %v227_v8  ;;  %v250_v14 = vand.u32 2147483647, %v196_v11  ;;  %v251_v15 = vand.u32 2147483647, %v197_v12 }
  0x15   : > { %3616 = vmatpush3.bf16.msra.mxu0 %v4070_v2  ;;  %4053 = vmatpush3.bf16.msra.mxu1 %v4070_v2  ;;  %282 = vst [vmem:[#allocation2 + $0x10] sm:$0x3] %v228_v9  ;;  %v252_v16 = vand.u32 2147483647, %v198_v13  ;;  %v4216_v17 = vld [vmem:[%s4191_s23 + $0x18] sm:$0xff]  ;;  %v4219_v18 = vld [vmem:[%s4191_s23 + $0x20] sm:$0xff] }
  0x16   : > { %3617 = vmatprep.subr.bf16.mxu0 %v4071_v3  ;;  %4046 = vmatprep.subr.bf16.mxu1 %v4071_v3  ;;  %v177_v19 = vld [vmem:[%s4191_s23 + $0x28] sm:$0x3]  ;;  %304 = vst [vmem:[#allocation2 + $0xc0] sm:$0xff] %v250_v14  ;;  %305 = vst [vmem:[#allocation2 + $0xc8] sm:$0xff] %v251_v15  ;;  %v229_v20 = vand.u32 2147483647, %v4216_v17  ;;  %v4224_v23 = vpack.c.bf16 %v251_v15, %v250_v14 }
  0x17   : > { %306 = vst [vmem:[#allocation2 + $0xd0] sm:$0x3] %v252_v16  ;;  %v230_v21 = vand.u32 2147483647, %v4219_v18  ;;  %v231_v22 = vand.u32 2147483647, %v177_v19 }
  0x18   : > { %v199_v24 = vld [vmem:[%s4191_s23 + $0xd8] sm:$0xff]  ;;  %v200_v25 = vld [vmem:[%s4191_s23 + $0xe0] sm:$0xff]  ;;  %v201_v26 = vld [vmem:[%s4191_s23 + $0xe8] sm:$0x3]  ;;  %283 = vst [vmem:[#allocation2 + $0x18] sm:$0xff] %v229_v20 }
  0x19   : > { %3618 = vmatpush3.bf16.msra.mxu0 %v4071_v3  ;;  %4054 = vmatpush3.bf16.msra.mxu1 %v4071_v3  ;;  %284 = vst [vmem:[#allocation2 + $0x20] sm:$0xff] %v230_v21  ;;  %285 = vst [vmem:[#allocation2 + $0x28] sm:$0x3] %v231_v22  ;;  %v253_v27 = vand.u32 2147483647, %v199_v24  ;;  %v4242_v39 = vld [vmem:[%s4191_s23 + $0x30] sm:$0xff] }
  0x1a   : > { %v254_v28 = vand.u32 2147483647, %v200_v25  ;;  %v255_v29 = vand.u32 2147483647, %v201_v26  ;;  %3619 = vmatprep.subr.bf16.mxu0 %v4072_v10  ;;  %4047 = vmatprep.subr.bf16.mxu1 %v4072_v10  ;;  %v4245_v40 = vld [vmem:[%s4191_s23 + $0x38] sm:$0xff]  ;;  %v202_v45 = vld [vmem:[%s4191_s23 + $0xf0] sm:$0xff] }
  0x1b   : > { %307 = vst [vmem:[#allocation2 + $0xd8] sm:$0xff] %v253_v27  ;;  %v398_v32 = vld [vmem:[#allocation2 + $0x1] sm:$0xff]  ;;  %v232_v42 = vand.u32 2147483647, %v4242_v39  ;;  %v233_v43 = vand.u32 2147483647, %v4245_v40 }
  0x1c   : > { %308 = vst [vmem:[#allocation2 + $0xe0] sm:$0xff] %v254_v28  ;;  %309 = vst [vmem:[#allocation2 + $0xe8] sm:$0x3] %v255_v29  ;;  %v4236_v31 = vpack.c.bf16 %v254_v28, %v253_v27  ;;  %v399_v33 = vld [vmem:[#allocation2 + $0x9] sm:$0xff]  ;;  %v180_v41 = vld [vmem:[%s4191_s23 + $0x40] sm:$0x3] }
  0x1d   : > { %3620 = vmatpush3.bf16.msra.mxu0 %v4072_v10  ;;  %4055 = vmatpush3.bf16.msra.mxu1 %v4072_v10  ;;  %v430_v35 = vpack.c.bf16 %v399_v33, %v398_v32  ;;  %v414_v36 = vld [vmem:[#allocation2 + $0xc1] sm:$0xff]  ;;  %v234_v44 = vand.u32 2147483647, %v180_v41  ;;  %v203_v46 = vld [vmem:[%s4191_s23 + $0xf8] sm:$0xff]  ;;  %286 = vst [vmem:[#allocation2 + $0x30] sm:$0xff] %v232_v42  ;;  %287 = vst [vmem:[#allocation2 + $0x38] sm:$0xff] %v233_v43 }
  0x1e   : > { %3621 = vmatprep.subr.bf16.mxu0 %v4073_v30  ;;  %4048 = vmatprep.subr.bf16.mxu1 %v4073_v30  ;;  %v415_v37 = vld [vmem:[#allocation2 + $0xc9] sm:$0xff]  ;;  %v204_v48 = vld [vmem:[%s4191_s23 + $0x100] sm:$0x3]  ;;  %v256_v49 = vand.u32 2147483647, %v202_v45 }
  0x1f   : > { %3627 = vmatprep.mubr.bf16.mxu0 %v430_v35  ;;  %v438_v38 = vpack.c.bf16 %v415_v37, %v414_v36  ;;  %288 = vst [vmem:[#allocation2 + $0x40] sm:$0x3] %v234_v44  ;;  %v257_v54 = vand.u32 2147483647, %v203_v46  ;;  %v258_v55 = vand.u32 2147483647, %v204_v48 }
  0x20   : > { %v400_v50 = vld [vmem:[#allocation2 + $0x19] sm:$0xff]  ;;  %v401_v51 = vld [vmem:[#allocation2 + $0x21] sm:$0xff]  ;;  %v4264_v57 = vld [vmem:[%s4191_s23 + $0x50] sm:$0xff]  ;;  %310 = vst [vmem:[#allocation2 + $0xf0] sm:$0xff] %v256_v49 }
  0x21   : > { %3622 = vmatpush3.bf16.msra.mxu0 %v4073_v30  ;;  %4056 = vmatpush3.bf16.msra.mxu1 %v4073_v30  ;;  %v4261_v56 = vld [vmem:[%s4191_s23 + $0x48] sm:$0xff]  ;;  %v183_v60 = vld [vmem:[%s4191_s23 + $0x58] sm:$0x3]  ;;  %v236_v62 = vand.u32 2147483647, %v4264_v57  ;;  %311 = vst [vmem:[#allocation2 + $0xf8] sm:$0xff] %v257_v54  ;;  %v4278_v3 = vpack.c.bf16 %v257_v54, %v256_v49  ;;  %v4284_v11 = vpack.c.bf16 %v401_v51, %v400_v50 }
  0x22   : > { %3623 = vmatprep.subr.bf16.mxu0 %v4074_v34  ;;  %4049 = vmatprep.subr.bf16.mxu1 %v4074_v34  ;;  %v235_v61 = vand.u32 2147483647, %v4261_v56  ;;  %312 = vst [vmem:[#allocation2 + $0x100] sm:$0x3] %v258_v55  ;;  %v237_v63 = vand.u32 2147483647, %v183_v60 }
  0x23   : > { %3643 = vmatprep.mubr.bf16.mxu1 %v438_v38  ;;  %v416_v52 = vld [vmem:[#allocation2 + $0xd9] sm:$0xff]  ;;  %v417_v53 = vld [vmem:[#allocation2 + $0xe1] sm:$0xff]  ;;  %v206_v1 = vld [vmem:[%s4191_s23 + $0x110] sm:$0xff]  ;;  %290 = vst [vmem:[#allocation2 + $0x50] sm:$0xff] %v236_v62 }
  0x24   : > { %v205_v0 = vld [vmem:[%s4191_s23 + $0x108] sm:$0xff]  ;;  %v207_v2 = vld [vmem:[%s4191_s23 + $0x118] sm:$0x3]  ;;  %289 = vst [vmem:[#allocation2 + $0x48] sm:$0xff] %v235_v61  ;;  %v260_v9 = vand.u32 2147483647, %v206_v1  ;;  %v439_v12 = vpack.c.bf16 %v417_v53, %v416_v52 }
  0x25   : > { %3624 = vmatpush3.bf16.msra.mxu0 %v4074_v34  ;;  %4057 = vmatpush3.bf16.msra.mxu1 %v4074_v34  ;;  %v259_v6 = vand.u32 2147483647, %v205_v0  ;;  %v261_v10 = vand.u32 2147483647, %v207_v2  ;;  %291 = vst [vmem:[#allocation2 + $0x58] sm:$0x3] %v237_v63 }
  0x26   : > { %3625 = vmatprep.subr.bf16.mxu0 %v4075_v47  ;;  %4050 = vmatprep.subr.bf16.mxu1 %v4075_v47  ;;  %v4078_v13 = vld [vmem:[%s5320_s1 + $0x30] sm:$0xff]   ;;  %314 = vst [vmem:[#allocation2 + $0x110] sm:$0xff] %v260_v9  ;;  %v403_v19 = vld [vmem:[#allocation2 + $0x39] sm:$0xff]  ;;  %v4080_v27 = vld [vmem:[%s5320_s1 + $0x28] sm:$0xff]  }
  0x27   : > { %313 = vst [vmem:[#allocation2 + $0x108] sm:$0xff] %v259_v6  ;;  %315 = vst [vmem:[#allocation2 + $0x118] sm:$0x3] %v261_v10  ;;  %v4289_v14 = vpack.c.bf16 %v260_v9, %v259_v6  ;;  %v4079_v15 = vld [vmem:[%s5320_s1 + $0xb0] sm:$0xff]   ;;  %v4297_v24 = vld [vmem:[%s4191_s23 + $0x60] sm:$0xff] }
  0x28   : > { %v402_v16 = vld [vmem:[#allocation2 + $0x31] sm:$0xff]  ;;  %v4081_v28 = vld [vmem:[%s5320_s1 + $0xa8] sm:$0xff]   ;;  %v238_v30 = vand.u32 2147483647, %v4297_v24  ;;  %v208_v36 = vld [vmem:[%s4191_s23 + $0x120] sm:$0xff] }
  0x29   : > { %3626 = vmatpush3.bf16.msra.mxu0 %v4075_v47  ;;  %4058 = vmatpush3.bf16.msra.mxu1 %v4075_v47  ;;  %v4294_v22 = vpack.c.bf16 %v403_v19, %v402_v16  ;;  %v418_v25 = vld [vmem:[#allocation2 + $0xf1] sm:$0xff]  ;;  %v419_v26 = vld [vmem:[#allocation2 + $0xf9] sm:$0xff]  ;;  %v4307_v29 = vld [vmem:[%s4191_s23 + $0x68] sm:$0xff]  ;;  %v262_v47 = vand.u32 2147483647, %v208_v36 }
  0x2a   : > { %3659 = vmatprep.subr.bf16.mxu1 %v4076_v58  ;;  %3707 = vmatprep.subr.bf16.mxu0 %v4077_v59  ;;  %v440_v32 = vpack.c.bf16 %v419_v26, %v418_v25  ;;  %v186_v34 = vld [vmem:[%s4191_s23 + $0x70] sm:$0x3]  ;;  %v239_v35 = vand.u32 2147483647, %v4307_v29  ;;  %292 = vst [vmem:[#allocation2 + $0x60] sm:$0xff] %v238_v30  ;;  %v209_v41 = vld [vmem:[%s4191_s23 + $0x128] sm:$0xff] }
  0x2b   : > { %v404_v33 = vld [vmem:[#allocation2 + $0x49] sm:$0xff]  ;;  %v240_v38 = vand.u32 2147483647, %v186_v34  ;;  %v263_v48 = vand.u32 2147483647, %v209_v41  ;;  %v4082_v51 = vld [vmem:[%s5320_s1 + $0x20] sm:$0xff]  }
  0x2c   : > { %3628 = vmatmul.mubr.bf16.vlgmr.msra.gmra.mxu0 %v4284_v11  ;;  %3644 = vmatmul.mubr.bf16.vlgmr.msra.gmra.mxu1 %v439_v12  ;;  %v405_v37 = vld [vmem:[#allocation2 + $0x51] sm:$0xff]  ;;  %293 = vst [vmem:[#allocation2 + $0x68] sm:$0xff] %v239_v35  ;;  %v4083_v52 = vld [vmem:[%s5320_s1 + $0xa0] sm:$0xff]   ;;  %316 = vst [vmem:[#allocation2 + $0x120] sm:$0xff] %v262_v47 }
  0x2d   : > { %3660 = vmatpush3.bf16.msra.mxu1 %v4076_v58  ;;  %3708 = vmatpush3.bf16.msra.mxu0 %v4077_v59  ;;  %v210_v44 = vld [vmem:[%s4191_s23 + $0x130] sm:$0x3]  ;;  %v4320_v49 = vpack.c.bf16 %v405_v37, %v404_v33  ;;  %294 = vst [vmem:[#allocation2 + $0x70] sm:$0x3] %v240_v38  ;;  %v4331_v54 = vld [vmem:[%s4191_s23 + $0x78] sm:$0xff]  ;;  %v4334_v55 = vld [vmem:[%s4191_s23 + $0x80] sm:$0xff]  ;;  %v4339_v0 = vpack.c.bf16 %v263_v48, %v262_v47 }
  0x2e   : > { %3661 = vmatprep.subr.bf16.mxu1 %v4078_v13  ;;  %3709 = vmatprep.subr.bf16.mxu0 %v4079_v15  ;;  %v420_v45 = vld [vmem:[#allocation2 + $0x109] sm:$0xff]  ;;  %v421_v46 = vld [vmem:[#allocation2 + $0x111] sm:$0xff]  ;;  %v264_v53 = vand.u32 2147483647, %v210_v44  ;;  %317 = vst [vmem:[#allocation2 + $0x128] sm:$0xff] %v263_v48  ;;  %v212_v2 = vld [vmem:[%s4191_s23 + $0x140] sm:$0xff] }
  0x2f   : > { %3631 = vmatprep.mubr.bf16.mxu0 %v4294_v22  ;;  %3647 = vmatprep.mubr.bf16.mxu1 %v440_v32  ;;  %v4322_v50 = vpack.c.bf16 %v421_v46, %v420_v45  ;;  %v189_v58 = vld [vmem:[%s4191_s23 + $0x88] sm:$0x3]  ;;  %v241_v59 = vand.u32 2147483647, %v4331_v54  ;;  %v242_v60 = vand.u32 2147483647, %v4334_v55 }
  0x30   : > { %v243_v63 = vand.u32 2147483647, %v189_v58  ;;  %318 = vst [vmem:[#allocation2 + $0x130] sm:$0x3] %v264_v53  ;;  %v211_v1 = vld [vmem:[%s4191_s23 + $0x138] sm:$0xff]  ;;  %v4087_v33 = vld [vmem:[%s5320_s1 + $0x90] sm:$0xff]  }
  0x31   : > { %3662 = vmatpush3.bf16.msra.mxu1 %v4078_v13  ;;  %3710 = vmatpush3.bf16.msra.mxu0 %v4079_v15  ;;  %v213_v6 = vld [vmem:[%s4191_s23 + $0x148] sm:$0x3]  ;;  %295 = vst [vmem:[#allocation2 + $0x78] sm:$0xff] %v241_v59  ;;  %296 = vst [vmem:[#allocation2 + $0x80] sm:$0xff] %v242_v60  ;;  %v265_v9 = vand.u32 2147483647, %v211_v1 }
  0x32   : > { %3663 = vmatprep.subr.bf16.mxu1 %v4080_v27  ;;  %3711 = vmatprep.subr.bf16.mxu0 %v4081_v28  ;;  %297 = vst [vmem:[#allocation2 + $0x88] sm:$0x3] %v243_v63  ;;  %v266_v10 = vand.u32 2147483647, %v212_v2  ;;  %v267_v12 = vand.u32 2147483647, %v213_v6 }
  0x33   : > { %319 = vst [vmem:[#allocation2 + $0x138] sm:$0xff] %v265_v9  ;;  %v4084_v13 = vld [vmem:[%s5320_s1 + $0x18] sm:$0xff]   ;;  %v406_v16 = vld [vmem:[#allocation2 + $0x61] sm:$0xff]  ;;  %v4367_v34 = vld [vmem:[%s4191_s23 + $0x90] sm:$0xff] }
  0x34   : > { %3632 = vmatmul.mubr.bf16.gmra.mxu0 %v4320_v49  ;;  %3648 = vmatmul.mubr.bf16.gmra.mxu1 %v4322_v50  ;;  %320 = vst [vmem:[#allocation2 + $0x140] sm:$0xff] %v266_v10  ;;  %321 = vst [vmem:[#allocation2 + $0x148] sm:$0x3] %v267_v12  ;;  %v4353_v15 = vpack.c.bf16 %v266_v10, %v265_v9  ;;  %v407_v19 = vld [vmem:[#allocation2 + $0x69] sm:$0xff]  ;;  %v4085_v25 = vld [vmem:[%s5320_s1 + $0x98] sm:$0xff]  }
  0x35   : > { %3664 = vmatpush3.bf16.msra.mxu1 %v4080_v27  ;;  %3712 = vmatpush3.bf16.msra.mxu0 %v4081_v28  ;;  %v4358_v26 = vpack.c.bf16 %v407_v19, %v406_v16  ;;  %v422_v27 = vld [vmem:[#allocation2 + $0x121] sm:$0xff]  ;;  %v4086_v28 = vld [vmem:[%s5320_s1 + $0x10] sm:$0xff]   ;;  %v4370_v36 = vld [vmem:[%s4191_s23 + $0x98] sm:$0xff]  ;;  %v244_v45 = vand.u32 2147483647, %v4367_v34 }
  0x36   : > { %3665 = vmatprep.subr.bf16.mxu1 %v4082_v51  ;;  %3713 = vmatprep.subr.bf16.mxu0 %v4083_v52  ;;  %v192_v44 = vld [vmem:[%s4191_s23 + $0xa0] sm:$0x3]  ;;  %v245_v47 = vand.u32 2147483647, %v4370_v36  ;;  %v4392_v10 = vld [vmem:[%s4191_s23 + $0xa8] sm:$0xff]  ;;  %v4395_v12 = vld [vmem:[%s4191_s23 + $0xb0] sm:$0xff] }
  0x37   : > { %v423_v32 = vld [vmem:[#allocation2 + $0x129] sm:$0xff]  ;;  %3635 = vmatprep.mubr.bf16.mxu0 %v4358_v26  ;;  %v246_v48 = vand.u32 2147483647, %v192_v44  ;;  %298 = vst [vmem:[#allocation2 + $0x90] sm:$0xff] %v244_v45  ;;  %v216_v63 = vld [vmem:[%s4191_s23 + $0x160] sm:$0x3] }
  0x38   : > { %v4373_v37 = vpack.c.bf16 %v423_v32, %v422_v27  ;;  %v408_v38 = vld [vmem:[#allocation2 + $0x79] sm:$0xff]  ;;  %299 = vst [vmem:[#allocation2 + $0x98] sm:$0xff] %v245_v47  ;;  %v270_v9 = vand.u32 2147483647, %v216_v63  ;;  %v247_v19 = vand.u32 2147483647, %v4392_v10 }
  0x39   : > { %3666 = vmatpush3.bf16.msra.mxu1 %v4082_v51  ;;  %3714 = vmatpush3.bf16.msra.mxu0 %v4083_v52  ;;  %v409_v41 = vld [vmem:[#allocation2 + $0x81] sm:$0xff]  ;;  %v214_v51 = vld [vmem:[%s4191_s23 + $0x150] sm:$0xff]  ;;  %v215_v52 = vld [vmem:[%s4191_s23 + $0x158] sm:$0xff]  ;;  %300 = vst [vmem:[#allocation2 + $0xa0] sm:$0x3] %v246_v48 }
  0x3a   : > { %3667 = vmatprep.subr.bf16.mxu1 %v4084_v13  ;;  %v4377_v46 = vpack.c.bf16 %v409_v41, %v408_v38  ;;  %3715 = vmatprep.subr.bf16.mxu0 %v4085_v25  ;;  %v268_v1 = vand.u32 2147483647, %v214_v51  ;;  %v269_v6 = vand.u32 2147483647, %v215_v52  ;;  %v195_v16 = vld [vmem:[%s4191_s23 + $0xb8] sm:$0x3] }
  0x3b   : > { %3651 = vmatprep.mubr.bf16.mxu1 %v4373_v37  ;;  %v424_v53 = vld [vmem:[#allocation2 + $0x139] sm:$0xff]  ;;  %v425_v58 = vld [vmem:[#allocation2 + $0x141] sm:$0xff]  ;;  %324 = vst [vmem:[#allocation2 + $0x160] sm:$0x3] %v270_v9  ;;  %v249_v27 = vand.u32 2147483647, %v195_v16 }
  0x3c   : > { %3636 = vmatmul.mubr.bf16.gmra.mxu0 %v4377_v46  ;;  %v4387_v2 = vpack.c.bf16 %v425_v58, %v424_v53  ;;  %322 = vst [vmem:[#allocation2 + $0x150] sm:$0xff] %v268_v1  ;;  %323 = vst [vmem:[#allocation2 + $0x158] sm:$0xff] %v269_v6  ;;  %v217_v32 = vld [vmem:[%s4191_s23 + $0x168] sm:$0xff]  ;;  %v218_v38 = vld [vmem:[%s4191_s23 + $0x170] sm:$0xff]  ;;  %v4404_v44 = vpack.c.bf16 %v269_v6, %v268_v1 }
  0x3d   : > { %3668 = vmatpush3.bf16.msra.mxu1 %v4084_v13  ;;  %3716 = vmatpush3.bf16.msra.mxu0 %v4085_v25  ;;  %v248_v13 = vand.u32 2147483647, %v4395_v12  ;;  %v219_v41 = vld [vmem:[%s4191_s23 + $0x178] sm:$0x3]  ;;  %301 = vst [vmem:[#allocation2 + $0xa8] sm:$0xff] %v247_v19  ;;  %v4088_v52 = vld [vmem:[%s5320_s1 + $0x8] sm:$0xff]  }
  0x3e   : > { %3669 = vmatprep.subr.bf16.mxu1 %v4086_v28  ;;  %3652 = vmatmul.mubr.bf16.gmra.mxu1 %v4387_v2  ;;  %v271_v25 = vand.u32 2147483647, %v217_v32  ;;  %v272_v48 = vand.u32 2147483647, %v218_v38  ;;  %v273_v51 = vand.u32 2147483647, %v219_v41 }
  0x3f   : > { %3717 = vmatprep.subr.bf16.mxu0 %v4087_v33  ;;  %302 = vst [vmem:[#allocation2 + $0xb0] sm:$0xff] %v248_v13  ;;  %303 = vst [vmem:[#allocation2 + $0xb8] sm:$0x3] %v249_v27  ;;  %v4089_v53 = vld [vmem:[%s5320_s1 + $0x88] sm:$0xff]   ;;  %v410_v63 = vld [vmem:[#allocation2 + $0x91] sm:$0xff] }
  0x40   : > { %325 = vst [vmem:[#allocation2 + $0x168] sm:$0xff] %v271_v25  ;;  %326 = vst [vmem:[#allocation2 + $0x170] sm:$0xff] %v272_v48  ;;  %v4416_v58 = vpack.c.bf16 %v272_v48, %v271_v25  ;;  %v411_v1 = vld [vmem:[#allocation2 + $0x99] sm:$0xff]  ;;  %v881_v9 = vld [vmem:[#allocation2 + $0x2] sm:$0xff] }
  0x41   : > { %3670 = vmatpush3.bf16.msra.mxu1 %v4086_v28  ;;  %3718 = vmatpush3.bf16.msra.mxu0 %v4087_v33  ;;  %327 = vst [vmem:[#allocation2 + $0x178] sm:$0x3] %v273_v51  ;;  %v4090_v28 = vld [vmem:[%s5320_s1] sm:$0xff]   ;;  %v4421_v6 = vpack.c.bf16 %v411_v1, %v410_v63  ;;  %v882_v32 = vld [vmem:[#allocation2 + $0xa] sm:$0xff]  ;;  %v4092_v1 = vld [vmem:[%s5320_s1 + $0xf8] sm:$0xff]  }
  0x42   : > { %3671 = vmatprep.subr.bf16.mxu1 %v4088_v52  ;;  %3719 = vmatprep.subr.bf16.mxu0 %v4089_v53  ;;  %v4091_v33 = vld [vmem:[%s5320_s1 + $0x80] sm:$0xff]   ;;  %v913_v48 = vpack.c.bf16 %v882_v32, %v881_v9  ;;  %v4093_v9 = vld [vmem:[%s5320_s1 + $0x138] sm:$0xff]   ;;  %v4095_v17 = vld [vmem:[%s5320_s1 + $0x130] sm:$0xff]  }
  0x43   : > { %v426_v16 = vld [vmem:[#allocation2 + $0x151] sm:$0xff]  ;;  %v427_v27 = vld [vmem:[#allocation2 + $0x159] sm:$0xff]  ;;  %3639 = vmatprep.mubr.bf16.mxu0 %v4421_v6  ;;  %v884_v4 = vld [vmem:[#allocation2 + $0x22] sm:$0xff] }
  0x44   : > { %v4427_v38 = vpack.c.bf16 %v427_v27, %v426_v16  ;;  %v883_v27 = vld [vmem:[#allocation2 + $0x1a] sm:$0xff]  ;;  %v888_v18 = vld [vmem:[#allocation2 + $0x52] sm:$0xff]  ;;  %v4097_v39 = vld [vmem:[%s5320_s1 + $0x128] sm:$0xff]  }
  0x45   : > { %3672 = vmatpush3.bf16.msra.mxu1 %v4088_v52  ;;  %3720 = vmatpush3.bf16.msra.mxu0 %v4089_v53  ;;  %v366_v53 = vpack.c.bf16 %v227_v8, %v226_v7  ;;  %v4446_v5 = vpack.c.bf16 %v884_v4, %v883_v27  ;;  %v885_v7 = vld [vmem:[#allocation2 + $0x32] sm:$0xff]  ;;  %v886_v8 = vld [vmem:[#allocation2 + $0x3a] sm:$0xff]  ;;  %v4096_v40 = vld [vmem:[%s5320_s1 + $0xe8] sm:$0xff]  }
  0x46   : > { %3673 = vmatprep.subr.bf16.mxu1 %v4090_v28  ;;  %v412_v41 = vld [vmem:[#allocation2 + $0xa9] sm:$0xff]  ;;  %3721 = vmatprep.subr.bf16.mxu0 %v4091_v33  ;;  %v413_v25 = vld [vmem:[#allocation2 + $0xb1] sm:$0xff]  ;;  %v4460_v32 = vpack.c.bf16 %v886_v8, %v885_v7  ;;  %v4098_v56 = vld [vmem:[%s5320_s1 + $0xe0] sm:$0xff]  }
  0x47   : > { %3655 = vmatprep.mubr.bf16.mxu1 %v4427_v38  ;;  %v4430_v51 = vpack.c.bf16 %v413_v25, %v412_v41  ;;  %v428_v52 = vld [vmem:[#allocation2 + $0x169] sm:$0xff]  ;;  %v4099_v57 = vld [vmem:[%s5320_s1 + $0x120] sm:$0xff]   ;;  %v893_v24 = vld [vmem:[#allocation2 + $0x92] sm:$0xff] }
  0x48   : > { %v429_v63 = vld [vmem:[#allocation2 + $0x171] sm:$0xff]  ;;  %v894_v29 = vld [vmem:[#allocation2 + $0x9a] sm:$0xff]  ;;  %v4104_v34 = vld [vmem:[%s5320_s1 + $0xc8] sm:$0xff]  }
  0x49   : > { %3674 = vmatpush3.bf16.msra.mxu1 %v4090_v28  ;;  %v4439_v16 = vpack.c.bf16 %v429_v63, %v428_v52  ;;  %3722 = vmatpush3.bf16.msra.mxu0 %v4091_v33  ;;  %v4452_v28 = vpack.c.bf16 %v230_v21, %v229_v20  ;;  %v4458_v33 = vpack.c.bf16 %v233_v43, %v232_v42  ;;  %v887_v41 = vld [vmem:[#allocation2 + $0x4a] sm:$0xff]  ;;  %v889_v20 = vld [vmem:[#allocation2 + $0x62] sm:$0xff]  ;;  %v4101_v63 = vld [vmem:[%s5320_s1 + $0x118] sm:$0xff]  }
  0x4a   : > { %3640 = vmatmul.mubr.bf16.gmra.mxu0 %v4430_v51  ;;  %3755 = vmatprep.subr.bf16.mxu1 %v4092_v1  ;;  %v4094_v25 = vld [vmem:[%s5320_s1 + $0xf0] sm:$0xff]   ;;  %v4478_v42 = vpack.c.bf16 %v888_v18, %v887_v41  ;;  %v4484_v43 = vpack.c.bf16 %v236_v62, %v235_v61  ;;  %v4492_v52 = vpack.c.bf16 %v239_v35, %v238_v30  ;;  %v891_v61 = vld [vmem:[#allocation2 + $0x7a] sm:$0xff]  ;;  %v892_v62 = vld [vmem:[#allocation2 + $0x82] sm:$0xff] }
  0x4b   : > { %3656 = vmatmul.mubr.bf16.gmra.mxu1 %v4439_v16  ;;  %3723 = vmatprep.mubr.bf16.mxu0 %v913_v48  ;;  %v890_v21 = vld [vmem:[#allocation2 + $0x6a] sm:$0xff]  ;;  %v4100_v30 = vld [vmem:[%s5320_s1 + $0xd8] sm:$0xff]   ;;  %v4507_v35 = vpack.c.bf16 %v892_v62, %v891_v61  ;;  %v4106_v8 = vld [vmem:[%s5320_s1 + $0xc0] sm:$0xff]  }
  0x4c   : > { %3675 = vmatprep.mubr.bf16.mxu1 %v366_v53  ;;  %3803 = vmatprep.subr.bf16.mxu0 %v4093_v9  ;;  %v4486_v48 = vpack.c.bf16 %v890_v21, %v889_v20  ;;  %v4516_v53 = vpack.c.bf16 %v242_v60, %v241_v59  ;;  %v895_v27 = vld [vmem:[#allocation2 + $0xaa] sm:$0xff]  ;;  %v896_v4 = vld [vmem:[#allocation2 + $0xb2] sm:$0xff]  ;;  %v897_v59 = vld [vmem:[#allocation2 + $0xc2] sm:$0xff] }
  0x4d   : > { %v4102_v54 = vld [vmem:[%s5320_s1 + $0xd0] sm:$0xff]   ;;  %v4539_v36 = vpack.c.bf16 %v896_v4, %v895_v27  ;;  %v4107_v10 = vld [vmem:[%s5320_s1 + $0x100] sm:$0xff]   ;;  %v4109_v18 = vld [vmem:[%s5320_s1 + $0x1b8] sm:$0xff]  }
  0x4e   : > { %v4103_v55 = vld [vmem:[%s5320_s1 + $0x110] sm:$0xff]   ;;  %v899_v12 = vld [vmem:[#allocation2 + $0xda] sm:$0xff] }
  0x4f   : > { %v898_v60 = vld [vmem:[#allocation2 + $0xca] sm:$0xff]  ;;  %v902_v41 = vld [vmem:[#allocation2 + $0xfa] sm:$0xff]  ;;  %v904_v21 = vld [vmem:[#allocation2 + $0x112] sm:$0xff] }
  0x50   : > { %v4550_v7 = vpack.c.bf16 %v898_v60, %v897_v59  ;;  %v909_v4 = vld [vmem:[#allocation2 + $0x152] sm:$0xff]  ;;  %v911_v60 = vld [vmem:[#allocation2 + $0x16a] sm:$0xff] }
  0x52   : > { %3724 = vmatmul.mubr.bf16.vlgmr.msra.gmra.mxu0 %v4446_v5 }
  0x53   : > { %3676 = vmatmul.mubr.bf16.vlgmr.msra.gmra.mxu1 %v4452_v28  ;;  %3804 = vmatpush3.bf16.msra.mxu0 %v4093_v9  ;;  %v4524_v9 = vpack.c.bf16 %v245_v47, %v244_v45  ;;  %v4105_v45 = vld [vmem:[%s5320_s1 + $0x108] sm:$0xff]   ;;  %v4548_v47 = vpack.c.bf16 %v248_v13, %v247_v19  ;;  %v901_v13 = vld [vmem:[#allocation2 + $0xf2] sm:$0xff] }
  0x54   : > { %3756 = vmatpush3.bf16.msra.mxu1 %v4092_v1  ;;  %3679 = vmatprep.mubr.bf16.mxu1 %v4458_v33  ;;  %v4518_v1 = vpack.c.bf16 %v894_v29, %v893_v24  ;;  %v900_v19 = vld [vmem:[#allocation2 + $0xe2] sm:$0xff]  ;;  %v4570_v20 = vpack.c.bf16 %v902_v41, %v901_v13  ;;  %v222_v24 = vld [vmem:[%s4191_s23 + $0x190] sm:$0x3] }
  0x55   : > { %3727 = vmatprep.mubr.bf16.mxu0 %v4460_v32  ;;  %3757 = vmatprep.subr.bf16.mxu1 %v4094_v25  ;;  %v276_v29 = vand.u32 2147483647, %v222_v24  ;;  %v4110_v13 = vld [vmem:[%s5320_s1 + $0x170] sm:$0xff]   ;;  %v4123_v24 = vld [vmem:[%s5320_s1 + $0x180] sm:$0xff]  }
  0x56   : > { %3805 = vmatprep.subr.bf16.mxu0 %v4095_v17 }
  0x57   : > { %3806 = vmatpush3.bf16.msra.mxu0 %v4095_v17  ;;  %v4565_v17 = vpack.c.bf16 %v900_v19, %v899_v12  ;;  %330 = vst [vmem:[#allocation2 + $0x190] sm:$0x3] %v276_v29  ;;  %v1512_v29 = vld [vmem:[#allocation2 + $0xf1] sm:$0xff] }
  0x58   : > { %3758 = vmatpush3.bf16.msra.mxu1 %v4094_v25  ;;  %3807 = vmatprep.subr.bf16.mxu0 %v4097_v39  ;;  %v4108_v25 = vld [vmem:[%s5320_s1 + $0x178] sm:$0xff]  }
  0x59   : > { %3759 = vmatprep.subr.bf16.mxu1 %v4096_v40 }
  0x5a   : > { %3728 = vmatmul.mubr.bf16.gmra.mxu0 %v4478_v42 }
  0x5b   : > { %3680 = vmatmul.mubr.bf16.gmra.mxu1 %v4484_v43  ;;  %3731 = vmatprep.mubr.bf16.mxu0 %v4486_v48 }
  0x5c   : > { %3683 = vmatprep.mubr.bf16.mxu1 %v4492_v52  ;;  %3760 = vmatpush3.bf16.msra.mxu1 %v4096_v40  ;;  %v906_v40 = vld [vmem:[#allocation2 + $0x12a] sm:$0xff] }
  0x5d   : > { %3808 = vmatpush3.bf16.msra.mxu0 %v4097_v39  ;;  %3761 = vmatprep.subr.bf16.mxu1 %v4098_v56  ;;  %v905_v39 = vld [vmem:[#allocation2 + $0x122] sm:$0xff] }
  0x5e   : > { %3809 = vmatprep.subr.bf16.mxu0 %v4099_v57  ;;  %v4583_v27 = vpack.c.bf16 %v906_v40, %v905_v39  ;;  %v1511_v39 = vld [vmem:[#allocation2 + $0xe1] sm:$0xff]  ;;  %v1204_v40 = vld [vmem:[#allocation2 + $0xd8] sm:$0xff] }
  0x60   : > { %3762 = vmatpush3.bf16.msra.mxu1 %v4098_v56  ;;  %v220_v56 = vld [vmem:[%s4191_s23 + $0x180] sm:$0xff] }
  0x61   : > { %3810 = vmatpush3.bf16.msra.mxu0 %v4099_v57  ;;  %3763 = vmatprep.subr.bf16.mxu1 %v4100_v30  ;;  %v221_v57 = vld [vmem:[%s4191_s23 + $0x188] sm:$0xff]  ;;  %v274_v61 = vand.u32 2147483647, %v220_v56 }
  0x62   : > { %3732 = vmatmul.mubr.bf16.gmra.mxu0 %v4507_v35  ;;  %3811 = vmatprep.subr.bf16.mxu0 %v4101_v63  ;;  %v275_v62 = vand.u32 2147483647, %v221_v57  ;;  %v4120_v56 = vld [vmem:[%s5320_s1 + $0x148] sm:$0xff]  }
  0x63   : > { %3684 = vmatmul.mubr.bf16.gmra.mxu1 %v4516_v53  ;;  %3735 = vmatprep.mubr.bf16.mxu0 %v4518_v1  ;;  %328 = vst [vmem:[#allocation2 + $0x180] sm:$0xff] %v274_v61 }
  0x64   : > { %3687 = vmatprep.mubr.bf16.mxu1 %v4524_v9  ;;  %3764 = vmatpush3.bf16.msra.mxu1 %v4100_v30  ;;  %329 = vst [vmem:[#allocation2 + $0x188] sm:$0xff] %v275_v62 }
  0x65   : > { %3812 = vmatpush3.bf16.msra.mxu0 %v4101_v63  ;;  %3765 = vmatprep.subr.bf16.mxu1 %v4102_v54  ;;  %v4581_v63 = vpack.c.bf16 %v275_v62, %v274_v61  ;;  %v4122_v62 = vld [vmem:[%s5320_s1 + $0x140] sm:$0xff]  }
  0x66   : > { %3813 = vmatprep.subr.bf16.mxu0 %v4103_v55 }
  0x68   : > { %3766 = vmatpush3.bf16.msra.mxu1 %v4102_v54  ;;  %v910_v54 = vld [vmem:[#allocation2 + $0x15a] sm:$0xff] }
  0x69   : > { %3814 = vmatpush3.bf16.msra.mxu0 %v4103_v55  ;;  %3767 = vmatprep.subr.bf16.mxu1 %v4104_v34  ;;  %v4591_v59 = vpack.c.bf16 %v910_v54, %v909_v4  ;;  %v1207_v4 = vld [vmem:[#allocation2 + $0xf8] sm:$0xff] }
  0x6a   : > { %3736 = vmatmul.mubr.bf16.gmra.mxu0 %v4539_v36  ;;  %3815 = vmatprep.subr.bf16.mxu0 %v4105_v45  ;;  %v4124_v54 = vld [vmem:[%s5320_s1 + $0x1f8] sm:$0xff]  }
  0x6b   : > { %3688 = vmatmul.mubr.bf16.gmra.mxu1 %v4548_v47  ;;  %3739 = vmatprep.mubr.bf16.mxu0 %v4550_v7 }
  0x6c   : > { %3691 = vmatprep.mubr.bf16.mxu1 %v4224_v23  ;;  %3768 = vmatpush3.bf16.msra.mxu1 %v4104_v34  ;;  %v903_v23 = vld [vmem:[#allocation2 + $0x10a] sm:$0xff]  ;;  %v912_v34 = vld [vmem:[#allocation2 + $0x172] sm:$0xff] }
  0x6d   : > { %3816 = vmatpush3.bf16.msra.mxu0 %v4105_v45  ;;  %3769 = vmatprep.subr.bf16.mxu1 %v4106_v8  ;;  %v4579_v30 = vpack.c.bf16 %v904_v21, %v903_v23  ;;  %v4597_v45 = vpack.c.bf16 %v912_v34, %v911_v60  ;;  %v1203_v23 = vld [vmem:[#allocation2 + $0xc8] sm:$0xff]  ;;  %v1510_v21 = vld [vmem:[#allocation2 + $0xd9] sm:$0xff] }
  0x6e   : > { %3817 = vmatprep.subr.bf16.mxu0 %v4107_v10  ;;  %v4659_v57 = vpack.c.bf16 %v1511_v39, %v1510_v21  ;;  %v4125_v34 = vld [vmem:[%s5320_s1 + $0x238] sm:$0xff]   ;;  %v4136_v39 = vld [vmem:[%s5320_s1 + $0x1c8] sm:$0xff]  }
  0x6f   : > { %v4133_v21 = vld [vmem:[%s5320_s1 + $0x218] sm:$0xff]  }
  0x70   : > { %3770 = vmatpush3.bf16.msra.mxu1 %v4106_v8  ;;  %v223_v8 = vld [vmem:[%s4191_s23 + $0x198] sm:$0xff] }
  0x71   : > { %3818 = vmatpush3.bf16.msra.mxu0 %v4107_v10  ;;  %3851 = vmatprep.subr.bf16.mxu1 %v4108_v25  ;;  %v224_v10 = vld [vmem:[%s4191_s23 + $0x1a0] sm:$0xff]  ;;  %v277_v12 = vand.u32 2147483647, %v223_v8 }
  0x72   : > { %3740 = vmatmul.mubr.bf16.gmra.mxu0 %v4565_v17  ;;  %3899 = vmatprep.subr.bf16.mxu0 %v4109_v18  ;;  %v278_v19 = vand.u32 2147483647, %v224_v10  ;;  %v225_v10 = vld [vmem:[%s4191_s23 + $0x1a8] sm:$0x3] }
  0x73   : > { %3692 = vmatmul.mubr.bf16.gmra.mxu1 %v4236_v31  ;;  %3743 = vmatprep.mubr.bf16.mxu0 %v4570_v20  ;;  %v907_v31 = vld [vmem:[#allocation2 + $0x13a] sm:$0xff]  ;;  %331 = vst [vmem:[#allocation2 + $0x198] sm:$0xff] %v277_v12 }
  0x74   : > { %3695 = vmatprep.mubr.bf16.mxu1 %v4278_v3  ;;  %v908_v3 = vld [vmem:[#allocation2 + $0x142] sm:$0xff]  ;;  %332 = vst [vmem:[#allocation2 + $0x1a0] sm:$0xff] %v278_v19  ;;  %v4608_v41 = vpack.c.bf16 %v278_v19, %v277_v12  ;;  %v279_v12 = vand.u32 2147483647, %v225_v10  ;;  %v2129_v10 = vld [vmem:[#allocation2 + $0x138] sm:$0xff] }
  0x75   : > { %v4589_v55 = vpack.c.bf16 %v908_v3, %v907_v31  ;;  %v1513_v31 = vld [vmem:[#allocation2 + $0xf9] sm:$0xff]  ;;  %v1206_v3 = vld [vmem:[#allocation2 + $0xf0] sm:$0xff] }
  0x76   : > { %v4676_v60 = vpack.c.bf16 %v1513_v31, %v1512_v29  ;;  %v4681_v8 = vpack.c.bf16 %v1207_v4, %v1206_v3  ;;  %333 = vst [vmem:[#allocation2 + $0x1a8] sm:$0x3] %v279_v12  ;;  %v1525_v19 = vld [vmem:[#allocation2 + $0x189] sm:$0xff]  ;;  %v2130_v12 = vld [vmem:[#allocation2 + $0x140] sm:$0xff] }
  0x7a   : > { %3744 = vmatmul.mubr.bf16.gmra.mxu0 %v4579_v30 }
  0x7b   : > { %3696 = vmatmul.mubr.bf16.gmra.mxu1 %v4289_v14  ;;  %3747 = vmatprep.mubr.bf16.mxu0 %v4583_v27 }
  0x7c   : > { %3699 = vmatprep.mubr.bf16.mxu1 %v4339_v0 }
  0x82   : > { %3748 = vmatmul.mubr.bf16.gmra.mxu0 %v4589_v55 }
  0x83   : > { %3700 = vmatmul.mubr.bf16.gmra.mxu1 %v4353_v15  ;;  %3751 = vmatprep.mubr.bf16.mxu0 %v4591_v59 }
  0x84   : > { %3703 = vmatprep.mubr.bf16.mxu1 %v4404_v44 }
  0x8a   : > { %3752 = vmatmul.mubr.bf16.gmra.mxu0 %v4597_v45 }
  0x8b   : > { %3704 = vmatmul.mubr.bf16.gmra.mxu1 %v4416_v58  ;;  %3819 = vmatprep.mubr.bf16.mxu0 %v4284_v11  ;;  %v4111_v11 = vld [vmem:[%s5320_s1 + $0x1b0] sm:$0xff]  }
  0x8c   : > { %3771 = vmatprep.mubr.bf16.mxu1 %v4452_v28  ;;  %v4113_v28 = vld [vmem:[%s5320_s1 + $0x1a8] sm:$0xff]  }
  0x92   : > { %3820 = vmatmul.mubr.bf16.vlgmr.msra.gmra.mxu0 %v4294_v22  ;;  %v4112_v22 = vld [vmem:[%s5320_s1 + $0x168] sm:$0xff]  }
  0x93   : > { %3772 = vmatmul.mubr.bf16.vlgmr.msra.gmra.mxu1 %v4458_v33  ;;  %3900 = vmatpush3.bf16.msra.mxu0 %v4109_v18  ;;  %v4114_v33 = vld [vmem:[%s5320_s1 + $0x160] sm:$0xff]   ;;  %v1509_v18 = vld [vmem:[#allocation2 + $0xc9] sm:$0xff] }
  0x94   : > { %3852 = vmatpush3.bf16.msra.mxu1 %v4108_v25  ;;  %3775 = vmatprep.mubr.bf16.mxu1 %v4484_v43  ;;  %v4116_v43 = vld [vmem:[%s5320_s1 + $0x158] sm:$0xff]   ;;  %v1508_v25 = vld [vmem:[#allocation2 + $0xc1] sm:$0xff] }
  0x95   : > { %3823 = vmatprep.mubr.bf16.mxu0 %v4320_v49  ;;  %3853 = vmatprep.subr.bf16.mxu1 %v4110_v13  ;;  %v4115_v49 = vld [vmem:[%s5320_s1 + $0x1a0] sm:$0xff]  }
  0x96   : > { %3901 = vmatprep.subr.bf16.mxu0 %v4111_v11 }
  0x97   : > { %3902 = vmatpush3.bf16.msra.mxu0 %v4111_v11 }
  0x98   : > { %3854 = vmatpush3.bf16.msra.mxu1 %v4110_v13  ;;  %3903 = vmatprep.subr.bf16.mxu0 %v4113_v28  ;;  %v2112_v13 = vld [vmem:[#allocation2 + $0x68] sm:$0xff] }
  0x99   : > { %3855 = vmatprep.subr.bf16.mxu1 %v4112_v22 }
  0x9a   : > { %3824 = vmatmul.mubr.bf16.gmra.mxu0 %v4358_v26  ;;  %v4117_v26 = vld [vmem:[%s5320_s1 + $0x198] sm:$0xff]  }
  0x9b   : > { %3776 = vmatmul.mubr.bf16.gmra.mxu1 %v4492_v52  ;;  %3827 = vmatprep.mubr.bf16.mxu0 %v4377_v46  ;;  %v4118_v46 = vld [vmem:[%s5320_s1 + $0x150] sm:$0xff]  }
  0x9c   : > { %3779 = vmatprep.mubr.bf16.mxu1 %v4516_v53  ;;  %3856 = vmatpush3.bf16.msra.mxu1 %v4112_v22  ;;  %v4119_v52 = vld [vmem:[%s5320_s1 + $0x190] sm:$0xff]   ;;  %v1202_v53 = vld [vmem:[#allocation2 + $0xc0] sm:$0xff]  ;;  %v2113_v22 = vld [vmem:[#allocation2 + $0x78] sm:$0xff] }
  0x9d   : > { %3904 = vmatpush3.bf16.msra.mxu0 %v4113_v28  ;;  %3857 = vmatprep.subr.bf16.mxu1 %v4114_v33  ;;  %v4127_v28 = vld [vmem:[%s5320_s1 + $0x230] sm:$0xff]  }
  0x9e   : > { %3905 = vmatprep.subr.bf16.mxu0 %v4115_v49 }
  0xa0   : > { %3858 = vmatpush3.bf16.msra.mxu1 %v4114_v33  ;;  %v2114_v33 = vld [vmem:[#allocation2 + $0x80] sm:$0xff] }
  0xa1   : > { %3906 = vmatpush3.bf16.msra.mxu0 %v4115_v49  ;;  %3859 = vmatprep.subr.bf16.mxu1 %v4116_v43  ;;  %v2116_v49 = vld [vmem:[#allocation2 + $0x98] sm:$0xff] }
  0xa2   : > { %3828 = vmatmul.mubr.bf16.gmra.mxu0 %v4421_v6  ;;  %3907 = vmatprep.subr.bf16.mxu0 %v4117_v26  ;;  %v1205_v6 = vld [vmem:[#allocation2 + $0xe0] sm:$0xff] }
  0xa3   : > { %3780 = vmatmul.mubr.bf16.gmra.mxu1 %v4524_v9  ;;  %3831 = vmatprep.mubr.bf16.mxu0 %v4430_v51  ;;  %v4652_v9 = vpack.c.bf16 %v1509_v18, %v1508_v25  ;;  %v4121_v51 = vld [vmem:[%s5320_s1 + $0x188] sm:$0xff]   ;;  %v4661_v61 = vpack.c.bf16 %v1205_v6, %v1204_v40  ;;  %v2118_v25 = vld [vmem:[#allocation2 + $0xb0] sm:$0xff]  ;;  %v4132_v18 = vld [vmem:[%s5320_s1 + $0x1d8] sm:$0xff]  }
  0xa4   : > { %3783 = vmatprep.mubr.bf16.mxu1 %v4548_v47  ;;  %3860 = vmatpush3.bf16.msra.mxu1 %v4116_v43  ;;  %v4657_v47 = vpack.c.bf16 %v1203_v23, %v1202_v53  ;;  %v4129_v43 = vld [vmem:[%s5320_s1 + $0x228] sm:$0xff]  }
  0xa5   : > { %3908 = vmatpush3.bf16.msra.mxu0 %v4117_v26  ;;  %3861 = vmatprep.subr.bf16.mxu1 %v4118_v46  ;;  %v4128_v26 = vld [vmem:[%s5320_s1 + $0x1e8] sm:$0xff]  }
  0xa6   : > { %3909 = vmatprep.subr.bf16.mxu0 %v4119_v52  ;;  %v2117_v53 = vld [vmem:[#allocation2 + $0xa8] sm:$0xff] }
  0xa7   : > { %v2144_v23 = vpack.c.bf16 %v2118_v25, %v2117_v53  ;;  %v4137_v40 = vld [vmem:[%s5320_s1 + $0x208] sm:$0xff]  }
  0xa8   : > { %3862 = vmatpush3.bf16.msra.mxu1 %v4118_v46  ;;  %v2142_v46 = vpack.c.bf16 %v2114_v33, %v2113_v22 }
  0xa9   : > { %3910 = vmatpush3.bf16.msra.mxu0 %v4119_v52  ;;  %3863 = vmatprep.subr.bf16.mxu1 %v4120_v56  ;;  %v4131_v52 = vld [vmem:[%s5320_s1 + $0x220] sm:$0xff]  }
  0xaa   : > { %3832 = vmatmul.mubr.bf16.gmra.mxu0 %v4652_v9  ;;  %3911 = vmatprep.subr.bf16.mxu0 %v4121_v51 }
  0xab   : > { %3784 = vmatmul.mubr.bf16.gmra.mxu1 %v4657_v47  ;;  %3835 = vmatprep.mubr.bf16.mxu0 %v4659_v57 }
  0xac   : > { %3787 = vmatprep.mubr.bf16.mxu1 %v4661_v61  ;;  %3864 = vmatpush3.bf16.msra.mxu1 %v4120_v56 }
  0xad   : > { %3912 = vmatpush3.bf16.msra.mxu0 %v4121_v51  ;;  %3865 = vmatprep.subr.bf16.mxu1 %v4122_v62  ;;  %v2125_v51 = vld [vmem:[#allocation2 + $0x108] sm:$0xff] }
  0xae   : > { %3913 = vmatprep.subr.bf16.mxu0 %v4123_v24 }
  0xb0   : > { %3866 = vmatpush3.bf16.msra.mxu1 %v4122_v62  ;;  %v2127_v62 = vld [vmem:[#allocation2 + $0x120] sm:$0xff] }
  0xb1   : > { %3914 = vmatpush3.bf16.msra.mxu0 %v4123_v24  ;;  %3947 = vmatprep.subr.bf16.mxu1 %v4124_v54  ;;  %v2128_v24 = vld [vmem:[#allocation2 + $0x128] sm:$0xff] }
  0xb2   : > { %3836 = vmatmul.mubr.bf16.gmra.mxu0 %v4676_v60  ;;  %3995 = vmatprep.subr.bf16.mxu0 %v4125_v34  ;;  %v2149_v4 = vpack.c.bf16 %v2128_v24, %v2127_v62 }
  0xb3   : > { %3788 = vmatmul.mubr.bf16.gmra.mxu1 %v4681_v8  ;;  %3839 = vmatprep.mubr.bf16.mxu0 %v4322_v50  ;;  %v1524_v50 = vld [vmem:[#allocation2 + $0x181] sm:$0xff] }
  0xb4   : > { %3791 = vmatprep.mubr.bf16.mxu1 %v4289_v14  ;;  %v2107_v14 = vld [vmem:[#allocation2 + $0x30] sm:$0xff] }
  0xba   : > { %3840 = vmatmul.mubr.bf16.gmra.mxu0 %v4373_v37  ;;  %v2108_v37 = vld [vmem:[#allocation2 + $0x38] sm:$0xff] }
  0xbb   : > { %3792 = vmatmul.mubr.bf16.gmra.mxu1 %v4339_v0  ;;  %3843 = vmatprep.mubr.bf16.mxu0 %v4387_v2  ;;  %v4696_v0 = vpack.c.bf16 %v1525_v19, %v1524_v50  ;;  %v2139_v2 = vpack.c.bf16 %v2108_v37, %v2107_v14  ;;  %v2131_v50 = vld [vmem:[#allocation2 + $0x150] sm:$0xff]  ;;  %v2132_v19 = vld [vmem:[#allocation2 + $0x158] sm:$0xff] }
  0xbc   : > { %3795 = vmatprep.mubr.bf16.mxu1 %v4353_v15  ;;  %v2109_v15 = vld [vmem:[#allocation2 + $0x48] sm:$0xff] }
  0xc2   : > { %3844 = vmatmul.mubr.bf16.gmra.mxu0 %v4427_v38  ;;  %v2110_v38 = vld [vmem:[#allocation2 + $0x50] sm:$0xff] }
  0xc3   : > { %3796 = vmatmul.mubr.bf16.gmra.mxu1 %v4404_v44  ;;  %3847 = vmatprep.mubr.bf16.mxu0 %v4439_v16  ;;  %v2140_v44 = vpack.c.bf16 %v2110_v38, %v2109_v15  ;;  %v2111_v16 = vld [vmem:[#allocation2 + $0x60] sm:$0xff] }
  0xc4   : > { %3799 = vmatprep.mubr.bf16.mxu1 %v4416_v58  ;;  %v2141_v11 = vpack.c.bf16 %v2112_v13, %v2111_v16  ;;  %v4126_v58 = vld [vmem:[%s5320_s1 + $0x1f0] sm:$0xff]  }
  0xc5   : > { %v2134_v13 = vld [vmem:[#allocation2 + $0x170] sm:$0xff] }
  0xca   : > { %3848 = vmatmul.mubr.bf16.gmra.mxu0 %v4696_v0 }
  0xcb   : > { %3800 = vmatmul.mubr.bf16.gmra.mxu1 %v4581_v63  ;;  %3915 = vmatprep.mubr.bf16.mxu0 %v2139_v2  ;;  %v2150_v2 = vpack.c.bf16 %v2130_v12, %v2129_v10 }
  0xcc   : > { %3867 = vmatprep.mubr.bf16.mxu1 %v4446_v5  ;;  %v2115_v5 = vld [vmem:[#allocation2 + $0x90] sm:$0xff] }
  0xd2   : > { %3916 = vmatmul.mubr.bf16.vlgmr.msra.gmra.mxu0 %v2140_v44 }
  0xd3   : > { %3868 = vmatmul.mubr.bf16.vlgmr.msra.gmra.mxu1 %v4460_v32  ;;  %3996 = vmatpush3.bf16.msra.mxu0 %v4125_v34  ;;  %v2143_v32 = vpack.c.bf16 %v2116_v49, %v2115_v5  ;;  %v1830_v49 = vld [vmem:[#allocation2 + $0x182] sm:$0xff] }
  0xd4   : > { %3948 = vmatpush3.bf16.msra.mxu1 %v4124_v54  ;;  %3871 = vmatprep.mubr.bf16.mxu1 %v4478_v42  ;;  %v4130_v42 = vld [vmem:[%s5320_s1 + $0x1e0] sm:$0xff]  }
  0xd5   : > { %3919 = vmatprep.mubr.bf16.mxu0 %v2141_v11  ;;  %3949 = vmatprep.subr.bf16.mxu1 %v4126_v58 }
  0xd6   : > { %3997 = vmatprep.subr.bf16.mxu0 %v4127_v28 }
  0xd7   : > { %3998 = vmatpush3.bf16.msra.mxu0 %v4127_v28 }
  0xd8   : > { %3950 = vmatpush3.bf16.msra.mxu1 %v4126_v58  ;;  %3999 = vmatprep.subr.bf16.mxu0 %v4129_v43 }
  0xd9   : > { %3951 = vmatprep.subr.bf16.mxu1 %v4128_v26 }
  0xda   : > { %3920 = vmatmul.mubr.bf16.gmra.mxu0 %v2142_v46  ;;  %v2413_v46 = vld [vmem:[#allocation2 + $0x31] sm:$0xff] }
  0xdb   : > { %3872 = vmatmul.mubr.bf16.gmra.mxu1 %v4486_v48  ;;  %3923 = vmatprep.mubr.bf16.mxu0 %v2143_v32  ;;  %v4134_v48 = vld [vmem:[%s5320_s1 + $0x1d0] sm:$0xff]   ;;  %v2414_v32 = vld [vmem:[#allocation2 + $0x39] sm:$0xff] }
  0xdc   : > { %3875 = vmatprep.mubr.bf16.mxu1 %v4507_v35  ;;  %3952 = vmatpush3.bf16.msra.mxu1 %v4128_v26  ;;  %v4135_v35 = vld [vmem:[%s5320_s1 + $0x210] sm:$0xff]   ;;  %v2720_v26 = vld [vmem:[#allocation2 + $0x3a] sm:$0xff] }
  0xdd   : > { %4000 = vmatpush3.bf16.msra.mxu0 %v4129_v43  ;;  %3953 = vmatprep.subr.bf16.mxu1 %v4130_v42  ;;  %v2719_v43 = vld [vmem:[#allocation2 + $0x32] sm:$0xff] }
  0xde   : > { %4001 = vmatprep.subr.bf16.mxu0 %v4131_v52  ;;  %v2751_v25 = vpack.c.bf16 %v2720_v26, %v2719_v43  ;;  %v2728_v43 = vld [vmem:[#allocation2 + $0x9a] sm:$0xff] }
  0xe0   : > { %3954 = vmatpush3.bf16.msra.mxu1 %v4130_v42 }
  0xe1   : > { %4002 = vmatpush3.bf16.msra.mxu0 %v4131_v52  ;;  %3955 = vmatprep.subr.bf16.mxu1 %v4132_v18 }
  0xe2   : > { %3924 = vmatmul.mubr.bf16.gmra.mxu0 %v2144_v23  ;;  %4003 = vmatprep.subr.bf16.mxu0 %v4133_v21  ;;  %v2721_v23 = vld [vmem:[#allocation2 + $0x4a] sm:$0xff] }
  0xe3   : > { %3876 = vmatmul.mubr.bf16.gmra.mxu1 %v4518_v1  ;;  %3927 = vmatprep.mubr.bf16.mxu0 %v4657_v47  ;;  %v4138_v1 = vld [vmem:[%s5320_s1 + $0x1c0] sm:$0xff]   ;;  %v2126_v47 = vld [vmem:[#allocation2 + $0x110] sm:$0xff] }
  0xe4   : > { %3879 = vmatprep.mubr.bf16.mxu1 %v4539_v36  ;;  %3956 = vmatpush3.bf16.msra.mxu1 %v4132_v18  ;;  %v4139_v36 = vld [vmem:[%s5320_s1 + $0x200] sm:$0xff]  }
  0xe5   : > { %4004 = vmatpush3.bf16.msra.mxu0 %v4133_v21  ;;  %3957 = vmatprep.subr.bf16.mxu1 %v4134_v48  ;;  %v2722_v21 = vld [vmem:[#allocation2 + $0x52] sm:$0xff] }
  0xe6   : > { %4005 = vmatprep.subr.bf16.mxu0 %v4135_v35 }
  0xe8   : > { %3958 = vmatpush3.bf16.msra.mxu1 %v4134_v48 }
  0xe9   : > { %4006 = vmatpush3.bf16.msra.mxu0 %v4135_v35  ;;  %3959 = vmatprep.subr.bf16.mxu1 %v4136_v39  ;;  %v2416_v35 = vld [vmem:[#allocation2 + $0x51] sm:$0xff] }
  0xea   : > { %3928 = vmatmul.mubr.bf16.gmra.mxu0 %v4661_v61  ;;  %4007 = vmatprep.subr.bf16.mxu0 %v4137_v40 }
  0xeb   : > { %3880 = vmatmul.mubr.bf16.gmra.mxu1 %v4550_v7  ;;  %3931 = vmatprep.mubr.bf16.mxu0 %v4681_v8  ;;  %v2148_v7 = vpack.c.bf16 %v2126_v47, %v2125_v51  ;;  %v2418_v51 = vld [vmem:[#allocation2 + $0x69] sm:$0xff] }
  0xec   : > { %v4753_v6 = vpop.f32.mrf.mxu0  ;;  %v4755_v56 = vpop.f32.mrf.mxu1  ;;  %3883 = vmatprep.mubr.bf16.mxu1 %v4565_v17  ;;  %3960 = vmatpush3.bf16.msra.mxu1 %v4136_v39  ;;  %v2723_v39 = vld [vmem:[#allocation2 + $0x62] sm:$0xff] }
  0xed   : > { %4008 = vmatpush3.bf16.msra.mxu0 %v4137_v40  ;;  %3961 = vmatprep.subr.bf16.mxu1 %v4138_v1  ;;  %v2724_v40 = vld [vmem:[#allocation2 + $0x6a] sm:$0xff] }
  0xee   : > { %v4758_v61 = vpop.f32.mrf.mxu0  ;;  %v4760_v29 = vpop.f32.mrf.mxu1  ;;  %4009 = vmatprep.subr.bf16.mxu0 %v4139_v36 }
  0xf0   : > { %v4762_v31 = vpop.f32.mrf.mxu0  ;;  %v4764_v3 = vpop.f32.mrf.mxu1  ;;  %3962 = vmatpush3.bf16.msra.mxu1 %v4138_v1 }
  0xf1   : > { %4010 = vmatpush3.bf16.msra.mxu0 %v4139_v36  ;;  %v2417_v36 = vld [vmem:[#allocation2 + $0x61] sm:$0xff] }
  0xf2   : > { %v4766_v54 = vpop.f32.mrf.mxu0  ;;  %v4768_v17 = vpop.f32.mrf.mxu1  ;;  %3932 = vmatmul.mubr.bf16.gmra.mxu0 %v2148_v7  ;;  %v2753_v7 = vpack.c.bf16 %v2724_v40, %v2723_v39  ;;  %v2447_v10 = vpack.c.bf16 %v2418_v51, %v2417_v36 }
  0xf3   : > { %3884 = vmatmul.mubr.bf16.gmra.mxu1 %v4570_v20  ;;  %3935 = vmatprep.mubr.bf16.mxu0 %v2149_v4  ;;  %v2151_v20 = vpack.c.bf16 %v2132_v19, %v2131_v50 }
  0xf4   : > { %v4771_v34 = vpop.f32.mrf.mxu0  ;;  %v4773_v8 = vpop.f32.mrf.mxu1  ;;  %3887 = vmatprep.mubr.bf16.mxu1 %v4579_v30  ;;  %v2133_v30 = vld [vmem:[#allocation2 + $0x168] sm:$0xff] }
  0xf5   : > { %v2152_v28 = vpack.c.bf16 %v2134_v13, %v2133_v30  ;;  %v2726_v30 = vld [vmem:[#allocation2 + $0x82] sm:$0xff] }
  0xf6   : > { %v4776_v14 = vpop.f32.mrf.mxu0  ;;  %v4778_v37 = vpop.f32.mrf.mxu1 }
  0xf8   : > { %v4780_v15 = vpop.f32.mrf.mxu0  ;;  %v4782_v38 = vpop.f32.mrf.mxu1 }
  0xfa   : > { %v4784_v44 = vpop.f32.mrf.mxu0  ;;  %3936 = vmatmul.mubr.bf16.gmra.mxu0 %v2150_v2  ;;  %v4786_v16 = vpop.f32.mrf.mxu1  ;;  %v2419_v2 = vld [vmem:[#allocation2 + $0x79] sm:$0xff] }
  0xfb   : > { %3888 = vmatmul.mubr.bf16.gmra.mxu1 %v4583_v27  ;;  %3939 = vmatprep.mubr.bf16.mxu0 %v2151_v20  ;;  %v2725_v20 = vld [vmem:[#allocation2 + $0x7a] sm:$0xff] }
  0xfc   : > { %3891 = vmatprep.mubr.bf16.mxu1 %v4589_v55  ;;  %v4790_v11 = vpop.f32.mrf.mxu0  ;;  %v1831_v55 = vld [vmem:[#allocation2 + $0x18a] sm:$0xff] }
  0xfd   : > { %v4809_v53 = vpack.c.bf16 %v1831_v55, %v1830_v49  ;;  %v2420_v49 = vld [vmem:[#allocation2 + $0x81] sm:$0xff]  ;;  %v2727_v55 = vld [vmem:[#allocation2 + $0x92] sm:$0xff] }
  0xfe   : > { %v4792_v58 = vpop.f32.mrf.mxu1  ;;  %v4794_v22 = vpop.f32.mrf.mxu0  ;;  %v2755_v39 = vpack.c.bf16 %v2728_v43, %v2727_v55 }
 0x100   : > { %v4796_v33 = vpop.f32.mrf.mxu1  ;;  %v4798_v5 = vpop.f32.mrf.mxu0 }
 0x102   : > { %3940 = vmatmul.mubr.bf16.gmra.mxu0 %v2152_v28  ;;  %v4801_v27 = vpop.f32.mrf.mxu1  ;;  %v4805_v42 = vpop.f32.mrf.mxu0 }
 0x103   : > { %3892 = vmatmul.mubr.bf16.gmra.mxu1 %v4591_v59  ;;  %3943 = vmatprep.mubr.bf16.mxu0 %v4581_v63  ;;  %v2445_v59 = vpack.c.bf16 %v2414_v32, %v2413_v46  ;;  %v2421_v46 = vld [vmem:[#allocation2 + $0x91] sm:$0xff]  ;;  %v2422_v32 = vld [vmem:[#allocation2 + $0x99] sm:$0xff] }
 0x104   : > { %3895 = vmatprep.mubr.bf16.mxu1 %v4597_v45  ;;  %v4807_v52 = vpop.f32.mrf.mxu1  ;;  %v2415_v45 = vld [vmem:[#allocation2 + $0x49] sm:$0xff]  ;;  %v2449_v51 = vpack.c.bf16 %v2422_v32, %v2421_v46 }
 0x105   : > { %v2446_v24 = vpack.c.bf16 %v2416_v35, %v2415_v45  ;;  %v2448_v35 = vpack.c.bf16 %v2420_v49, %v2419_v2  ;;  %v2730_v2 = vld [vmem:[#allocation2 + $0xb2] sm:$0xff]  ;;  %v2732_v49 = vld [vmem:[#allocation2 + $0xca] sm:$0xff] }
 0x10a   : > { %v4811_v18 = vpop.f32.mrf.mxu0  ;;  %3944 = vmatmul.mubr.bf16.gmra.mxu0 %v4608_v41  ;;  %v2752_v41 = vpack.c.bf16 %v2722_v21, %v2721_v23  ;;  %v2754_v23 = vpack.c.bf16 %v2726_v30, %v2725_v20 }
 0x10b   : > { %v4814_v63 = vpop.f32.mrf.mxu1  ;;  %3896 = vmatmul.mubr.bf16.gmra.mxu1 %v4809_v53  ;;  %4011 = vmatprep.mubr.bf16.mxu0 %v2751_v25 }
 0x10c   : > { %v4817_v48 = vpop.f32.mrf.mxu0  ;;  %3963 = vmatprep.mubr.bf16.mxu1 %v2445_v59 }
 0x10d   : > { %v4819_v1 = vpop.f32.mrf.mxu1 }
 0x10e   : > { %v4821_v47 = vpop.f32.mrf.mxu0 }
 0x10f   : > { %v4823_v62 = vpop.f32.mrf.mxu1 }
 0x110   : > { %v4825_v4 = vpop.f32.mrf.mxu0 }
 0x111   : > { %v4827_v12 = vpop.f32.mrf.mxu1 }
 0x112   : > { %v3725_v50 = vpop.f32.mrf.mxu0  ;;  %4012 = vmatmul.mubr.bf16.vlgmr.msra.gmra.mxu0 %v2752_v41 }
 0x113   : > { %v3677_v19 = vpop.f32.mrf.mxu1  ;;  %3964 = vmatmul.mubr.bf16.vlgmr.msra.gmra.mxu1 %v2446_v24  ;;  %4015 = vmatprep.mubr.bf16.mxu0 %v2753_v7 }
 0x114   : > { %v763_v13 = vadd.f32 %v3677_v19, %v4753_v6  ;;  %v1028_v28 = vpop.f32.mrf.mxu0  ;;  %3967 = vmatprep.mubr.bf16.mxu1 %v2447_v10  ;;  %v2729_v19 = vld [vmem:[#allocation2 + $0xaa] sm:$0xff] }
 0x115   : > { %v754_v26 = vpop.f32.mrf.mxu1  ;;  %v2756_v46 = vpack.c.bf16 %v2730_v2, %v2729_v19 }
 0x116   : > { %v4830_v25 = vadd.f32 %v3725_v50, %v763_v13  ;;  %v755_v59 = vadd.f32 %v754_v26, %v4758_v61  ;;  %v3726_v45 = vpop.f32.mrf.mxu0  ;;  %v2423_v61 = vld [vmem:[#allocation2 + $0xa9] sm:$0xff]  ;;  %v2424_v13 = vld [vmem:[#allocation2 + $0xb1] sm:$0xff] }
 0x117   : > { %v3678_v21 = vpop.f32.mrf.mxu1 }
 0x118   : > { %v4833_v40 = vadd.f32 %v1028_v28, %v755_v59  ;;  %v766_v6 = vadd.f32 %v3678_v21, %v4762_v31  ;;  %v1031_v36 = vpop.f32.mrf.mxu0  ;;  %v2731_v28 = vld [vmem:[#allocation2 + $0xc2] sm:$0xff]  ;;  %v2450_v59 = vpack.c.bf16 %v2424_v13, %v2423_v61  ;;  %v2736_v61 = vld [vmem:[#allocation2 + $0xfa] sm:$0xff] }
 0x119   : > { %v757_v41 = vpop.f32.mrf.mxu1 }
 0x11a   : > { %v4836_v24 = vadd.f32 %v3726_v45, %v766_v6  ;;  %v758_v7 = vadd.f32 %v757_v41, %v4766_v54  ;;  %v3729_v10 = vpop.f32.mrf.mxu0  ;;  %4016 = vmatmul.mubr.bf16.gmra.mxu0 %v2754_v23  ;;  %v2757_v45 = vpack.c.bf16 %v2732_v49, %v2731_v28  ;;  %v2734_v41 = vld [vmem:[#allocation2 + $0xe2] sm:$0xff] }
 0x11b   : > { %v3681_v50 = vpop.f32.mrf.mxu1  ;;  %3968 = vmatmul.mubr.bf16.gmra.mxu1 %v2448_v35  ;;  %4019 = vmatprep.mubr.bf16.mxu0 %v2755_v39 }
 0x11c   : > { %v4839_v20 = vadd.f32 %v1031_v36, %v758_v7  ;;  %v779_v30 = vadd.f32 %v3681_v50, %v4771_v34  ;;  %v1044_v31 = vpop.f32.mrf.mxu0  ;;  %3971 = vmatprep.mubr.bf16.mxu1 %v2449_v51 }
 0x11d   : > { %v770_v55 = vpop.f32.mrf.mxu1 }
 0x11e   : > { %v4842_v43 = vadd.f32 %v3729_v10, %v779_v30  ;;  %v771_v54 = vadd.f32 %v770_v55, %v4776_v14  ;;  %v3730_v26 = vpop.f32.mrf.mxu0  ;;  %v2733_v14 = vld [vmem:[#allocation2 + $0xda] sm:$0xff] }
 0x11f   : > { %v3682_v32 = vpop.f32.mrf.mxu1 }
 0x120   : > { %v4845_v23 = vadd.f32 %v1044_v31, %v771_v54  ;;  %v782_v21 = vadd.f32 %v3682_v32, %v4780_v15  ;;  %v1047_v34 = vpop.f32.mrf.mxu0  ;;  %v2735_v15 = vld [vmem:[#allocation2 + $0xf2] sm:$0xff]  ;;  %v2758_v31 = vpack.c.bf16 %v2734_v41, %v2733_v14  ;;  %v2434_v14 = vld [vmem:[#allocation2 + $0x129] sm:$0xff] }
 0x121   : > { %v773_v35 = vpop.f32.mrf.mxu1  ;;  %v2759_v28 = vpack.c.bf16 %v2736_v61, %v2735_v15 }
 0x122   : > { %v4848_v39 = vadd.f32 %v3730_v26, %v782_v21  ;;  %v774_v6 = vadd.f32 %v773_v35, %v4784_v44  ;;  %v3733_v36 = vpop.f32.mrf.mxu0  ;;  %4020 = vmatmul.mubr.bf16.gmra.mxu0 %v2756_v46  ;;  %v2432_v35 = vld [vmem:[#allocation2 + $0x111] sm:$0xff] }
 0x123   : > { %v3685_v51 = vpop.f32.mrf.mxu1  ;;  %3972 = vmatmul.mubr.bf16.gmra.mxu1 %v2450_v59  ;;  %4023 = vmatprep.mubr.bf16.mxu0 %v2757_v45  ;;  %v2737_v59 = vld [vmem:[#allocation2 + $0x10a] sm:$0xff]  ;;  %v2738_v45 = vld [vmem:[#allocation2 + $0x112] sm:$0xff] }
 0x124   : > { %v4851_v7 = vadd.f32 %v1047_v34, %v774_v6  ;;  %v795_v10 = vadd.f32 %v3685_v51, %v4790_v11  ;;  %v1060_v50 = vpop.f32.mrf.mxu0  ;;  %3975 = vmatprep.mubr.bf16.mxu1 %v4652_v9  ;;  %v2739_v6 = vld [vmem:[#allocation2 + $0x122] sm:$0xff] }
 0x125   : > { %v786_v19 = vpop.f32.mrf.mxu1  ;;  %v2433_v51 = vld [vmem:[#allocation2 + $0x121] sm:$0xff] }
 0x126   : > { %v4855_v2 = vadd.f32 %v3733_v36, %v795_v10  ;;  %v787_v44 = vadd.f32 %v786_v19, %v4794_v22  ;;  %v3734_v30 = vpop.f32.mrf.mxu0  ;;  %v2431_v22 = vld [vmem:[#allocation2 + $0x109] sm:$0xff] }
 0x127   : > { %v3686_v13 = vpop.f32.mrf.mxu1  ;;  %v2740_v36 = vld [vmem:[#allocation2 + $0x12a] sm:$0xff]  ;;  %v2454_v61 = vpack.c.bf16 %v2432_v35, %v2431_v22  ;;  %v2436_v22 = vld [vmem:[#allocation2 + $0x141] sm:$0xff] }
 0x128   : > { %v4858_v49 = vadd.f32 %v1060_v50, %v787_v44  ;;  %v798_v55 = vadd.f32 %v3686_v13, %v4798_v5  ;;  %v1063_v54 = vpop.f32.mrf.mxu0  ;;  %v2760_v50 = vpack.c.bf16 %v2738_v45, %v2737_v59  ;;  %v2761_v19 = vpack.c.bf16 %v2740_v36, %v2739_v6  ;;  %v2743_v59 = vld [vmem:[#allocation2 + $0x152] sm:$0xff]  ;;  %v2744_v45 = vld [vmem:[#allocation2 + $0x15a] sm:$0xff] }
 0x129   : > { %v789_v11 = vpop.f32.mrf.mxu1 }
 0x12a   : > { %v4861_v26 = vadd.f32 %v3734_v30, %v798_v55  ;;  %v790_v9 = vadd.f32 %v789_v11, %v4805_v42  ;;  %v3737_v46 = vpop.f32.mrf.mxu0  ;;  %4024 = vmatmul.mubr.bf16.gmra.mxu0 %v2758_v31  ;;  %v2455_v30 = vpack.c.bf16 %v2434_v14, %v2433_v51  ;;  %v2741_v11 = vld [vmem:[#allocation2 + $0x13a] sm:$0xff] }
 0x12b   : > { %v3689_v32 = vpop.f32.mrf.mxu1  ;;  %3976 = vmatmul.mubr.bf16.gmra.mxu1 %v4659_v57  ;;  %4027 = vmatprep.mubr.bf16.mxu0 %v2759_v28 }
 0x12c   : > { %v4865_v21 = vadd.f32 %v1063_v54, %v790_v9  ;;  %v811_v34 = vadd.f32 %v3689_v32, %v4811_v18  ;;  %v1076_v5 = vpop.f32.mrf.mxu0  ;;  %3979 = vmatprep.mubr.bf16.mxu1 %v4676_v60  ;;  %v2742_v9 = vld [vmem:[#allocation2 + $0x142] sm:$0xff] }
 0x12d   : > { %v802_v42 = vpop.f32.mrf.mxu1 }
 0x12e   : > { %v4869_v41 = vadd.f32 %v3737_v46, %v811_v34  ;;  %v803_v57 = vadd.f32 %v802_v42, %v4817_v48  ;;  %v3738_v10 = vpop.f32.mrf.mxu0  ;;  %v2435_v48 = vld [vmem:[#allocation2 + $0x139] sm:$0xff]  ;;  %v2762_v42 = vpack.c.bf16 %v2742_v9, %v2741_v11 }
 0x12f   : > { %v3690_v15 = vpop.f32.mrf.mxu1  ;;  %v2456_v14 = vpack.c.bf16 %v2436_v22, %v2435_v48  ;;  %v2440_v48 = vld [vmem:[#allocation2 + $0x171] sm:$0xff] }
 0x130   : > { %v4872_v44 = vadd.f32 %v1076_v5, %v803_v57  ;;  %v814_v18 = vadd.f32 %v3690_v15, %v4821_v47  ;;  %v1079_v60 = vpop.f32.mrf.mxu0  ;;  %v2437_v5 = vld [vmem:[#allocation2 + $0x151] sm:$0xff]  ;;  %v2763_v57 = vpack.c.bf16 %v2744_v45, %v2743_v59 }
 0x131   : > { %v805_v31 = vpop.f32.mrf.mxu1 }
 0x132   : > { %v4875_v13 = vadd.f32 %v3738_v10, %v814_v18  ;;  %v806_v28 = vadd.f32 %v805_v31, %v4825_v4  ;;  %v3741_v55 = vpop.f32.mrf.mxu0  ;;  %4028 = vmatmul.mubr.bf16.gmra.mxu0 %v2760_v50  ;;  %v2438_v4 = vld [vmem:[#allocation2 + $0x159] sm:$0xff] }
 0x133   : > { %v3693_v54 = vpop.f32.mrf.mxu1  ;;  %3980 = vmatmul.mubr.bf16.gmra.mxu1 %v2454_v61  ;;  %4031 = vmatprep.mubr.bf16.mxu0 %v2761_v19  ;;  %v2457_v15 = vpack.c.bf16 %v2438_v4, %v2437_v5  ;;  %v2746_v31 = vld [vmem:[#allocation2 + $0x172] sm:$0xff] }
 0x134   : > { %v4878_v46 = vadd.f32 %v1079_v60, %v806_v28  ;;  %v827_v32 = vadd.f32 %v3693_v54, %v4755_v56  ;;  %v1092_v47 = vpop.f32.mrf.mxu0  ;;  %3983 = vmatprep.mubr.bf16.mxu1 %v2455_v30 }
 0x135   : > { %v818_v34 = vpop.f32.mrf.mxu1 }
 0x136   : > { %v4881_v35 = vadd.f32 %v3741_v55, %v827_v32  ;;  %v819_v6 = vadd.f32 %v818_v34, %v4760_v29  ;;  %v3742_v36 = vpop.f32.mrf.mxu0  ;;  %v2745_v29 = vld [vmem:[#allocation2 + $0x16a] sm:$0xff] }
 0x137   : > { %v3694_v51 = vpop.f32.mrf.mxu1 }
 0x138   : > { %v4884_v10 = vadd.f32 %v1092_v47, %v819_v6  ;;  %v830_v56 = vadd.f32 %v3694_v51, %v4764_v3  ;;  %v1095_v50 = vpop.f32.mrf.mxu0  ;;  %v2439_v3 = vld [vmem:[#allocation2 + $0x169] sm:$0xff]  ;;  %v2764_v47 = vpack.c.bf16 %v2746_v31, %v2745_v29 }
 0x139   : > { %v821_v61 = vpop.f32.mrf.mxu1  ;;  %v2458_v59 = vpack.c.bf16 %v2440_v48, %v2439_v3  ;;  %v2750_v51 = vld [vmem:[#allocation2 + $0x1a2] sm:$0xff] }
 0x13a   : > { %v4887_v19 = vadd.f32 %v3742_v36, %v830_v56  ;;  %v822_v18 = vadd.f32 %v821_v61, %v4768_v17  ;;  %v3745_v60 = vpop.f32.mrf.mxu0  ;;  %4032 = vmatmul.mubr.bf16.gmra.mxu0 %v2762_v42 }
 0x13b   : > { %v3697_v30 = vpop.f32.mrf.mxu1  ;;  %3984 = vmatmul.mubr.bf16.gmra.mxu1 %v2456_v14  ;;  %4035 = vmatprep.mubr.bf16.mxu0 %v2763_v57 }
 0x13c   : > { %v4890_v28 = vadd.f32 %v1095_v50, %v822_v18  ;;  %v843_v55 = vadd.f32 %v3697_v30, %v4773_v8  ;;  %v1108_v54 = vpop.f32.mrf.mxu0  ;;  %3987 = vmatprep.mubr.bf16.mxu1 %v2457_v15  ;;  %v2444_v50 = vld [vmem:[#allocation2 + $0x1a1] sm:$0xff] }
 0x13d   : > { %v834_v11 = vpop.f32.mrf.mxu1 }
 0x13e   : > { %v4893_v9 = vadd.f32 %v3745_v60, %v843_v55  ;;  %v835_v17 = vadd.f32 %v834_v11, %v4778_v37  ;;  %v3746_v32 = vpop.f32.mrf.mxu0  ;;  %v2749_v37 = vld [vmem:[#allocation2 + $0x19a] sm:$0xff] }
 0x13f   : > { %v3698_v22 = vpop.f32.mrf.mxu1  ;;  %v2766_v60 = vpack.c.bf16 %v2750_v51, %v2749_v37 }
 0x140   : > { %v4896_v45 = vadd.f32 %v1108_v54, %v835_v17  ;;  %v846_v34 = vadd.f32 %v3698_v22, %v4782_v38  ;;  %v1111_v5 = vpop.f32.mrf.mxu0  ;;  %v2443_v38 = vld [vmem:[#allocation2 + $0x199] sm:$0xff] }
 0x141   : > { %v837_v4 = vpop.f32.mrf.mxu1 }
 0x142   : > { %v4899_v8 = vadd.f32 %v3746_v32, %v846_v34  ;;  %v838_v6 = vadd.f32 %v837_v4, %v4786_v16  ;;  %v3749_v36 = vpop.f32.mrf.mxu0  ;;  %4036 = vmatmul.mubr.bf16.gmra.mxu0 %v2764_v47 }
 0x143   : > { %v3701_v42 = vpop.f32.mrf.mxu1  ;;  %3988 = vmatmul.mubr.bf16.gmra.mxu1 %v2458_v59  ;;  %4039 = vmatprep.mubr.bf16.mxu0 %v4809_v53  ;;  %v2460_v53 = vpack.c.bf16 %v2444_v50, %v2443_v38 }
 0x144   : > { %v4903_v14 = vadd.f32 %v1111_v5, %v838_v6  ;;  %v859_v57 = vadd.f32 %v3701_v42, %v4792_v58  ;;  %v1124_v56 = vpop.f32.mrf.mxu0  ;;  %3991 = vmatprep.mubr.bf16.mxu1 %v4696_v0 }
 0x145   : > { %v850_v15 = vpop.f32.mrf.mxu1 }
 0x146   : > { %v4907_v61 = vadd.f32 %v3749_v36, %v859_v57  ;;  %v851_v16 = vadd.f32 %v850_v15, %v4796_v33  ;;  %v3750_v18 = vpop.f32.mrf.mxu0 }
 0x147   : > { %v3702_v30 = vpop.f32.mrf.mxu1 }
 0x148   : > { %v4910_v29 = vadd.f32 %v1124_v56, %v851_v16  ;;  %v862_v31 = vadd.f32 %v3702_v30, %v4801_v27  ;;  %v1127_v55 = vpop.f32.mrf.mxu0 }
 0x149   : > { %v853_v58 = vpop.f32.mrf.mxu1 }
 0x14a   : > { %v4913_v54 = vadd.f32 %v3750_v18, %v862_v31  ;;  %v854_v0 = vadd.f32 %v853_v58, %v4807_v52  ;;  %v3753_v3 = vpop.f32.mrf.mxu0  ;;  %4040 = vmatmul.mubr.bf16.gmra.mxu0 %v2766_v60 }
 0x14b   : > { %v3705_v48 = vpop.f32.mrf.mxu1  ;;  %3992 = vmatmul.mubr.bf16.gmra.mxu1 %v2460_v53 }
 0x14c   : > { %v4916_v11 = vadd.f32 %v1127_v55, %v854_v0  ;;  %v875_v33 = vadd.f32 %v3705_v48, %v4814_v63  ;;  %v1140_v17 = vpop.f32.mrf.mxu0 }
 0x14d   : > { %v866_v32 = vpop.f32.mrf.mxu1 }
 0x14e   : > { %v4919_v47 = vadd.f32 %v3753_v3, %v875_v33  ;;  %v867_v27 = vadd.f32 %v866_v32, %v4819_v1  ;;  %v3754_v22 = vpop.f32.mrf.mxu0 }
 0x14f   : > { %v3706_v59 = vpop.f32.mrf.mxu1 }
 0x150   : > { %v4922_v34 = vadd.f32 %v1140_v17, %v867_v27  ;;  %v878_v52 = vadd.f32 %v3706_v59, %v4823_v62  ;;  %v1143_v5 = vpop.f32.mrf.mxu0 }
 0x151   : > { %v869_v4 = vpop.f32.mrf.mxu1 }
 0x152   : > { %v4925_v6 = vadd.f32 %v3754_v22, %v878_v52  ;;  %v870_v36 = vadd.f32 %v869_v4, %v4827_v12  ;;  %v3821_v42 = vpop.f32.mrf.mxu0 }
 0x153   : > { %v3773_v63 = vpop.f32.mrf.mxu1 }
 0x154   : > { %v4928_v37 = vadd.f32 %v1143_v5, %v870_v36  ;;  %v1464_v51 = vadd.f32 %v3773_v63, %v4830_v25  ;;  %v1641_v57 = vpop.f32.mrf.mxu0 }
 0x155   : > { %v1335_v1 = vpop.f32.mrf.mxu1 }
 0x156   : > { %v4931_v56 = vadd.f32 %v3821_v42, %v1464_v51  ;;  %v1462_v38 = vadd.f32 %v1335_v1, %v4833_v40  ;;  %v3822_v50 = vpop.f32.mrf.mxu0 }
 0x157   : > { %v3774_v62 = vpop.f32.mrf.mxu1 }
 0x158   : > { %v4934_v15 = vadd.f32 %v1641_v57, %v1462_v38  ;;  %v1465_v16 = vadd.f32 %v3774_v62, %v4836_v24  ;;  %v1644_v18 = vpop.f32.mrf.mxu0 }
 0x159   : > { %v1338_v12 = vpop.f32.mrf.mxu1 }
 0x15a   : > { %v4937_v60 = vadd.f32 %v3822_v50, %v1465_v16  ;;  %v1463_v30 = vadd.f32 %v1338_v12, %v4839_v20  ;;  %v3825_v53 = vpop.f32.mrf.mxu0 }
 0x15b   : > { %v3777_v25 = vpop.f32.mrf.mxu1 }
 0x15c   : > { %v4940_v31 = vadd.f32 %v1644_v18, %v1463_v30  ;;  %v1468_v55 = vadd.f32 %v3777_v25, %v4842_v43  ;;  %v1657_v58 = vpop.f32.mrf.mxu0 }
 0x15d   : > { %v1351_v40 = vpop.f32.mrf.mxu1 }
 0x15e   : > { %v4943_v0 = vadd.f32 %v3825_v53, %v1468_v55  ;;  %v1466_v3 = vadd.f32 %v1351_v40, %v4845_v23  ;;  %v3826_v48 = vpop.f32.mrf.mxu0 }
 0x15f   : > { %v3778_v24 = vpop.f32.mrf.mxu1 }
 0x160   : > { %v4946_v33 = vadd.f32 %v1657_v58, %v1466_v3  ;;  %v1469_v17 = vadd.f32 %v3778_v24, %v4848_v39  ;;  %v1660_v32 = vpop.f32.mrf.mxu0 }
 0x161   : > { %v1354_v20 = vpop.f32.mrf.mxu1 }
 0x162   : > { %v4949_v27 = vadd.f32 %v3826_v48, %v1469_v17  ;;  %v1467_v22 = vadd.f32 %v1354_v20, %v4851_v7  ;;  %v3829_v59 = vpop.f32.mrf.mxu0 }
 0x163   : > { %v3781_v43 = vpop.f32.mrf.mxu1 }
 0x164   : > { %v4952_v52 = vadd.f32 %v1660_v32, %v1467_v22  ;;  %v1472_v5 = vadd.f32 %v3781_v43, %v4855_v2  ;;  %v1673_v4 = vpop.f32.mrf.mxu0 }
 0x165   : > { %v1367_v23 = vpop.f32.mrf.mxu1 }
 0x166   : > { %v4955_v36 = vadd.f32 %v3829_v59, %v1472_v5  ;;  %v1470_v42 = vadd.f32 %v1367_v23, %v4858_v49  ;;  %v3830_v63 = vpop.f32.mrf.mxu0 }
 0x167   : > { %v3782_v39 = vpop.f32.mrf.mxu1 }
 0x168   : > { %v4958_v51 = vadd.f32 %v1673_v4, %v1470_v42  ;;  %v1473_v57 = vadd.f32 %v3782_v39, %v4861_v26  ;;  %v1676_v1 = vpop.f32.mrf.mxu0 }
 0x169   : > { %v1370_v7 = vpop.f32.mrf.mxu1 }
 0x16a   : > { %v4961_v38 = vadd.f32 %v3830_v63, %v1473_v57  ;;  %v1471_v50 = vadd.f32 %v1370_v7, %v4865_v21  ;;  %v3833_v62 = vpop.f32.mrf.mxu0 }
 0x16b   : > { %v3785_v2 = vpop.f32.mrf.mxu1 }
 0x16c   : > { %v4964_v16 = vadd.f32 %v1676_v1, %v1471_v50  ;;  %v1476_v18 = vadd.f32 %v3785_v2, %v4869_v41  ;;  %v1689_v12 = vpop.f32.mrf.mxu0 }
 0x16d   : > { %v1383_v49 = vpop.f32.mrf.mxu1 }
 0x16e   : > { %v4967_v30 = vadd.f32 %v3833_v62, %v1476_v18  ;;  %v1474_v53 = vadd.f32 %v1383_v49, %v4872_v44  ;;  %v3834_v25 = vpop.f32.mrf.mxu0 }
 0x16f   : > { %v3786_v26 = vpop.f32.mrf.mxu1 }
 0x170   : > { %v4970_v55 = vadd.f32 %v1689_v12, %v1474_v53  ;;  %v1477_v58 = vadd.f32 %v3786_v26, %v4875_v13  ;;  %v1692_v40 = vpop.f32.mrf.mxu0 }
 0x171   : > { %v1386_v21 = vpop.f32.mrf.mxu1 }
 0x172   : > { %v4973_v3 = vadd.f32 %v3834_v25, %v1477_v58  ;;  %v1475_v48 = vadd.f32 %v1386_v21, %v4878_v46  ;;  %v3837_v24 = vpop.f32.mrf.mxu0 }
 0x173   : > { %v3789_v41 = vpop.f32.mrf.mxu1 }
 0x174   : > { %v4976_v17 = vadd.f32 %v1692_v40, %v1475_v48  ;;  %v1480_v32 = vadd.f32 %v3789_v41, %v4881_v35  ;;  %v1705_v20 = vpop.f32.mrf.mxu0 }
 0x175   : > { %v1399_v44 = vpop.f32.mrf.mxu1 }
 0x176   : > { %v4979_v22 = vadd.f32 %v3837_v24, %v1480_v32  ;;  %v1478_v59 = vadd.f32 %v1399_v44, %v4884_v10  ;;  %v3838_v43 = vpop.f32.mrf.mxu0 }
 0x177   : > { %v3790_v13 = vpop.f32.mrf.mxu1 }
 0x178   : > { %v4982_v5 = vadd.f32 %v1705_v20, %v1478_v59  ;;  %v1481_v4 = vadd.f32 %v3790_v13, %v4887_v19  ;;  %v1708_v23 = vpop.f32.mrf.mxu0 }
 0x179   : > { %v1402_v46 = vpop.f32.mrf.mxu1 }
 0x17a   : > { %v4985_v42 = vadd.f32 %v3838_v43, %v1481_v4  ;;  %v1479_v63 = vadd.f32 %v1402_v46, %v4890_v28  ;;  %v3841_v39 = vpop.f32.mrf.mxu0 }
 0x17b   : > { %v3793_v35 = vpop.f32.mrf.mxu1 }
 0x17c   : > { %5323 = vst [vmem:[#allocation3_spill] sm:$0xff] %v4985_v42  ;;  %v4988_v57 = vadd.f32 %v1708_v23, %v1479_v63  ;;  %v1484_v1 = vadd.f32 %v3793_v35, %v4893_v9  ;;  %v1721_v7 = vpop.f32.mrf.mxu0 }
 0x17d   : > { %v1415_v10 = vpop.f32.mrf.mxu1 }
 0x17e   : > { %5324 = vst [vmem:[#allocation4_spill] sm:$0xff] %v4988_v57  ;;  %v4991_v50 = vadd.f32 %v3841_v39, %v1484_v1  ;;  %v1482_v62 = vadd.f32 %v1415_v10, %v4896_v45  ;;  %v3842_v2 = vpop.f32.mrf.mxu0 }
 0x17f   : > { %v3794_v19 = vpop.f32.mrf.mxu1 }
 0x180   : > { %5325 = vst [vmem:[#allocation5_spill] sm:$0xff] %v4991_v50  ;;  %v4994_v18 = vadd.f32 %v1721_v7, %v1482_v62  ;;  %v1485_v12 = vadd.f32 %v3794_v19, %v4899_v8  ;;  %v1724_v49 = vpop.f32.mrf.mxu0 }
 0x181   : > { %v1418_v28 = vpop.f32.mrf.mxu1 }
 0x182   : > { %5326 = vst [vmem:[#allocation6_spill] sm:$0xff] %v4994_v18  ;;  %v4997_v53 = vadd.f32 %v3842_v2, %v1485_v12  ;;  %v1483_v25 = vadd.f32 %v1418_v28, %v4903_v14  ;;  %v3845_v26 = vpop.f32.mrf.mxu0 }
 0x183   : > { %v3797_v9 = vpop.f32.mrf.mxu1 }
 0x184   : > { %5327 = vst [vmem:[#allocation7_spill] sm:$0xff] %v4997_v53  ;;  %v5000_v58 = vadd.f32 %v1724_v49, %v1483_v25  ;;  %v1488_v40 = vadd.f32 %v3797_v9, %v4907_v61  ;;  %v1737_v21 = vpop.f32.mrf.mxu0 }
 0x185   : > { %v1431_v45 = vpop.f32.mrf.mxu1 }
 0x186   : > { %5328 = vst [vmem:[#allocation8_spill] sm:$0xff] %v5000_v58  ;;  %v5003_v48 = vadd.f32 %v3845_v26, %v1488_v40  ;;  %v1486_v24 = vadd.f32 %v1431_v45, %v4910_v29  ;;  %v3846_v41 = vpop.f32.mrf.mxu0 }
 0x187   : > { %v3798_v8 = vpop.f32.mrf.mxu1 }
 0x188   : > { %5329 = vst [vmem:[#allocation9_spill] sm:$0xff] %v5003_v48  ;;  %v5006_v32 = vadd.f32 %v1737_v21, %v1486_v24  ;;  %v1489_v20 = vadd.f32 %v3798_v8, %v4913_v54  ;;  %v1740_v44 = vpop.f32.mrf.mxu0 }
 0x189   : > { %v1434_v14 = vpop.f32.mrf.mxu1 }
 0x18a   : > { %5330 = vst [vmem:[#allocation10_spill] sm:$0xff] %v5006_v32  ;;  %v5009_v59 = vadd.f32 %v3846_v41, %v1489_v20  ;;  %v1487_v43 = vadd.f32 %v1434_v14, %v4916_v11  ;;  %v3849_v13 = vpop.f32.mrf.mxu0 }
 0x18b   : > { %v3801_v61 = vpop.f32.mrf.mxu1 }
 0x18c   : > { %5331 = vst [vmem:[#allocation11_spill] sm:$0xff] %v5009_v59  ;;  %v5012_v4 = vadd.f32 %v1740_v44, %v1487_v43  ;;  %v1492_v23 = vadd.f32 %v3801_v61, %v4919_v47  ;;  %v1753_v46 = vpop.f32.mrf.mxu0 }
 0x18d   : > { %v1447_v29 = vpop.f32.mrf.mxu1 }
 0x18e   : > { %5332 = vst [vmem:[#allocation12_spill] sm:$0xff] %v5012_v4  ;;  %v5015_v63 = vadd.f32 %v3849_v13, %v1492_v23  ;;  %v1490_v39 = vadd.f32 %v1447_v29, %v4922_v34  ;;  %v3850_v35 = vpop.f32.mrf.mxu0 }
 0x18f   : > { %v3802_v54 = vpop.f32.mrf.mxu1 }
 0x190   : > { %5333 = vst [vmem:[#allocation13_spill] sm:$0xff] %v5015_v63  ;;  %v5018_v1 = vadd.f32 %v1753_v46, %v1490_v39  ;;  %v1493_v7 = vadd.f32 %v3802_v54, %v4925_v6  ;;  %v1756_v10 = vpop.f32.mrf.mxu0 }
 0x191   : > { %v1450_v11 = vpop.f32.mrf.mxu1 }
 0x192   : > { %5334 = vst [vmem:[#allocation14_spill] sm:$0xff] %v5018_v1  ;;  %v5021_v62 = vadd.f32 %v3850_v35, %v1493_v7  ;;  %v1491_v2 = vadd.f32 %v1450_v11, %v4928_v37  ;;  %v5024_v19 = vpop.f32.mrf.mxu0 }
 0x193   : > { %v3869_v47 = vpop.f32.mrf.mxu1 }
 0x194   : > { %5335 = vst [vmem:[#allocation15_spill] sm:$0xff] %v5021_v62  ;;  %v5026_v12 = vadd.f32 %v1756_v10, %v1491_v2  ;;  %v5028_v49 = vpop.f32.mrf.mxu0 }
 0x195   : > { %v1947_v34 = vpop.f32.mrf.mxu1 }
 0x196   : > { %5336 = vst [vmem:[#allocation16_spill] sm:$0xff] %v5026_v12  ;;  %v5030_v28 = vpop.f32.mrf.mxu0 }
 0x197   : > { %v3870_v25 = vpop.f32.mrf.mxu1 }
 0x198   : > { %v5032_v26 = vpop.f32.mrf.mxu0 }
 0x199   : > { %v5034_v6 = vpop.f32.mrf.mxu1 }
 0x19a   : > { %v5036_v9 = vpop.f32.mrf.mxu0 }
 0x19b   : > { %v5038_v40 = vpop.f32.mrf.mxu1 }
 0x19c   : > { %v5040_v37 = vpop.f32.mrf.mxu0 }
 0x19d   : > { %v5042_v21 = vpop.f32.mrf.mxu1 }
 0x19e   : > { %v5044_v45 = vpop.f32.mrf.mxu0 }
 0x19f   : > { %v5046_v24 = vpop.f32.mrf.mxu1 }
 0x1a0   : > { %v5048_v41 = vpop.f32.mrf.mxu0 }
 0x1a1   : > { %v5050_v8 = vpop.f32.mrf.mxu1 }
 0x1a2   : > { %v5052_v20 = vpop.f32.mrf.mxu0 }
 0x1a3   : > { %v5054_v44 = vpop.f32.mrf.mxu1 }
 0x1a4   : > { %v5056_v14 = vpop.f32.mrf.mxu0 }
 0x1a5   : > { %v5058_v43 = vpop.f32.mrf.mxu1 }
 0x1a6   : > { %v5060_v13 = vpop.f32.mrf.mxu0 }
 0x1a7   : > { %v5062_v61 = vpop.f32.mrf.mxu1 }
 0x1a8   : > { %v5064_v23 = vpop.f32.mrf.mxu0 }
 0x1a9   : > { %v5066_v46 = vpop.f32.mrf.mxu1 }
 0x1aa   : > { %v5068_v29 = vpop.f32.mrf.mxu0 }
 0x1ab   : > { %v5070_v39 = vpop.f32.mrf.mxu1 }
 0x1ac   : > { %v5072_v35 = vpop.f32.mrf.mxu0 }
 0x1ad   : > { %v5074_v54 = vpop.f32.mrf.mxu1 }
 0x1ae   : > { %v5076_v7 = vpop.f32.mrf.mxu0 }
 0x1af   : > { %v5078_v10 = vpop.f32.mrf.mxu1 }
 0x1b0   : > { %v5080_v11 = vpop.f32.mrf.mxu0 }
 0x1b1   : > { %v5082_v2 = vpop.f32.mrf.mxu1 }
 0x1b2   : > { %v5084_v12 = vpop.f32.mrf.mxu0 }
 0x1b3   : > { %v5086_v62 = vpop.f32.mrf.mxu1 }
 0x1b4   : > { %v5088_v1 = vpop.f32.mrf.mxu0 }
 0x1b5   : > { %5337 = vst [vmem:[#allocation17_spill] sm:$0xff] %v5088_v1  ;;  %v5090_v63 = vpop.f32.mrf.mxu1 }
 0x1b6   : > { %v5092_v4 = vpop.f32.mrf.mxu0 }
 0x1b7   : > { %5338 = vst [vmem:[#allocation18_spill] sm:$0xff] %v5092_v4  ;;  %v5094_v59 = vpop.f32.mrf.mxu1 }
 0x1b8   : > { %5339 = vst [vmem:[#allocation19_spill] sm:$0xff] %v5094_v59  ;;  %v5096_v32 = vpop.f32.mrf.mxu0 }
 0x1b9   : > { %5340 = vst [vmem:[#allocation20_spill] sm:$0xff] %v5096_v32  ;;  %v5098_v48 = vpop.f32.mrf.mxu1 }
 0x1ba   : > { %5341 = vst [vmem:[#allocation21_spill] sm:$0xff] %v5098_v48  ;;  %v5100_v58 = vpop.f32.mrf.mxu0 }
 0x1bb   : > { %5342 = vst [vmem:[#allocation22_spill] sm:$0xff] %v5100_v58  ;;  %v5102_v53 = vpop.f32.mrf.mxu1 }
 0x1bc   : > { %5343 = vst [vmem:[#allocation23_spill] sm:$0xff] %v5102_v53  ;;  %v5104_v18 = vpop.f32.mrf.mxu0 }
 0x1bd   : > { %5344 = vst [vmem:[#allocation24_spill] sm:$0xff] %v5104_v18  ;;  %v5106_v50 = vpop.f32.mrf.mxu1 }
 0x1be   : > { %5345 = vst [vmem:[#allocation25_spill] sm:$0xff] %v5106_v50  ;;  %v5108_v57 = vpop.f32.mrf.mxu0 }
 0x1bf   : > { %5346 = vst [vmem:[#allocation26_spill] sm:$0xff] %v5108_v57  ;;  %v5110_v1 = vpop.f32.mrf.mxu1 }
 0x1c0   : > { %5347 = vst [vmem:[#allocation27_spill] sm:$0xff] %v5110_v1  ;;  %v5112_v42 = vpop.f32.mrf.mxu0 }
 0x1c1   : > { %5348 = vst [vmem:[#allocation28_spill] sm:$0xff] %v5112_v42  ;;  %v5114_v4 = vpop.f32.mrf.mxu1 }
 0x1c2   : > { %5349 = vst [vmem:[#allocation29_spill] sm:$0xff] %v5114_v4  ;;  %v5116_v59 = vpop.f32.mrf.mxu0 }
 0x1c3   : > { %5350 = vst [vmem:[#allocation30_spill] sm:$0xff] %v5116_v59  ;;  %v5118_v32 = vpop.f32.mrf.mxu1 }
 0x1c4   : > { %5351 = vst [vmem:[#allocation31_spill] sm:$0xff] %v5118_v32  ;;  %v5120_v48 = vpop.f32.mrf.mxu0 }
 0x1c5   : > { %5352 = vst [vmem:[#allocation32_spill] sm:$0xff] %v5120_v48  ;;  %v5122_v58 = vpop.f32.mrf.mxu1  ;;  %v2076_v48 = vadd.f32 %v3869_v47, %v4931_v56  ;;  %v2075_v56 = vadd.f32 %v5034_v6, %v4940_v31  ;;  %v2078_v31 = vadd.f32 %v5042_v21, %v4946_v33 }
 0x1c6   : > { %5353 = vst [vmem:[#allocation33_spill] sm:$0xff] %v5122_v58  ;;  %v5124_v53 = vpop.f32.mrf.mxu0 }
 0x1c7   : > { %5354 = vst [vmem:[#allocation34_spill] sm:$0xff] %v5124_v53  ;;  %v5126_v18 = vpop.f32.mrf.mxu1  ;;  %v2074_v53 = vadd.f32 %v1947_v34, %v4934_v15  ;;  %v2080_v15 = vadd.f32 %v5038_v40, %v4943_v0  ;;  %v5160_v34 = vld [vmem:[%s5321_s2] ss:$0 sm:$0xff]  ;;  %v2385_v21 = vadd.f32 %v5040_v37, %v2078_v31 }
 0x1c8   : > { %5355 = vst [vmem:[#allocation35_spill] sm:$0xff] %v5126_v18  ;;  %v5128_v50 = vpop.f32.mrf.mxu0 }
 0x1c9   : > { %5356 = vst [vmem:[#allocation36_spill] sm:$0xff] %v5128_v50  ;;  %v5130_v57 = vpop.f32.mrf.mxu1 }
 0x1ca   : > { %5357 = vst [vmem:[#allocation37_spill] sm:$0xff] %v5130_v57  ;;  %v5132_v1 = vpop.f32.mrf.mxu0 }
 0x1cb   : > { %5358 = vst [vmem:[#allocation38_spill] sm:$0xff] %v5132_v1  ;;  %v5134_v42 = vpop.f32.mrf.mxu1  ;;  %v2383_v1 = vadd.f32 %v5024_v19, %v2076_v48 }
 0x1cc   : > { %5359 = vst [vmem:[#allocation39_spill] sm:$0xff] %v5134_v42  ;;  %v5136_v4 = vpop.f32.mrf.mxu0  ;;  %v2077_v42 = vadd.f32 %v3870_v25, %v4937_v60 }
 0x1cd   : > { %5360 = vst [vmem:[#allocation40_spill] sm:$0xff] %v5136_v4  ;;  %v5138_v59 = vpop.f32.mrf.mxu1 }
 0x1ce   : > { %5361 = vst [vmem:[#allocation41_spill] sm:$0xff] %v5138_v59  ;;  %v5141_v32 = vpop.f32.mrf.mxu0  ;;  %v2381_v59 = vadd.f32 %v5028_v49, %v2074_v53  ;;  %v2384_v60 = vadd.f32 %v5030_v28, %v2077_v42  ;;  %v2081_v42 = vadd.f32 %v5046_v24, %v4949_v27 }
 0x1cf   : > { %5362 = vst [vmem:[#allocation42_spill] sm:$0xff] %v5141_v32  ;;  %v5143_v58 = vpop.f32.mrf.mxu1 }
 0x1d0   : > { %v5146_v50 = vpop.f32.mrf.mxu0 }
 0x1d1   : > { %5363 = vst [vmem:[#allocation43_spill] sm:$0xff] %v5146_v50  ;;  %v5148_v57 = vpop.f32.mrf.mxu1  ;;  %v2387_v50 = vadd.f32 %v5036_v9, %v2080_v15  ;;  %v2079_v9 = vadd.f32 %v5050_v8, %v4952_v52 }
 0x1d2   : > { %v4013_v4 = vpop.f32.mrf.mxu0 }
 0x1d3   : > { %v3965_v18 = vpop.f32.mrf.mxu1 }
 0x1d4   : > { %v2689_v47 = vadd.f32 %v3965_v18, %v2383_v1  ;;  %v2866_v32 = vpop.f32.mrf.mxu0  ;;  %v2382_v1 = vadd.f32 %v5032_v26, %v2075_v56 }
 0x1d5   : > { %v2560_v48 = vpop.f32.mrf.mxu1 }
 0x1d6   : > { %v2995_v19 = vadd.f32 %v4013_v4, %v2689_v47  ;;  %v2687_v25 = vadd.f32 %v2560_v48, %v2381_v59  ;;  %v4014_v53 = vpop.f32.mrf.mxu0 }
 0x1d7   : > { %v3966_v18 = vpop.f32.mrf.mxu1 }
 0x1d8   : > { %v3034_v0 = vadd.f32 %v5160_v34, %v2995_v19  ;;  %v2993_v49 = vadd.f32 %v2866_v32, %v2687_v25  ;;  %v2690_v6 = vadd.f32 %v3966_v18, %v2384_v60  ;;  %v2869_v40 = vpop.f32.mrf.mxu0  ;;  %v2388_v60 = vadd.f32 %v5044_v45, %v2081_v42 }
 0x1d9   : > { %v2563_v33 = vpop.f32.mrf.mxu1  ;;  %v2084_v19 = vadd.f32 %v5054_v44, %v4955_v36  ;;  %v2386_v18 = vadd.f32 %v5048_v41, %v2079_v9 }
 0x1da   : > { %v3066_v59 = vmax.f32 %v3034_v0, 0.0  ;;  %v3032_v4 = vadd.f32 %v5160_v34, %v2993_v49  ;;  %v2996_v28 = vadd.f32 %v4014_v53, %v2690_v6  ;;  %v2688_v32 = vadd.f32 %v2563_v33, %v2382_v1  ;;  %v4017_v26 = vpop.f32.mrf.mxu0 }
 0x1db   : > { %v3969_v27 = vpop.f32.mrf.mxu1  ;;  %v2391_v6 = vadd.f32 %v5052_v20, %v2084_v19 }
 0x1dc   : > { %3098 = vst [vmem:[%s5174_s19 + $0x10] sm:$0xff] %v3066_v59  ;;  %v3064_v24 = vmax.f32 %v3032_v4, 0.0  ;;  %v3035_v56 = vadd.f32 %v5160_v34, %v2996_v28  ;;  %v2994_v47 = vadd.f32 %v2869_v40, %v2688_v32  ;;  %v2693_v15 = vadd.f32 %v3969_v27, %v2387_v50  ;;  %v2882_v48 = vpop.f32.mrf.mxu0 }
 0x1dd   : > { %v2576_v25 = vpop.f32.mrf.mxu1  ;;  %v2082_v50 = vadd.f32 %v5058_v43, %v4958_v51  ;;  %v2085_v40 = vadd.f32 %v5062_v61, %v4961_v38  ;;  %v2083_v28 = vadd.f32 %v5066_v46, %v4964_v16  ;;  %v2088_v27 = vadd.f32 %v5070_v39, %v4967_v30 }
 0x1de   : > { %3096 = vst [vmem:[%s5174_s19] sm:$0xff] %v3064_v24  ;;  %v3067_v37 = vmax.f32 %v3035_v56, 0.0  ;;  %v3033_v53 = vadd.f32 %v5160_v34, %v2994_v47  ;;  %v2999_v52 = vadd.f32 %v4017_v26, %v2693_v15  ;;  %v2691_v8 = vadd.f32 %v2576_v25, %v2385_v21  ;;  %v4018_v31 = vpop.f32.mrf.mxu0 }
 0x1df   : > { %v3970_v1 = vpop.f32.mrf.mxu1  ;;  %v2389_v4 = vadd.f32 %v5056_v14, %v2082_v50  ;;  %v2392_v9 = vadd.f32 %v5060_v13, %v2085_v40  ;;  %v2390_v15 = vadd.f32 %v5064_v23, %v2083_v28  ;;  %v2087_v50 = vadd.f32 %v5082_v2, %v4976_v17  ;;  %v5365_v28 = vld [vmem:[#allocation19_spill] sm:$0xff] }
 0x1e0   : > { %3099 = vst [vmem:[%s5174_s19 + $0x18] sm:$0xff] %v3067_v37  ;;  %v3065_v45 = vmax.f32 %v3033_v53, 0.0  ;;  %v3038_v0 = vadd.f32 %v5160_v34, %v2999_v52  ;;  %v2997_v36 = vadd.f32 %v2882_v48, %v2691_v8  ;;  %v2694_v44 = vadd.f32 %v3970_v1, %v2388_v60  ;;  %v2885_v49 = vpop.f32.mrf.mxu0 }
 0x1e1   : > { %v2579_v42 = vpop.f32.mrf.mxu1  ;;  %v2086_v48 = vadd.f32 %v5074_v54, %v4970_v55  ;;  %v2395_v37 = vadd.f32 %v5068_v29, %v2088_v27  ;;  %v2089_v53 = vadd.f32 %v5078_v10, %v4973_v3  ;;  %v5368_v27 = vld [vmem:[#allocation21_spill] sm:$0xff] }
 0x1e2   : > { %3097 = vst [vmem:[%s5174_s19 + $0x8] sm:$0xff] %v3065_v45  ;;  %v3070_v41 = vmax.f32 %v3038_v0, 0.0  ;;  %v3036_v33 = vadd.f32 %v5160_v34, %v2997_v36  ;;  %v3000_v51 = vadd.f32 %v4018_v31, %v2694_v44  ;;  %v2692_v43 = vadd.f32 %v2579_v42, %v2386_v18  ;;  %v4021_v59 = vpop.f32.mrf.mxu0 }
 0x1e3   : > { %v3973_v32 = vpop.f32.mrf.mxu1  ;;  %v2393_v18 = vadd.f32 %v5072_v35, %v2086_v48  ;;  %v2396_v36 = vadd.f32 %v5076_v7, %v2089_v53  ;;  %v2092_v44 = vadd.f32 %v5086_v62, %v4979_v22  ;;  %v2394_v42 = vadd.f32 %v5080_v11, %v2087_v50 }
 0x1e4   : > { %3102 = vst [vmem:[%s5174_s19 + $0x30] sm:$0xff] %v3070_v41  ;;  %v3068_v20 = vmax.f32 %v3036_v33, 0.0  ;;  %v3039_v26 = vadd.f32 %v5160_v34, %v3000_v51  ;;  %v2998_v38 = vadd.f32 %v2885_v49, %v2692_v43  ;;  %v2697_v61 = vadd.f32 %v3973_v32, %v2391_v6  ;;  %v2898_v21 = vpop.f32.mrf.mxu0 }
 0x1e5   : > { %v2592_v24 = vpop.f32.mrf.mxu1  ;;  %v2090_v41 = vadd.f32 %v5090_v63, %v4982_v5 }
 0x1e6   : > { %3100 = vst [vmem:[%s5174_s19 + $0x20] sm:$0xff] %v3068_v20  ;;  %v3071_v14 = vmax.f32 %v3039_v26, 0.0  ;;  %v3037_v56 = vadd.f32 %v5160_v34, %v2998_v38  ;;  %v3003_v16 = vadd.f32 %v4021_v59, %v2697_v61  ;;  %v2695_v46 = vadd.f32 %v2592_v24, %v2389_v4  ;;  %v4022_v47 = vpop.f32.mrf.mxu0  ;;  %v5364_v4 = vld [vmem:[#allocation3_spill] sm:$0xff]  ;;  %v5366_v61 = vld [vmem:[#allocation17_spill] sm:$0xff] }
 0x1e7   : > { %v3974_v60 = vpop.f32.mrf.mxu1  ;;  %v2399_v59 = vadd.f32 %v5084_v12, %v2092_v44  ;;  %v2093_v32 = vadd.f32 %v5365_v28, %v5364_v4  ;;  %v5377_v44 = vld [vmem:[#allocation27_spill] sm:$0xff] }
 0x1e8   : > { %3103 = vst [vmem:[%s5174_s19 + $0x38] sm:$0xff] %v3071_v14  ;;  %v3069_v13 = vmax.f32 %v3037_v56, 0.0  ;;  %v3042_v19 = vadd.f32 %v5160_v34, %v3003_v16  ;;  %v3001_v30 = vadd.f32 %v2898_v21, %v2695_v46  ;;  %v2698_v39 = vadd.f32 %v3974_v60, %v2392_v9  ;;  %v2901_v25 = vpop.f32.mrf.mxu0  ;;  %v5367_v9 = vld [vmem:[#allocation4_spill] sm:$0xff]  ;;  %v5370_v60 = vld [vmem:[#allocation5_spill] sm:$0xff] }
 0x1e9   : > { %v2595_v52 = vpop.f32.mrf.mxu1  ;;  %v2397_v21 = vadd.f32 %v5366_v61, %v2090_v41  ;;  %v2091_v24 = vadd.f32 %v5368_v27, %v5367_v9  ;;  %v5378_v41 = vld [vmem:[#allocation24_spill] sm:$0xff] }
 0x1ea   : > { %3101 = vst [vmem:[%s5174_s19 + $0x28] sm:$0xff] %v3069_v13  ;;  %v3074_v23 = vmax.f32 %v3042_v19, 0.0  ;;  %v3040_v8 = vadd.f32 %v5160_v34, %v3001_v30  ;;  %v3004_v55 = vadd.f32 %v4022_v47, %v2698_v39  ;;  %v2696_v54 = vadd.f32 %v2595_v52, %v2390_v15  ;;  %v4025_v31 = vpop.f32.mrf.mxu0  ;;  %v5369_v15 = vld [vmem:[#allocation18_spill] sm:$0xff]  ;;  %v5371_v13 = vld [vmem:[#allocation23_spill] sm:$0xff] }
 0x1eb   : > { %v3977_v1 = vpop.f32.mrf.mxu1  ;;  %v2400_v48 = vadd.f32 %v5369_v15, %v2093_v32  ;;  %v2096_v19 = vadd.f32 %v5371_v13, %v5370_v60 }
 0x1ec   : > { %3106 = vst [vmem:[%s5174_s19 + $0x50] sm:$0xff] %v3074_v23  ;;  %v3072_v29 = vmax.f32 %v3040_v8, 0.0  ;;  %v3043_v45 = vadd.f32 %v5160_v34, %v3004_v55  ;;  %v3002_v3 = vadd.f32 %v2901_v25, %v2696_v54  ;;  %v2701_v10 = vadd.f32 %v3977_v1, %v2395_v37  ;;  %v2914_v0 = vpop.f32.mrf.mxu0  ;;  %v5372_v23 = vld [vmem:[#allocation20_spill] sm:$0xff]  ;;  %v5373_v55 = vld [vmem:[#allocation6_spill] sm:$0xff]  ;;  %v5374_v54 = vld [vmem:[#allocation25_spill] sm:$0xff] }
 0x1ed   : > { %v2608_v49 = vpop.f32.mrf.mxu1  ;;  %v2398_v8 = vadd.f32 %v5372_v23, %v2091_v24 }
 0x1ee   : > { %3104 = vst [vmem:[%s5174_s19 + $0x40] sm:$0xff] %v3072_v29  ;;  %v3075_v35 = vmax.f32 %v3043_v45, 0.0  ;;  %v3041_v6 = vadd.f32 %v5160_v34, %v3002_v3  ;;  %v3007_v17 = vadd.f32 %v4025_v31, %v2701_v10  ;;  %v2699_v2 = vadd.f32 %v2608_v49, %v2393_v18  ;;  %v4026_v40 = vpop.f32.mrf.mxu0  ;;  %v5375_v10 = vld [vmem:[#allocation22_spill] sm:$0xff] }
 0x1ef   : > { %v3978_v33 = vpop.f32.mrf.mxu1  ;;  %v2094_v31 = vadd.f32 %v5374_v54, %v5373_v55 }
 0x1f0   : > { %3107 = vst [vmem:[%s5174_s19 + $0x58] sm:$0xff] %v3075_v35  ;;  %v3073_v7 = vmax.f32 %v3041_v6, 0.0  ;;  %v3046_v51 = vadd.f32 %v5160_v34, %v3007_v17  ;;  %v3005_v22 = vadd.f32 %v2914_v0, %v2699_v2  ;;  %v2702_v62 = vadd.f32 %v3978_v33, %v2396_v36  ;;  %v2917_v43 = vpop.f32.mrf.mxu0  ;;  %v5376_v36 = vld [vmem:[#allocation7_spill] sm:$0xff] }
 0x1f1   : > { %v2611_v20 = vpop.f32.mrf.mxu1  ;;  %v2403_v0 = vadd.f32 %v5375_v10, %v2096_v19  ;;  %v2097_v49 = vadd.f32 %v5377_v44, %v5376_v36  ;;  %v2401_v33 = vadd.f32 %v5378_v41, %v2094_v31 }
 0x1f2   : > { %3105 = vst [vmem:[%s5174_s19 + $0x48] sm:$0xff] %v3073_v7  ;;  %v3078_v11 = vmax.f32 %v3046_v51, 0.0  ;;  %v3044_v26 = vadd.f32 %v5160_v34, %v3005_v22  ;;  %v3008_v5 = vadd.f32 %v4026_v40, %v2702_v62  ;;  %v2700_v63 = vadd.f32 %v2611_v20, %v2394_v42  ;;  %v4029_v38 = vpop.f32.mrf.mxu0  ;;  %v5379_v7 = vld [vmem:[#allocation8_spill] sm:$0xff]  ;;  %v5380_v51 = vld [vmem:[#allocation29_spill] sm:$0xff]  ;;  %v5381_v20 = vld [vmem:[#allocation26_spill] sm:$0xff] }
 0x1f3   : > { %v3981_v14 = vpop.f32.mrf.mxu1  ;;  %v2095_v22 = vadd.f32 %v5380_v51, %v5379_v7 }
 0x1f4   : > { %3110 = vst [vmem:[%s5174_s19 + $0x70] sm:$0xff] %v3078_v11  ;;  %v3076_v12 = vmax.f32 %v3044_v26, 0.0  ;;  %v3047_v56 = vadd.f32 %v5160_v34, %v3008_v5  ;;  %v3006_v16 = vadd.f32 %v2917_v43, %v2700_v63  ;;  %v2705_v46 = vadd.f32 %v3981_v14, %v2399_v59  ;;  %v2930_v47 = vpop.f32.mrf.mxu0  ;;  %v5382_v26 = vld [vmem:[#allocation9_spill] sm:$0xff]  ;;  %v5383_v5 = vld [vmem:[#allocation31_spill] sm:$0xff]  ;;  %v5384_v14 = vld [vmem:[#allocation28_spill] sm:$0xff] }
 0x1f5   : > { %v2624_v30 = vpop.f32.mrf.mxu1  ;;  %v2404_v11 = vadd.f32 %v5381_v20, %v2097_v49  ;;  %v2100_v63 = vadd.f32 %v5383_v5, %v5382_v26 }
 0x1f6   : > { %3108 = vst [vmem:[%s5174_s19 + $0x60] sm:$0xff] %v3076_v12  ;;  %v3079_v39 = vmax.f32 %v3047_v56, 0.0  ;;  %v3045_v25 = vadd.f32 %v5160_v34, %v3006_v16  ;;  %v3011_v37 = vadd.f32 %v4029_v38, %v2705_v46  ;;  %v2703_v53 = vadd.f32 %v2624_v30, %v2397_v21  ;;  %v4030_v52 = vpop.f32.mrf.mxu0  ;;  %v5385_v56 = vld [vmem:[#allocation10_spill] sm:$0xff]  ;;  %v5386_v16 = vld [vmem:[#allocation33_spill] sm:$0xff] }
 0x1f7   : > { %v3982_v18 = vpop.f32.mrf.mxu1  ;;  %v2402_v12 = vadd.f32 %v5384_v14, %v2095_v22  ;;  %v2098_v46 = vadd.f32 %v5386_v16, %v5385_v56  ;;  %v5387_v30 = vld [vmem:[#allocation30_spill] sm:$0xff] }
 0x1f8   : > { %3111 = vst [vmem:[%s5174_s19 + $0x78] sm:$0xff] %v3079_v39  ;;  %v3077_v50 = vmax.f32 %v3045_v25, 0.0  ;;  %v3050_v1 = vadd.f32 %v5160_v34, %v3011_v37  ;;  %v3009_v29 = vadd.f32 %v2930_v47, %v2703_v53  ;;  %v2706_v45 = vadd.f32 %v3982_v18, %v2400_v48  ;;  %v2933_v3 = vpop.f32.mrf.mxu0  ;;  %v5388_v25 = vld [vmem:[#allocation11_spill] sm:$0xff]  ;;  %v5390_v18 = vld [vmem:[#allocation32_spill] sm:$0xff] }
 0x1f9   : > { %v2627_v35 = vpop.f32.mrf.mxu1  ;;  %v2407_v39 = vadd.f32 %v5387_v30, %v2100_v63  ;;  %v5389_v37 = vld [vmem:[#allocation35_spill] sm:$0xff] }
 0x1fa   : > { %3109 = vst [vmem:[%s5174_s19 + $0x68] sm:$0xff] %v3077_v50  ;;  %v3082_v6 = vmax.f32 %v3050_v1, 0.0  ;;  %v3048_v17 = vadd.f32 %v5160_v34, %v3009_v29  ;;  %v3012_v2 = vadd.f32 %v4030_v52, %v2706_v45  ;;  %v2704_v40 = vadd.f32 %v2627_v35, %v2398_v8  ;;  %v4033_v42 = vpop.f32.mrf.mxu0  ;;  %v5391_v1 = vld [vmem:[#allocation12_spill] sm:$0xff]  ;;  %v5392_v29 = vld [vmem:[#allocation37_spill] sm:$0xff]  ;;  %v5393_v35 = vld [vmem:[#allocation34_spill] sm:$0xff] }
 0x1fb   : > { %v3985_v62 = vpop.f32.mrf.mxu1  ;;  %v2101_v53 = vadd.f32 %v5389_v37, %v5388_v25  ;;  %v2405_v50 = vadd.f32 %v5390_v18, %v2098_v46  ;;  %v2099_v45 = vadd.f32 %v5392_v29, %v5391_v1  ;;  %v5401_v46 = vld [vmem:[#allocation40_spill] sm:$0xff]  ;;  %v5403_v25 = vld [vmem:[#allocation42_spill] sm:$0xff] }
 0x1fc   : > { %3114 = vst [vmem:[%s5174_s19 + $0x90] sm:$0xff] %v3082_v6  ;;  %v3080_v43 = vmax.f32 %v3048_v17, 0.0  ;;  %v3051_v59 = vadd.f32 %v5160_v34, %v3012_v2  ;;  %v3010_v4 = vadd.f32 %v2933_v3, %v2704_v40  ;;  %v2709_v28 = vadd.f32 %v3985_v62, %v2403_v0  ;;  %v2946_v32 = vpop.f32.mrf.mxu0  ;;  %v5394_v17 = vld [vmem:[#allocation13_spill] sm:$0xff]  ;;  %v5395_v2 = vld [vmem:[#allocation39_spill] sm:$0xff]  ;;  %v5396_v62 = vld [vmem:[#allocation36_spill] sm:$0xff] }
 0x1fd   : > { %v2640_v38 = vpop.f32.mrf.mxu1  ;;  %v2408_v6 = vadd.f32 %v5393_v35, %v2101_v53  ;;  %v2104_v40 = vadd.f32 %v5395_v2, %v5394_v17 }
 0x1fe   : > { %3112 = vst [vmem:[%s5174_s19 + $0x80] sm:$0xff] %v3080_v43  ;;  %v3083_v61 = vmax.f32 %v3051_v59, 0.0  ;;  %v3049_v21 = vadd.f32 %v5160_v34, %v3010_v4  ;;  %v3015_v9 = vadd.f32 %v4033_v42, %v2709_v28  ;;  %v2707_v27 = vadd.f32 %v2640_v38, %v2401_v33  ;;  %v4034_v24 = vpop.f32.mrf.mxu0  ;;  %v5397_v59 = vld [vmem:[#allocation14_spill] sm:$0xff]  ;;  %v5398_v4 = vld [vmem:[#allocation41_spill] sm:$0xff] }
 0x1ff   : > { %v3986_v47 = vpop.f32.mrf.mxu1  ;;  %v2406_v43 = vadd.f32 %v5396_v62, %v2099_v45  ;;  %v2102_v28 = vadd.f32 %v5398_v4, %v5397_v59  ;;  %v5399_v38 = vld [vmem:[#allocation38_spill] sm:$0xff] }
 0x200   : > { %3115 = vst [vmem:[%s5174_s19 + $0x98] sm:$0xff] %v3083_v61  ;;  %v3081_v15 = vmax.f32 %v3049_v21, 0.0  ;;  %v3054_v48 = vadd.f32 %v5160_v34, %v3015_v9  ;;  %v3013_v60 = vadd.f32 %v2946_v32, %v2707_v27  ;;  %v2710_v13 = vadd.f32 %v3986_v47, %v2404_v11  ;;  %v2949_v19 = vpop.f32.mrf.mxu0  ;;  %v5400_v21 = vld [vmem:[#allocation15_spill] sm:$0xff] }
 0x201   : > { %v2643_v52 = vpop.f32.mrf.mxu1  ;;  %v2411_v61 = vadd.f32 %v5399_v38, %v2104_v40  ;;  %v2105_v9 = vadd.f32 %v5143_v58, %v5400_v21  ;;  %v2409_v47 = vadd.f32 %v5401_v46, %v2102_v28 }
 0x202   : > { %3113 = vst [vmem:[%s5174_s19 + $0x88] sm:$0xff] %v3081_v15  ;;  %v3086_v23 = vmax.f32 %v3054_v48, 0.0  ;;  %v3052_v8 = vadd.f32 %v5160_v34, %v3013_v60  ;;  %v3016_v55 = vadd.f32 %v4034_v24, %v2710_v13  ;;  %v2708_v54 = vadd.f32 %v2643_v52, %v2402_v12  ;;  %v4037_v31 = vpop.f32.mrf.mxu0  ;;  %v5402_v15 = vld [vmem:[#allocation16_spill] sm:$0xff] }
 0x203   : > { %v3989_v3 = vpop.f32.mrf.mxu1  ;;  %v2103_v48 = vadd.f32 %v5148_v57, %v5402_v15  ;;  %v2412_v37 = vadd.f32 %v5403_v25, %v2105_v9  ;;  %v5404_v57 = vld [vmem:[#allocation43_spill] sm:$0xff] }
 0x204   : > { %3118 = vst [vmem:[%s5174_s19 + $0xb0] sm:$0xff] %v3086_v23  ;;  %v3084_v10 = vmax.f32 %v3052_v8, 0.0  ;;  %v3055_v0 = vadd.f32 %v5160_v34, %v3016_v55  ;;  %v3014_v36 = vadd.f32 %v2949_v19, %v2708_v54  ;;  %v2713_v44 = vadd.f32 %v3989_v3, %v2407_v39  ;;  %v2962_v49 = vpop.f32.mrf.mxu0 }
 0x205   : > { %v2656_v42 = vpop.f32.mrf.mxu1  ;;  %v2410_v54 = vadd.f32 %v5404_v57, %v2103_v48 }
 0x206   : > { %3116 = vst [vmem:[%s5174_s19 + $0xa0] sm:$0xff] %v3084_v10  ;;  %v3087_v41 = vmax.f32 %v3055_v0, 0.0  ;;  %v3053_v33 = vadd.f32 %v5160_v34, %v3014_v36  ;;  %v3019_v7 = vadd.f32 %v4037_v31, %v2713_v44  ;;  %v2711_v51 = vadd.f32 %v2656_v42, %v2405_v50  ;;  %v4038_v22 = vpop.f32.mrf.mxu0 }
 0x207   : > { %v3990_v32 = vpop.f32.mrf.mxu1 }
 0x208   : > { %3119 = vst [vmem:[%s5174_s19 + $0xb8] sm:$0xff] %v3087_v41  ;;  %v3085_v20 = vmax.f32 %v3053_v33, 0.0  ;;  %v3058_v11 = vadd.f32 %v5160_v34, %v3019_v7  ;;  %v3017_v26 = vadd.f32 %v2962_v49, %v2711_v51  ;;  %v2714_v5 = vadd.f32 %v3990_v32, %v2408_v6  ;;  %v2965_v63 = vpop.f32.mrf.mxu0 }
 0x209   : > { %v2659_v27 = vpop.f32.mrf.mxu1 }
 0x20a   : > { %3117 = vst [vmem:[%s5174_s19 + $0xa8] sm:$0xff] %v3085_v20  ;;  %v3090_v24 = vmax.f32 %v3058_v11, 0.0  ;;  %v3056_v14 = vadd.f32 %v5160_v34, %v3017_v26  ;;  %v3020_v12 = vadd.f32 %v4038_v22, %v2714_v5  ;;  %v2712_v56 = vadd.f32 %v2659_v27, %v2406_v43  ;;  %v4041_v16 = vpop.f32.mrf.mxu0 }
 0x20b   : > { %v3993_v60 = vpop.f32.mrf.mxu1 }
 0x20c   : > { %3122 = vst [vmem:[%s5174_s19 + $0xd0] sm:$0xff] %v3090_v24  ;;  %v3088_v13 = vmax.f32 %v3056_v14, 0.0  ;;  %v3059_v58 = vadd.f32 %v5160_v34, %v3020_v12  ;;  %v3018_v19 = vadd.f32 %v2965_v63, %v2712_v56  ;;  %v2717_v30 = vadd.f32 %v3993_v60, %v2411_v61  ;;  %v2978_v39 = vpop.f32.mrf.mxu0 }
 0x20d   : > { %v2672_v53 = vpop.f32.mrf.mxu1 }
 0x20e   : > { %3120 = vst [vmem:[%s5174_s19 + $0xc0] sm:$0xff] %v3088_v13  ;;  %v3091_v52 = vmax.f32 %v3059_v58, 0.0  ;;  %v3057_v23 = vadd.f32 %v5160_v34, %v3018_v19  ;;  %v3023_v8 = vadd.f32 %v4041_v16, %v2717_v30  ;;  %v2715_v55 = vadd.f32 %v2672_v53, %v2409_v47  ;;  %v4042_v18 = vpop.f32.mrf.mxu0 }
 0x20f   : > { %v3994_v31 = vpop.f32.mrf.mxu1 }
 0x210   : > { %3123 = vst [vmem:[%s5174_s19 + $0xd8] sm:$0xff] %v3091_v52  ;;  %v3089_v50 = vmax.f32 %v3057_v23, 0.0  ;;  %v3062_v1 = vadd.f32 %v5160_v34, %v3023_v8  ;;  %v3021_v29 = vadd.f32 %v2978_v39, %v2715_v55  ;;  %v2718_v45 = vadd.f32 %v3994_v31, %v2412_v37  ;;  %v2981_v49 = vpop.f32.mrf.mxu0 }
 0x211   : > { %v2675_v3 = vpop.f32.mrf.mxu1 }
 0x212   : > { %3121 = vst [vmem:[%s5174_s19 + $0xc8] sm:$0xff] %v3089_v50  ;;  %v3094_v10 = vmax.f32 %v3062_v1, 0.0  ;;  %v3060_v0 = vadd.f32 %v5160_v34, %v3021_v29  ;;  %v3024_v36 = vadd.f32 %v4042_v18, %v2718_v45  ;;  %v2716_v44 = vadd.f32 %v2675_v3, %v2410_v54 }
 0x214   : > { %3126 = vst [vmem:[%s5174_s19 + $0xf0] sm:$0xff] %v3094_v10  ;;  %v3092_v35 = vmax.f32 %v3060_v0, 0.0  ;;  %v3063_v6 = vadd.f32 %v5160_v34, %v3024_v36  ;;  %v3022_v17 = vadd.f32 %v2981_v49, %v2716_v44 }
 0x216   : > { %3124 = vst [vmem:[%s5174_s19 + $0xe0] sm:$0xff] %v3092_v35  ;;  %v3095_v2 = vmax.f32 %v3063_v6, 0.0  ;;  %v3061_v40 = vadd.f32 %v5160_v34, %v3022_v17 }
 0x218   : > { %3127 = vst [vmem:[%s5174_s19 + $0xf8] sm:$0xff] %v3095_v2  ;;  %v3093_v42 = vmax.f32 %v3061_v40, 0.0 }
 0x21a   : > { %3125 = vst [vmem:[%s5174_s19 + $0xe8] sm:$0xff] %v3093_v42 }
 0x21b PF: > { %s13_s12 = sadd.s32 1, %s4146_s12  }
 0x21c   : > { %p10_p4 = scmp.ge.s32.totalorder %s13_s12, 4  }
 0x21e   :  { %12 = sbr.rel (!%p10_p4) target bundleno = 1 (0x1), region = 72 }

// kernel: hyper_analysis_forward.4
= control target key start
LH: loop header
LB: loop body
LE: loop exit
PB: predicated region body
PF: predicated region fallthrough
CT: control target
= control target key end

     0   :  { %s5925_s12 = smov 0   ;;  %s7343_s0 = inlined_call_operand.vmem [shape: f32[2,4,10,10,128], index: 0, kind: input, shape index: {}]   ;;  %s7344_s1 = inlined_call_operand.vmem [shape: bf16[25,128,128], index: 1, kind: input, shape index: {}]   ;;  %s7345_s2 = inlined_call_operand.vmem [shape: f32[1,128], index: 2, kind: input, shape index: {}]   ;;  %s7346_s3 = inlined_call_operand.vmem [shape: f32[2,64,128], index: 3, kind: output, shape index: {}]  }
   0x1 LB: > { %s4000_s13 = sadd.s32 4294967295, %s5903_s12   ;;  %p4004_p0 = scmp.ge.s32.totalorder %s5903_s12, 1  ;;  %s5903_s12 = sphi %s5925_s12, %s13_s12  }
   0x2   : > { %p137_p1 = scmp.lt.s32.totalorder %s5903_s12, 3 }
   0x4   : > { %p138_p2 = pnand %p4004_p0, %p137_p1 }
   0x6   : > { %141 = sbr.rel (%p138_p2) target bundleno = 635 (0x27b), region = 32 }
   0xb   : > { %v5697_v0 = vld [vmem:[%s7344_s1 + $0xb8] sm:$0xff]   ;;  %p161_p3 = scmp.lt.s32.totalorder %s4000_s13, 1  ;;  %v5699_v2 = vld [vmem:[%s7344_s1 + $0xb0] sm:$0xff]   ;;  %v5701_v4 = vld [vmem:[%s7344_s1 + $0xa8] sm:$0xff]  }
   0xc   : > { %v5698_v1 = vld [vmem:[%s7344_s1 + $0x38] sm:$0xff]   ;;  %5072 = vmatprep.subr.bf16.mxu0 %v5697_v0  ;;  %v5700_v3 = vld [vmem:[%s7344_s1 + $0x30] sm:$0xff]   ;;  %v5702_v5 = vld [vmem:[%s7344_s1 + $0x28] sm:$0xff]  }
   0xd   : > { %5096 = vmatprep.subr.bf16.mxu1 %v5698_v1  ;;  %5073 = vmatpush3.bf16.msra.mxu0 %v5697_v0  ;;  %s7384_s13 = smov (!%p161_p3, %s4000_s13), 1  ;;  %v5703_v6 = vld [vmem:[%s7344_s1 + $0xa0] sm:$0xff]   ;;  %v5705_v8 = vld [vmem:[%s7344_s1 + $0x98] sm:$0xff]   ;;  %v5707_v10 = vld [vmem:[%s7344_s1 + $0x90] sm:$0xff]  }
   0xe   : > { %5097 = vmatpush3.bf16.msra.mxu1 %v5698_v1  ;;  %5074 = vmatprep.subr.bf16.mxu0 %v5699_v2  ;;  %v5704_v7 = vld [vmem:[%s7344_s1 + $0x20] sm:$0xff]   ;;  %s5688_s30 = smul.u32 640, %s7384_s13  ;;  %v5706_v9 = vld [vmem:[%s7344_s1 + $0x18] sm:$0xff]   ;;  %v5708_v14 = vld [vmem:[%s7344_s1 + $0x10] sm:$0xff]   ;;  %s4771_s7 = sshll.u32 %s7384_s13, 6 }
   0xf   : > { %5098 = vmatprep.subr.bf16.mxu1 %v5700_v3  ;;  %v5709_v18 = vld [vmem:[%s7344_s1 + $0x88] sm:$0xff]   ;;  %v5711_v20 = vld [vmem:[%s7344_s1 + $0x80] sm:$0xff]   ;;  %v5713_v26 = vld [vmem:[%s7344_s1 + $0x138] sm:$0xff]   ;;  %s7329_s11 = scalar_lea.vmem %s7346_s3, %s4771_s7 }
  0x10   : > { %s5969_s10 = scalar_lea.vmem %s7343_s0, %s5688_s30  ;;  %v5710_v19 = vld [vmem:[%s7344_s1 + $0x8] sm:$0xff]   ;;  %v5712_v21 = vld [vmem:[%s7344_s1] sm:$0xff]   ;;  %v5714_v27 = vld [vmem:[%s7344_s1 + $0x2b8] sm:$0xff]  }
  0x11   : > { %5075 = vmatpush3.bf16.msra.mxu0 %v5699_v2  ;;  %v200_v11 = vld [vmem:[%s5969_s10 + $0x1] sm:$0xff]  ;;  %v5976_v12 = vld [vmem:[%s5969_s10 + $0x11] sm:$0xff] }
  0x12   : > { %5099 = vmatpush3.bf16.msra.mxu1 %v5700_v3  ;;  %5076 = vmatprep.subr.bf16.mxu0 %v5701_v4  ;;  %v172_v13 = vld [vmem:[%s5969_s10] sm:$0xff]  ;;  %v208_v15 = vpack.c.bf16 %v5976_v12, %v200_v11  ;;  %v5984_v16 = vld [vmem:[%s5969_s10 + $0x10] sm:$0xff]  ;;  %v5717_v38 = vld [vmem:[%s7344_s1 + $0x128] sm:$0xff]  }
  0x13   : > { %5100 = vmatprep.subr.bf16.mxu1 %v5702_v5  ;;  %v180_v17 = vpack.c.bf16 %v5984_v16, %v172_v13  ;;  %v6000_v22 = vld [vmem:[%s5969_s10 + $0x21] sm:$0xff]  ;;  %v6003_v23 = vld [vmem:[%s5969_s10 + $0x31] sm:$0xff] }
  0x14   : > { %5088 = vmatprep.mubr.bf16.mxu0 %v208_v15  ;;  %v174_v24 = vld [vmem:[%s5969_s10 + $0x20] sm:$0xff]  ;;  %v6007_v25 = vld [vmem:[%s5969_s10 + $0x30] sm:$0xff]  ;;  %v6017_v28 = vpack.c.bf16 %v6003_v23, %v6000_v22  ;;  %v5718_v43 = vld [vmem:[%s7344_s1 + $0x2a8] sm:$0xff]  }
  0x15   : > { %5077 = vmatpush3.bf16.msra.mxu0 %v5701_v4  ;;  %5112 = vmatprep.mubr.bf16.mxu1 %v180_v17  ;;  %v5715_v29 = vld [vmem:[%s7344_s1 + $0x130] sm:$0xff]   ;;  %v6023_v30 = vld [vmem:[%s5969_s10 + $0x41] sm:$0xff]  ;;  %v6032_v33 = vpack.c.bf16 %v6007_v25, %v174_v24  ;;  %v614_v51 = vpack.c.bf16 %v174_v24, %v5984_v16  ;;  %v5721_v52 = vld [vmem:[%s7344_s1 + $0x118] sm:$0xff]  }
  0x16   : > { %5101 = vmatpush3.bf16.msra.mxu1 %v5702_v5  ;;  %5078 = vmatprep.subr.bf16.mxu0 %v5703_v6  ;;  %v6026_v31 = vld [vmem:[%s5969_s10 + $0x51] sm:$0xff]  ;;  %v6029_v32 = vld [vmem:[%s5969_s10 + $0x40] sm:$0xff]  ;;  %v5725_v56 = vld [vmem:[%s7344_s1 + $0x108] sm:$0xff]  }
  0x17   : > { %5102 = vmatprep.subr.bf16.mxu1 %v5704_v7  ;;  %v6035_v34 = vld [vmem:[%s5969_s10 + $0x50] sm:$0xff]  ;;  %v6042_v36 = vpack.c.bf16 %v6026_v31, %v6023_v30  ;;  %v6045_v37 = vld [vmem:[%s5969_s10 + $0x61] sm:$0xff]  ;;  %v5722_v53 = vld [vmem:[%s7344_s1 + $0x298] sm:$0xff]   ;;  %v615_v3 = vpack.c.bf16 %v6029_v32, %v6007_v25 }
  0x18   : > { %v5716_v35 = vld [vmem:[%s7344_s1 + $0x2b0] sm:$0xff]   ;;  %v6053_v39 = vpack.c.bf16 %v6035_v34, %v6029_v32  ;;  %v6060_v41 = vld [vmem:[%s5969_s10 + $0x60] sm:$0xff]  ;;  %v5726_v57 = vld [vmem:[%s7344_s1 + $0x288] sm:$0xff]  }
  0x19   : > { %5079 = vmatpush3.bf16.msra.mxu0 %v5703_v6  ;;  %v6056_v40 = vld [vmem:[%s5969_s10 + $0x71] sm:$0xff]  ;;  %v455_v45 = vld [vmem:[%s5969_s10 + $0x2] sm:$0xff] }
  0x1a   : > { %5103 = vmatpush3.bf16.msra.mxu1 %v5704_v7  ;;  %5080 = vmatprep.subr.bf16.mxu0 %v5705_v8  ;;  %v6063_v42 = vld [vmem:[%s5969_s10 + $0x70] sm:$0xff]  ;;  %v6072_v44 = vpack.c.bf16 %v6056_v40, %v6045_v37  ;;  %v5719_v48 = vld [vmem:[%s7344_s1 + $0x120] sm:$0xff]   ;;  %v5729_v62 = vld [vmem:[%s7344_s1 + $0x338] sm:$0xff]  }
  0x1b   : > { %5104 = vmatprep.subr.bf16.mxu1 %v5706_v9  ;;  %v6076_v46 = vld [vmem:[%s5969_s10 + $0x12] sm:$0xff]  ;;  %v6080_v47 = vpack.c.bf16 %v6063_v42, %v6060_v41  ;;  %v5720_v49 = vld [vmem:[%s7344_s1 + $0x2a0] sm:$0xff]   ;;  %v5734_v13 = vld [vmem:[%s7344_s1 + $0x3a8] sm:$0xff]  }
  0x1c   : > { %v463_v50 = vpack.c.bf16 %v6076_v46, %v455_v45  ;;  %v5723_v54 = vld [vmem:[%s7344_s1 + $0x110] sm:$0xff]   ;;  %v5727_v58 = vld [vmem:[%s7344_s1 + $0x100] sm:$0xff]   ;;  %v5730_v63 = vld [vmem:[%s7344_s1 + $0x3b8] sm:$0xff]  }
  0x1d   : > { %5081 = vmatpush3.bf16.msra.mxu0 %v5705_v8  ;;  %v5724_v55 = vld [vmem:[%s7344_s1 + $0x290] sm:$0xff]   ;;  %v5728_v59 = vld [vmem:[%s7344_s1 + $0x280] sm:$0xff]   ;;  %v5741_v24 = vld [vmem:[%s7344_s1 + $0x308] sm:$0xff]  }
  0x1e   : > { %5105 = vmatpush3.bf16.msra.mxu1 %v5706_v9  ;;  %5082 = vmatprep.subr.bf16.mxu0 %v5707_v10  ;;  %v457_v60 = vld [vmem:[%s5969_s10 + $0x22] sm:$0xff]  ;;  %v6118_v61 = vld [vmem:[%s5969_s10 + $0x32] sm:$0xff]  ;;  %v616_v9 = vpack.c.bf16 %v6060_v41, %v6035_v34  ;;  %v765_v34 = vpack.c.bf16 %v6023_v30, %v6003_v23 }
  0x1f   : > { %5106 = vmatprep.subr.bf16.mxu1 %v5708_v14  ;;  %v6127_v0 = vpack.c.bf16 %v6118_v61, %v457_v60  ;;  %v6130_v1 = vld [vmem:[%s5969_s10 + $0x42] sm:$0xff]  ;;  %v6133_v2 = vld [vmem:[%s5969_s10 + $0x52] sm:$0xff] }
  0x20   : > { %v5731_v4 = vld [vmem:[%s7344_s1 + $0x330] sm:$0xff]   ;;  %v6145_v6 = vpack.c.bf16 %v6133_v2, %v6130_v1  ;;  %v6148_v7 = vld [vmem:[%s5969_s10 + $0x62] sm:$0xff]  ;;  %v5746_v32 = vld [vmem:[%s7344_s1 + $0x5b8] sm:$0xff]  }
  0x21   : > { %5083 = vmatpush3.bf16.msra.mxu0 %v5707_v10  ;;  %v5732_v5 = vld [vmem:[%s7344_s1 + $0x3b0] sm:$0xff]   ;;  %v5733_v10 = vld [vmem:[%s7344_s1 + $0x328] sm:$0xff]   ;;  %v6160_v11 = vld [vmem:[%s5969_s10 + $0x80] sm:$0xff]  ;;  %v916_v30 = vpack.c.bf16 %v6148_v7, %v6133_v2 }
  0x22   : > { %5107 = vmatpush3.bf16.msra.mxu1 %v5708_v14  ;;  %5084 = vmatprep.subr.bf16.mxu0 %v5709_v18  ;;  %v6152_v8 = vld [vmem:[%s5969_s10 + $0x72] sm:$0xff]  ;;  %v617_v15 = vpack.c.bf16 %v6160_v11, %v6063_v42  ;;  %v5735_v16 = vld [vmem:[%s7344_s1 + $0x320] sm:$0xff]   ;;  %v5742_v25 = vld [vmem:[%s7344_s1 + $0x388] sm:$0xff]   ;;  %v766_v42 = vpack.c.bf16 %v6045_v37, %v6026_v31 }
  0x23   : > { %5108 = vmatprep.subr.bf16.mxu1 %v5710_v19  ;;  %v6168_v14 = vpack.c.bf16 %v6152_v8, %v6148_v7  ;;  %v5736_v17 = vld [vmem:[%s7344_s1 + $0x3a0] sm:$0xff]   ;;  %v5748_v41 = vld [vmem:[%s7344_s1 + $0x5b0] sm:$0xff]   ;;  %v5750_v31 = vld [vmem:[%s7344_s1 + $0x5a8] sm:$0xff]  }
  0x24   : > { %v6225_v23 = vld [vmem:[%s5969_s10 + $0x81] sm:$0xff]  ;;  %v5772_v7 = vld [vmem:[%s7344_s1 + $0x50] sm:$0xff]  }
  0x25   : > { %5085 = vmatpush3.bf16.msra.mxu0 %v5709_v18  ;;  %v764_v18 = vpack.c.bf16 %v6000_v22, %v5976_v12  ;;  %v5739_v12 = vld [vmem:[%s7344_s1 + $0x310] sm:$0xff]   ;;  %v6233_v45 = vld [vmem:[%s5969_s10 + $0x82] sm:$0xff]  ;;  %v767_v37 = vpack.c.bf16 %v6225_v23, %v6056_v40  ;;  %v5753_v40 = vld [vmem:[%s7344_s1 + $0x518] sm:$0xff]  }
  0x26   : > { %5109 = vmatpush3.bf16.msra.mxu1 %v5710_v19  ;;  %5086 = vmatprep.subr.bf16.mxu0 %v5711_v20  ;;  %v914_v19 = vpack.c.bf16 %v457_v60, %v6076_v46  ;;  %v5740_v22 = vld [vmem:[%s7344_s1 + $0x390] sm:$0xff]   ;;  %v917_v46 = vpack.c.bf16 %v6233_v45, %v6152_v8  ;;  %v5765_v60 = vld [vmem:[%s7344_s1 + $0x628] sm:$0xff]   ;;  %v5768_v2 = vld [vmem:[%s7344_s1 + $0x60] sm:$0xff]  }
  0x27   : > { %5110 = vmatprep.subr.bf16.mxu1 %v5712_v21  ;;  %v5774_v8 = vld [vmem:[%s7344_s1 + $0x48] sm:$0xff]  }
  0x29   : > { %5087 = vmatpush3.bf16.msra.mxu0 %v5711_v20  ;;  %v5737_v20 = vld [vmem:[%s7344_s1 + $0x318] sm:$0xff]  }
  0x2a   : > { %5111 = vmatpush3.bf16.msra.mxu1 %v5712_v21  ;;  %5120 = vmatprep.subr.bf16.mxu0 %v5713_v26  ;;  %v5738_v21 = vld [vmem:[%s7344_s1 + $0x398] sm:$0xff]  }
  0x2b   : > { %5144 = vmatprep.subr.bf16.mxu1 %v5714_v27 }
  0x2c   : > { %5089 = vmatmul.mubr.bf16.vlgmr.msra.gmra.mxu0 %v6017_v28 }
  0x2d   : > { %5113 = vmatmul.mubr.bf16.vlgmr.msra.gmra.mxu1 %v6032_v33  ;;  %5121 = vmatpush3.bf16.msra.mxu0 %v5713_v26  ;;  %v5743_v26 = vld [vmem:[%s7344_s1 + $0x300] sm:$0xff]  }
  0x2e   : > { %5145 = vmatpush3.bf16.msra.mxu1 %v5714_v27  ;;  %5122 = vmatprep.subr.bf16.mxu0 %v5715_v29  ;;  %v5744_v27 = vld [vmem:[%s7344_s1 + $0x380] sm:$0xff]  }
  0x2f   : > { %5146 = vmatprep.subr.bf16.mxu1 %v5716_v35  ;;  %5092 = vmatprep.mubr.bf16.mxu0 %v6042_v36 }
  0x30   : > { %5116 = vmatprep.mubr.bf16.mxu1 %v6053_v39 }
  0x31   : > { %5123 = vmatpush3.bf16.msra.mxu0 %v5715_v29  ;;  %v5745_v29 = vld [vmem:[%s7344_s1 + $0x538] sm:$0xff]  }
  0x32   : > { %5147 = vmatpush3.bf16.msra.mxu1 %v5716_v35  ;;  %5124 = vmatprep.subr.bf16.mxu0 %v5717_v38  ;;  %v915_v35 = vpack.c.bf16 %v6130_v1, %v6118_v61  ;;  %v4199_v61 = vld [vmem:[%s5969_s10 + $0x91] sm:$0xff] }
  0x33   : > { %5148 = vmatprep.subr.bf16.mxu1 %v5718_v43  ;;  %v6302_v1 = vld [vmem:[%s5969_s10 + $0xb0] sm:$0xff] }
  0x34   : > { %5093 = vmatmul.mubr.bf16.gmra.mxu0 %v6072_v44 }
  0x35   : > { %5125 = vmatpush3.bf16.msra.mxu0 %v5717_v38  ;;  %5117 = vmatmul.mubr.bf16.gmra.mxu1 %v6080_v47  ;;  %v5747_v38 = vld [vmem:[%s7344_s1 + $0x530] sm:$0xff]  }
  0x36   : > { %5149 = vmatpush3.bf16.msra.mxu1 %v5718_v43  ;;  %5126 = vmatprep.subr.bf16.mxu0 %v5719_v48  ;;  %v5749_v43 = vld [vmem:[%s7344_s1 + $0x528] sm:$0xff]  }
  0x37   : > { %5150 = vmatprep.subr.bf16.mxu1 %v5720_v49  ;;  %5136 = vmatprep.mubr.bf16.mxu0 %v463_v50  ;;  %v5754_v50 = vld [vmem:[%s7344_s1 + $0x598] sm:$0xff]  }
  0x38   : > { %5160 = vmatprep.mubr.bf16.mxu1 %v614_v51  ;;  %v5755_v51 = vld [vmem:[%s7344_s1 + $0x510] sm:$0xff]  }
  0x39   : > { %5127 = vmatpush3.bf16.msra.mxu0 %v5719_v48  ;;  %v5751_v48 = vld [vmem:[%s7344_s1 + $0x520] sm:$0xff]  }
  0x3a   : > { %5151 = vmatpush3.bf16.msra.mxu1 %v5720_v49  ;;  %5128 = vmatprep.subr.bf16.mxu0 %v5721_v52  ;;  %v5752_v49 = vld [vmem:[%s7344_s1 + $0x5a0] sm:$0xff]  }
  0x3b   : > { %5152 = vmatprep.subr.bf16.mxu1 %v5722_v53 }
  0x3d   : > { %5129 = vmatpush3.bf16.msra.mxu0 %v5721_v52  ;;  %v5756_v52 = vld [vmem:[%s7344_s1 + $0x590] sm:$0xff]  }
  0x3e   : > { %5153 = vmatpush3.bf16.msra.mxu1 %v5722_v53  ;;  %5130 = vmatprep.subr.bf16.mxu0 %v5723_v54  ;;  %v5759_v53 = vld [vmem:[%s7344_s1 + $0x500] sm:$0xff]  }
  0x3f   : > { %5154 = vmatprep.subr.bf16.mxu1 %v5724_v55 }
  0x41   : > { %5131 = vmatpush3.bf16.msra.mxu0 %v5723_v54  ;;  %v5760_v54 = vld [vmem:[%s7344_s1 + $0x580] sm:$0xff]  }
  0x42   : > { %5155 = vmatpush3.bf16.msra.mxu1 %v5724_v55  ;;  %5132 = vmatprep.subr.bf16.mxu0 %v5725_v56  ;;  %v5761_v55 = vld [vmem:[%s7344_s1 + $0x638] sm:$0xff]  }
  0x43   : > { %5156 = vmatprep.subr.bf16.mxu1 %v5726_v57 }
  0x45   : > { %5133 = vmatpush3.bf16.msra.mxu0 %v5725_v56  ;;  %v5762_v56 = vld [vmem:[%s7344_s1 + $0x78] sm:$0xff]  }
  0x46   : > { %5157 = vmatpush3.bf16.msra.mxu1 %v5726_v57  ;;  %5134 = vmatprep.subr.bf16.mxu0 %v5727_v58  ;;  %v5763_v57 = vld [vmem:[%s7344_s1 + $0x630] sm:$0xff]  }
  0x47   : > { %5158 = vmatprep.subr.bf16.mxu1 %v5728_v59 }
  0x49   : > { %5135 = vmatpush3.bf16.msra.mxu0 %v5727_v58  ;;  %v5764_v58 = vld [vmem:[%s7344_s1 + $0x70] sm:$0xff]  }
  0x4a   : > { %5159 = vmatpush3.bf16.msra.mxu1 %v5728_v59  ;;  %5168 = vmatprep.subr.bf16.mxu0 %v5729_v62  ;;  %v4167_v59 = vld [vmem:[%s5969_s10 + $0x90] sm:$0xff] }
  0x4b   : > { %5192 = vmatprep.subr.bf16.mxu1 %v5730_v63 }
  0x4c   : > { %5137 = vmatmul.mubr.bf16.vlgmr.msra.gmra.mxu0 %v6127_v0 }
  0x4d   : > { %5161 = vmatmul.mubr.bf16.vlgmr.msra.gmra.mxu1 %v615_v3  ;;  %5169 = vmatpush3.bf16.msra.mxu0 %v5729_v62  ;;  %v5766_v62 = vld [vmem:[%s7344_s1 + $0x68] sm:$0xff]   ;;  %v5769_v3 = vld [vmem:[%s7344_s1 + $0x618] sm:$0xff]  }
  0x4e   : > { %5193 = vmatpush3.bf16.msra.mxu1 %v5730_v63  ;;  %5170 = vmatprep.subr.bf16.mxu0 %v5731_v4  ;;  %v1218_v63 = vpack.c.bf16 %v4199_v61, %v6225_v23  ;;  %v5786_v23 = vld [vmem:[%s7344_s1 + $0x2d8] sm:$0xff]   ;;  %v5798_v61 = vld [vmem:[%s7344_s1 + $0x568] sm:$0xff]  }
  0x4f   : > { %5194 = vmatprep.subr.bf16.mxu1 %v5732_v5  ;;  %5140 = vmatprep.mubr.bf16.mxu0 %v6145_v6 }
  0x50   : > { %5164 = vmatprep.mubr.bf16.mxu1 %v616_v9  ;;  %v5775_v9 = vld [vmem:[%s7344_s1 + $0x600] sm:$0xff]  }
  0x51   : > { %5171 = vmatpush3.bf16.msra.mxu0 %v5731_v4  ;;  %v5770_v4 = vld [vmem:[%s7344_s1 + $0x58] sm:$0xff]  }
  0x52   : > { %5195 = vmatpush3.bf16.msra.mxu1 %v5732_v5  ;;  %5172 = vmatprep.subr.bf16.mxu0 %v5733_v10  ;;  %v5771_v5 = vld [vmem:[%s7344_s1 + $0x610] sm:$0xff]  }
  0x53   : > { %5196 = vmatprep.subr.bf16.mxu1 %v5734_v13 }
  0x54   : > { %5141 = vmatmul.mubr.bf16.gmra.mxu0 %v6168_v14 }
  0x55   : > { %5173 = vmatpush3.bf16.msra.mxu0 %v5733_v10  ;;  %5165 = vmatmul.mubr.bf16.gmra.mxu1 %v617_v15  ;;  %v5776_v10 = vld [vmem:[%s7344_s1 + $0x40] sm:$0xff]   ;;  %v5777_v15 = vld [vmem:[%s7344_s1 + $0xf8] sm:$0xff]  }
  0x56   : > { %5197 = vmatpush3.bf16.msra.mxu1 %v5734_v13  ;;  %5174 = vmatprep.subr.bf16.mxu0 %v5735_v16  ;;  %v6338_v13 = vld [vmem:[%s5969_s10 + $0xd0] sm:$0xff] }
  0x57   : > { %5198 = vmatprep.subr.bf16.mxu1 %v5736_v17  ;;  %5184 = vmatprep.mubr.bf16.mxu0 %v764_v18 }
  0x58   : > { %5208 = vmatprep.mubr.bf16.mxu1 %v914_v19  ;;  %v6353_v19 = vld [vmem:[%s5969_s10 + $0xf0] sm:$0xff] }
  0x59   : > { %5175 = vmatpush3.bf16.msra.mxu0 %v5735_v16  ;;  %v5778_v16 = vld [vmem:[%s7344_s1 + $0x2f8] sm:$0xff]  }
  0x5a   : > { %5199 = vmatpush3.bf16.msra.mxu1 %v5736_v17  ;;  %5176 = vmatprep.subr.bf16.mxu0 %v5737_v20  ;;  %v6347_v17 = vld [vmem:[%s5969_s10 + $0xe0] sm:$0xff] }
  0x5b   : > { %5200 = vmatprep.subr.bf16.mxu1 %v5738_v21 }
  0x5d   : > { %5177 = vmatpush3.bf16.msra.mxu0 %v5737_v20  ;;  %v5779_v20 = vld [vmem:[%s7344_s1 + $0xf0] sm:$0xff]  }
  0x5e   : > { %5201 = vmatpush3.bf16.msra.mxu1 %v5738_v21  ;;  %5178 = vmatprep.subr.bf16.mxu0 %v5739_v12  ;;  %v5780_v21 = vld [vmem:[%s7344_s1 + $0x2f0] sm:$0xff]  }
  0x5f   : > { %5202 = vmatprep.subr.bf16.mxu1 %v5740_v22 }
  0x61   : > { %5179 = vmatpush3.bf16.msra.mxu0 %v5739_v12  ;;  %v6364_v12 = vpack.c.bf16 %v6353_v19, %v6347_v17 }
  0x62   : > { %5203 = vmatpush3.bf16.msra.mxu1 %v5740_v22  ;;  %5180 = vmatprep.subr.bf16.mxu0 %v5741_v24  ;;  %v4231_v22 = vld [vmem:[%s5969_s10 + $0x92] sm:$0xff] }
  0x63   : > { %5204 = vmatprep.subr.bf16.mxu1 %v5742_v25 }
  0x65   : > { %5181 = vmatpush3.bf16.msra.mxu0 %v5741_v24  ;;  %v5781_v24 = vld [vmem:[%s7344_s1 + $0xe8] sm:$0xff]  }
  0x66   : > { %5205 = vmatpush3.bf16.msra.mxu1 %v5742_v25  ;;  %5182 = vmatprep.subr.bf16.mxu0 %v5743_v26  ;;  %v6372_v25 = vld [vmem:[%s5969_s10 + $0x100] sm:$0xff] }
  0x67   : > { %5206 = vmatprep.subr.bf16.mxu1 %v5744_v27 }
  0x69   : > { %5183 = vmatpush3.bf16.msra.mxu0 %v5743_v26  ;;  %v6375_v26 = vld [vmem:[%s5969_s10 + $0x110] sm:$0xff] }
  0x6a   : > { %5207 = vmatpush3.bf16.msra.mxu1 %v5744_v27  ;;  %5216 = vmatprep.subr.bf16.mxu0 %v5745_v29  ;;  %v4288_v27 = vld [vmem:[%s5969_s10 + $0xa1] sm:$0xff] }
  0x6b   : > { %5240 = vmatprep.subr.bf16.mxu1 %v5746_v32 }
  0x6c   : > { %5185 = vmatmul.mubr.bf16.vlgmr.msra.gmra.mxu0 %v765_v34  ;;  %v6389_v34 = vpack.c.bf16 %v6375_v26, %v6372_v25 }
  0x6d   : > { %5209 = vmatmul.mubr.bf16.vlgmr.msra.gmra.mxu1 %v915_v35  ;;  %5217 = vmatpush3.bf16.msra.mxu0 %v5745_v29  ;;  %v1368_v29 = vpack.c.bf16 %v4231_v22, %v6233_v45  ;;  %v5784_v35 = vld [vmem:[%s7344_s1 + $0x2e0] sm:$0xff]   ;;  %v5789_v45 = vld [vmem:[%s7344_s1 + $0xc8] sm:$0xff]   ;;  %v4391_v22 = vld [vmem:[%s5969_s10 + $0x130] sm:$0xff] }
  0x6e   : > { %5241 = vmatpush3.bf16.msra.mxu1 %v5746_v32  ;;  %5218 = vmatprep.subr.bf16.mxu0 %v5747_v38  ;;  %v6385_v32 = vld [vmem:[%s5969_s10 + $0xb1] sm:$0xff] }
  0x6f   : > { %5242 = vmatprep.subr.bf16.mxu1 %v5748_v41  ;;  %5188 = vmatprep.mubr.bf16.mxu0 %v766_v42  ;;  %v5785_v42 = vld [vmem:[%s7344_s1 + $0xd8] sm:$0xff]  }
  0x70   : > { %5212 = vmatprep.mubr.bf16.mxu1 %v916_v30  ;;  %v5787_v30 = vld [vmem:[%s7344_s1 + $0xd0] sm:$0xff]  }
  0x71   : > { %5219 = vmatpush3.bf16.msra.mxu0 %v5747_v38  ;;  %v1666_v38 = vpack.c.bf16 %v6385_v32, %v4288_v27 }
  0x72   : > { %5243 = vmatpush3.bf16.msra.mxu1 %v5748_v41  ;;  %5220 = vmatprep.subr.bf16.mxu0 %v5749_v43 }
  0x73   : > { %5244 = vmatprep.subr.bf16.mxu1 %v5750_v31 }
  0x74   : > { %5189 = vmatmul.mubr.bf16.gmra.mxu0 %v767_v37  ;;  %v5791_v37 = vld [vmem:[%s7344_s1 + $0xc0] sm:$0xff]  }
  0x75   : > { %5221 = vmatpush3.bf16.msra.mxu0 %v5749_v43  ;;  %5213 = vmatmul.mubr.bf16.gmra.mxu1 %v917_v46  ;;  %v5788_v43 = vld [vmem:[%s7344_s1 + $0x2d0] sm:$0xff]   ;;  %v5792_v46 = vld [vmem:[%s7344_s1 + $0x2c0] sm:$0xff]  }
  0x76   : > { %5245 = vmatpush3.bf16.msra.mxu1 %v5750_v31  ;;  %5222 = vmatprep.subr.bf16.mxu0 %v5751_v48  ;;  %v5790_v31 = vld [vmem:[%s7344_s1 + $0x2c8] sm:$0xff]  }
  0x77   : > { %5246 = vmatprep.subr.bf16.mxu1 %v5752_v49  ;;  %5232 = vmatprep.mubr.bf16.mxu0 %v6032_v33  ;;  %v5757_v33 = vld [vmem:[%s7344_s1 + $0x508] sm:$0xff]  }
  0x78   : > { %5256 = vmatprep.mubr.bf16.mxu1 %v6017_v28  ;;  %v5758_v28 = vld [vmem:[%s7344_s1 + $0x588] sm:$0xff]  }
  0x79   : > { %5223 = vmatpush3.bf16.msra.mxu0 %v5751_v48  ;;  %v4290_v48 = vld [vmem:[%s5969_s10 + $0xc1] sm:$0xff] }
  0x7a   : > { %5247 = vmatpush3.bf16.msra.mxu1 %v5752_v49  ;;  %5224 = vmatprep.subr.bf16.mxu0 %v5753_v40  ;;  %v6426_v49 = vld [vmem:[%s5969_s10 + $0xd1] sm:$0xff] }
  0x7b   : > { %5248 = vmatprep.subr.bf16.mxu1 %v5754_v50 }
  0x7d   : > { %5225 = vmatpush3.bf16.msra.mxu0 %v5753_v40  ;;  %v5793_v40 = vld [vmem:[%s7344_s1 + $0x378] sm:$0xff]  }
  0x7e   : > { %5249 = vmatpush3.bf16.msra.mxu1 %v5754_v50  ;;  %5226 = vmatprep.subr.bf16.mxu0 %v5755_v51  ;;  %v5794_v50 = vld [vmem:[%s7344_s1 + $0x578] sm:$0xff]  }
  0x7f   : > { %5250 = vmatprep.subr.bf16.mxu1 %v5756_v52 }
  0x81   : > { %5227 = vmatpush3.bf16.msra.mxu0 %v5755_v51  ;;  %v6435_v51 = vld [vmem:[%s5969_s10 + $0xe1] sm:$0xff] }
  0x82   : > { %5251 = vmatpush3.bf16.msra.mxu1 %v5756_v52  ;;  %5228 = vmatprep.subr.bf16.mxu0 %v5757_v33  ;;  %v6438_v52 = vld [vmem:[%s5969_s10 + $0xf1] sm:$0xff] }
  0x83   : > { %5252 = vmatprep.subr.bf16.mxu1 %v5758_v28 }
  0x85   : > { %5229 = vmatpush3.bf16.msra.mxu0 %v5757_v33  ;;  %v6441_v33 = vpack.c.bf16 %v6426_v49, %v4290_v48 }
  0x86   : > { %5253 = vmatpush3.bf16.msra.mxu1 %v5758_v28  ;;  %5230 = vmatprep.subr.bf16.mxu0 %v5759_v53  ;;  %v5795_v28 = vld [vmem:[%s7344_s1 + $0x370] sm:$0xff]  }
  0x87   : > { %5254 = vmatprep.subr.bf16.mxu1 %v5760_v54 }
  0x89   : > { %5231 = vmatpush3.bf16.msra.mxu0 %v5759_v53  ;;  %v1818_v53 = vpack.c.bf16 %v6347_v17, %v6338_v13 }
  0x8a   : > { %5255 = vmatpush3.bf16.msra.mxu1 %v5760_v54  ;;  %5264 = vmatprep.subr.bf16.mxu0 %v5761_v55  ;;  %v5796_v54 = vld [vmem:[%s7344_s1 + $0x570] sm:$0xff]  }
  0x8b   : > { %5288 = vmatprep.subr.bf16.mxu1 %v5762_v56 }
  0x8c   : > { %5233 = vmatmul.mubr.bf16.vlgmr.msra.gmra.mxu0 %v6053_v39  ;;  %v1068_v39 = vpack.c.bf16 %v4167_v59, %v6160_v11  ;;  %v4258_v11 = vld [vmem:[%s5969_s10 + $0xc0] sm:$0xff]  ;;  %v1819_v59 = vpack.c.bf16 %v6372_v25, %v6353_v19 }
  0x8d   : > { %5257 = vmatmul.mubr.bf16.vlgmr.msra.gmra.mxu1 %v6042_v36  ;;  %5265 = vmatpush3.bf16.msra.mxu0 %v5761_v55  ;;  %v4256_v36 = vld [vmem:[%s5969_s10 + $0xa0] sm:$0xff]  ;;  %v6350_v18 = vpack.c.bf16 %v6338_v13, %v4258_v11  ;;  %v1817_v41 = vpack.c.bf16 %v4258_v11, %v6302_v1  ;;  %v6453_v55 = vpack.c.bf16 %v6438_v52, %v6435_v51  ;;  %v5811_v11 = vld [vmem:[%s7344_s1 + $0x5f0] sm:$0xff]  }
  0x8e   : > { %5289 = vmatpush3.bf16.msra.mxu1 %v5762_v56  ;;  %5266 = vmatprep.subr.bf16.mxu0 %v5763_v57  ;;  %v6456_v56 = vld [vmem:[%s5969_s10 + $0x101] sm:$0xff]  ;;  %v5812_v13 = vld [vmem:[%s7344_s1 + $0x170] sm:$0xff]  }
  0x8f   : > { %5290 = vmatprep.subr.bf16.mxu1 %v5764_v58  ;;  %5236 = vmatprep.mubr.bf16.mxu0 %v6080_v47  ;;  %v5767_v47 = vld [vmem:[%s7344_s1 + $0x620] sm:$0xff]  }
  0x90   : > { %5260 = vmatprep.mubr.bf16.mxu1 %v6072_v44  ;;  %v1516_v44 = vpack.c.bf16 %v6302_v1, %v4256_v36  ;;  %v5799_v36 = vld [vmem:[%s7344_s1 + $0x360] sm:$0xff]   ;;  %v1967_v1 = vpack.c.bf16 %v4290_v48, %v6385_v32  ;;  %v5818_v48 = vld [vmem:[%s7344_s1 + $0x158] sm:$0xff]  }
  0x91   : > { %5267 = vmatpush3.bf16.msra.mxu0 %v5763_v57  ;;  %v6459_v57 = vld [vmem:[%s5969_s10 + $0x111] sm:$0xff]  ;;  %v4448_v32 = vld [vmem:[%s5969_s10 + $0x140] sm:$0xff] }
  0x92   : > { %5291 = vmatpush3.bf16.msra.mxu1 %v5764_v58  ;;  %5268 = vmatprep.subr.bf16.mxu0 %v5765_v60  ;;  %v5797_v58 = vld [vmem:[%s7344_s1 + $0x368] sm:$0xff]  }
  0x93   : > { %5292 = vmatprep.subr.bf16.mxu1 %v5766_v62 }
  0x94   : > { %5237 = vmatmul.mubr.bf16.gmra.mxu0 %v1068_v39 }
  0x95   : > { %5269 = vmatpush3.bf16.msra.mxu0 %v5765_v60  ;;  %5261 = vmatmul.mubr.bf16.gmra.mxu1 %v1218_v63  ;;  %v6468_v60 = vld [vmem:[%s5969_s10 + $0x120] sm:$0xff] }
  0x96   : > { %5293 = vmatpush3.bf16.msra.mxu1 %v5766_v62  ;;  %5270 = vmatprep.subr.bf16.mxu0 %v5767_v47  ;;  %v6476_v62 = vpack.c.bf16 %v6459_v57, %v6456_v56  ;;  %v1820_v39 = vpack.c.bf16 %v6468_v60, %v6375_v26  ;;  %v5800_v63 = vld [vmem:[%s7344_s1 + $0x560] sm:$0xff]  }
  0x97   : > { %5294 = vmatprep.subr.bf16.mxu1 %v5768_v2  ;;  %5280 = vmatprep.mubr.bf16.mxu0 %v6127_v0  ;;  %v5773_v0 = vld [vmem:[%s7344_s1 + $0x608] sm:$0xff]  }
  0x98   : > { %5304 = vmatprep.mubr.bf16.mxu1 %v1516_v44  ;;  %v5803_v44 = vld [vmem:[%s7344_s1 + $0x350] sm:$0xff]  }
  0x99   : > { %5271 = vmatpush3.bf16.msra.mxu0 %v5767_v47  ;;  %v5801_v47 = vld [vmem:[%s7344_s1 + $0x358] sm:$0xff]  }
  0x9a   : > { %5295 = vmatpush3.bf16.msra.mxu1 %v5768_v2  ;;  %5272 = vmatprep.subr.bf16.mxu0 %v5769_v3  ;;  %v5802_v2 = vld [vmem:[%s7344_s1 + $0x558] sm:$0xff]  }
  0x9b   : > { %5296 = vmatprep.subr.bf16.mxu1 %v5770_v4 }
  0x9d   : > { %5273 = vmatpush3.bf16.msra.mxu0 %v5769_v3  ;;  %v5804_v3 = vld [vmem:[%s7344_s1 + $0x550] sm:$0xff]  }
  0x9e   : > { %5297 = vmatpush3.bf16.msra.mxu1 %v5770_v4  ;;  %5274 = vmatprep.subr.bf16.mxu0 %v5771_v5  ;;  %v5805_v4 = vld [vmem:[%s7344_s1 + $0x348] sm:$0xff]  }
  0x9f   : > { %5298 = vmatprep.subr.bf16.mxu1 %v5772_v7 }
  0xa1   : > { %5275 = vmatpush3.bf16.msra.mxu0 %v5771_v5  ;;  %v5806_v5 = vld [vmem:[%s7344_s1 + $0x548] sm:$0xff]  }
  0xa2   : > { %5299 = vmatpush3.bf16.msra.mxu1 %v5772_v7  ;;  %5276 = vmatprep.subr.bf16.mxu0 %v5773_v0  ;;  %v5807_v7 = vld [vmem:[%s7344_s1 + $0x340] sm:$0xff]  }
  0xa3   : > { %5300 = vmatprep.subr.bf16.mxu1 %v5774_v8 }
  0xa5   : > { %5277 = vmatpush3.bf16.msra.mxu0 %v5773_v0  ;;  %v5808_v0 = vld [vmem:[%s7344_s1 + $0x540] sm:$0xff]  }
  0xa6   : > { %5301 = vmatpush3.bf16.msra.mxu1 %v5774_v8  ;;  %5278 = vmatprep.subr.bf16.mxu0 %v5775_v9  ;;  %v5809_v8 = vld [vmem:[%s7344_s1 + $0x5f8] sm:$0xff]  }
  0xa7   : > { %5302 = vmatprep.subr.bf16.mxu1 %v5776_v10 }
  0xa9   : > { %5279 = vmatpush3.bf16.msra.mxu0 %v5775_v9  ;;  %v5810_v9 = vld [vmem:[%s7344_s1 + $0x178] sm:$0xff]  }
  0xaa   : > { %5303 = vmatpush3.bf16.msra.mxu1 %v5776_v10  ;;  %5312 = vmatprep.subr.bf16.mxu0 %v5777_v15  ;;  %v1968_v10 = vpack.c.bf16 %v6435_v51, %v6426_v49 }
  0xab   : > { %5336 = vmatprep.subr.bf16.mxu1 %v5778_v16 }
  0xac   : > { %5281 = vmatmul.mubr.bf16.vlgmr.msra.gmra.mxu0 %v6145_v6  ;;  %v5782_v6 = vld [vmem:[%s7344_s1 + $0x2e8] sm:$0xff]  }
  0xad   : > { %5305 = vmatmul.mubr.bf16.vlgmr.msra.gmra.mxu1 %v6350_v18  ;;  %5313 = vmatpush3.bf16.msra.mxu0 %v5777_v15  ;;  %v1969_v15 = vpack.c.bf16 %v6456_v56, %v6438_v52  ;;  %v5819_v52 = vld [vmem:[%s7344_s1 + $0x5d0] sm:$0xff]  }
  0xae   : > { %5337 = vmatpush3.bf16.msra.mxu1 %v5778_v16  ;;  %5314 = vmatprep.subr.bf16.mxu0 %v5779_v20 }
  0xaf   : > { %5338 = vmatprep.subr.bf16.mxu1 %v5780_v21  ;;  %5284 = vmatprep.mubr.bf16.mxu0 %v6168_v14  ;;  %v5783_v14 = vld [vmem:[%s7344_s1 + $0xe0] sm:$0xff]  }
  0xb0   : > { %5308 = vmatprep.mubr.bf16.mxu1 %v6364_v12 }
  0xb1   : > { %5315 = vmatpush3.bf16.msra.mxu0 %v5779_v20 }
  0xb2   : > { %5339 = vmatpush3.bf16.msra.mxu1 %v5780_v21  ;;  %5316 = vmatprep.subr.bf16.mxu0 %v5781_v24  ;;  %v5813_v21 = vld [vmem:[%s7344_s1 + $0x5e8] sm:$0xff]  }
  0xb3   : > { %5340 = vmatprep.subr.bf16.mxu1 %v5782_v6 }
  0xb4   : > { %5285 = vmatmul.mubr.bf16.gmra.mxu0 %v1368_v29  ;;  %v2121_v29 = vpack.c.bf16 %v4391_v22, %v6468_v60  ;;  %v5824_v60 = vld [vmem:[%s7344_s1 + $0x140] sm:$0xff]   ;;  %v6646_v22 = vld [vmem:[%s5969_s10 + $0x151] sm:$0xff] }
  0xb5   : > { %5317 = vmatpush3.bf16.msra.mxu0 %v5781_v24  ;;  %5309 = vmatmul.mubr.bf16.gmra.mxu1 %v6389_v34 }
  0xb6   : > { %5341 = vmatpush3.bf16.msra.mxu1 %v5782_v6  ;;  %5318 = vmatprep.subr.bf16.mxu0 %v5783_v14 }
  0xb7   : > { %5342 = vmatprep.subr.bf16.mxu1 %v5784_v35  ;;  %5328 = vmatprep.mubr.bf16.mxu0 %v1666_v38 }
  0xb8   : > { %5352 = vmatprep.mubr.bf16.mxu1 %v1817_v41  ;;  %v5815_v41 = vld [vmem:[%s7344_s1 + $0x5e0] sm:$0xff]  }
  0xb9   : > { %5319 = vmatpush3.bf16.msra.mxu0 %v5783_v14  ;;  %v6550_v14 = vld [vmem:[%s5969_s10 + $0x150] sm:$0xff] }
  0xba   : > { %5343 = vmatpush3.bf16.msra.mxu1 %v5784_v35  ;;  %5320 = vmatprep.subr.bf16.mxu0 %v5785_v42 }
  0xbb   : > { %5344 = vmatprep.subr.bf16.mxu1 %v5786_v23 }
  0xbd   : > { %5321 = vmatpush3.bf16.msra.mxu0 %v5785_v42 }
  0xbe   : > { %5345 = vmatpush3.bf16.msra.mxu1 %v5786_v23  ;;  %5322 = vmatprep.subr.bf16.mxu0 %v5787_v30 }
  0xbf   : > { %5346 = vmatprep.subr.bf16.mxu1 %v5788_v43 }
  0xc1   : > { %5323 = vmatpush3.bf16.msra.mxu0 %v5787_v30 }
  0xc2   : > { %5347 = vmatpush3.bf16.msra.mxu1 %v5788_v43  ;;  %5324 = vmatprep.subr.bf16.mxu0 %v5789_v45  ;;  %v2419_v43 = vpack.c.bf16 %v6550_v14, %v4448_v32 }
  0xc3   : > { %5348 = vmatprep.subr.bf16.mxu1 %v5790_v31 }
  0xc5   : > { %5325 = vmatpush3.bf16.msra.mxu0 %v5789_v45 }
  0xc6   : > { %5349 = vmatpush3.bf16.msra.mxu1 %v5790_v31  ;;  %5326 = vmatprep.subr.bf16.mxu0 %v5791_v37  ;;  %v5817_v31 = vld [vmem:[%s7344_s1 + $0x5d8] sm:$0xff]  }
  0xc7   : > { %5350 = vmatprep.subr.bf16.mxu1 %v5792_v46 }
  0xc9   : > { %5327 = vmatpush3.bf16.msra.mxu0 %v5791_v37 }
  0xca   : > { %5351 = vmatpush3.bf16.msra.mxu1 %v5792_v46  ;;  %5360 = vmatprep.subr.bf16.mxu0 %v5793_v40 }
  0xcb   : > { %5384 = vmatprep.subr.bf16.mxu1 %v5794_v50 }
  0xcc   : > { %5329 = vmatmul.mubr.bf16.vlgmr.msra.gmra.mxu0 %v6441_v33 }
  0xcd   : > { %5353 = vmatmul.mubr.bf16.vlgmr.msra.gmra.mxu1 %v1818_v53  ;;  %5361 = vmatpush3.bf16.msra.mxu0 %v5793_v40 }
  0xce   : > { %5385 = vmatpush3.bf16.msra.mxu1 %v5794_v50  ;;  %5362 = vmatprep.subr.bf16.mxu0 %v5795_v28 }
  0xcf   : > { %5386 = vmatprep.subr.bf16.mxu1 %v5796_v54  ;;  %5332 = vmatprep.mubr.bf16.mxu0 %v6453_v55 }
  0xd0   : > { %5356 = vmatprep.mubr.bf16.mxu1 %v1819_v59  ;;  %v5823_v59 = vld [vmem:[%s7344_s1 + $0x5c0] sm:$0xff]  }
  0xd1   : > { %5363 = vmatpush3.bf16.msra.mxu0 %v5795_v28 }
  0xd2   : > { %5387 = vmatpush3.bf16.msra.mxu1 %v5796_v54  ;;  %5364 = vmatprep.subr.bf16.mxu0 %v5797_v58 }
  0xd3   : > { %5388 = vmatprep.subr.bf16.mxu1 %v5798_v61 }
  0xd4   : > { %5333 = vmatmul.mubr.bf16.gmra.mxu0 %v6476_v62 }
  0xd5   : > { %5365 = vmatpush3.bf16.msra.mxu0 %v5797_v58  ;;  %5357 = vmatmul.mubr.bf16.gmra.mxu1 %v1820_v39  ;;  %v5822_v58 = vld [vmem:[%s7344_s1 + $0x148] sm:$0xff]   ;;  %v6600_v39 = vld [vmem:[%s5969_s10 + $0x170] sm:$0xff] }
  0xd6   : > { %5389 = vmatpush3.bf16.msra.mxu1 %v5798_v61  ;;  %5366 = vmatprep.subr.bf16.mxu0 %v5799_v36  ;;  %v6597_v61 = vld [vmem:[%s5969_s10 + $0x160] sm:$0xff] }
  0xd7   : > { %5390 = vmatprep.subr.bf16.mxu1 %v5800_v63  ;;  %5376 = vmatprep.mubr.bf16.mxu0 %v1967_v1  ;;  %v2420_v1 = vpack.c.bf16 %v6600_v39, %v6597_v61 }
  0xd8   : > { %5400 = vmatprep.mubr.bf16.mxu1 %v6350_v18  ;;  %v6531_v18 = vld [vmem:[%s5969_s10 + $0x121] sm:$0xff] }
  0xd9   : > { %5367 = vmatpush3.bf16.msra.mxu0 %v5799_v36  ;;  %v1970_v6 = vpack.c.bf16 %v6531_v18, %v6459_v57  ;;  %v5821_v57 = vld [vmem:[%s7344_s1 + $0x5c8] sm:$0xff]   ;;  %v5825_v36 = vld [vmem:[%s7344_s1 + $0x1f8] sm:$0xff]  }
  0xda   : > { %5391 = vmatpush3.bf16.msra.mxu1 %v5800_v63  ;;  %5368 = vmatprep.subr.bf16.mxu0 %v5801_v47  ;;  %v5826_v63 = vld [vmem:[%s7344_s1 + $0x278] sm:$0xff]  }
  0xdb   : > { %5392 = vmatprep.subr.bf16.mxu1 %v5802_v2 }
  0xdd   : > { %5369 = vmatpush3.bf16.msra.mxu0 %v5801_v47  ;;  %v6611_v47 = vld [vmem:[%s5969_s10 + $0x180] sm:$0xff] }
  0xde   : > { %5393 = vmatpush3.bf16.msra.mxu1 %v5802_v2  ;;  %5370 = vmatprep.subr.bf16.mxu0 %v5803_v44  ;;  %v6614_v2 = vld [vmem:[%s5969_s10 + $0x190] sm:$0xff] }
  0xdf   : > { %5394 = vmatprep.subr.bf16.mxu1 %v5804_v3 }
  0xe1   : > { %5371 = vmatpush3.bf16.msra.mxu0 %v5803_v44  ;;  %v5827_v44 = vld [vmem:[%s7344_s1 + $0x1f0] sm:$0xff]  }
  0xe2   : > { %5395 = vmatpush3.bf16.msra.mxu1 %v5804_v3  ;;  %5372 = vmatprep.subr.bf16.mxu0 %v5805_v4  ;;  %v5828_v3 = vld [vmem:[%s7344_s1 + $0x270] sm:$0xff]  }
  0xe3   : > { %5396 = vmatprep.subr.bf16.mxu1 %v5806_v5 }
  0xe5   : > { %5373 = vmatpush3.bf16.msra.mxu0 %v5805_v4 }
  0xe6   : > { %5397 = vmatpush3.bf16.msra.mxu1 %v5806_v5  ;;  %5374 = vmatprep.subr.bf16.mxu0 %v5807_v7  ;;  %v2421_v5 = vpack.c.bf16 %v6614_v2, %v6611_v47 }
  0xe7   : > { %5398 = vmatprep.subr.bf16.mxu1 %v5808_v0 }
  0xe9   : > { %5375 = vmatpush3.bf16.msra.mxu0 %v5807_v7 }
  0xea   : > { %5399 = vmatpush3.bf16.msra.mxu1 %v5808_v0  ;;  %5408 = vmatprep.subr.bf16.mxu0 %v5809_v8 }
  0xeb   : > { %5432 = vmatprep.subr.bf16.mxu1 %v5810_v9 }
  0xec   : > { %v5090_v16 = vpop.f32.mrf.mxu0  ;;  %5377 = vmatmul.mubr.bf16.vlgmr.msra.gmra.mxu0 %v1968_v10  ;;  %v5829_v10 = vld [vmem:[%s7344_s1 + $0x1e8] sm:$0xff]  }
  0xed   : > { %v5114_v17 = vpop.f32.mrf.mxu1  ;;  %5401 = vmatmul.mubr.bf16.vlgmr.msra.gmra.mxu1 %v6364_v12  ;;  %5409 = vmatpush3.bf16.msra.mxu0 %v5809_v8  ;;  %v5814_v12 = vld [vmem:[%s7344_s1 + $0x168] sm:$0xff]   ;;  %v4423_v8 = vld [vmem:[%s5969_s10 + $0x131] sm:$0xff] }
  0xee   : > { %v6533_v19 = vadd.f32 %v5114_v17, %v5090_v16  ;;  %5433 = vmatpush3.bf16.msra.mxu1 %v5810_v9  ;;  %v311_v20 = vpop.f32.mrf.mxu0  ;;  %5410 = vmatprep.subr.bf16.mxu0 %v5811_v11  ;;  %v5830_v17 = vld [vmem:[%s7344_s1 + $0x268] sm:$0xff]  }
  0xef   : > { %v424_v24 = vpop.f32.mrf.mxu1  ;;  %5434 = vmatprep.subr.bf16.mxu1 %v5812_v13  ;;  %5380 = vmatprep.mubr.bf16.mxu0 %v1969_v15 }
  0xf0   : > { %v6542_v25 = vadd.f32 %v424_v24, %v311_v20  ;;  %v5091_v26 = vpop.f32.mrf.mxu0  ;;  %5404 = vmatprep.mubr.bf16.mxu1 %v6389_v34  ;;  %v5816_v34 = vld [vmem:[%s7344_s1 + $0x160] sm:$0xff]   ;;  %v2271_v20 = vpack.c.bf16 %v4423_v8, %v6531_v18 }
  0xf1   : > { %v5115_v27 = vpop.f32.mrf.mxu1  ;;  %5411 = vmatpush3.bf16.msra.mxu0 %v5811_v11  ;;  %v6631_v11 = vld [vmem:[%s5969_s10 + $0x1a0] sm:$0xff] }
  0xf2   : > { %v6552_v35 = vadd.f32 %v5115_v27, %v5091_v26  ;;  %5435 = vmatpush3.bf16.msra.mxu1 %v5812_v13  ;;  %v314_v38 = vpop.f32.mrf.mxu0  ;;  %5412 = vmatprep.subr.bf16.mxu0 %v5813_v21  ;;  %v4512_v26 = vld [vmem:[%s5969_s10 + $0x142] sm:$0xff] }
  0xf3   : > { %v427_v42 = vpop.f32.mrf.mxu1  ;;  %5436 = vmatprep.subr.bf16.mxu1 %v5814_v12  ;;  %v5831_v18 = vld [vmem:[%s7344_s1 + $0x1e0] sm:$0xff]  }
  0xf4   : > { %v6560_v23 = vadd.f32 %v427_v42, %v314_v38  ;;  %5381 = vmatmul.mubr.bf16.gmra.mxu0 %v1970_v6  ;;  %v5094_v30 = vpop.f32.mrf.mxu0  ;;  %v6655_v6 = vld [vmem:[%s5969_s10 + $0x152] sm:$0xff]  ;;  %v5832_v38 = vld [vmem:[%s7344_s1 + $0x260] sm:$0xff]  }
  0xf5   : > { %5413 = vmatpush3.bf16.msra.mxu0 %v5813_v21  ;;  %5405 = vmatmul.mubr.bf16.gmra.mxu1 %v2121_v29  ;;  %v5118_v45 = vpop.f32.mrf.mxu1  ;;  %v4480_v21 = vld [vmem:[%s5969_s10 + $0x141] sm:$0xff] }
  0xf6   : > { %5437 = vmatpush3.bf16.msra.mxu1 %v5814_v12  ;;  %5414 = vmatprep.subr.bf16.mxu0 %v5815_v41  ;;  %v6566_v37 = vadd.f32 %v5118_v45, %v5094_v30  ;;  %v327_v46 = vpop.f32.mrf.mxu0  ;;  %v6727_v8 = vld [vmem:[%s5969_s10 + $0x181] sm:$0xff] }
  0xf7   : > { %5438 = vmatprep.subr.bf16.mxu1 %v5816_v34  ;;  %v440_v49 = vpop.f32.mrf.mxu1  ;;  %5424 = vmatprep.mubr.bf16.mxu0 %v6441_v33  ;;  %v5820_v33 = vld [vmem:[%s7344_s1 + $0x150] sm:$0xff]  }
  0xf8   : > { %v6572_v40 = vadd.f32 %v440_v49, %v327_v46  ;;  %v5095_v50 = vpop.f32.mrf.mxu0  ;;  %5448 = vmatprep.mubr.bf16.mxu1 %v2419_v43 }
  0xf9   : > { %5415 = vmatpush3.bf16.msra.mxu0 %v5815_v41  ;;  %v5119_v51 = vpop.f32.mrf.mxu1  ;;  %v2569_v41 = vpack.c.bf16 %v6646_v22, %v4480_v21 }
  0xfa   : > { %5439 = vmatpush3.bf16.msra.mxu1 %v5816_v34  ;;  %5416 = vmatprep.subr.bf16.mxu0 %v5817_v31  ;;  %v6577_v28 = vadd.f32 %v5119_v51, %v5095_v50  ;;  %v330_v53 = vpop.f32.mrf.mxu0  ;;  %v2719_v34 = vpack.c.bf16 %v6655_v6, %v4512_v26  ;;  %v6752_v26 = vld [vmem:[%s5969_s10 + $0x1a1] sm:$0xff] }
  0xfb   : > { %5440 = vmatprep.subr.bf16.mxu1 %v5818_v48  ;;  %v443_v54 = vpop.f32.mrf.mxu1 }
  0xfc   : > { %v6582_v56 = vadd.f32 %v443_v54, %v330_v53 }
  0xfd   : > { %5417 = vmatpush3.bf16.msra.mxu0 %v5817_v31  ;;  %v5833_v31 = vld [vmem:[%s7344_s1 + $0x1d8] sm:$0xff]  }
  0xfe   : > { %5441 = vmatpush3.bf16.msra.mxu1 %v5818_v48  ;;  %5418 = vmatprep.subr.bf16.mxu0 %v5819_v52 }
  0xff   : > { %5442 = vmatprep.subr.bf16.mxu1 %v5820_v33 }
 0x101   : > { %5419 = vmatpush3.bf16.msra.mxu0 %v5819_v52 }
 0x102   : > { %5443 = vmatpush3.bf16.msra.mxu1 %v5820_v33  ;;  %5420 = vmatprep.subr.bf16.mxu0 %v5821_v57 }
 0x103   : > { %5444 = vmatprep.subr.bf16.mxu1 %v5822_v58 }
 0x105   : > { %5421 = vmatpush3.bf16.msra.mxu0 %v5821_v57 }
 0x106   : > { %5445 = vmatpush3.bf16.msra.mxu1 %v5822_v58  ;;  %5422 = vmatprep.subr.bf16.mxu0 %v5823_v59 }
 0x107   : > { %5446 = vmatprep.subr.bf16.mxu1 %v5824_v60 }
 0x109   : > { %5423 = vmatpush3.bf16.msra.mxu0 %v5823_v59 }
 0x10a   : > { %5447 = vmatpush3.bf16.msra.mxu1 %v5824_v60  ;;  %5456 = vmatprep.subr.bf16.mxu0 %v5825_v36  ;;  %v5838_v60 = vld [vmem:[%s7344_s1 + $0x248] sm:$0xff]  }
 0x10b   : > { %5480 = vmatprep.subr.bf16.mxu1 %v5826_v63 }
 0x10c   : > { %v5138_v4 = vpop.f32.mrf.mxu0  ;;  %5425 = vmatmul.mubr.bf16.vlgmr.msra.gmra.mxu0 %v6453_v55  ;;  %v6634_v55 = vld [vmem:[%s5969_s10 + $0x1b0] sm:$0xff] }
 0x10d   : > { %v599_v7 = vadd.f32 %v5138_v4, %v6533_v19  ;;  %v5162_v0 = vpop.f32.mrf.mxu1  ;;  %5449 = vmatmul.mubr.bf16.vlgmr.msra.gmra.mxu1 %v2420_v1  ;;  %5457 = vmatpush3.bf16.msra.mxu0 %v5825_v36  ;;  %v5839_v36 = vld [vmem:[%s7344_s1 + $0x1c0] sm:$0xff]   ;;  %v6716_v4 = vld [vmem:[%s5969_s10 + $0x172] sm:$0xff] }
 0x10e   : > { %5481 = vmatpush3.bf16.msra.mxu1 %v5826_v63  ;;  %v566_v9 = vpop.f32.mrf.mxu0  ;;  %5458 = vmatprep.subr.bf16.mxu0 %v5827_v44  ;;  %v5840_v63 = vld [vmem:[%s7344_s1 + $0x240] sm:$0xff]  }
 0x10f   : > { %v6636_v13 = vadd.f32 %v5162_v0, %v599_v7  ;;  %v597_v15 = vadd.f32 %v566_v9, %v6542_v25  ;;  %v717_v16 = vpop.f32.mrf.mxu1  ;;  %5482 = vmatprep.subr.bf16.mxu1 %v5828_v3  ;;  %5428 = vmatprep.mubr.bf16.mxu0 %v6476_v62  ;;  %v2422_v62 = vpack.c.bf16 %v6634_v55, %v6631_v11  ;;  %v6707_v1 = vld [vmem:[%s5969_s10 + $0x161] sm:$0xff]  ;;  %v5842_v7 = vld [vmem:[%s7344_s1 + $0x478] sm:$0xff]  }
 0x110   : > { %v5139_v19 = vpop.f32.mrf.mxu0  ;;  %5452 = vmatprep.mubr.bf16.mxu1 %v2421_v5  ;;  %v5841_v5 = vld [vmem:[%s7344_s1 + $0x3f8] sm:$0xff]  }
 0x111   : > { %v6648_v24 = vadd.f32 %v717_v16, %v597_v15  ;;  %v600_v12 = vadd.f32 %v5139_v19, %v6552_v35  ;;  %v5163_v25 = vpop.f32.mrf.mxu1  ;;  %5459 = vmatpush3.bf16.msra.mxu0 %v5827_v44  ;;  %v6710_v44 = vld [vmem:[%s5969_s10 + $0x171] sm:$0xff]  ;;  %v6735_v15 = vld [vmem:[%s5969_s10 + $0x182] sm:$0xff] }
 0x112   : > { %5483 = vmatpush3.bf16.msra.mxu1 %v5828_v3  ;;  %v569_v27 = vpop.f32.mrf.mxu0  ;;  %5460 = vmatprep.subr.bf16.mxu0 %v5829_v10  ;;  %v6713_v3 = vld [vmem:[%s5969_s10 + $0x162] sm:$0xff]  ;;  %v2570_v0 = vpack.c.bf16 %v6710_v44, %v6707_v1  ;;  %v6730_v9 = vld [vmem:[%s5969_s10 + $0x191] sm:$0xff] }
 0x113   : > { %v6660_v29 = vadd.f32 %v5163_v25, %v600_v12  ;;  %v598_v32 = vadd.f32 %v569_v27, %v6560_v23  ;;  %v720_v35 = vpop.f32.mrf.mxu1  ;;  %5484 = vmatprep.subr.bf16.mxu1 %v5830_v17  ;;  %v6738_v16 = vld [vmem:[%s5969_s10 + $0x192] sm:$0xff] }
 0x114   : > { %v5142_v42 = vpop.f32.mrf.mxu0  ;;  %5429 = vmatmul.mubr.bf16.gmra.mxu0 %v2271_v20  ;;  %v5844_v19 = vld [vmem:[%s7344_s1 + $0x470] sm:$0xff]   ;;  %v2571_v20 = vpack.c.bf16 %v6730_v9, %v6727_v8  ;;  %v2721_v12 = vpack.c.bf16 %v6738_v16, %v6735_v15 }
 0x115   : > { %v6668_v30 = vadd.f32 %v720_v35, %v598_v32  ;;  %v603_v43 = vadd.f32 %v5142_v42, %v6566_v37  ;;  %5461 = vmatpush3.bf16.msra.mxu0 %v5829_v10  ;;  %v5166_v45 = vpop.f32.mrf.mxu1  ;;  %5453 = vmatmul.mubr.bf16.gmra.mxu1 %v2422_v62  ;;  %v5834_v37 = vld [vmem:[%s7344_s1 + $0x258] sm:$0xff]   ;;  %v2720_v10 = vpack.c.bf16 %v6716_v4, %v6713_v3  ;;  %v5845_v32 = vld [vmem:[%s7344_s1 + $0x3e8] sm:$0xff]  }
 0x116   : > { %5485 = vmatpush3.bf16.msra.mxu1 %v5830_v17  ;;  %v582_v23 = vpop.f32.mrf.mxu0  ;;  %5462 = vmatprep.subr.bf16.mxu0 %v5831_v18  ;;  %v5843_v17 = vld [vmem:[%s7344_s1 + $0x3f0] sm:$0xff]   ;;  %v6761_v35 = vld [vmem:[%s5969_s10 + $0x1a2] sm:$0xff] }
 0x117   : > { %v601_v46 = vadd.f32 %v582_v23, %v6572_v40  ;;  %v6675_v48 = vadd.f32 %v5166_v45, %v603_v43  ;;  %v733_v49 = vpop.f32.mrf.mxu1  ;;  %5486 = vmatprep.subr.bf16.mxu1 %v5832_v38  ;;  %5472 = vmatprep.mubr.bf16.mxu0 %v2569_v41  ;;  %v5835_v40 = vld [vmem:[%s7344_s1 + $0x1d0] sm:$0xff]  }
 0x118   : > { %v5143_v50 = vpop.f32.mrf.mxu0  ;;  %5496 = vmatprep.mubr.bf16.mxu1 %v2719_v34  ;;  %v6755_v27 = vld [vmem:[%s5969_s10 + $0x1b1] sm:$0xff]  ;;  %v5846_v34 = vld [vmem:[%s7344_s1 + $0x468] sm:$0xff]  }
 0x119   : > { %v604_v51 = vadd.f32 %v5143_v50, %v6577_v28  ;;  %v6681_v52 = vadd.f32 %v733_v49, %v601_v46  ;;  %5463 = vmatpush3.bf16.msra.mxu0 %v5831_v18  ;;  %v5167_v53 = vpop.f32.mrf.mxu1  ;;  %v5836_v28 = vld [vmem:[%s7344_s1 + $0x250] sm:$0xff]   ;;  %v2572_v45 = vpack.c.bf16 %v6755_v27, %v6752_v26 }
 0x11a   : > { %5487 = vmatpush3.bf16.msra.mxu1 %v5832_v38  ;;  %v585_v33 = vpop.f32.mrf.mxu0  ;;  %5464 = vmatprep.subr.bf16.mxu0 %v5833_v31  ;;  %v6764_v38 = vld [vmem:[%s5969_s10 + $0x1b2] sm:$0xff] }
 0x11b   : > { %v602_v54 = vadd.f32 %v585_v33, %v6582_v56  ;;  %v6687_v57 = vadd.f32 %v5167_v53, %v604_v51  ;;  %v736_v58 = vpop.f32.mrf.mxu1  ;;  %5488 = vmatprep.subr.bf16.mxu1 %v5834_v37  ;;  %v5837_v56 = vld [vmem:[%s7344_s1 + $0x1c8] sm:$0xff]   ;;  %v2870_v33 = vpack.c.bf16 %v6597_v61, %v6550_v14 }
 0x11d   : > { %v6692_v59 = vadd.f32 %v736_v58, %v602_v54  ;;  %5465 = vmatpush3.bf16.msra.mxu0 %v5833_v31  ;;  %v3020_v54 = vpack.c.bf16 %v6707_v1, %v6646_v22  ;;  %v5850_v22 = vld [vmem:[%s7344_s1 + $0x458] sm:$0xff]  }
 0x11e   : > { %5489 = vmatpush3.bf16.msra.mxu1 %v5834_v37  ;;  %5466 = vmatprep.subr.bf16.mxu0 %v5835_v40  ;;  %v5847_v37 = vld [vmem:[%s7344_s1 + $0x3e0] sm:$0xff]  }
 0x11f   : > { %5490 = vmatprep.subr.bf16.mxu1 %v5836_v28 }
 0x121   : > { %5467 = vmatpush3.bf16.msra.mxu0 %v5835_v40 }
 0x122   : > { %5491 = vmatpush3.bf16.msra.mxu1 %v5836_v28  ;;  %5468 = vmatprep.subr.bf16.mxu0 %v5837_v56 }
 0x123   : > { %5492 = vmatprep.subr.bf16.mxu1 %v5838_v60 }
 0x125   : > { %5469 = vmatpush3.bf16.msra.mxu0 %v5837_v56 }
 0x126   : > { %5493 = vmatpush3.bf16.msra.mxu1 %v5838_v60  ;;  %5470 = vmatprep.subr.bf16.mxu0 %v5839_v36  ;;  %v5849_v60 = vld [vmem:[%s7344_s1 + $0x3d8] sm:$0xff]  }
 0x127   : > { %5494 = vmatprep.subr.bf16.mxu1 %v5840_v63 }
 0x129   : > { %5471 = vmatpush3.bf16.msra.mxu0 %v5839_v36 }
 0x12a   : > { %5495 = vmatpush3.bf16.msra.mxu1 %v5840_v63  ;;  %5504 = vmatprep.subr.bf16.mxu0 %v5841_v5 }
 0x12b   : > { %5528 = vmatprep.subr.bf16.mxu1 %v5842_v7 }
 0x12c   : > { %v5186_v21 = vpop.f32.mrf.mxu0  ;;  %5473 = vmatmul.mubr.bf16.vlgmr.msra.gmra.mxu0 %v2570_v0 }
 0x12d   : > { %v900_v25 = vadd.f32 %v5186_v21, %v6636_v13  ;;  %v5210_v62 = vpop.f32.mrf.mxu1  ;;  %5497 = vmatmul.mubr.bf16.vlgmr.msra.gmra.mxu1 %v2720_v10  ;;  %5505 = vmatpush3.bf16.msra.mxu0 %v5841_v5  ;;  %v5855_v21 = vld [vmem:[%s7344_s1 + $0x3c0] sm:$0xff]  }
 0x12e   : > { %5529 = vmatpush3.bf16.msra.mxu1 %v5842_v7  ;;  %v867_v18 = vpop.f32.mrf.mxu0  ;;  %5506 = vmatprep.subr.bf16.mxu0 %v5843_v17 }
 0x12f   : > { %v6766_v41 = vadd.f32 %v5210_v62, %v900_v25  ;;  %v898_v13 = vadd.f32 %v867_v18, %v6648_v24  ;;  %v1017_v42 = vpop.f32.mrf.mxu1  ;;  %5530 = vmatprep.subr.bf16.mxu1 %v5844_v19  ;;  %5476 = vmatprep.mubr.bf16.mxu0 %v2571_v20  ;;  %v2722_v24 = vpack.c.bf16 %v6764_v38, %v6761_v35  ;;  %v5853_v20 = vld [vmem:[%s7344_s1 + $0x3c8] sm:$0xff]   ;;  %v5857_v25 = vld [vmem:[%s7344_s1 + $0x4f8] sm:$0xff]  }
 0x130   : > { %v5187_v43 = vpop.f32.mrf.mxu0  ;;  %5500 = vmatprep.mubr.bf16.mxu1 %v2721_v12  ;;  %v5856_v12 = vld [vmem:[%s7344_s1 + $0x440] sm:$0xff]   ;;  %v5858_v62 = vld [vmem:[%s7344_s1 + $0x1b8] sm:$0xff]   ;;  %v2871_v18 = vpack.c.bf16 %v6611_v47, %v6600_v39  ;;  %v2872_v39 = vpack.c.bf16 %v6631_v11, %v6614_v2 }
 0x131   : > { %v6774_v23 = vadd.f32 %v1017_v42, %v898_v13  ;;  %v901_v31 = vadd.f32 %v5187_v43, %v6660_v29  ;;  %v5211_v46 = vpop.f32.mrf.mxu1  ;;  %5507 = vmatpush3.bf16.msra.mxu0 %v5843_v17  ;;  %v5848_v29 = vld [vmem:[%s7344_s1 + $0x460] sm:$0xff]   ;;  %v5859_v13 = vld [vmem:[%s7344_s1 + $0x4f0] sm:$0xff]  }
 0x132   : > { %5531 = vmatpush3.bf16.msra.mxu1 %v5844_v19  ;;  %v870_v49 = vpop.f32.mrf.mxu0  ;;  %5508 = vmatprep.subr.bf16.mxu0 %v5845_v32  ;;  %v5860_v42 = vld [vmem:[%s7344_s1 + $0x1b0] sm:$0xff]   ;;  %v4551_v43 = vld [vmem:[%s5969_s10 + $0x1c0] sm:$0xff] }
 0x133   : > { %v6782_v50 = vadd.f32 %v5211_v46, %v901_v31  ;;  %v899_v51 = vadd.f32 %v870_v49, %v6668_v30  ;;  %v1020_v53 = vpop.f32.mrf.mxu1  ;;  %5532 = vmatprep.subr.bf16.mxu1 %v5846_v34  ;;  %v5861_v31 = vld [vmem:[%s7344_s1 + $0x4e8] sm:$0xff]  }
 0x134   : > { %v5190_v40 = vpop.f32.mrf.mxu0  ;;  %5477 = vmatmul.mubr.bf16.gmra.mxu0 %v2572_v45  ;;  %v4583_v2 = vld [vmem:[%s5969_s10 + $0x1c1] sm:$0xff] }
 0x135   : > { %v6792_v58 = vadd.f32 %v1020_v53, %v899_v51  ;;  %v904_v28 = vadd.f32 %v5190_v40, %v6675_v48  ;;  %5509 = vmatpush3.bf16.msra.mxu0 %v5845_v32  ;;  %v5214_v30 = vpop.f32.mrf.mxu1  ;;  %5501 = vmatmul.mubr.bf16.gmra.mxu1 %v2722_v24  ;;  %v3021_v32 = vpack.c.bf16 %v6727_v8, %v6710_v44  ;;  %v5863_v40 = vld [vmem:[%s7344_s1 + $0x4e0] sm:$0xff]  }
 0x136   : > { %5533 = vmatpush3.bf16.msra.mxu1 %v5846_v34  ;;  %v883_v56 = vpop.f32.mrf.mxu0  ;;  %5510 = vmatprep.subr.bf16.mxu0 %v5847_v37  ;;  %v3022_v44 = vpack.c.bf16 %v6752_v26, %v6730_v9  ;;  %v2873_v24 = vpack.c.bf16 %v4551_v43, %v6634_v55  ;;  %v3023_v53 = vpack.c.bf16 %v4583_v2, %v6755_v27  ;;  %v5864_v27 = vld [vmem:[%s7344_s1 + $0x1a0] sm:$0xff]  }
 0x137   : > { %v902_v14 = vadd.f32 %v883_v56, %v6681_v52  ;;  %v6799_v61 = vadd.f32 %v5214_v30, %v904_v28  ;;  %v1033_v36 = vpop.f32.mrf.mxu1  ;;  %5534 = vmatprep.subr.bf16.mxu1 %v5848_v29  ;;  %5520 = vmatprep.mubr.bf16.mxu0 %v2870_v33  ;;  %v5851_v52 = vld [vmem:[%s7344_s1 + $0x3d0] sm:$0xff]   ;;  %v4615_v2 = vld [vmem:[%s5969_s10 + $0x1c2] sm:$0xff] }
 0x138   : > { %v5191_v48 = vpop.f32.mrf.mxu0  ;;  %5544 = vmatprep.mubr.bf16.mxu1 %v3020_v54 }
 0x139   : > { %v905_v63 = vadd.f32 %v5191_v48, %v6687_v57  ;;  %v6805_v1 = vadd.f32 %v1033_v36, %v902_v14  ;;  %5511 = vmatpush3.bf16.msra.mxu0 %v5847_v37  ;;  %v5215_v5 = vpop.f32.mrf.mxu1  ;;  %v5852_v57 = vld [vmem:[%s7344_s1 + $0x450] sm:$0xff]  }
 0x13a   : > { %5535 = vmatpush3.bf16.msra.mxu1 %v5848_v29  ;;  %v886_v7 = vpop.f32.mrf.mxu0  ;;  %5512 = vmatprep.subr.bf16.mxu0 %v5849_v60  ;;  %v6869_v29 = vld [vmem:[%s5969_s10 + $0x1f0] sm:$0xff] }
 0x13b   : > { %v903_v0 = vadd.f32 %v886_v7, %v6692_v59  ;;  %v6811_v10 = vadd.f32 %v5215_v5, %v905_v63  ;;  %v1036_v17 = vpop.f32.mrf.mxu1  ;;  %5536 = vmatprep.subr.bf16.mxu1 %v5850_v22  ;;  %v5854_v59 = vld [vmem:[%s7344_s1 + $0x448] sm:$0xff]  }
 0x13d   : > { %v6816_v19 = vadd.f32 %v1036_v17, %v903_v0  ;;  %5513 = vmatpush3.bf16.msra.mxu0 %v5849_v60 }
 0x13e   : > { %5537 = vmatpush3.bf16.msra.mxu1 %v5850_v22  ;;  %5514 = vmatprep.subr.bf16.mxu0 %v5851_v52  ;;  %v5865_v22 = vld [vmem:[%s7344_s1 + $0x4d8] sm:$0xff]  }
 0x13f   : > { %5538 = vmatprep.subr.bf16.mxu1 %v5852_v57 }
 0x141   : > { %5515 = vmatpush3.bf16.msra.mxu0 %v5851_v52 }
 0x142   : > { %5539 = vmatpush3.bf16.msra.mxu1 %v5852_v57  ;;  %5516 = vmatprep.subr.bf16.mxu0 %v5853_v20 }
 0x143   : > { %5540 = vmatprep.subr.bf16.mxu1 %v5854_v59 }
 0x145   : > { %5517 = vmatpush3.bf16.msra.mxu0 %v5853_v20 }
 0x146   : > { %5541 = vmatpush3.bf16.msra.mxu1 %v5854_v59  ;;  %5518 = vmatprep.subr.bf16.mxu0 %v5855_v21 }
 0x147   : > { %5542 = vmatprep.subr.bf16.mxu1 %v5856_v12 }
 0x149   : > { %5519 = vmatpush3.bf16.msra.mxu0 %v5855_v21  ;;  %v5869_v21 = vld [vmem:[%s7344_s1 + $0x4c8] sm:$0xff]  }
 0x14a   : > { %5543 = vmatpush3.bf16.msra.mxu1 %v5856_v12  ;;  %5552 = vmatprep.subr.bf16.mxu0 %v5857_v25  ;;  %v5871_v12 = vld [vmem:[%s7344_s1 + $0x4c0] sm:$0xff]  }
 0x14b   : > { %5576 = vmatprep.subr.bf16.mxu1 %v5858_v62 }
 0x14c   : > { %v5234_v47 = vpop.f32.mrf.mxu0  ;;  %5521 = vmatmul.mubr.bf16.vlgmr.msra.gmra.mxu0 %v2871_v18  ;;  %v6925_v18 = vld [vmem:[%s5969_s10 + $0x210] sm:$0xff] }
 0x14d   : > { %v1201_v8 = vadd.f32 %v5234_v47, %v6766_v41  ;;  %v5258_v34 = vpop.f32.mrf.mxu1  ;;  %5545 = vmatmul.mubr.bf16.vlgmr.msra.gmra.mxu1 %v3021_v32  ;;  %5553 = vmatpush3.bf16.msra.mxu0 %v5857_v25  ;;  %v5862_v41 = vld [vmem:[%s7344_s1 + $0x1a8] sm:$0xff]   ;;  %v5872_v25 = vld [vmem:[%s7344_s1 + $0x180] sm:$0xff]   ;;  %v5873_v32 = vld [vmem:[%s7344_s1 + $0x238] sm:$0xff]  }
 0x14e   : > { %5577 = vmatpush3.bf16.msra.mxu1 %v5858_v62  ;;  %v1168_v45 = vpop.f32.mrf.mxu0  ;;  %5554 = vmatprep.subr.bf16.mxu0 %v5859_v13  ;;  %v6922_v62 = vld [vmem:[%s5969_s10 + $0x200] sm:$0xff] }
 0x14f   : > { %v6856_v11 = vadd.f32 %v5258_v34, %v1201_v8  ;;  %v1199_v9 = vadd.f32 %v1168_v45, %v6774_v23  ;;  %v1318_v26 = vpop.f32.mrf.mxu1  ;;  %5578 = vmatprep.subr.bf16.mxu1 %v5860_v42  ;;  %5524 = vmatprep.mubr.bf16.mxu0 %v2872_v39  ;;  %v4640_v23 = vld [vmem:[%s5969_s10 + $0x1e0] sm:$0xff]  ;;  %v3322_v39 = vpack.c.bf16 %v6925_v18, %v6922_v62  ;;  %v5875_v8 = vld [vmem:[%s7344_s1 + $0x230] sm:$0xff]  }
 0x150   : > { %v5235_v46 = vpop.f32.mrf.mxu0  ;;  %5548 = vmatprep.mubr.bf16.mxu1 %v3022_v44  ;;  %v3321_v56 = vpack.c.bf16 %v6869_v29, %v4640_v23  ;;  %v6938_v47 = vld [vmem:[%s5969_s10 + $0x220] sm:$0xff]  ;;  %v6941_v44 = vld [vmem:[%s5969_s10 + $0x230] sm:$0xff] }
 0x151   : > { %v6863_v49 = vadd.f32 %v1318_v26, %v1199_v9  ;;  %v1202_v37 = vadd.f32 %v5235_v46, %v6782_v50  ;;  %v5259_v51 = vpop.f32.mrf.mxu1  ;;  %5555 = vmatpush3.bf16.msra.mxu0 %v5859_v13  ;;  %v3170_v50 = vpack.c.bf16 %v6713_v3, %v6655_v6  ;;  %v5874_v13 = vld [vmem:[%s7344_s1 + $0x438] sm:$0xff]   ;;  %v3323_v43 = vpack.c.bf16 %v6941_v44, %v6938_v47  ;;  %v6962_v26 = vld [vmem:[%s5969_s10 + $0x250] sm:$0xff] }
 0x152   : > { %5579 = vmatpush3.bf16.msra.mxu1 %v5860_v42  ;;  %v1171_v33 = vpop.f32.mrf.mxu0  ;;  %5556 = vmatprep.subr.bf16.mxu0 %v5861_v31  ;;  %v3171_v42 = vpack.c.bf16 %v6735_v15, %v6716_v4  ;;  %v5876_v4 = vld [vmem:[%s7344_s1 + $0x430] sm:$0xff]   ;;  %v3172_v15 = vpack.c.bf16 %v6761_v35, %v6738_v16  ;;  %v5877_v16 = vld [vmem:[%s7344_s1 + $0x228] sm:$0xff]   ;;  %v6959_v35 = vld [vmem:[%s5969_s10 + $0x240] sm:$0xff] }
 0x153   : > { %v6874_v55 = vadd.f32 %v5259_v51, %v1202_v37  ;;  %v1200_v54 = vadd.f32 %v1171_v33, %v6792_v58  ;;  %v1321_v28 = vpop.f32.mrf.mxu1  ;;  %5580 = vmatprep.subr.bf16.mxu1 %v5862_v41  ;;  %v3173_v51 = vpack.c.bf16 %v4615_v2, %v6764_v38  ;;  %v6973_v23 = vld [vmem:[%s5969_s10 + $0x1f1] sm:$0xff]  ;;  %v5879_v38 = vld [vmem:[%s7344_s1 + $0x220] sm:$0xff]  }
 0x154   : > { %v5238_v30 = vpop.f32.mrf.mxu0  ;;  %5525 = vmatmul.mubr.bf16.gmra.mxu0 %v2873_v24  ;;  %v5878_v24 = vld [vmem:[%s7344_s1 + $0x428] sm:$0xff]  }
 0x155   : > { %v6883_v60 = vadd.f32 %v1321_v28, %v1200_v54  ;;  %v1205_v14 = vadd.f32 %v5238_v30, %v6799_v61  ;;  %5557 = vmatpush3.bf16.msra.mxu0 %v5861_v31  ;;  %v5262_v36 = vpop.f32.mrf.mxu1  ;;  %5549 = vmatmul.mubr.bf16.gmra.mxu1 %v3023_v53  ;;  %v5866_v61 = vld [vmem:[%s7344_s1 + $0x198] sm:$0xff]   ;;  %v4672_v53 = vld [vmem:[%s5969_s10 + $0x1e1] sm:$0xff] }
 0x156   : > { %5581 = vmatpush3.bf16.msra.mxu1 %v5862_v41  ;;  %v1184_v58 = vpop.f32.mrf.mxu0  ;;  %5558 = vmatprep.subr.bf16.mxu0 %v5863_v40 }
 0x157   : > { %v1203_v6 = vadd.f32 %v1184_v58, %v6805_v1  ;;  %v6890_v3 = vadd.f32 %v5262_v36, %v1205_v14  ;;  %v1334_v48 = vpop.f32.mrf.mxu1  ;;  %5582 = vmatprep.subr.bf16.mxu1 %v5864_v27  ;;  %5568 = vmatprep.mubr.bf16.mxu0 %v3170_v50  ;;  %v5867_v1 = vld [vmem:[%s7344_s1 + $0x4d0] sm:$0xff]   ;;  %v3622_v36 = vpack.c.bf16 %v6922_v62, %v6869_v29  ;;  %v5882_v29 = vld [vmem:[%s7344_s1 + $0x418] sm:$0xff]   ;;  %v5888_v62 = vld [vmem:[%s7344_s1 + $0x400] sm:$0xff]  }
 0x158   : > { %v5239_v63 = vpop.f32.mrf.mxu0  ;;  %5592 = vmatprep.mubr.bf16.mxu1 %v3321_v56  ;;  %v3471_v56 = vpack.c.bf16 %v6973_v23, %v4672_v53 }
 0x159   : > { %v1206_v5 = vadd.f32 %v5239_v63, %v6811_v10  ;;  %v6896_v7 = vadd.f32 %v1334_v48, %v1203_v6  ;;  %5559 = vmatpush3.bf16.msra.mxu0 %v5863_v40  ;;  %v5263_v52 = vpop.f32.mrf.mxu1  ;;  %v5868_v10 = vld [vmem:[%s7344_s1 + $0x190] sm:$0xff]   ;;  %v5881_v48 = vld [vmem:[%s7344_s1 + $0x218] sm:$0xff]  }
 0x15a   : > { %5583 = vmatpush3.bf16.msra.mxu1 %v5864_v27  ;;  %v1187_v0 = vpop.f32.mrf.mxu0  ;;  %5560 = vmatprep.subr.bf16.mxu0 %v5865_v22 }
 0x15b   : > { %v1204_v17 = vadd.f32 %v1187_v0, %v6816_v19  ;;  %v6902_v57 = vadd.f32 %v5263_v52, %v1206_v5  ;;  %v1337_v20 = vpop.f32.mrf.mxu1  ;;  %5584 = vmatprep.subr.bf16.mxu1 %v5866_v61  ;;  %v5870_v19 = vld [vmem:[%s7344_s1 + $0x188] sm:$0xff]  }
 0x15d   : > { %v6907_v59 = vadd.f32 %v1337_v20, %v1204_v17  ;;  %5561 = vmatpush3.bf16.msra.mxu0 %v5865_v22 }
 0x15e   : > { %5585 = vmatpush3.bf16.msra.mxu1 %v5866_v61  ;;  %5562 = vmatprep.subr.bf16.mxu0 %v5867_v1 }
 0x15f   : > { %5586 = vmatprep.subr.bf16.mxu1 %v5868_v10 }
 0x161   : > { %5563 = vmatpush3.bf16.msra.mxu0 %v5867_v1 }
 0x162   : > { %5587 = vmatpush3.bf16.msra.mxu1 %v5868_v10  ;;  %5564 = vmatprep.subr.bf16.mxu0 %v5869_v21 }
 0x163   : > { %5588 = vmatprep.subr.bf16.mxu1 %v5870_v19 }
 0x165   : > { %5565 = vmatpush3.bf16.msra.mxu0 %v5869_v21 }
 0x166   : > { %5589 = vmatpush3.bf16.msra.mxu1 %v5870_v19  ;;  %5566 = vmatprep.subr.bf16.mxu0 %v5871_v12 }
 0x167   : > { %5590 = vmatprep.subr.bf16.mxu1 %v5872_v25 }
 0x169   : > { %5567 = vmatpush3.bf16.msra.mxu0 %v5871_v12  ;;  %v5885_v12 = vld [vmem:[%s7344_s1 + $0x208] sm:$0xff]  }
 0x16a   : > { %5591 = vmatpush3.bf16.msra.mxu1 %v5872_v25  ;;  %5600 = vmatprep.subr.bf16.mxu0 %v5873_v32  ;;  %v5887_v25 = vld [vmem:[%s7344_s1 + $0x200] sm:$0xff]  }
 0x16b   : > { %5624 = vmatprep.subr.bf16.mxu1 %v5874_v13 }
 0x16c   : > { %v5282_v34 = vpop.f32.mrf.mxu0  ;;  %5569 = vmatmul.mubr.bf16.vlgmr.msra.gmra.mxu0 %v3171_v42  ;;  %v5889_v42 = vld [vmem:[%s7344_s1 + $0x4b8] sm:$0xff]  }
 0x16d   : > { %v1501_v45 = vadd.f32 %v5282_v34, %v6856_v11  ;;  %v5306_v31 = vpop.f32.mrf.mxu1  ;;  %5593 = vmatmul.mubr.bf16.vlgmr.msra.gmra.mxu1 %v3322_v39  ;;  %5601 = vmatpush3.bf16.msra.mxu0 %v5873_v32  ;;  %v7031_v32 = vld [vmem:[%s5969_s10 + $0x201] sm:$0xff]  ;;  %v5890_v34 = vld [vmem:[%s7344_s1 + $0x4b0] sm:$0xff]  }
 0x16e   : > { %5625 = vmatpush3.bf16.msra.mxu1 %v5874_v13  ;;  %v1468_v9 = vpop.f32.mrf.mxu0  ;;  %5602 = vmatprep.subr.bf16.mxu0 %v5875_v8  ;;  %v7034_v13 = vld [vmem:[%s5969_s10 + $0x211] sm:$0xff] }
 0x16f   : > { %v6964_v41 = vadd.f32 %v5306_v31, %v1501_v45  ;;  %v1499_v11 = vadd.f32 %v1468_v9, %v6863_v49  ;;  %v1619_v46 = vpop.f32.mrf.mxu1  ;;  %5626 = vmatprep.subr.bf16.mxu1 %v5876_v4  ;;  %5572 = vmatprep.mubr.bf16.mxu0 %v3172_v15  ;;  %v3324_v49 = vpack.c.bf16 %v6962_v26, %v6959_v35 }
 0x170   : > { %v5283_v37 = vpop.f32.mrf.mxu0  ;;  %5596 = vmatprep.mubr.bf16.mxu1 %v3323_v43  ;;  %v3472_v39 = vpack.c.bf16 %v7034_v13, %v7031_v32  ;;  %v3623_v15 = vpack.c.bf16 %v6938_v47, %v6925_v18  ;;  %v3624_v31 = vpack.c.bf16 %v6959_v35, %v6941_v44  ;;  %v4678_v18 = vld [vmem:[%s5969_s10 + $0x241] sm:$0xff]  ;;  %v7056_v47 = vld [vmem:[%s5969_s10 + $0x251] sm:$0xff] }
 0x171   : > { %v6975_v33 = vadd.f32 %v1619_v46, %v1499_v11  ;;  %v1502_v40 = vadd.f32 %v5283_v37, %v6874_v55  ;;  %v5307_v54 = vpop.f32.mrf.mxu1  ;;  %5603 = vmatpush3.bf16.msra.mxu0 %v5875_v8  ;;  %v5880_v55 = vld [vmem:[%s7344_s1 + $0x420] sm:$0xff]   ;;  %v5891_v11 = vld [vmem:[%s7344_s1 + $0x4a8] sm:$0xff]   ;;  %v3474_v37 = vpack.c.bf16 %v7056_v47, %v4678_v18 }
 0x172   : > { %5627 = vmatpush3.bf16.msra.mxu1 %v5876_v4  ;;  %v1471_v28 = vpop.f32.mrf.mxu0  ;;  %5604 = vmatprep.subr.bf16.mxu0 %v5877_v16  ;;  %v7042_v8 = vld [vmem:[%s5969_s10 + $0x221] sm:$0xff]  ;;  %v4677_v4 = vld [vmem:[%s5969_s10 + $0x231] sm:$0xff] }
 0x173   : > { %v6983_v27 = vadd.f32 %v5307_v54, %v1502_v40  ;;  %v1500_v50 = vadd.f32 %v1471_v28, %v6883_v60  ;;  %v1622_v30 = vpop.f32.mrf.mxu1  ;;  %5628 = vmatprep.subr.bf16.mxu1 %v5878_v24  ;;  %v3473_v43 = vpack.c.bf16 %v4677_v4, %v7042_v8  ;;  %v4711_v46 = vld [vmem:[%s5969_s10 + $0x260] sm:$0xff] }
 0x174   : > { %v5286_v14 = vpop.f32.mrf.mxu0  ;;  %5573 = vmatmul.mubr.bf16.gmra.mxu0 %v3173_v51  ;;  %v3625_v54 = vpack.c.bf16 %v4711_v46, %v6962_v26 }
 0x175   : > { %v6992_v58 = vadd.f32 %v1622_v30, %v1500_v50  ;;  %v1505_v22 = vadd.f32 %v5286_v14, %v6890_v3  ;;  %5605 = vmatpush3.bf16.msra.mxu0 %v5877_v16  ;;  %v5310_v6 = vpop.f32.mrf.mxu1  ;;  %5597 = vmatmul.mubr.bf16.gmra.mxu1 %v3324_v49 }
 0x176   : > { %5629 = vmatpush3.bf16.msra.mxu1 %v5878_v24  ;;  %v1484_v60 = vpop.f32.mrf.mxu0  ;;  %5606 = vmatprep.subr.bf16.mxu0 %v5879_v38 }
 0x177   : > { %v1503_v61 = vadd.f32 %v1484_v60, %v6896_v7  ;;  %v6999_v63 = vadd.f32 %v5310_v6, %v1505_v22  ;;  %v1635_v5 = vpop.f32.mrf.mxu1  ;;  %5630 = vmatprep.subr.bf16.mxu1 %v5880_v55  ;;  %5616 = vmatprep.mubr.bf16.mxu0 %v3471_v56  ;;  %v5883_v7 = vld [vmem:[%s7344_s1 + $0x210] sm:$0xff]  }
 0x178   : > { %v5287_v3 = vpop.f32.mrf.mxu0  ;;  %5640 = vmatprep.mubr.bf16.mxu1 %v3622_v36 }
 0x179   : > { %v1506_v52 = vadd.f32 %v5287_v3, %v6902_v57  ;;  %v7005_v0 = vadd.f32 %v1635_v5, %v1503_v61  ;;  %5607 = vmatpush3.bf16.msra.mxu0 %v5879_v38  ;;  %v5311_v1 = vpop.f32.mrf.mxu1  ;;  %v5884_v57 = vld [vmem:[%s7344_s1 + $0x410] sm:$0xff]  }
 0x17a   : > { %5631 = vmatpush3.bf16.msra.mxu1 %v5880_v55  ;;  %v1487_v17 = vpop.f32.mrf.mxu0  ;;  %5608 = vmatprep.subr.bf16.mxu0 %v5881_v48  ;;  %v3774_v55 = vpack.c.bf16 %v4678_v18, %v4677_v4 }
 0x17b   : > { %v1504_v20 = vadd.f32 %v1487_v17, %v6907_v59  ;;  %v7011_v10 = vadd.f32 %v5311_v1, %v1506_v52  ;;  %v1638_v21 = vpop.f32.mrf.mxu1  ;;  %5632 = vmatprep.subr.bf16.mxu1 %v5882_v29  ;;  %v5886_v59 = vld [vmem:[%s7344_s1 + $0x408] sm:$0xff]  }
 0x17c   : > { %v5895_v17 = vld [vmem:[%s7344_s1 + $0x488] sm:$0xff]  }
 0x17d   : > { %v7016_v19 = vadd.f32 %v1638_v21, %v1504_v20  ;;  %5609 = vmatpush3.bf16.msra.mxu0 %v5881_v48  ;;  %v4743_v20 = vld [vmem:[%s5969_s10 + $0x261] sm:$0xff] }
 0x17e   : > { %5633 = vmatpush3.bf16.msra.mxu1 %v5882_v29  ;;  %5610 = vmatprep.subr.bf16.mxu0 %v5883_v7  ;;  %v5894_v29 = vld [vmem:[%s7344_s1 + $0x490] sm:$0xff]   ;;  %v3775_v21 = vpack.c.bf16 %v4743_v20, %v7056_v47 }
 0x17f   : > { %5634 = vmatprep.subr.bf16.mxu1 %v5884_v57 }
 0x181   : > { %5611 = vmatpush3.bf16.msra.mxu0 %v5883_v7  ;;  %v5896_v7 = vld [vmem:[%s7344_s1 + $0x480] sm:$0xff]  }
 0x182   : > { %5635 = vmatpush3.bf16.msra.mxu1 %v5884_v57  ;;  %5612 = vmatprep.subr.bf16.mxu0 %v5885_v12 }
 0x183   : > { %5636 = vmatprep.subr.bf16.mxu1 %v5886_v59 }
 0x185   : > { %5613 = vmatpush3.bf16.msra.mxu0 %v5885_v12 }
 0x186   : > { %5637 = vmatpush3.bf16.msra.mxu1 %v5886_v59  ;;  %5614 = vmatprep.subr.bf16.mxu0 %v5887_v25 }
 0x187   : > { %5638 = vmatprep.subr.bf16.mxu1 %v5888_v62 }
 0x189   : > { %5615 = vmatpush3.bf16.msra.mxu0 %v5887_v25 }
 0x18a   : > { %5639 = vmatpush3.bf16.msra.mxu1 %v5888_v62  ;;  %5648 = vmatprep.subr.bf16.mxu0 %v5889_v42 }
 0x18b   : > { %5672 = vmatprep.subr.bf16.mxu1 %v5889_v42 }
 0x18c   : > { %v5330_v45 = vpop.f32.mrf.mxu0  ;;  %5617 = vmatmul.mubr.bf16.vlgmr.msra.gmra.mxu0 %v3472_v39 }
 0x18d   : > { %v1802_v2 = vadd.f32 %v5330_v45, %v6964_v41  ;;  %v5354_v9 = vpop.f32.mrf.mxu1  ;;  %5641 = vmatmul.mubr.bf16.vlgmr.msra.gmra.mxu1 %v3623_v15  ;;  %5649 = vmatpush3.bf16.msra.mxu0 %v5889_v42 }
 0x18e   : > { %5680 = vmatpush3.bf16.msra.mxu1 %v5889_v42  ;;  %v1769_v16 = vpop.f32.mrf.mxu0  ;;  %5650 = vmatprep.subr.bf16.mxu0 %v5890_v34 }
 0x18f   : > { %v7062_v24 = vadd.f32 %v5354_v9, %v1802_v2  ;;  %v1800_v44 = vadd.f32 %v1769_v16, %v6975_v33  ;;  %v1920_v35 = vpop.f32.mrf.mxu1  ;;  %5673 = vmatprep.subr.bf16.mxu1 %v5890_v34  ;;  %5620 = vmatprep.mubr.bf16.mxu0 %v3473_v43  ;;  %v5892_v33 = vld [vmem:[%s7344_s1 + $0x4a0] sm:$0xff]  }
 0x190   : > { %v5331_v41 = vpop.f32.mrf.mxu0  ;;  %5644 = vmatprep.mubr.bf16.mxu1 %v3624_v31 }
 0x191   : > { %v7066_v51 = vadd.f32 %v1920_v35, %v1800_v44  ;;  %v1803_v53 = vadd.f32 %v5331_v41, %v6983_v27  ;;  %v5355_v40 = vpop.f32.mrf.mxu1  ;;  %5651 = vmatpush3.bf16.msra.mxu0 %v5890_v34  ;;  %v3772_v27 = vpack.c.bf16 %v7031_v32, %v6973_v23 }
 0x192   : > { %5681 = vmatpush3.bf16.msra.mxu1 %v5890_v34  ;;  %v1772_v49 = vpop.f32.mrf.mxu0  ;;  %5652 = vmatprep.subr.bf16.mxu0 %v5891_v11 }
 0x193   : > { %v7073_v28 = vadd.f32 %v5355_v40, %v1803_v53  ;;  %v1801_v38 = vadd.f32 %v1772_v49, %v6992_v58  ;;  %v1923_v50 = vpop.f32.mrf.mxu1  ;;  %5674 = vmatprep.subr.bf16.mxu1 %v5891_v11  ;;  %v5893_v58 = vld [vmem:[%s7344_s1 + $0x498] sm:$0xff]  }
 0x194   : > { %v5334_v30 = vpop.f32.mrf.mxu0  ;;  %5621 = vmatmul.mubr.bf16.gmra.mxu0 %v3474_v37 }
 0x195   : > { %v7078_v26 = vadd.f32 %v1923_v50, %v1801_v38  ;;  %v1806_v56 = vadd.f32 %v5334_v30, %v6999_v63  ;;  %5653 = vmatpush3.bf16.msra.mxu0 %v5891_v11  ;;  %v5358_v14 = vpop.f32.mrf.mxu1  ;;  %5645 = vmatmul.mubr.bf16.gmra.mxu1 %v3625_v54 }
 0x196   : > { %5682 = vmatpush3.bf16.msra.mxu1 %v5891_v11  ;;  %v1785_v36 = vpop.f32.mrf.mxu0  ;;  %5654 = vmatprep.subr.bf16.mxu0 %v5892_v33 }
 0x197   : > { %v1804_v22 = vadd.f32 %v1785_v36, %v7005_v0  ;;  %v1957_v23 = vadd.f32 %v5358_v14, %v1806_v56  ;;  %v1936_v6 = vpop.f32.mrf.mxu1  ;;  %5675 = vmatprep.subr.bf16.mxu1 %v5892_v33  ;;  %5664 = vmatprep.mubr.bf16.mxu0 %v3772_v27 }
 0x198   : > { %v5335_v60 = vpop.f32.mrf.mxu0  ;;  %5668 = vmatprep.mubr.bf16.mxu1 %v3774_v55 }
 0x199   : > { %v1807_v48 = vadd.f32 %v5335_v60, %v7011_v10  ;;  %v1955_v61 = vadd.f32 %v1936_v6, %v1804_v22  ;;  %5655 = vmatpush3.bf16.msra.mxu0 %v5892_v33  ;;  %v5359_v63 = vpop.f32.mrf.mxu1  ;;  %v3773_v10 = vpack.c.bf16 %v7042_v8, %v7034_v13 }
 0x19a   : > { %5683 = vmatpush3.bf16.msra.mxu1 %v5892_v33  ;;  %v1788_v5 = vpop.f32.mrf.mxu0  ;;  %5656 = vmatprep.subr.bf16.mxu0 %v5893_v58 }
 0x19b   : > { %v1805_v3 = vadd.f32 %v1788_v5, %v7016_v19  ;;  %v1958_v52 = vadd.f32 %v5359_v63, %v1807_v48  ;;  %v1939_v0 = vpop.f32.mrf.mxu1  ;;  %5676 = vmatprep.subr.bf16.mxu1 %v5893_v58 }
 0x19d   : > { %v1956_v1 = vadd.f32 %v1939_v0, %v1805_v3  ;;  %5657 = vmatpush3.bf16.msra.mxu0 %v5893_v58 }
 0x19e   : > { %5684 = vmatpush3.bf16.msra.mxu1 %v5893_v58  ;;  %5658 = vmatprep.subr.bf16.mxu0 %v5894_v29 }
 0x19f   : > { %5677 = vmatprep.subr.bf16.mxu1 %v5894_v29 }
 0x1a1   : > { %5659 = vmatpush3.bf16.msra.mxu0 %v5894_v29 }
 0x1a2   : > { %5685 = vmatpush3.bf16.msra.mxu1 %v5894_v29  ;;  %5660 = vmatprep.subr.bf16.mxu0 %v5895_v17 }
 0x1a3   : > { %5678 = vmatprep.subr.bf16.mxu1 %v5895_v17 }
 0x1a5   : > { %5661 = vmatpush3.bf16.msra.mxu0 %v5895_v17 }
 0x1a6   : > { %5686 = vmatpush3.bf16.msra.mxu1 %v5895_v17  ;;  %5662 = vmatprep.subr.bf16.mxu0 %v5896_v7 }
 0x1a7   : > { %5679 = vmatprep.subr.bf16.mxu1 %v5896_v7 }
 0x1a9   : > { %5663 = vmatpush3.bf16.msra.mxu0 %v5896_v7 }
 0x1aa   : > { %5687 = vmatpush3.bf16.msra.mxu1 %v5896_v7 }
 0x1ac   : > { %v5378_v57 = vpop.f32.mrf.mxu0  ;;  %5665 = vmatmul.mubr.bf16.vlgmr.msra.gmra.mxu0 %v3773_v10 }
 0x1ad   : > { %v2103_v19 = vadd.f32 %v5378_v57, %v7062_v24  ;;  %v5402_v12 = vpop.f32.mrf.mxu1  ;;  %5669 = vmatmul.mubr.bf16.vlgmr.msra.gmra.mxu1 %v3775_v21 }
 0x1ae   : > { %v2070_v59 = vpop.f32.mrf.mxu0 }
 0x1af   : > { %v7101_v25 = vadd.f32 %v5402_v12, %v2103_v19  ;;  %v2101_v62 = vadd.f32 %v2070_v59, %v7066_v51  ;;  %v2221_v32 = vpop.f32.mrf.mxu1 }
 0x1b0   : > { %v5379_v42 = vpop.f32.mrf.mxu0 }
 0x1b1   : > { %v7104_v39 = vadd.f32 %v2221_v32, %v2101_v62  ;;  %v2104_v13 = vadd.f32 %v5379_v42, %v7073_v28  ;;  %v5403_v8 = vpop.f32.mrf.mxu1 }
 0x1b2   : > { %v2073_v4 = vpop.f32.mrf.mxu0 }
 0x1b3   : > { %v7107_v15 = vadd.f32 %v5403_v8, %v2104_v13  ;;  %v2102_v34 = vadd.f32 %v2073_v4, %v7078_v26  ;;  %v2224_v43 = vpop.f32.mrf.mxu1 }
 0x1b4   : > { %v5382_v45 = vpop.f32.mrf.mxu0 }
 0x1b5   : > { %v7110_v31 = vadd.f32 %v2224_v43, %v2102_v34  ;;  %v2107_v2 = vadd.f32 %v5382_v45, %v1957_v23  ;;  %v5406_v9 = vpop.f32.mrf.mxu1 }
 0x1b6   : > { %v2086_v18 = vpop.f32.mrf.mxu0 }
 0x1b7   : > { %v2105_v47 = vadd.f32 %v2086_v18, %v1955_v61  ;;  %v7112_v16 = vadd.f32 %v5406_v9, %v2107_v2  ;;  %v2237_v11 = vpop.f32.mrf.mxu1 }
 0x1b8   : > { %v5383_v46 = vpop.f32.mrf.mxu0 }
 0x1b9   : > { %v2108_v24 = vadd.f32 %v5383_v46, %v1958_v52  ;;  %v7114_v44 = vadd.f32 %v2237_v11, %v2105_v47  ;;  %v5407_v35 = vpop.f32.mrf.mxu1 }
 0x1ba   : > { %v2089_v41 = vpop.f32.mrf.mxu0 }
 0x1bb   : > { %v2106_v37 = vadd.f32 %v2089_v41, %v1956_v1  ;;  %v7116_v51 = vadd.f32 %v5407_v35, %v2108_v24  ;;  %v2240_v53 = vpop.f32.mrf.mxu1 }
 0x1bd   : > { %v7118_v40 = vadd.f32 %v2240_v53, %v2106_v37 }
 0x1cc   : > { %v7120_v54 = vpop.f32.mrf.mxu0 }
 0x1cd   : > { %v7126_v28 = vpop.f32.mrf.mxu1 }
 0x1ce   : > { %v7122_v49 = vpop.f32.mrf.mxu0 }
 0x1cf   : > { %v7130_v50 = vpop.f32.mrf.mxu1 }
 0x1d0   : > { %v7124_v33 = vpop.f32.mrf.mxu0 }
 0x1d1   : > { %v7132_v30 = vpop.f32.mrf.mxu1 }
 0x1d2   : > { %v7128_v38 = vpop.f32.mrf.mxu0 }
 0x1d3   : > { %v7134_v26 = vpop.f32.mrf.mxu1 }
 0x1d4   : > { %v5430_v27 = vpop.f32.mrf.mxu0 }
 0x1d5   : > { %v5454_v14 = vpop.f32.mrf.mxu1 }
 0x1d6   : > { %v2387_v55 = vpop.f32.mrf.mxu0 }
 0x1d7   : > { %v7140_v58 = vpop.f32.mrf.mxu1 }
 0x1d8   : > { %v7136_v56 = vpop.f32.mrf.mxu0 }
 0x1d9   : > { %v7144_v23 = vpop.f32.mrf.mxu1 }
 0x1da   : > { %v7138_v36 = vpop.f32.mrf.mxu0 }
 0x1db   : > { %v7148_v60 = vpop.f32.mrf.mxu1 }
 0x1ec   : > { %v7142_v22 = vpop.f32.mrf.mxu0 }
 0x1ed   : > { %v7152_v61 = vpop.f32.mrf.mxu1 }
 0x1ee   : > { %v7146_v6 = vpop.f32.mrf.mxu0 }
 0x1ef   : > { %v7156_v5 = vpop.f32.mrf.mxu1 }
 0x1f0   : > { %v7150_v48 = vpop.f32.mrf.mxu0 }
 0x1f1   : > { %v7158_v3 = vpop.f32.mrf.mxu1 }
 0x1f2   : > { %v7154_v63 = vpop.f32.mrf.mxu0 }
 0x1f3   : > { %v7160_v0 = vpop.f32.mrf.mxu1 }
 0x1f4   : > { %v5478_v29 = vpop.f32.mrf.mxu0 }
 0x1f5   : > { %v7162_v1 = vpop.f32.mrf.mxu1 }
 0x1f6   : > { %v2688_v52 = vpop.f32.mrf.mxu0 }
 0x1f7   : > { %v7166_v7 = vpop.f32.mrf.mxu1 }
 0x1f8   : > { %v7164_v17 = vpop.f32.mrf.mxu0 }
 0x1f9   : > { %v7172_v21 = vpop.f32.mrf.mxu1 }
 0x1fa   : > { %v7168_v20 = vpop.f32.mrf.mxu0 }
 0x1fb   : > { %v7176_v19 = vpop.f32.mrf.mxu1 }
 0x20c   : > { %v7170_v10 = vpop.f32.mrf.mxu0 }
 0x20d   : > { %v7178_v12 = vpop.f32.mrf.mxu1 }
 0x20e   : > { %v7174_v57 = vpop.f32.mrf.mxu0 }
 0x20f   : > { %v7182_v62 = vpop.f32.mrf.mxu1 }
 0x210   : > { %v7180_v59 = vpop.f32.mrf.mxu0 }
 0x211   : > { %v7186_v42 = vpop.f32.mrf.mxu1 }
 0x212   : > { %v7184_v32 = vpop.f32.mrf.mxu0  ;;  %7347 = vst [vmem:[#allocation2_spill] sm:$0xff] %v7186_v42 }
 0x213   : > { %v7188_v8 = vpop.f32.mrf.mxu1 }
 0x214   : > { %v5526_v13 = vpop.f32.mrf.mxu0  ;;  %7348 = vst [vmem:[#allocation3_spill] sm:$0xff] %v7188_v8 }
 0x215   : > { %v7192_v34 = vpop.f32.mrf.mxu1 }
 0x216   : > { %v7190_v4 = vpop.f32.mrf.mxu0 }
 0x217   : > { %v7196_v45 = vpop.f32.mrf.mxu1 }
 0x218   : > { %v7194_v43 = vpop.f32.mrf.mxu0 }
 0x219   : > { %v7200_v9 = vpop.f32.mrf.mxu1 }
 0x21a   : > { %v7198_v2 = vpop.f32.mrf.mxu0  ;;  %7349 = vst [vmem:[#allocation4_spill] sm:$0xff] %v7200_v9 }
 0x21b   : > { %v7204_v47 = vpop.f32.mrf.mxu1 }
 0x21c   : > { %7350 = vst [vmem:[#allocation5_spill] sm:$0xff] %v7204_v47 }
 0x22c   : > { %v7202_v18 = vpop.f32.mrf.mxu0 }
 0x22d   : > { %v7208_v46 = vpop.f32.mrf.mxu1 }
 0x22e   : > { %v7206_v11 = vpop.f32.mrf.mxu0  ;;  %7352 = vst [vmem:[#allocation7_spill] sm:$0xff] %v7208_v46 }
 0x22f   : > { %7351 = vst [vmem:[#allocation6_spill] sm:$0xff] %v7206_v11  ;;  %v7212_v35 = vpop.f32.mrf.mxu1 }
 0x230   : > { %v7210_v24 = vpop.f32.mrf.mxu0  ;;  %7354 = vst [vmem:[#allocation9_spill] sm:$0xff] %v7212_v35 }
 0x231   : > { %7353 = vst [vmem:[#allocation8_spill] sm:$0xff] %v7210_v24  ;;  %v7216_v37 = vpop.f32.mrf.mxu1 }
 0x232   : > { %v7214_v41 = vpop.f32.mrf.mxu0  ;;  %7356 = vst [vmem:[#allocation11_spill] sm:$0xff] %v7216_v37  ;;  %v2404_v37 = vadd.f32 %v7120_v54, %v7101_v25  ;;  %v2409_v25 = vadd.f32 %v7136_v56, %v7116_v51 }
 0x233   : > { %7355 = vst [vmem:[#allocation10_spill] sm:$0xff] %v7214_v41  ;;  %v7220_v8 = vpop.f32.mrf.mxu1 }
 0x234   : > { %v7218_v53 = vpop.f32.mrf.mxu0  ;;  %7357 = vst [vmem:[#allocation12_spill] sm:$0xff] %v7220_v8  ;;  %v2408_v8 = vadd.f32 %v5430_v27, %v7112_v16 }
 0x235   : > { %v7222_v9 = vpop.f32.mrf.mxu1 }
 0x236   : > { %7358 = vst [vmem:[#allocation13_spill] sm:$0xff] %v7222_v9  ;;  %v7224_v42 = vpop.f32.mrf.mxu0  ;;  %v2402_v9 = vadd.f32 %v7122_v49, %v7104_v39  ;;  %v2403_v39 = vadd.f32 %v7128_v38, %v7110_v31 }
 0x237   : > { %7359 = vst [vmem:[#allocation14_spill] sm:$0xff] %v7224_v42  ;;  %v7226_v47 = vpop.f32.mrf.mxu1 }
 0x238   : > { %7360 = vst [vmem:[#allocation15_spill] sm:$0xff] %v7226_v47  ;;  %v7228_v11 = vpop.f32.mrf.mxu0  ;;  %v2406_v47 = vadd.f32 %v2387_v55, %v7114_v44  ;;  %v2553_v16 = vadd.f32 %v7130_v50, %v2402_v9  ;;  %v2560_v50 = vadd.f32 %v7144_v23, %v2409_v25  ;;  %v2554_v31 = vadd.f32 %v7134_v26, %v2403_v39  ;;  %v7369_v25 = vld [vmem:[#allocation3_spill] sm:$0xff]  ;;  %v7371_v39 = vld [vmem:[#allocation8_spill] sm:$0xff] }
 0x239   : > { %7361 = vst [vmem:[#allocation16_spill] sm:$0xff] %v7228_v11  ;;  %v7230_v46 = vpop.f32.mrf.mxu1 }
 0x23a   : > { %7362 = vst [vmem:[#allocation17_spill] sm:$0xff] %v7230_v46  ;;  %v7232_v24 = vpop.f32.mrf.mxu0  ;;  %v2555_v46 = vadd.f32 %v7126_v28, %v2404_v37  ;;  %v2557_v44 = vadd.f32 %v7140_v58, %v2406_v47  ;;  %v2407_v28 = vadd.f32 %v7138_v36, %v7118_v40  ;;  %v2703_v51 = vadd.f32 %v7146_v6, %v2553_v16  ;;  %v7365_v47 = vld [vmem:[#allocation2_spill] sm:$0xff]  ;;  %v7370_v16 = vld [vmem:[#allocation7_spill] sm:$0xff] }
 0x23b   : > { %7363 = vst [vmem:[#allocation18_spill] sm:$0xff] %v7232_v24  ;;  %v7238_v41 = vpop.f32.mrf.mxu1  ;;  %v2405_v24 = vadd.f32 %v7124_v33, %v7107_v15  ;;  %v2710_v58 = vadd.f32 %v7164_v17, %v2560_v50  ;;  %v2704_v23 = vadd.f32 %v7154_v63, %v2554_v31 }
 0x23c   : > { %v2705_v54 = vadd.f32 %v7142_v22, %v2555_v46  ;;  %v2707_v55 = vadd.f32 %v2688_v52, %v2557_v44  ;;  %v2558_v40 = vadd.f32 %v7148_v60, %v2407_v28  ;;  %v2853_v22 = vadd.f32 %v7156_v5, %v2703_v51  ;;  %v7375_v51 = vld [vmem:[#allocation9_spill] sm:$0xff] }
 0x23d   : > { %v2556_v33 = vadd.f32 %v7132_v30, %v2405_v24  ;;  %v2854_v63 = vadd.f32 %v7160_v0, %v2704_v23  ;;  %v7373_v44 = vld [vmem:[#allocation13_spill] sm:$0xff] }
 0x23e   : > { %v2855_v38 = vadd.f32 %v7152_v61, %v2705_v54  ;;  %v2857_v26 = vadd.f32 %v7166_v7, %v2707_v55  ;;  %v2708_v61 = vadd.f32 %v7168_v20, %v2558_v40  ;;  %v3004_v60 = vadd.f32 %v7174_v57, %v2853_v22  ;;  %v7368_v37 = vld [vmem:[#allocation14_spill] sm:$0xff]  ;;  %v7372_v54 = vld [vmem:[#allocation5_spill] sm:$0xff] }
 0x23f   : > { %v2706_v56 = vadd.f32 %v7150_v48, %v2556_v33  ;;  %v7376_v55 = vld [vmem:[#allocation10_spill] sm:$0xff] }
 0x240   : > { %v3006_v6 = vadd.f32 %v7170_v10, %v2855_v38  ;;  %v3008_v17 = vadd.f32 %v7190_v4, %v2857_v26  ;;  %v2858_v20 = vadd.f32 %v7176_v19, %v2708_v61  ;;  %v7366_v19 = vld [vmem:[#allocation6_spill] sm:$0xff]  ;;  %v7374_v28 = vld [vmem:[#allocation16_spill] sm:$0xff]  ;;  %v7380_v26 = vld [vmem:[#allocation11_spill] sm:$0xff] }
 0x242   : > { %v3156_v10 = vadd.f32 %v7178_v12, %v3006_v6  ;;  %v3158_v9 = vadd.f32 %v7196_v45, %v3008_v17  ;;  %v3009_v0 = vadd.f32 %v7198_v2, %v2858_v20  ;;  %v7379_v22 = vld [vmem:[#allocation18_spill] sm:$0xff] }
 0x244   : > { %v3306_v4 = vadd.f32 %v7202_v18, %v3156_v10  ;;  %v3159_v2 = vadd.f32 %v7372_v54, %v3009_v0 }
 0x246   : > { %v3457_v18 = vadd.f32 %v7370_v16, %v3306_v4  ;;  %v3309_v23 = vadd.f32 %v7379_v22, %v3159_v2 }
 0x24c   : > { %v7234_v35 = vpop.f32.mrf.mxu0 }
 0x24d   : > { %7364 = vst [vmem:[#allocation19_spill] sm:$0xff] %v7234_v35  ;;  %v7243_v42 = vpop.f32.mrf.mxu1  ;;  %v2559_v35 = vadd.f32 %v5454_v14, %v2408_v8 }
 0x24e   : > { %v7246_v11 = vpop.f32.mrf.mxu0 }
 0x24f   : > { %v7257_v49 = vpop.f32.mrf.mxu1  ;;  %v2709_v27 = vadd.f32 %v5478_v29, %v2559_v35  ;;  %v2856_v29 = vadd.f32 %v7158_v3, %v2706_v56  ;;  %v7367_v35 = vld [vmem:[#allocation4_spill] sm:$0xff] }
 0x250   : > { %v7262_v15 = vpop.f32.mrf.mxu0 }
 0x251   : > { %v7270_v14 = vpop.f32.mrf.mxu1  ;;  %v2859_v36 = vadd.f32 %v7162_v1, %v2709_v27  ;;  %v2860_v1 = vadd.f32 %v7172_v21, %v2710_v58  ;;  %v3007_v7 = vadd.f32 %v7180_v59, %v2856_v29  ;;  %v3005_v21 = vadd.f32 %v7184_v32, %v2854_v63  ;;  %v7381_v29 = vld [vmem:[#allocation17_spill] sm:$0xff]  ;;  %v7382_v63 = vld [vmem:[#allocation12_spill] sm:$0xff] }
 0x252   : > { %v3577_v30 = vpop.f32.mrf.mxu0 }
 0x253   : > { %v3010_v48 = vadd.f32 %v5526_v13, %v2859_v36  ;;  %v7282_v52 = vpop.f32.mrf.mxu1  ;;  %v3011_v57 = vadd.f32 %v7194_v43, %v2860_v1  ;;  %v3154_v13 = vadd.f32 %v7182_v62, %v3004_v60  ;;  %v3157_v46 = vadd.f32 %v7365_v47, %v3007_v7  ;;  %v7378_v36 = vld [vmem:[#allocation15_spill] sm:$0xff] }
 0x254   : > { %v5622_v5 = vpop.f32.mrf.mxu0  ;;  %v3308_v62 = vadd.f32 %v7368_v37, %v3158_v9  ;;  %v3155_v32 = vadd.f32 %v7369_v25, %v3005_v21  ;;  %v7377_v38 = vld [vmem:[#allocation19_spill] sm:$0xff] }
 0x255   : > { %v5646_v8 = vpop.f32.mrf.mxu1  ;;  %v3160_v3 = vadd.f32 %v7192_v34, %v3010_v48  ;;  %v3304_v24 = vadd.f32 %v7366_v19, %v3154_v13  ;;  %v3161_v43 = vadd.f32 %v7367_v35, %v3011_v57  ;;  %v3307_v45 = vadd.f32 %v7371_v39, %v3157_v46 }
 0x256   : > { %v3590_v59 = vpop.f32.mrf.mxu0  ;;  %v3305_v31 = vadd.f32 %v7376_v55, %v3155_v32  ;;  %v3607_v56 = vadd.f32 %v7377_v38, %v3457_v18  ;;  %v3459_v58 = vadd.f32 %v7378_v36, %v3308_v62  ;;  %v3460_v57 = vadd.f32 %v7238_v41, %v3309_v23 }
 0x257   : > { %v3310_v12 = vadd.f32 %v7218_v53, %v3160_v3  ;;  %v3741_v34 = vpop.f32.mrf.mxu1  ;;  %v3311_v27 = vadd.f32 %v7374_v28, %v3161_v43  ;;  %v3455_v50 = vadd.f32 %v7375_v51, %v3304_v24  ;;  %v3458_v61 = vadd.f32 %v7380_v26, %v3307_v45 }
 0x258   : > { %v5623_v33 = vpop.f32.mrf.mxu0  ;;  %v3609_v1 = vadd.f32 %v3590_v59, %v3459_v58  ;;  %v3456_v10 = vadd.f32 %v7382_v63, %v3305_v31  ;;  %v3758_v7 = vadd.f32 %v7243_v42, %v3607_v56 }
 0x259   : > { %v3461_v53 = vadd.f32 %v7373_v44, %v3310_v12  ;;  %v5647_v40 = vpop.f32.mrf.mxu1  ;;  %v3605_v48 = vadd.f32 %v7246_v11, %v3455_v50  ;;  %v3462_v60 = vadd.f32 %v7381_v29, %v3311_v27  ;;  %v3608_v20 = vadd.f32 %v7262_v15, %v3458_v61  ;;  %v4768_v11 = vld [vmem:[%s7345_s2] ss:$0 sm:$0xff] }
 0x25a   : > { %v3593_v17 = vpop.f32.mrf.mxu0  ;;  %v3606_v9 = vadd.f32 %v3577_v30, %v3456_v10  ;;  %v3760_v59 = vadd.f32 %v3741_v34, %v3609_v1 }
 0x25b   : > { %v3611_v6 = vadd.f32 %v5622_v5, %v3461_v53  ;;  %v3744_v3 = vpop.f32.mrf.mxu1  ;;  %v3612_v5 = vadd.f32 %v5623_v33, %v3462_v60  ;;  %v3756_v4 = vadd.f32 %v7257_v49, %v3605_v48  ;;  %v3610_v42 = vadd.f32 %v3593_v17, %v3460_v57 }
 0x25c   : > { %v3759_v46 = vadd.f32 %v7270_v14, %v3608_v20  ;;  %v3757_v34 = vadd.f32 %v7282_v52, %v3606_v9 }
 0x25d   : > { %v3762_v13 = vadd.f32 %v5646_v8, %v3611_v6  ;;  %v3763_v24 = vadd.f32 %v5647_v40, %v3612_v5  ;;  %v3761_v25 = vadd.f32 %v3744_v3, %v3610_v42 }
 0x26c   : > { %v5666_v21 = vpop.f32.mrf.mxu0 }
 0x26d   : > { %v3908_v0 = vadd.f32 %v5666_v21, %v3758_v7  ;;  %v5670_v12 = vpop.f32.mrf.mxu1 }
 0x26e   : > { %v3912_v47 = vadd.f32 %v5670_v12, %v3762_v13  ;;  %v3875_v15 = vpop.f32.mrf.mxu0 }
 0x26f   : > { %v3923_v41 = vadd.f32 %v4768_v11, %v3908_v0  ;;  %v3906_v8 = vadd.f32 %v3875_v15, %v3756_v4  ;;  %v3891_v19 = vpop.f32.mrf.mxu1 }
 0x270   : > { %v3927_v49 = vadd.f32 %v4768_v11, %v3912_v47  ;;  %v3910_v30 = vadd.f32 %v3891_v19, %v3760_v59  ;;  %v5667_v35 = vpop.f32.mrf.mxu0 }
 0x271   : > { %v3931_v43 = vmax.f32 %v3923_v41, 0.0  ;;  %v3921_v37 = vadd.f32 %v4768_v11, %v3906_v8  ;;  %v3909_v62 = vadd.f32 %v5667_v35, %v3759_v46  ;;  %v5671_v14 = vpop.f32.mrf.mxu1 }
 0x272   : > { %v3935_v32 = vmax.f32 %v3927_v49, 0.0  ;;  %v3925_v16 = vadd.f32 %v4768_v11, %v3910_v30  ;;  %v3913_v18 = vadd.f32 %v5671_v14, %v3763_v24  ;;  %v3878_v39 = vpop.f32.mrf.mxu0 }
 0x273   : > { %3939 = vst [vmem:[%s7329_s11 + $0x10] sm:$0xff] %v3931_v43  ;;  %v3929_v45 = vmax.f32 %v3921_v37, 0.0  ;;  %v3924_v54 = vadd.f32 %v4768_v11, %v3909_v62  ;;  %v3907_v2 = vadd.f32 %v3878_v39, %v3757_v34  ;;  %v3894_v44 = vpop.f32.mrf.mxu1 }
 0x274   : > { %3943 = vst [vmem:[%s7329_s11 + $0x30] sm:$0xff] %v3935_v32  ;;  %v3933_v52 = vmax.f32 %v3925_v16, 0.0  ;;  %v3928_v53 = vadd.f32 %v4768_v11, %v3913_v18  ;;  %v3911_v28 = vadd.f32 %v3894_v44, %v3761_v25 }
 0x275   : > { %3937 = vst [vmem:[%s7329_s11] sm:$0xff] %v3929_v45  ;;  %v3932_v27 = vmax.f32 %v3924_v54, 0.0  ;;  %v3922_v33 = vadd.f32 %v4768_v11, %v3907_v2 }
 0x276   : > { %3941 = vst [vmem:[%s7329_s11 + $0x20] sm:$0xff] %v3933_v52  ;;  %v3936_v51 = vmax.f32 %v3928_v53, 0.0  ;;  %v3926_v50 = vadd.f32 %v4768_v11, %v3911_v28 }
 0x277   : > { %3940 = vst [vmem:[%s7329_s11 + $0x18] sm:$0xff] %v3932_v27  ;;  %v3930_v55 = vmax.f32 %v3922_v33, 0.0 }
 0x278   : > { %3944 = vst [vmem:[%s7329_s11 + $0x38] sm:$0xff] %v3936_v51  ;;  %v3934_v31 = vmax.f32 %v3926_v50, 0.0 }
 0x279   : > { %3938 = vst [vmem:[%s7329_s11 + $0x8] sm:$0xff] %v3930_v55 }
 0x27a   : > { %3942 = vst [vmem:[%s7329_s11 + $0x28] sm:$0xff] %v3934_v31 }
 0x27b PF: > { %s13_s12 = sadd.s32 1, %s5903_s12  }
 0x27c   : > { %p10_p4 = scmp.ge.s32.totalorder %s13_s12, 4  }
 0x27e   :  { %12 = sbr.rel (!%p10_p4) target bundleno = 1 (0x1), region = 95 }

// kernel: hyper_analysis_forward.5
= control target key start
LH: loop header
LB: loop body
LE: loop exit
PB: predicated region body
PF: predicated region fallthrough
CT: control target
= control target key end

     0   :  { %s5917_s12 = smov 0   ;;  %s7335_s0 = inlined_call_operand.vmem [shape: f32[2,4,10,10,128], index: 0, kind: input, shape index: {}]   ;;  %s7336_s1 = inlined_call_operand.vmem [shape: bf16[25,128,128], index: 1, kind: input, shape index: {}]   ;;  %s7337_s2 = inlined_call_operand.vmem [shape: f32[1,128], index: 2, kind: input, shape index: {}]   ;;  %s7338_s3 = inlined_call_operand.vmem [shape: f32[2,64,128], index: 3, kind: output, shape index: {}]  }
   0x1 LB: > { %s3992_s13 = sadd.s32 4294967295, %s5895_s12   ;;  %p3996_p0 = scmp.ge.s32.totalorder %s5895_s12, 1  ;;  %s5895_s12 = sphi %s5917_s12, %s13_s12  }
   0x2   : > { %p137_p1 = scmp.lt.s32.totalorder %s5895_s12, 3 }
   0x4   : > { %p138_p2 = pnand %p3996_p0, %p137_p1 }
   0x6   : > { %141 = sbr.rel (%p138_p2) target bundleno = 633 (0x279), region = 32 }
   0xb   : > { %v5689_v0 = vld [vmem:[%s7336_s1 + $0xb8] sm:$0xff]   ;;  %p161_p3 = scmp.lt.s32.totalorder %s3992_s13, 1  ;;  %v5691_v2 = vld [vmem:[%s7336_s1 + $0xb0] sm:$0xff]   ;;  %v5693_v4 = vld [vmem:[%s7336_s1 + $0xa8] sm:$0xff]  }
   0xc   : > { %v5690_v1 = vld [vmem:[%s7336_s1 + $0x38] sm:$0xff]   ;;  %5064 = vmatprep.subr.bf16.mxu0 %v5689_v0  ;;  %v5692_v3 = vld [vmem:[%s7336_s1 + $0x30] sm:$0xff]   ;;  %v5694_v5 = vld [vmem:[%s7336_s1 + $0x28] sm:$0xff]  }
   0xd   : > { %5088 = vmatprep.subr.bf16.mxu1 %v5690_v1  ;;  %5065 = vmatpush3.bf16.msra.mxu0 %v5689_v0  ;;  %s7376_s13 = smov (!%p161_p3, %s3992_s13), 1  ;;  %v5695_v6 = vld [vmem:[%s7336_s1 + $0xa0] sm:$0xff]   ;;  %v5697_v8 = vld [vmem:[%s7336_s1 + $0x98] sm:$0xff]   ;;  %v5699_v10 = vld [vmem:[%s7336_s1 + $0x90] sm:$0xff]  }
   0xe   : > { %5089 = vmatpush3.bf16.msra.mxu1 %v5690_v1  ;;  %5066 = vmatprep.subr.bf16.mxu0 %v5691_v2  ;;  %v5696_v7 = vld [vmem:[%s7336_s1 + $0x20] sm:$0xff]   ;;  %s5680_s30 = smul.u32 640, %s7376_s13  ;;  %v5698_v9 = vld [vmem:[%s7336_s1 + $0x18] sm:$0xff]   ;;  %v5700_v14 = vld [vmem:[%s7336_s1 + $0x10] sm:$0xff]  }
   0xf   : > { %5090 = vmatprep.subr.bf16.mxu1 %v5692_v3  ;;  %v5701_v18 = vld [vmem:[%s7336_s1 + $0x88] sm:$0xff]   ;;  %v5703_v20 = vld [vmem:[%s7336_s1 + $0x80] sm:$0xff]   ;;  %v5705_v26 = vld [vmem:[%s7336_s1 + $0x138] sm:$0xff]  }
  0x10   : > { %s5961_s10 = scalar_lea.vmem %s7335_s0, %s5680_s30  ;;  %v5702_v19 = vld [vmem:[%s7336_s1 + $0x8] sm:$0xff]   ;;  %v5704_v21 = vld [vmem:[%s7336_s1] sm:$0xff]   ;;  %v5706_v27 = vld [vmem:[%s7336_s1 + $0x2b8] sm:$0xff]  }
  0x11   : > { %5067 = vmatpush3.bf16.msra.mxu0 %v5691_v2  ;;  %v200_v11 = vld [vmem:[%s5961_s10 + $0x1] sm:$0xff]  ;;  %v5968_v12 = vld [vmem:[%s5961_s10 + $0x11] sm:$0xff] }
  0x12   : > { %5091 = vmatpush3.bf16.msra.mxu1 %v5692_v3  ;;  %5068 = vmatprep.subr.bf16.mxu0 %v5693_v4  ;;  %v172_v13 = vld [vmem:[%s5961_s10] sm:$0xff]  ;;  %v208_v15 = vpack.c.bf16 %v5968_v12, %v200_v11  ;;  %v5976_v16 = vld [vmem:[%s5961_s10 + $0x10] sm:$0xff]  ;;  %v5709_v38 = vld [vmem:[%s7336_s1 + $0x128] sm:$0xff]  }
  0x13   : > { %5092 = vmatprep.subr.bf16.mxu1 %v5694_v5  ;;  %v180_v17 = vpack.c.bf16 %v5976_v16, %v172_v13  ;;  %v5992_v22 = vld [vmem:[%s5961_s10 + $0x21] sm:$0xff]  ;;  %v5995_v23 = vld [vmem:[%s5961_s10 + $0x31] sm:$0xff] }
  0x14   : > { %5080 = vmatprep.mubr.bf16.mxu0 %v208_v15  ;;  %v174_v24 = vld [vmem:[%s5961_s10 + $0x20] sm:$0xff]  ;;  %v5999_v25 = vld [vmem:[%s5961_s10 + $0x30] sm:$0xff]  ;;  %v6009_v28 = vpack.c.bf16 %v5995_v23, %v5992_v22  ;;  %v5710_v43 = vld [vmem:[%s7336_s1 + $0x2a8] sm:$0xff]  }
  0x15   : > { %5069 = vmatpush3.bf16.msra.mxu0 %v5693_v4  ;;  %5104 = vmatprep.mubr.bf16.mxu1 %v180_v17  ;;  %v5707_v29 = vld [vmem:[%s7336_s1 + $0x130] sm:$0xff]   ;;  %v6015_v30 = vld [vmem:[%s5961_s10 + $0x41] sm:$0xff]  ;;  %v6024_v33 = vpack.c.bf16 %v5999_v25, %v174_v24  ;;  %v614_v51 = vpack.c.bf16 %v174_v24, %v5976_v16  ;;  %v5713_v52 = vld [vmem:[%s7336_s1 + $0x118] sm:$0xff]  }
  0x16   : > { %5093 = vmatpush3.bf16.msra.mxu1 %v5694_v5  ;;  %5070 = vmatprep.subr.bf16.mxu0 %v5695_v6  ;;  %v6018_v31 = vld [vmem:[%s5961_s10 + $0x51] sm:$0xff]  ;;  %v6021_v32 = vld [vmem:[%s5961_s10 + $0x40] sm:$0xff]  ;;  %v5717_v56 = vld [vmem:[%s7336_s1 + $0x108] sm:$0xff]  }
  0x17   : > { %5094 = vmatprep.subr.bf16.mxu1 %v5696_v7  ;;  %v6027_v34 = vld [vmem:[%s5961_s10 + $0x50] sm:$0xff]  ;;  %v6034_v36 = vpack.c.bf16 %v6018_v31, %v6015_v30  ;;  %v6037_v37 = vld [vmem:[%s5961_s10 + $0x61] sm:$0xff]  ;;  %v5714_v53 = vld [vmem:[%s7336_s1 + $0x298] sm:$0xff]   ;;  %v615_v3 = vpack.c.bf16 %v6021_v32, %v5999_v25 }
  0x18   : > { %v5708_v35 = vld [vmem:[%s7336_s1 + $0x2b0] sm:$0xff]   ;;  %v6045_v39 = vpack.c.bf16 %v6027_v34, %v6021_v32  ;;  %v6052_v41 = vld [vmem:[%s5961_s10 + $0x60] sm:$0xff]  ;;  %v5718_v57 = vld [vmem:[%s7336_s1 + $0x288] sm:$0xff]  }
  0x19   : > { %5071 = vmatpush3.bf16.msra.mxu0 %v5695_v6  ;;  %v6048_v40 = vld [vmem:[%s5961_s10 + $0x71] sm:$0xff]  ;;  %v455_v45 = vld [vmem:[%s5961_s10 + $0x2] sm:$0xff] }
  0x1a   : > { %5095 = vmatpush3.bf16.msra.mxu1 %v5696_v7  ;;  %5072 = vmatprep.subr.bf16.mxu0 %v5697_v8  ;;  %v6055_v42 = vld [vmem:[%s5961_s10 + $0x70] sm:$0xff]  ;;  %v6064_v44 = vpack.c.bf16 %v6048_v40, %v6037_v37  ;;  %v5711_v48 = vld [vmem:[%s7336_s1 + $0x120] sm:$0xff]   ;;  %v5721_v62 = vld [vmem:[%s7336_s1 + $0x338] sm:$0xff]  }
  0x1b   : > { %5096 = vmatprep.subr.bf16.mxu1 %v5698_v9  ;;  %v6068_v46 = vld [vmem:[%s5961_s10 + $0x12] sm:$0xff]  ;;  %v6072_v47 = vpack.c.bf16 %v6055_v42, %v6052_v41  ;;  %v5712_v49 = vld [vmem:[%s7336_s1 + $0x2a0] sm:$0xff]   ;;  %v5726_v13 = vld [vmem:[%s7336_s1 + $0x3a8] sm:$0xff]  }
  0x1c   : > { %v463_v50 = vpack.c.bf16 %v6068_v46, %v455_v45  ;;  %v5715_v54 = vld [vmem:[%s7336_s1 + $0x110] sm:$0xff]   ;;  %v5719_v58 = vld [vmem:[%s7336_s1 + $0x100] sm:$0xff]   ;;  %v5722_v63 = vld [vmem:[%s7336_s1 + $0x3b8] sm:$0xff]  }
  0x1d   : > { %5073 = vmatpush3.bf16.msra.mxu0 %v5697_v8  ;;  %v5716_v55 = vld [vmem:[%s7336_s1 + $0x290] sm:$0xff]   ;;  %v5720_v59 = vld [vmem:[%s7336_s1 + $0x280] sm:$0xff]   ;;  %v5733_v24 = vld [vmem:[%s7336_s1 + $0x308] sm:$0xff]  }
  0x1e   : > { %5097 = vmatpush3.bf16.msra.mxu1 %v5698_v9  ;;  %5074 = vmatprep.subr.bf16.mxu0 %v5699_v10  ;;  %v457_v60 = vld [vmem:[%s5961_s10 + $0x22] sm:$0xff]  ;;  %v6110_v61 = vld [vmem:[%s5961_s10 + $0x32] sm:$0xff]  ;;  %v616_v9 = vpack.c.bf16 %v6052_v41, %v6027_v34  ;;  %v765_v34 = vpack.c.bf16 %v6015_v30, %v5995_v23 }
  0x1f   : > { %5098 = vmatprep.subr.bf16.mxu1 %v5700_v14  ;;  %v6119_v0 = vpack.c.bf16 %v6110_v61, %v457_v60  ;;  %v6122_v1 = vld [vmem:[%s5961_s10 + $0x42] sm:$0xff]  ;;  %v6125_v2 = vld [vmem:[%s5961_s10 + $0x52] sm:$0xff] }
  0x20   : > { %v5723_v4 = vld [vmem:[%s7336_s1 + $0x330] sm:$0xff]   ;;  %v6137_v6 = vpack.c.bf16 %v6125_v2, %v6122_v1  ;;  %v6140_v7 = vld [vmem:[%s5961_s10 + $0x62] sm:$0xff]  ;;  %v5738_v32 = vld [vmem:[%s7336_s1 + $0x5b8] sm:$0xff]  }
  0x21   : > { %5075 = vmatpush3.bf16.msra.mxu0 %v5699_v10  ;;  %v5724_v5 = vld [vmem:[%s7336_s1 + $0x3b0] sm:$0xff]   ;;  %v5725_v10 = vld [vmem:[%s7336_s1 + $0x328] sm:$0xff]   ;;  %v6152_v11 = vld [vmem:[%s5961_s10 + $0x80] sm:$0xff]  ;;  %v916_v30 = vpack.c.bf16 %v6140_v7, %v6125_v2 }
  0x22   : > { %5099 = vmatpush3.bf16.msra.mxu1 %v5700_v14  ;;  %5076 = vmatprep.subr.bf16.mxu0 %v5701_v18  ;;  %v6144_v8 = vld [vmem:[%s5961_s10 + $0x72] sm:$0xff]  ;;  %v617_v15 = vpack.c.bf16 %v6152_v11, %v6055_v42  ;;  %v5727_v16 = vld [vmem:[%s7336_s1 + $0x320] sm:$0xff]   ;;  %v5734_v25 = vld [vmem:[%s7336_s1 + $0x388] sm:$0xff]   ;;  %v766_v42 = vpack.c.bf16 %v6037_v37, %v6018_v31 }
  0x23   : > { %5100 = vmatprep.subr.bf16.mxu1 %v5702_v19  ;;  %v6160_v14 = vpack.c.bf16 %v6144_v8, %v6140_v7  ;;  %v5728_v17 = vld [vmem:[%s7336_s1 + $0x3a0] sm:$0xff]   ;;  %v5740_v41 = vld [vmem:[%s7336_s1 + $0x5b0] sm:$0xff]   ;;  %v5742_v31 = vld [vmem:[%s7336_s1 + $0x5a8] sm:$0xff]  }
  0x24   : > { %v6217_v23 = vld [vmem:[%s5961_s10 + $0x81] sm:$0xff]  ;;  %v5764_v7 = vld [vmem:[%s7336_s1 + $0x50] sm:$0xff]  }
  0x25   : > { %5077 = vmatpush3.bf16.msra.mxu0 %v5701_v18  ;;  %v764_v18 = vpack.c.bf16 %v5992_v22, %v5968_v12  ;;  %v5731_v12 = vld [vmem:[%s7336_s1 + $0x310] sm:$0xff]   ;;  %v6225_v45 = vld [vmem:[%s5961_s10 + $0x82] sm:$0xff]  ;;  %v767_v37 = vpack.c.bf16 %v6217_v23, %v6048_v40  ;;  %v5745_v40 = vld [vmem:[%s7336_s1 + $0x518] sm:$0xff]  }
  0x26   : > { %5101 = vmatpush3.bf16.msra.mxu1 %v5702_v19  ;;  %5078 = vmatprep.subr.bf16.mxu0 %v5703_v20  ;;  %v914_v19 = vpack.c.bf16 %v457_v60, %v6068_v46  ;;  %v5732_v22 = vld [vmem:[%s7336_s1 + $0x390] sm:$0xff]   ;;  %v917_v46 = vpack.c.bf16 %v6225_v45, %v6144_v8  ;;  %v5757_v60 = vld [vmem:[%s7336_s1 + $0x628] sm:$0xff]   ;;  %v5760_v2 = vld [vmem:[%s7336_s1 + $0x60] sm:$0xff]  }
  0x27   : > { %5102 = vmatprep.subr.bf16.mxu1 %v5704_v21  ;;  %v5766_v8 = vld [vmem:[%s7336_s1 + $0x48] sm:$0xff]  }
  0x29   : > { %5079 = vmatpush3.bf16.msra.mxu0 %v5703_v20  ;;  %v5729_v20 = vld [vmem:[%s7336_s1 + $0x318] sm:$0xff]  }
  0x2a   : > { %5103 = vmatpush3.bf16.msra.mxu1 %v5704_v21  ;;  %5112 = vmatprep.subr.bf16.mxu0 %v5705_v26  ;;  %v5730_v21 = vld [vmem:[%s7336_s1 + $0x398] sm:$0xff]  }
  0x2b   : > { %5136 = vmatprep.subr.bf16.mxu1 %v5706_v27 }
  0x2c   : > { %5081 = vmatmul.mubr.bf16.vlgmr.msra.gmra.mxu0 %v6009_v28 }
  0x2d   : > { %5105 = vmatmul.mubr.bf16.vlgmr.msra.gmra.mxu1 %v6024_v33  ;;  %5113 = vmatpush3.bf16.msra.mxu0 %v5705_v26  ;;  %v5735_v26 = vld [vmem:[%s7336_s1 + $0x300] sm:$0xff]  }
  0x2e   : > { %5137 = vmatpush3.bf16.msra.mxu1 %v5706_v27  ;;  %5114 = vmatprep.subr.bf16.mxu0 %v5707_v29  ;;  %v5736_v27 = vld [vmem:[%s7336_s1 + $0x380] sm:$0xff]  }
  0x2f   : > { %5138 = vmatprep.subr.bf16.mxu1 %v5708_v35  ;;  %5084 = vmatprep.mubr.bf16.mxu0 %v6034_v36 }
  0x30   : > { %5108 = vmatprep.mubr.bf16.mxu1 %v6045_v39 }
  0x31   : > { %5115 = vmatpush3.bf16.msra.mxu0 %v5707_v29  ;;  %v5737_v29 = vld [vmem:[%s7336_s1 + $0x538] sm:$0xff]  }
  0x32   : > { %5139 = vmatpush3.bf16.msra.mxu1 %v5708_v35  ;;  %5116 = vmatprep.subr.bf16.mxu0 %v5709_v38  ;;  %v915_v35 = vpack.c.bf16 %v6122_v1, %v6110_v61  ;;  %v4191_v61 = vld [vmem:[%s5961_s10 + $0x91] sm:$0xff] }
  0x33   : > { %5140 = vmatprep.subr.bf16.mxu1 %v5710_v43  ;;  %v6294_v1 = vld [vmem:[%s5961_s10 + $0xb0] sm:$0xff] }
  0x34   : > { %5085 = vmatmul.mubr.bf16.gmra.mxu0 %v6064_v44 }
  0x35   : > { %5117 = vmatpush3.bf16.msra.mxu0 %v5709_v38  ;;  %5109 = vmatmul.mubr.bf16.gmra.mxu1 %v6072_v47  ;;  %v5739_v38 = vld [vmem:[%s7336_s1 + $0x530] sm:$0xff]  }
  0x36   : > { %5141 = vmatpush3.bf16.msra.mxu1 %v5710_v43  ;;  %5118 = vmatprep.subr.bf16.mxu0 %v5711_v48  ;;  %v5741_v43 = vld [vmem:[%s7336_s1 + $0x528] sm:$0xff]  }
  0x37   : > { %5142 = vmatprep.subr.bf16.mxu1 %v5712_v49  ;;  %5128 = vmatprep.mubr.bf16.mxu0 %v463_v50  ;;  %v5746_v50 = vld [vmem:[%s7336_s1 + $0x598] sm:$0xff]  }
  0x38   : > { %5152 = vmatprep.mubr.bf16.mxu1 %v614_v51  ;;  %v5747_v51 = vld [vmem:[%s7336_s1 + $0x510] sm:$0xff]  }
  0x39   : > { %5119 = vmatpush3.bf16.msra.mxu0 %v5711_v48  ;;  %v5743_v48 = vld [vmem:[%s7336_s1 + $0x520] sm:$0xff]  }
  0x3a   : > { %5143 = vmatpush3.bf16.msra.mxu1 %v5712_v49  ;;  %5120 = vmatprep.subr.bf16.mxu0 %v5713_v52  ;;  %v5744_v49 = vld [vmem:[%s7336_s1 + $0x5a0] sm:$0xff]  }
  0x3b   : > { %5144 = vmatprep.subr.bf16.mxu1 %v5714_v53 }
  0x3d   : > { %5121 = vmatpush3.bf16.msra.mxu0 %v5713_v52  ;;  %v5748_v52 = vld [vmem:[%s7336_s1 + $0x590] sm:$0xff]  }
  0x3e   : > { %5145 = vmatpush3.bf16.msra.mxu1 %v5714_v53  ;;  %5122 = vmatprep.subr.bf16.mxu0 %v5715_v54  ;;  %v5751_v53 = vld [vmem:[%s7336_s1 + $0x500] sm:$0xff]  }
  0x3f   : > { %5146 = vmatprep.subr.bf16.mxu1 %v5716_v55 }
  0x41   : > { %5123 = vmatpush3.bf16.msra.mxu0 %v5715_v54  ;;  %v5752_v54 = vld [vmem:[%s7336_s1 + $0x580] sm:$0xff]  }
  0x42   : > { %5147 = vmatpush3.bf16.msra.mxu1 %v5716_v55  ;;  %5124 = vmatprep.subr.bf16.mxu0 %v5717_v56  ;;  %v5753_v55 = vld [vmem:[%s7336_s1 + $0x638] sm:$0xff]  }
  0x43   : > { %5148 = vmatprep.subr.bf16.mxu1 %v5718_v57 }
  0x45   : > { %5125 = vmatpush3.bf16.msra.mxu0 %v5717_v56  ;;  %v5754_v56 = vld [vmem:[%s7336_s1 + $0x78] sm:$0xff]  }
  0x46   : > { %5149 = vmatpush3.bf16.msra.mxu1 %v5718_v57  ;;  %5126 = vmatprep.subr.bf16.mxu0 %v5719_v58  ;;  %v5755_v57 = vld [vmem:[%s7336_s1 + $0x630] sm:$0xff]  }
  0x47   : > { %5150 = vmatprep.subr.bf16.mxu1 %v5720_v59 }
  0x49   : > { %5127 = vmatpush3.bf16.msra.mxu0 %v5719_v58  ;;  %v5756_v58 = vld [vmem:[%s7336_s1 + $0x70] sm:$0xff]  }
  0x4a   : > { %5151 = vmatpush3.bf16.msra.mxu1 %v5720_v59  ;;  %5160 = vmatprep.subr.bf16.mxu0 %v5721_v62  ;;  %v4159_v59 = vld [vmem:[%s5961_s10 + $0x90] sm:$0xff] }
  0x4b   : > { %5184 = vmatprep.subr.bf16.mxu1 %v5722_v63 }
  0x4c   : > { %5129 = vmatmul.mubr.bf16.vlgmr.msra.gmra.mxu0 %v6119_v0 }
  0x4d   : > { %5153 = vmatmul.mubr.bf16.vlgmr.msra.gmra.mxu1 %v615_v3  ;;  %5161 = vmatpush3.bf16.msra.mxu0 %v5721_v62  ;;  %v5758_v62 = vld [vmem:[%s7336_s1 + $0x68] sm:$0xff]   ;;  %v5761_v3 = vld [vmem:[%s7336_s1 + $0x618] sm:$0xff]  }
  0x4e   : > { %5185 = vmatpush3.bf16.msra.mxu1 %v5722_v63  ;;  %5162 = vmatprep.subr.bf16.mxu0 %v5723_v4  ;;  %v1218_v63 = vpack.c.bf16 %v4191_v61, %v6217_v23  ;;  %v5778_v23 = vld [vmem:[%s7336_s1 + $0x2d8] sm:$0xff]   ;;  %v5790_v61 = vld [vmem:[%s7336_s1 + $0x568] sm:$0xff]  }
  0x4f   : > { %5186 = vmatprep.subr.bf16.mxu1 %v5724_v5  ;;  %5132 = vmatprep.mubr.bf16.mxu0 %v6137_v6 }
  0x50   : > { %5156 = vmatprep.mubr.bf16.mxu1 %v616_v9  ;;  %v5767_v9 = vld [vmem:[%s7336_s1 + $0x600] sm:$0xff]  }
  0x51   : > { %5163 = vmatpush3.bf16.msra.mxu0 %v5723_v4  ;;  %v5762_v4 = vld [vmem:[%s7336_s1 + $0x58] sm:$0xff]  }
  0x52   : > { %5187 = vmatpush3.bf16.msra.mxu1 %v5724_v5  ;;  %5164 = vmatprep.subr.bf16.mxu0 %v5725_v10  ;;  %v5763_v5 = vld [vmem:[%s7336_s1 + $0x610] sm:$0xff]  }
  0x53   : > { %5188 = vmatprep.subr.bf16.mxu1 %v5726_v13 }
  0x54   : > { %5133 = vmatmul.mubr.bf16.gmra.mxu0 %v6160_v14 }
  0x55   : > { %5165 = vmatpush3.bf16.msra.mxu0 %v5725_v10  ;;  %5157 = vmatmul.mubr.bf16.gmra.mxu1 %v617_v15  ;;  %v5768_v10 = vld [vmem:[%s7336_s1 + $0x40] sm:$0xff]   ;;  %v5769_v15 = vld [vmem:[%s7336_s1 + $0xf8] sm:$0xff]  }
  0x56   : > { %5189 = vmatpush3.bf16.msra.mxu1 %v5726_v13  ;;  %5166 = vmatprep.subr.bf16.mxu0 %v5727_v16  ;;  %v6330_v13 = vld [vmem:[%s5961_s10 + $0xd0] sm:$0xff] }
  0x57   : > { %5190 = vmatprep.subr.bf16.mxu1 %v5728_v17  ;;  %5176 = vmatprep.mubr.bf16.mxu0 %v764_v18 }
  0x58   : > { %5200 = vmatprep.mubr.bf16.mxu1 %v914_v19  ;;  %v6345_v19 = vld [vmem:[%s5961_s10 + $0xf0] sm:$0xff] }
  0x59   : > { %5167 = vmatpush3.bf16.msra.mxu0 %v5727_v16  ;;  %v5770_v16 = vld [vmem:[%s7336_s1 + $0x2f8] sm:$0xff]  }
  0x5a   : > { %5191 = vmatpush3.bf16.msra.mxu1 %v5728_v17  ;;  %5168 = vmatprep.subr.bf16.mxu0 %v5729_v20  ;;  %v6339_v17 = vld [vmem:[%s5961_s10 + $0xe0] sm:$0xff] }
  0x5b   : > { %5192 = vmatprep.subr.bf16.mxu1 %v5730_v21 }
  0x5d   : > { %5169 = vmatpush3.bf16.msra.mxu0 %v5729_v20  ;;  %v5771_v20 = vld [vmem:[%s7336_s1 + $0xf0] sm:$0xff]  }
  0x5e   : > { %5193 = vmatpush3.bf16.msra.mxu1 %v5730_v21  ;;  %5170 = vmatprep.subr.bf16.mxu0 %v5731_v12  ;;  %v5772_v21 = vld [vmem:[%s7336_s1 + $0x2f0] sm:$0xff]  }
  0x5f   : > { %5194 = vmatprep.subr.bf16.mxu1 %v5732_v22 }
  0x61   : > { %5171 = vmatpush3.bf16.msra.mxu0 %v5731_v12  ;;  %v6356_v12 = vpack.c.bf16 %v6345_v19, %v6339_v17 }
  0x62   : > { %5195 = vmatpush3.bf16.msra.mxu1 %v5732_v22  ;;  %5172 = vmatprep.subr.bf16.mxu0 %v5733_v24  ;;  %v4223_v22 = vld [vmem:[%s5961_s10 + $0x92] sm:$0xff] }
  0x63   : > { %5196 = vmatprep.subr.bf16.mxu1 %v5734_v25 }
  0x65   : > { %5173 = vmatpush3.bf16.msra.mxu0 %v5733_v24  ;;  %v5773_v24 = vld [vmem:[%s7336_s1 + $0xe8] sm:$0xff]  }
  0x66   : > { %5197 = vmatpush3.bf16.msra.mxu1 %v5734_v25  ;;  %5174 = vmatprep.subr.bf16.mxu0 %v5735_v26  ;;  %v6364_v25 = vld [vmem:[%s5961_s10 + $0x100] sm:$0xff] }
  0x67   : > { %5198 = vmatprep.subr.bf16.mxu1 %v5736_v27 }
  0x69   : > { %5175 = vmatpush3.bf16.msra.mxu0 %v5735_v26  ;;  %v6367_v26 = vld [vmem:[%s5961_s10 + $0x110] sm:$0xff] }
  0x6a   : > { %5199 = vmatpush3.bf16.msra.mxu1 %v5736_v27  ;;  %5208 = vmatprep.subr.bf16.mxu0 %v5737_v29  ;;  %v4280_v27 = vld [vmem:[%s5961_s10 + $0xa1] sm:$0xff] }
  0x6b   : > { %5232 = vmatprep.subr.bf16.mxu1 %v5738_v32 }
  0x6c   : > { %5177 = vmatmul.mubr.bf16.vlgmr.msra.gmra.mxu0 %v765_v34  ;;  %v6381_v34 = vpack.c.bf16 %v6367_v26, %v6364_v25 }
  0x6d   : > { %5201 = vmatmul.mubr.bf16.vlgmr.msra.gmra.mxu1 %v915_v35  ;;  %5209 = vmatpush3.bf16.msra.mxu0 %v5737_v29  ;;  %v1368_v29 = vpack.c.bf16 %v4223_v22, %v6225_v45  ;;  %v5776_v35 = vld [vmem:[%s7336_s1 + $0x2e0] sm:$0xff]   ;;  %v5781_v45 = vld [vmem:[%s7336_s1 + $0xc8] sm:$0xff]   ;;  %v4383_v22 = vld [vmem:[%s5961_s10 + $0x130] sm:$0xff] }
  0x6e   : > { %5233 = vmatpush3.bf16.msra.mxu1 %v5738_v32  ;;  %5210 = vmatprep.subr.bf16.mxu0 %v5739_v38  ;;  %v6377_v32 = vld [vmem:[%s5961_s10 + $0xb1] sm:$0xff] }
  0x6f   : > { %5234 = vmatprep.subr.bf16.mxu1 %v5740_v41  ;;  %5180 = vmatprep.mubr.bf16.mxu0 %v766_v42  ;;  %v5777_v42 = vld [vmem:[%s7336_s1 + $0xd8] sm:$0xff]  }
  0x70   : > { %5204 = vmatprep.mubr.bf16.mxu1 %v916_v30  ;;  %v5779_v30 = vld [vmem:[%s7336_s1 + $0xd0] sm:$0xff]  }
  0x71   : > { %5211 = vmatpush3.bf16.msra.mxu0 %v5739_v38  ;;  %v1666_v38 = vpack.c.bf16 %v6377_v32, %v4280_v27 }
  0x72   : > { %5235 = vmatpush3.bf16.msra.mxu1 %v5740_v41  ;;  %5212 = vmatprep.subr.bf16.mxu0 %v5741_v43 }
  0x73   : > { %5236 = vmatprep.subr.bf16.mxu1 %v5742_v31 }
  0x74   : > { %5181 = vmatmul.mubr.bf16.gmra.mxu0 %v767_v37  ;;  %v5783_v37 = vld [vmem:[%s7336_s1 + $0xc0] sm:$0xff]  }
  0x75   : > { %5213 = vmatpush3.bf16.msra.mxu0 %v5741_v43  ;;  %5205 = vmatmul.mubr.bf16.gmra.mxu1 %v917_v46  ;;  %v5780_v43 = vld [vmem:[%s7336_s1 + $0x2d0] sm:$0xff]   ;;  %v5784_v46 = vld [vmem:[%s7336_s1 + $0x2c0] sm:$0xff]  }
  0x76   : > { %5237 = vmatpush3.bf16.msra.mxu1 %v5742_v31  ;;  %5214 = vmatprep.subr.bf16.mxu0 %v5743_v48  ;;  %v5782_v31 = vld [vmem:[%s7336_s1 + $0x2c8] sm:$0xff]  }
  0x77   : > { %5238 = vmatprep.subr.bf16.mxu1 %v5744_v49  ;;  %5224 = vmatprep.mubr.bf16.mxu0 %v6024_v33  ;;  %v5749_v33 = vld [vmem:[%s7336_s1 + $0x508] sm:$0xff]  }
  0x78   : > { %5248 = vmatprep.mubr.bf16.mxu1 %v6009_v28  ;;  %v5750_v28 = vld [vmem:[%s7336_s1 + $0x588] sm:$0xff]  }
  0x79   : > { %5215 = vmatpush3.bf16.msra.mxu0 %v5743_v48  ;;  %v4282_v48 = vld [vmem:[%s5961_s10 + $0xc1] sm:$0xff] }
  0x7a   : > { %5239 = vmatpush3.bf16.msra.mxu1 %v5744_v49  ;;  %5216 = vmatprep.subr.bf16.mxu0 %v5745_v40  ;;  %v6418_v49 = vld [vmem:[%s5961_s10 + $0xd1] sm:$0xff] }
  0x7b   : > { %5240 = vmatprep.subr.bf16.mxu1 %v5746_v50 }
  0x7d   : > { %5217 = vmatpush3.bf16.msra.mxu0 %v5745_v40  ;;  %v5785_v40 = vld [vmem:[%s7336_s1 + $0x378] sm:$0xff]  }
  0x7e   : > { %5241 = vmatpush3.bf16.msra.mxu1 %v5746_v50  ;;  %5218 = vmatprep.subr.bf16.mxu0 %v5747_v51  ;;  %v5786_v50 = vld [vmem:[%s7336_s1 + $0x578] sm:$0xff]  }
  0x7f   : > { %5242 = vmatprep.subr.bf16.mxu1 %v5748_v52 }
  0x81   : > { %5219 = vmatpush3.bf16.msra.mxu0 %v5747_v51  ;;  %v6427_v51 = vld [vmem:[%s5961_s10 + $0xe1] sm:$0xff] }
  0x82   : > { %5243 = vmatpush3.bf16.msra.mxu1 %v5748_v52  ;;  %5220 = vmatprep.subr.bf16.mxu0 %v5749_v33  ;;  %v6430_v52 = vld [vmem:[%s5961_s10 + $0xf1] sm:$0xff] }
  0x83   : > { %5244 = vmatprep.subr.bf16.mxu1 %v5750_v28 }
  0x85   : > { %5221 = vmatpush3.bf16.msra.mxu0 %v5749_v33  ;;  %v6433_v33 = vpack.c.bf16 %v6418_v49, %v4282_v48 }
  0x86   : > { %5245 = vmatpush3.bf16.msra.mxu1 %v5750_v28  ;;  %5222 = vmatprep.subr.bf16.mxu0 %v5751_v53  ;;  %v5787_v28 = vld [vmem:[%s7336_s1 + $0x370] sm:$0xff]  }
  0x87   : > { %5246 = vmatprep.subr.bf16.mxu1 %v5752_v54 }
  0x89   : > { %5223 = vmatpush3.bf16.msra.mxu0 %v5751_v53  ;;  %v1818_v53 = vpack.c.bf16 %v6339_v17, %v6330_v13 }
  0x8a   : > { %5247 = vmatpush3.bf16.msra.mxu1 %v5752_v54  ;;  %5256 = vmatprep.subr.bf16.mxu0 %v5753_v55  ;;  %v5788_v54 = vld [vmem:[%s7336_s1 + $0x570] sm:$0xff]  }
  0x8b   : > { %5280 = vmatprep.subr.bf16.mxu1 %v5754_v56 }
  0x8c   : > { %5225 = vmatmul.mubr.bf16.vlgmr.msra.gmra.mxu0 %v6045_v39  ;;  %v1068_v39 = vpack.c.bf16 %v4159_v59, %v6152_v11  ;;  %v4250_v11 = vld [vmem:[%s5961_s10 + $0xc0] sm:$0xff]  ;;  %v1819_v59 = vpack.c.bf16 %v6364_v25, %v6345_v19 }
  0x8d   : > { %5249 = vmatmul.mubr.bf16.vlgmr.msra.gmra.mxu1 %v6034_v36  ;;  %5257 = vmatpush3.bf16.msra.mxu0 %v5753_v55  ;;  %v4248_v36 = vld [vmem:[%s5961_s10 + $0xa0] sm:$0xff]  ;;  %v6342_v18 = vpack.c.bf16 %v6330_v13, %v4250_v11  ;;  %v1817_v41 = vpack.c.bf16 %v4250_v11, %v6294_v1  ;;  %v6445_v55 = vpack.c.bf16 %v6430_v52, %v6427_v51  ;;  %v5803_v11 = vld [vmem:[%s7336_s1 + $0x5f0] sm:$0xff]  }
  0x8e   : > { %5281 = vmatpush3.bf16.msra.mxu1 %v5754_v56  ;;  %5258 = vmatprep.subr.bf16.mxu0 %v5755_v57  ;;  %v6448_v56 = vld [vmem:[%s5961_s10 + $0x101] sm:$0xff]  ;;  %v5804_v13 = vld [vmem:[%s7336_s1 + $0x170] sm:$0xff]  }
  0x8f   : > { %5282 = vmatprep.subr.bf16.mxu1 %v5756_v58  ;;  %5228 = vmatprep.mubr.bf16.mxu0 %v6072_v47  ;;  %v5759_v47 = vld [vmem:[%s7336_s1 + $0x620] sm:$0xff]  }
  0x90   : > { %5252 = vmatprep.mubr.bf16.mxu1 %v6064_v44  ;;  %v1516_v44 = vpack.c.bf16 %v6294_v1, %v4248_v36  ;;  %v5791_v36 = vld [vmem:[%s7336_s1 + $0x360] sm:$0xff]   ;;  %v1967_v1 = vpack.c.bf16 %v4282_v48, %v6377_v32  ;;  %v5810_v48 = vld [vmem:[%s7336_s1 + $0x158] sm:$0xff]  }
  0x91   : > { %5259 = vmatpush3.bf16.msra.mxu0 %v5755_v57  ;;  %v6451_v57 = vld [vmem:[%s5961_s10 + $0x111] sm:$0xff]  ;;  %v4440_v32 = vld [vmem:[%s5961_s10 + $0x140] sm:$0xff] }
  0x92   : > { %5283 = vmatpush3.bf16.msra.mxu1 %v5756_v58  ;;  %5260 = vmatprep.subr.bf16.mxu0 %v5757_v60  ;;  %v5789_v58 = vld [vmem:[%s7336_s1 + $0x368] sm:$0xff]  }
  0x93   : > { %5284 = vmatprep.subr.bf16.mxu1 %v5758_v62 }
  0x94   : > { %5229 = vmatmul.mubr.bf16.gmra.mxu0 %v1068_v39 }
  0x95   : > { %5261 = vmatpush3.bf16.msra.mxu0 %v5757_v60  ;;  %5253 = vmatmul.mubr.bf16.gmra.mxu1 %v1218_v63  ;;  %v6460_v60 = vld [vmem:[%s5961_s10 + $0x120] sm:$0xff] }
  0x96   : > { %5285 = vmatpush3.bf16.msra.mxu1 %v5758_v62  ;;  %5262 = vmatprep.subr.bf16.mxu0 %v5759_v47  ;;  %v6468_v62 = vpack.c.bf16 %v6451_v57, %v6448_v56  ;;  %v1820_v39 = vpack.c.bf16 %v6460_v60, %v6367_v26  ;;  %v5792_v63 = vld [vmem:[%s7336_s1 + $0x560] sm:$0xff]  }
  0x97   : > { %5286 = vmatprep.subr.bf16.mxu1 %v5760_v2  ;;  %5272 = vmatprep.mubr.bf16.mxu0 %v6119_v0  ;;  %v5765_v0 = vld [vmem:[%s7336_s1 + $0x608] sm:$0xff]  }
  0x98   : > { %5296 = vmatprep.mubr.bf16.mxu1 %v1516_v44  ;;  %v5795_v44 = vld [vmem:[%s7336_s1 + $0x350] sm:$0xff]  }
  0x99   : > { %5263 = vmatpush3.bf16.msra.mxu0 %v5759_v47  ;;  %v5793_v47 = vld [vmem:[%s7336_s1 + $0x358] sm:$0xff]  }
  0x9a   : > { %5287 = vmatpush3.bf16.msra.mxu1 %v5760_v2  ;;  %5264 = vmatprep.subr.bf16.mxu0 %v5761_v3  ;;  %v5794_v2 = vld [vmem:[%s7336_s1 + $0x558] sm:$0xff]  }
  0x9b   : > { %5288 = vmatprep.subr.bf16.mxu1 %v5762_v4 }
  0x9d   : > { %5265 = vmatpush3.bf16.msra.mxu0 %v5761_v3  ;;  %v5796_v3 = vld [vmem:[%s7336_s1 + $0x550] sm:$0xff]  }
  0x9e   : > { %5289 = vmatpush3.bf16.msra.mxu1 %v5762_v4  ;;  %5266 = vmatprep.subr.bf16.mxu0 %v5763_v5  ;;  %v5797_v4 = vld [vmem:[%s7336_s1 + $0x348] sm:$0xff]  }
  0x9f   : > { %5290 = vmatprep.subr.bf16.mxu1 %v5764_v7 }
  0xa1   : > { %5267 = vmatpush3.bf16.msra.mxu0 %v5763_v5  ;;  %v5798_v5 = vld [vmem:[%s7336_s1 + $0x548] sm:$0xff]  }
  0xa2   : > { %5291 = vmatpush3.bf16.msra.mxu1 %v5764_v7  ;;  %5268 = vmatprep.subr.bf16.mxu0 %v5765_v0  ;;  %v5799_v7 = vld [vmem:[%s7336_s1 + $0x340] sm:$0xff]  }
  0xa3   : > { %5292 = vmatprep.subr.bf16.mxu1 %v5766_v8 }
  0xa5   : > { %5269 = vmatpush3.bf16.msra.mxu0 %v5765_v0  ;;  %v5800_v0 = vld [vmem:[%s7336_s1 + $0x540] sm:$0xff]  }
  0xa6   : > { %5293 = vmatpush3.bf16.msra.mxu1 %v5766_v8  ;;  %5270 = vmatprep.subr.bf16.mxu0 %v5767_v9  ;;  %v5801_v8 = vld [vmem:[%s7336_s1 + $0x5f8] sm:$0xff]  }
  0xa7   : > { %5294 = vmatprep.subr.bf16.mxu1 %v5768_v10 }
  0xa9   : > { %5271 = vmatpush3.bf16.msra.mxu0 %v5767_v9  ;;  %v5802_v9 = vld [vmem:[%s7336_s1 + $0x178] sm:$0xff]  }
  0xaa   : > { %5295 = vmatpush3.bf16.msra.mxu1 %v5768_v10  ;;  %5304 = vmatprep.subr.bf16.mxu0 %v5769_v15  ;;  %v1968_v10 = vpack.c.bf16 %v6427_v51, %v6418_v49 }
  0xab   : > { %5328 = vmatprep.subr.bf16.mxu1 %v5770_v16 }
  0xac   : > { %5273 = vmatmul.mubr.bf16.vlgmr.msra.gmra.mxu0 %v6137_v6  ;;  %v5774_v6 = vld [vmem:[%s7336_s1 + $0x2e8] sm:$0xff]  }
  0xad   : > { %5297 = vmatmul.mubr.bf16.vlgmr.msra.gmra.mxu1 %v6342_v18  ;;  %5305 = vmatpush3.bf16.msra.mxu0 %v5769_v15  ;;  %v1969_v15 = vpack.c.bf16 %v6448_v56, %v6430_v52  ;;  %v5811_v52 = vld [vmem:[%s7336_s1 + $0x5d0] sm:$0xff]  }
  0xae   : > { %5329 = vmatpush3.bf16.msra.mxu1 %v5770_v16  ;;  %5306 = vmatprep.subr.bf16.mxu0 %v5771_v20 }
  0xaf   : > { %5330 = vmatprep.subr.bf16.mxu1 %v5772_v21  ;;  %5276 = vmatprep.mubr.bf16.mxu0 %v6160_v14  ;;  %v5775_v14 = vld [vmem:[%s7336_s1 + $0xe0] sm:$0xff]  }
  0xb0   : > { %5300 = vmatprep.mubr.bf16.mxu1 %v6356_v12 }
  0xb1   : > { %5307 = vmatpush3.bf16.msra.mxu0 %v5771_v20 }
  0xb2   : > { %5331 = vmatpush3.bf16.msra.mxu1 %v5772_v21  ;;  %5308 = vmatprep.subr.bf16.mxu0 %v5773_v24  ;;  %v5805_v21 = vld [vmem:[%s7336_s1 + $0x5e8] sm:$0xff]  }
  0xb3   : > { %5332 = vmatprep.subr.bf16.mxu1 %v5774_v6 }
  0xb4   : > { %5277 = vmatmul.mubr.bf16.gmra.mxu0 %v1368_v29  ;;  %v2121_v29 = vpack.c.bf16 %v4383_v22, %v6460_v60  ;;  %v5816_v60 = vld [vmem:[%s7336_s1 + $0x140] sm:$0xff]   ;;  %v6638_v22 = vld [vmem:[%s5961_s10 + $0x151] sm:$0xff] }
  0xb5   : > { %5309 = vmatpush3.bf16.msra.mxu0 %v5773_v24  ;;  %5301 = vmatmul.mubr.bf16.gmra.mxu1 %v6381_v34 }
  0xb6   : > { %5333 = vmatpush3.bf16.msra.mxu1 %v5774_v6  ;;  %5310 = vmatprep.subr.bf16.mxu0 %v5775_v14 }
  0xb7   : > { %5334 = vmatprep.subr.bf16.mxu1 %v5776_v35  ;;  %5320 = vmatprep.mubr.bf16.mxu0 %v1666_v38 }
  0xb8   : > { %5344 = vmatprep.mubr.bf16.mxu1 %v1817_v41  ;;  %v5807_v41 = vld [vmem:[%s7336_s1 + $0x5e0] sm:$0xff]  }
  0xb9   : > { %5311 = vmatpush3.bf16.msra.mxu0 %v5775_v14  ;;  %v6542_v14 = vld [vmem:[%s5961_s10 + $0x150] sm:$0xff] }
  0xba   : > { %5335 = vmatpush3.bf16.msra.mxu1 %v5776_v35  ;;  %5312 = vmatprep.subr.bf16.mxu0 %v5777_v42 }
  0xbb   : > { %5336 = vmatprep.subr.bf16.mxu1 %v5778_v23 }
  0xbd   : > { %5313 = vmatpush3.bf16.msra.mxu0 %v5777_v42 }
  0xbe   : > { %5337 = vmatpush3.bf16.msra.mxu1 %v5778_v23  ;;  %5314 = vmatprep.subr.bf16.mxu0 %v5779_v30 }
  0xbf   : > { %5338 = vmatprep.subr.bf16.mxu1 %v5780_v43 }
  0xc1   : > { %5315 = vmatpush3.bf16.msra.mxu0 %v5779_v30 }
  0xc2   : > { %5339 = vmatpush3.bf16.msra.mxu1 %v5780_v43  ;;  %5316 = vmatprep.subr.bf16.mxu0 %v5781_v45  ;;  %v2419_v43 = vpack.c.bf16 %v6542_v14, %v4440_v32 }
  0xc3   : > { %5340 = vmatprep.subr.bf16.mxu1 %v5782_v31 }
  0xc5   : > { %5317 = vmatpush3.bf16.msra.mxu0 %v5781_v45 }
  0xc6   : > { %5341 = vmatpush3.bf16.msra.mxu1 %v5782_v31  ;;  %5318 = vmatprep.subr.bf16.mxu0 %v5783_v37  ;;  %v5809_v31 = vld [vmem:[%s7336_s1 + $0x5d8] sm:$0xff]  }
  0xc7   : > { %5342 = vmatprep.subr.bf16.mxu1 %v5784_v46 }
  0xc9   : > { %5319 = vmatpush3.bf16.msra.mxu0 %v5783_v37 }
  0xca   : > { %5343 = vmatpush3.bf16.msra.mxu1 %v5784_v46  ;;  %5352 = vmatprep.subr.bf16.mxu0 %v5785_v40 }
  0xcb   : > { %5376 = vmatprep.subr.bf16.mxu1 %v5786_v50 }
  0xcc   : > { %5321 = vmatmul.mubr.bf16.vlgmr.msra.gmra.mxu0 %v6433_v33 }
  0xcd   : > { %5345 = vmatmul.mubr.bf16.vlgmr.msra.gmra.mxu1 %v1818_v53  ;;  %5353 = vmatpush3.bf16.msra.mxu0 %v5785_v40 }
  0xce   : > { %5377 = vmatpush3.bf16.msra.mxu1 %v5786_v50  ;;  %5354 = vmatprep.subr.bf16.mxu0 %v5787_v28 }
  0xcf   : > { %5378 = vmatprep.subr.bf16.mxu1 %v5788_v54  ;;  %5324 = vmatprep.mubr.bf16.mxu0 %v6445_v55 }
  0xd0   : > { %5348 = vmatprep.mubr.bf16.mxu1 %v1819_v59  ;;  %v5815_v59 = vld [vmem:[%s7336_s1 + $0x5c0] sm:$0xff]  }
  0xd1   : > { %5355 = vmatpush3.bf16.msra.mxu0 %v5787_v28 }
  0xd2   : > { %5379 = vmatpush3.bf16.msra.mxu1 %v5788_v54  ;;  %5356 = vmatprep.subr.bf16.mxu0 %v5789_v58 }
  0xd3   : > { %5380 = vmatprep.subr.bf16.mxu1 %v5790_v61 }
  0xd4   : > { %5325 = vmatmul.mubr.bf16.gmra.mxu0 %v6468_v62 }
  0xd5   : > { %5357 = vmatpush3.bf16.msra.mxu0 %v5789_v58  ;;  %5349 = vmatmul.mubr.bf16.gmra.mxu1 %v1820_v39  ;;  %v5814_v58 = vld [vmem:[%s7336_s1 + $0x148] sm:$0xff]   ;;  %v6592_v39 = vld [vmem:[%s5961_s10 + $0x170] sm:$0xff] }
  0xd6   : > { %5381 = vmatpush3.bf16.msra.mxu1 %v5790_v61  ;;  %5358 = vmatprep.subr.bf16.mxu0 %v5791_v36  ;;  %v6589_v61 = vld [vmem:[%s5961_s10 + $0x160] sm:$0xff] }
  0xd7   : > { %5382 = vmatprep.subr.bf16.mxu1 %v5792_v63  ;;  %5368 = vmatprep.mubr.bf16.mxu0 %v1967_v1  ;;  %v2420_v1 = vpack.c.bf16 %v6592_v39, %v6589_v61 }
  0xd8   : > { %5392 = vmatprep.mubr.bf16.mxu1 %v6342_v18  ;;  %v6523_v18 = vld [vmem:[%s5961_s10 + $0x121] sm:$0xff] }
  0xd9   : > { %5359 = vmatpush3.bf16.msra.mxu0 %v5791_v36  ;;  %v1970_v6 = vpack.c.bf16 %v6523_v18, %v6451_v57  ;;  %v5813_v57 = vld [vmem:[%s7336_s1 + $0x5c8] sm:$0xff]   ;;  %v5817_v36 = vld [vmem:[%s7336_s1 + $0x1f8] sm:$0xff]  }
  0xda   : > { %5383 = vmatpush3.bf16.msra.mxu1 %v5792_v63  ;;  %5360 = vmatprep.subr.bf16.mxu0 %v5793_v47  ;;  %v5818_v63 = vld [vmem:[%s7336_s1 + $0x278] sm:$0xff]  }
  0xdb   : > { %5384 = vmatprep.subr.bf16.mxu1 %v5794_v2 }
  0xdd   : > { %5361 = vmatpush3.bf16.msra.mxu0 %v5793_v47  ;;  %v6603_v47 = vld [vmem:[%s5961_s10 + $0x180] sm:$0xff] }
  0xde   : > { %5385 = vmatpush3.bf16.msra.mxu1 %v5794_v2  ;;  %5362 = vmatprep.subr.bf16.mxu0 %v5795_v44  ;;  %v6606_v2 = vld [vmem:[%s5961_s10 + $0x190] sm:$0xff] }
  0xdf   : > { %5386 = vmatprep.subr.bf16.mxu1 %v5796_v3 }
  0xe1   : > { %5363 = vmatpush3.bf16.msra.mxu0 %v5795_v44  ;;  %v5819_v44 = vld [vmem:[%s7336_s1 + $0x1f0] sm:$0xff]  }
  0xe2   : > { %5387 = vmatpush3.bf16.msra.mxu1 %v5796_v3  ;;  %5364 = vmatprep.subr.bf16.mxu0 %v5797_v4  ;;  %v5820_v3 = vld [vmem:[%s7336_s1 + $0x270] sm:$0xff]  }
  0xe3   : > { %5388 = vmatprep.subr.bf16.mxu1 %v5798_v5 }
  0xe5   : > { %5365 = vmatpush3.bf16.msra.mxu0 %v5797_v4 }
  0xe6   : > { %5389 = vmatpush3.bf16.msra.mxu1 %v5798_v5  ;;  %5366 = vmatprep.subr.bf16.mxu0 %v5799_v7  ;;  %v2421_v5 = vpack.c.bf16 %v6606_v2, %v6603_v47 }
  0xe7   : > { %5390 = vmatprep.subr.bf16.mxu1 %v5800_v0 }
  0xe9   : > { %5367 = vmatpush3.bf16.msra.mxu0 %v5799_v7 }
  0xea   : > { %5391 = vmatpush3.bf16.msra.mxu1 %v5800_v0  ;;  %5400 = vmatprep.subr.bf16.mxu0 %v5801_v8 }
  0xeb   : > { %5424 = vmatprep.subr.bf16.mxu1 %v5802_v9 }
  0xec   : > { %v5082_v16 = vpop.f32.mrf.mxu0  ;;  %5369 = vmatmul.mubr.bf16.vlgmr.msra.gmra.mxu0 %v1968_v10  ;;  %v5821_v10 = vld [vmem:[%s7336_s1 + $0x1e8] sm:$0xff]  }
  0xed   : > { %v5106_v17 = vpop.f32.mrf.mxu1  ;;  %5393 = vmatmul.mubr.bf16.vlgmr.msra.gmra.mxu1 %v6356_v12  ;;  %5401 = vmatpush3.bf16.msra.mxu0 %v5801_v8  ;;  %v5806_v12 = vld [vmem:[%s7336_s1 + $0x168] sm:$0xff]   ;;  %v4415_v8 = vld [vmem:[%s5961_s10 + $0x131] sm:$0xff] }
  0xee   : > { %v6525_v19 = vadd.f32 %v5106_v17, %v5082_v16  ;;  %5425 = vmatpush3.bf16.msra.mxu1 %v5802_v9  ;;  %v311_v20 = vpop.f32.mrf.mxu0  ;;  %5402 = vmatprep.subr.bf16.mxu0 %v5803_v11  ;;  %v5822_v17 = vld [vmem:[%s7336_s1 + $0x268] sm:$0xff]  }
  0xef   : > { %v424_v24 = vpop.f32.mrf.mxu1  ;;  %5426 = vmatprep.subr.bf16.mxu1 %v5804_v13  ;;  %5372 = vmatprep.mubr.bf16.mxu0 %v1969_v15 }
  0xf0   : > { %v6534_v25 = vadd.f32 %v424_v24, %v311_v20  ;;  %v5083_v26 = vpop.f32.mrf.mxu0  ;;  %5396 = vmatprep.mubr.bf16.mxu1 %v6381_v34  ;;  %v5808_v34 = vld [vmem:[%s7336_s1 + $0x160] sm:$0xff]   ;;  %v2271_v20 = vpack.c.bf16 %v4415_v8, %v6523_v18 }
  0xf1   : > { %v5107_v27 = vpop.f32.mrf.mxu1  ;;  %5403 = vmatpush3.bf16.msra.mxu0 %v5803_v11  ;;  %v6623_v11 = vld [vmem:[%s5961_s10 + $0x1a0] sm:$0xff] }
  0xf2   : > { %v6544_v35 = vadd.f32 %v5107_v27, %v5083_v26  ;;  %5427 = vmatpush3.bf16.msra.mxu1 %v5804_v13  ;;  %v314_v38 = vpop.f32.mrf.mxu0  ;;  %5404 = vmatprep.subr.bf16.mxu0 %v5805_v21  ;;  %v4504_v26 = vld [vmem:[%s5961_s10 + $0x142] sm:$0xff] }
  0xf3   : > { %v427_v42 = vpop.f32.mrf.mxu1  ;;  %5428 = vmatprep.subr.bf16.mxu1 %v5806_v12  ;;  %v5823_v18 = vld [vmem:[%s7336_s1 + $0x1e0] sm:$0xff]  }
  0xf4   : > { %v6552_v23 = vadd.f32 %v427_v42, %v314_v38  ;;  %5373 = vmatmul.mubr.bf16.gmra.mxu0 %v1970_v6  ;;  %v5086_v30 = vpop.f32.mrf.mxu0  ;;  %v6647_v6 = vld [vmem:[%s5961_s10 + $0x152] sm:$0xff]  ;;  %v5824_v38 = vld [vmem:[%s7336_s1 + $0x260] sm:$0xff]  }
  0xf5   : > { %5405 = vmatpush3.bf16.msra.mxu0 %v5805_v21  ;;  %5397 = vmatmul.mubr.bf16.gmra.mxu1 %v2121_v29  ;;  %v5110_v45 = vpop.f32.mrf.mxu1  ;;  %v4472_v21 = vld [vmem:[%s5961_s10 + $0x141] sm:$0xff] }
  0xf6   : > { %5429 = vmatpush3.bf16.msra.mxu1 %v5806_v12  ;;  %5406 = vmatprep.subr.bf16.mxu0 %v5807_v41  ;;  %v6558_v37 = vadd.f32 %v5110_v45, %v5086_v30  ;;  %v327_v46 = vpop.f32.mrf.mxu0  ;;  %v6719_v8 = vld [vmem:[%s5961_s10 + $0x181] sm:$0xff] }
  0xf7   : > { %5430 = vmatprep.subr.bf16.mxu1 %v5808_v34  ;;  %v440_v49 = vpop.f32.mrf.mxu1  ;;  %5416 = vmatprep.mubr.bf16.mxu0 %v6433_v33  ;;  %v5812_v33 = vld [vmem:[%s7336_s1 + $0x150] sm:$0xff]  }
  0xf8   : > { %v6564_v40 = vadd.f32 %v440_v49, %v327_v46  ;;  %v5087_v50 = vpop.f32.mrf.mxu0  ;;  %5440 = vmatprep.mubr.bf16.mxu1 %v2419_v43 }
  0xf9   : > { %5407 = vmatpush3.bf16.msra.mxu0 %v5807_v41  ;;  %v5111_v51 = vpop.f32.mrf.mxu1  ;;  %v2569_v41 = vpack.c.bf16 %v6638_v22, %v4472_v21 }
  0xfa   : > { %5431 = vmatpush3.bf16.msra.mxu1 %v5808_v34  ;;  %5408 = vmatprep.subr.bf16.mxu0 %v5809_v31  ;;  %v6569_v28 = vadd.f32 %v5111_v51, %v5087_v50  ;;  %v330_v53 = vpop.f32.mrf.mxu0  ;;  %v2719_v34 = vpack.c.bf16 %v6647_v6, %v4504_v26  ;;  %v6744_v26 = vld [vmem:[%s5961_s10 + $0x1a1] sm:$0xff] }
  0xfb   : > { %5432 = vmatprep.subr.bf16.mxu1 %v5810_v48  ;;  %v443_v54 = vpop.f32.mrf.mxu1 }
  0xfc   : > { %v6574_v56 = vadd.f32 %v443_v54, %v330_v53 }
  0xfd   : > { %5409 = vmatpush3.bf16.msra.mxu0 %v5809_v31  ;;  %v5825_v31 = vld [vmem:[%s7336_s1 + $0x1d8] sm:$0xff]  }
  0xfe   : > { %5433 = vmatpush3.bf16.msra.mxu1 %v5810_v48  ;;  %5410 = vmatprep.subr.bf16.mxu0 %v5811_v52 }
  0xff   : > { %5434 = vmatprep.subr.bf16.mxu1 %v5812_v33 }
 0x101   : > { %5411 = vmatpush3.bf16.msra.mxu0 %v5811_v52 }
 0x102   : > { %5435 = vmatpush3.bf16.msra.mxu1 %v5812_v33  ;;  %5412 = vmatprep.subr.bf16.mxu0 %v5813_v57 }
 0x103   : > { %5436 = vmatprep.subr.bf16.mxu1 %v5814_v58 }
 0x105   : > { %5413 = vmatpush3.bf16.msra.mxu0 %v5813_v57 }
 0x106   : > { %5437 = vmatpush3.bf16.msra.mxu1 %v5814_v58  ;;  %5414 = vmatprep.subr.bf16.mxu0 %v5815_v59 }
 0x107   : > { %5438 = vmatprep.subr.bf16.mxu1 %v5816_v60 }
 0x109   : > { %5415 = vmatpush3.bf16.msra.mxu0 %v5815_v59 }
 0x10a   : > { %5439 = vmatpush3.bf16.msra.mxu1 %v5816_v60  ;;  %5448 = vmatprep.subr.bf16.mxu0 %v5817_v36  ;;  %v5830_v60 = vld [vmem:[%s7336_s1 + $0x248] sm:$0xff]  }
 0x10b   : > { %5472 = vmatprep.subr.bf16.mxu1 %v5818_v63 }
 0x10c   : > { %v5130_v4 = vpop.f32.mrf.mxu0  ;;  %5417 = vmatmul.mubr.bf16.vlgmr.msra.gmra.mxu0 %v6445_v55  ;;  %v6626_v55 = vld [vmem:[%s5961_s10 + $0x1b0] sm:$0xff] }
 0x10d   : > { %v599_v7 = vadd.f32 %v5130_v4, %v6525_v19  ;;  %v5154_v0 = vpop.f32.mrf.mxu1  ;;  %5441 = vmatmul.mubr.bf16.vlgmr.msra.gmra.mxu1 %v2420_v1  ;;  %5449 = vmatpush3.bf16.msra.mxu0 %v5817_v36  ;;  %v5831_v36 = vld [vmem:[%s7336_s1 + $0x1c0] sm:$0xff]   ;;  %v6708_v4 = vld [vmem:[%s5961_s10 + $0x172] sm:$0xff] }
 0x10e   : > { %5473 = vmatpush3.bf16.msra.mxu1 %v5818_v63  ;;  %v566_v9 = vpop.f32.mrf.mxu0  ;;  %5450 = vmatprep.subr.bf16.mxu0 %v5819_v44  ;;  %v5832_v63 = vld [vmem:[%s7336_s1 + $0x240] sm:$0xff]  }
 0x10f   : > { %v6628_v13 = vadd.f32 %v5154_v0, %v599_v7  ;;  %v597_v15 = vadd.f32 %v566_v9, %v6534_v25  ;;  %v717_v16 = vpop.f32.mrf.mxu1  ;;  %5474 = vmatprep.subr.bf16.mxu1 %v5820_v3  ;;  %5420 = vmatprep.mubr.bf16.mxu0 %v6468_v62  ;;  %v2422_v62 = vpack.c.bf16 %v6626_v55, %v6623_v11  ;;  %v6699_v1 = vld [vmem:[%s5961_s10 + $0x161] sm:$0xff]  ;;  %v5834_v7 = vld [vmem:[%s7336_s1 + $0x478] sm:$0xff]  }
 0x110   : > { %v5131_v19 = vpop.f32.mrf.mxu0  ;;  %5444 = vmatprep.mubr.bf16.mxu1 %v2421_v5  ;;  %v5833_v5 = vld [vmem:[%s7336_s1 + $0x3f8] sm:$0xff]  }
 0x111   : > { %v6640_v24 = vadd.f32 %v717_v16, %v597_v15  ;;  %v600_v12 = vadd.f32 %v5131_v19, %v6544_v35  ;;  %v5155_v25 = vpop.f32.mrf.mxu1  ;;  %5451 = vmatpush3.bf16.msra.mxu0 %v5819_v44  ;;  %v6702_v44 = vld [vmem:[%s5961_s10 + $0x171] sm:$0xff]  ;;  %v6727_v15 = vld [vmem:[%s5961_s10 + $0x182] sm:$0xff] }
 0x112   : > { %5475 = vmatpush3.bf16.msra.mxu1 %v5820_v3  ;;  %v569_v27 = vpop.f32.mrf.mxu0  ;;  %5452 = vmatprep.subr.bf16.mxu0 %v5821_v10  ;;  %v6705_v3 = vld [vmem:[%s5961_s10 + $0x162] sm:$0xff]  ;;  %v2570_v0 = vpack.c.bf16 %v6702_v44, %v6699_v1  ;;  %v6722_v9 = vld [vmem:[%s5961_s10 + $0x191] sm:$0xff] }
 0x113   : > { %v6652_v29 = vadd.f32 %v5155_v25, %v600_v12  ;;  %v598_v32 = vadd.f32 %v569_v27, %v6552_v23  ;;  %v720_v35 = vpop.f32.mrf.mxu1  ;;  %5476 = vmatprep.subr.bf16.mxu1 %v5822_v17  ;;  %v6730_v16 = vld [vmem:[%s5961_s10 + $0x192] sm:$0xff] }
 0x114   : > { %v5134_v42 = vpop.f32.mrf.mxu0  ;;  %5421 = vmatmul.mubr.bf16.gmra.mxu0 %v2271_v20  ;;  %v5836_v19 = vld [vmem:[%s7336_s1 + $0x470] sm:$0xff]   ;;  %v2571_v20 = vpack.c.bf16 %v6722_v9, %v6719_v8  ;;  %v2721_v12 = vpack.c.bf16 %v6730_v16, %v6727_v15 }
 0x115   : > { %v6660_v30 = vadd.f32 %v720_v35, %v598_v32  ;;  %v603_v43 = vadd.f32 %v5134_v42, %v6558_v37  ;;  %5453 = vmatpush3.bf16.msra.mxu0 %v5821_v10  ;;  %v5158_v45 = vpop.f32.mrf.mxu1  ;;  %5445 = vmatmul.mubr.bf16.gmra.mxu1 %v2422_v62  ;;  %v5826_v37 = vld [vmem:[%s7336_s1 + $0x258] sm:$0xff]   ;;  %v2720_v10 = vpack.c.bf16 %v6708_v4, %v6705_v3  ;;  %v5837_v32 = vld [vmem:[%s7336_s1 + $0x3e8] sm:$0xff]  }
 0x116   : > { %5477 = vmatpush3.bf16.msra.mxu1 %v5822_v17  ;;  %v582_v23 = vpop.f32.mrf.mxu0  ;;  %5454 = vmatprep.subr.bf16.mxu0 %v5823_v18  ;;  %v5835_v17 = vld [vmem:[%s7336_s1 + $0x3f0] sm:$0xff]   ;;  %v6753_v35 = vld [vmem:[%s5961_s10 + $0x1a2] sm:$0xff] }
 0x117   : > { %v601_v46 = vadd.f32 %v582_v23, %v6564_v40  ;;  %v6667_v48 = vadd.f32 %v5158_v45, %v603_v43  ;;  %v733_v49 = vpop.f32.mrf.mxu1  ;;  %5478 = vmatprep.subr.bf16.mxu1 %v5824_v38  ;;  %5464 = vmatprep.mubr.bf16.mxu0 %v2569_v41  ;;  %v5827_v40 = vld [vmem:[%s7336_s1 + $0x1d0] sm:$0xff]  }
 0x118   : > { %v5135_v50 = vpop.f32.mrf.mxu0  ;;  %5488 = vmatprep.mubr.bf16.mxu1 %v2719_v34  ;;  %v6747_v27 = vld [vmem:[%s5961_s10 + $0x1b1] sm:$0xff]  ;;  %v5838_v34 = vld [vmem:[%s7336_s1 + $0x468] sm:$0xff]  }
 0x119   : > { %v604_v51 = vadd.f32 %v5135_v50, %v6569_v28  ;;  %v6673_v52 = vadd.f32 %v733_v49, %v601_v46  ;;  %5455 = vmatpush3.bf16.msra.mxu0 %v5823_v18  ;;  %v5159_v53 = vpop.f32.mrf.mxu1  ;;  %v5828_v28 = vld [vmem:[%s7336_s1 + $0x250] sm:$0xff]   ;;  %v2572_v45 = vpack.c.bf16 %v6747_v27, %v6744_v26 }
 0x11a   : > { %5479 = vmatpush3.bf16.msra.mxu1 %v5824_v38  ;;  %v585_v33 = vpop.f32.mrf.mxu0  ;;  %5456 = vmatprep.subr.bf16.mxu0 %v5825_v31  ;;  %v6756_v38 = vld [vmem:[%s5961_s10 + $0x1b2] sm:$0xff] }
 0x11b   : > { %v602_v54 = vadd.f32 %v585_v33, %v6574_v56  ;;  %v6679_v57 = vadd.f32 %v5159_v53, %v604_v51  ;;  %v736_v58 = vpop.f32.mrf.mxu1  ;;  %5480 = vmatprep.subr.bf16.mxu1 %v5826_v37  ;;  %v5829_v56 = vld [vmem:[%s7336_s1 + $0x1c8] sm:$0xff]   ;;  %v2870_v33 = vpack.c.bf16 %v6589_v61, %v6542_v14 }
 0x11d   : > { %v6684_v59 = vadd.f32 %v736_v58, %v602_v54  ;;  %5457 = vmatpush3.bf16.msra.mxu0 %v5825_v31  ;;  %v3020_v54 = vpack.c.bf16 %v6699_v1, %v6638_v22  ;;  %v5842_v22 = vld [vmem:[%s7336_s1 + $0x458] sm:$0xff]  }
 0x11e   : > { %5481 = vmatpush3.bf16.msra.mxu1 %v5826_v37  ;;  %5458 = vmatprep.subr.bf16.mxu0 %v5827_v40  ;;  %v5839_v37 = vld [vmem:[%s7336_s1 + $0x3e0] sm:$0xff]  }
 0x11f   : > { %5482 = vmatprep.subr.bf16.mxu1 %v5828_v28 }
 0x121   : > { %5459 = vmatpush3.bf16.msra.mxu0 %v5827_v40 }
 0x122   : > { %5483 = vmatpush3.bf16.msra.mxu1 %v5828_v28  ;;  %5460 = vmatprep.subr.bf16.mxu0 %v5829_v56 }
 0x123   : > { %5484 = vmatprep.subr.bf16.mxu1 %v5830_v60 }
 0x125   : > { %5461 = vmatpush3.bf16.msra.mxu0 %v5829_v56 }
 0x126   : > { %5485 = vmatpush3.bf16.msra.mxu1 %v5830_v60  ;;  %5462 = vmatprep.subr.bf16.mxu0 %v5831_v36  ;;  %v5841_v60 = vld [vmem:[%s7336_s1 + $0x3d8] sm:$0xff]  }
 0x127   : > { %5486 = vmatprep.subr.bf16.mxu1 %v5832_v63 }
 0x129   : > { %5463 = vmatpush3.bf16.msra.mxu0 %v5831_v36 }
 0x12a   : > { %5487 = vmatpush3.bf16.msra.mxu1 %v5832_v63  ;;  %5496 = vmatprep.subr.bf16.mxu0 %v5833_v5 }
 0x12b   : > { %5520 = vmatprep.subr.bf16.mxu1 %v5834_v7 }
 0x12c   : > { %v5178_v21 = vpop.f32.mrf.mxu0  ;;  %5465 = vmatmul.mubr.bf16.vlgmr.msra.gmra.mxu0 %v2570_v0 }
 0x12d   : > { %v900_v25 = vadd.f32 %v5178_v21, %v6628_v13  ;;  %v5202_v62 = vpop.f32.mrf.mxu1  ;;  %5489 = vmatmul.mubr.bf16.vlgmr.msra.gmra.mxu1 %v2720_v10  ;;  %5497 = vmatpush3.bf16.msra.mxu0 %v5833_v5  ;;  %v5847_v21 = vld [vmem:[%s7336_s1 + $0x3c0] sm:$0xff]  }
 0x12e   : > { %5521 = vmatpush3.bf16.msra.mxu1 %v5834_v7  ;;  %v867_v18 = vpop.f32.mrf.mxu0  ;;  %5498 = vmatprep.subr.bf16.mxu0 %v5835_v17 }
 0x12f   : > { %v6758_v41 = vadd.f32 %v5202_v62, %v900_v25  ;;  %v898_v13 = vadd.f32 %v867_v18, %v6640_v24  ;;  %v1017_v42 = vpop.f32.mrf.mxu1  ;;  %5522 = vmatprep.subr.bf16.mxu1 %v5836_v19  ;;  %5468 = vmatprep.mubr.bf16.mxu0 %v2571_v20  ;;  %v2722_v24 = vpack.c.bf16 %v6756_v38, %v6753_v35  ;;  %v5845_v20 = vld [vmem:[%s7336_s1 + $0x3c8] sm:$0xff]   ;;  %v5849_v25 = vld [vmem:[%s7336_s1 + $0x4f8] sm:$0xff]  }
 0x130   : > { %v5179_v43 = vpop.f32.mrf.mxu0  ;;  %5492 = vmatprep.mubr.bf16.mxu1 %v2721_v12  ;;  %v5848_v12 = vld [vmem:[%s7336_s1 + $0x440] sm:$0xff]   ;;  %v5850_v62 = vld [vmem:[%s7336_s1 + $0x1b8] sm:$0xff]   ;;  %v2871_v18 = vpack.c.bf16 %v6603_v47, %v6592_v39  ;;  %v2872_v39 = vpack.c.bf16 %v6623_v11, %v6606_v2 }
 0x131   : > { %v6766_v23 = vadd.f32 %v1017_v42, %v898_v13  ;;  %v901_v31 = vadd.f32 %v5179_v43, %v6652_v29  ;;  %v5203_v46 = vpop.f32.mrf.mxu1  ;;  %5499 = vmatpush3.bf16.msra.mxu0 %v5835_v17  ;;  %v5840_v29 = vld [vmem:[%s7336_s1 + $0x460] sm:$0xff]   ;;  %v5851_v13 = vld [vmem:[%s7336_s1 + $0x4f0] sm:$0xff]  }
 0x132   : > { %5523 = vmatpush3.bf16.msra.mxu1 %v5836_v19  ;;  %v870_v49 = vpop.f32.mrf.mxu0  ;;  %5500 = vmatprep.subr.bf16.mxu0 %v5837_v32  ;;  %v5852_v42 = vld [vmem:[%s7336_s1 + $0x1b0] sm:$0xff]   ;;  %v4543_v43 = vld [vmem:[%s5961_s10 + $0x1c0] sm:$0xff] }
 0x133   : > { %v6774_v50 = vadd.f32 %v5203_v46, %v901_v31  ;;  %v899_v51 = vadd.f32 %v870_v49, %v6660_v30  ;;  %v1020_v53 = vpop.f32.mrf.mxu1  ;;  %5524 = vmatprep.subr.bf16.mxu1 %v5838_v34  ;;  %v5853_v31 = vld [vmem:[%s7336_s1 + $0x4e8] sm:$0xff]  }
 0x134   : > { %v5182_v40 = vpop.f32.mrf.mxu0  ;;  %5469 = vmatmul.mubr.bf16.gmra.mxu0 %v2572_v45  ;;  %v4575_v2 = vld [vmem:[%s5961_s10 + $0x1c1] sm:$0xff] }
 0x135   : > { %v6784_v58 = vadd.f32 %v1020_v53, %v899_v51  ;;  %v904_v28 = vadd.f32 %v5182_v40, %v6667_v48  ;;  %5501 = vmatpush3.bf16.msra.mxu0 %v5837_v32  ;;  %v5206_v30 = vpop.f32.mrf.mxu1  ;;  %5493 = vmatmul.mubr.bf16.gmra.mxu1 %v2722_v24  ;;  %v3021_v32 = vpack.c.bf16 %v6719_v8, %v6702_v44  ;;  %v5855_v40 = vld [vmem:[%s7336_s1 + $0x4e0] sm:$0xff]  }
 0x136   : > { %5525 = vmatpush3.bf16.msra.mxu1 %v5838_v34  ;;  %v883_v56 = vpop.f32.mrf.mxu0  ;;  %5502 = vmatprep.subr.bf16.mxu0 %v5839_v37  ;;  %v3022_v44 = vpack.c.bf16 %v6744_v26, %v6722_v9  ;;  %v2873_v24 = vpack.c.bf16 %v4543_v43, %v6626_v55  ;;  %v3023_v53 = vpack.c.bf16 %v4575_v2, %v6747_v27  ;;  %v5856_v27 = vld [vmem:[%s7336_s1 + $0x1a0] sm:$0xff]  }
 0x137   : > { %v902_v14 = vadd.f32 %v883_v56, %v6673_v52  ;;  %v6791_v61 = vadd.f32 %v5206_v30, %v904_v28  ;;  %v1033_v36 = vpop.f32.mrf.mxu1  ;;  %5526 = vmatprep.subr.bf16.mxu1 %v5840_v29  ;;  %5512 = vmatprep.mubr.bf16.mxu0 %v2870_v33  ;;  %v5843_v52 = vld [vmem:[%s7336_s1 + $0x3d0] sm:$0xff]   ;;  %v4607_v2 = vld [vmem:[%s5961_s10 + $0x1c2] sm:$0xff] }
 0x138   : > { %v5183_v48 = vpop.f32.mrf.mxu0  ;;  %5536 = vmatprep.mubr.bf16.mxu1 %v3020_v54 }
 0x139   : > { %v905_v63 = vadd.f32 %v5183_v48, %v6679_v57  ;;  %v6797_v1 = vadd.f32 %v1033_v36, %v902_v14  ;;  %5503 = vmatpush3.bf16.msra.mxu0 %v5839_v37  ;;  %v5207_v5 = vpop.f32.mrf.mxu1  ;;  %v5844_v57 = vld [vmem:[%s7336_s1 + $0x450] sm:$0xff]  }
 0x13a   : > { %5527 = vmatpush3.bf16.msra.mxu1 %v5840_v29  ;;  %v886_v7 = vpop.f32.mrf.mxu0  ;;  %5504 = vmatprep.subr.bf16.mxu0 %v5841_v60  ;;  %v6861_v29 = vld [vmem:[%s5961_s10 + $0x1f0] sm:$0xff] }
 0x13b   : > { %v903_v0 = vadd.f32 %v886_v7, %v6684_v59  ;;  %v6803_v10 = vadd.f32 %v5207_v5, %v905_v63  ;;  %v1036_v17 = vpop.f32.mrf.mxu1  ;;  %5528 = vmatprep.subr.bf16.mxu1 %v5842_v22  ;;  %v5846_v59 = vld [vmem:[%s7336_s1 + $0x448] sm:$0xff]  }
 0x13d   : > { %v6808_v19 = vadd.f32 %v1036_v17, %v903_v0  ;;  %5505 = vmatpush3.bf16.msra.mxu0 %v5841_v60 }
 0x13e   : > { %5529 = vmatpush3.bf16.msra.mxu1 %v5842_v22  ;;  %5506 = vmatprep.subr.bf16.mxu0 %v5843_v52  ;;  %v5857_v22 = vld [vmem:[%s7336_s1 + $0x4d8] sm:$0xff]  }
 0x13f   : > { %5530 = vmatprep.subr.bf16.mxu1 %v5844_v57 }
 0x141   : > { %5507 = vmatpush3.bf16.msra.mxu0 %v5843_v52 }
 0x142   : > { %5531 = vmatpush3.bf16.msra.mxu1 %v5844_v57  ;;  %5508 = vmatprep.subr.bf16.mxu0 %v5845_v20 }
 0x143   : > { %5532 = vmatprep.subr.bf16.mxu1 %v5846_v59 }
 0x145   : > { %5509 = vmatpush3.bf16.msra.mxu0 %v5845_v20 }
 0x146   : > { %5533 = vmatpush3.bf16.msra.mxu1 %v5846_v59  ;;  %5510 = vmatprep.subr.bf16.mxu0 %v5847_v21 }
 0x147   : > { %5534 = vmatprep.subr.bf16.mxu1 %v5848_v12 }
 0x149   : > { %5511 = vmatpush3.bf16.msra.mxu0 %v5847_v21  ;;  %v5861_v21 = vld [vmem:[%s7336_s1 + $0x4c8] sm:$0xff]  }
 0x14a   : > { %5535 = vmatpush3.bf16.msra.mxu1 %v5848_v12  ;;  %5544 = vmatprep.subr.bf16.mxu0 %v5849_v25  ;;  %v5863_v12 = vld [vmem:[%s7336_s1 + $0x4c0] sm:$0xff]  }
 0x14b   : > { %5568 = vmatprep.subr.bf16.mxu1 %v5850_v62 }
 0x14c   : > { %v5226_v47 = vpop.f32.mrf.mxu0  ;;  %5513 = vmatmul.mubr.bf16.vlgmr.msra.gmra.mxu0 %v2871_v18  ;;  %v6917_v18 = vld [vmem:[%s5961_s10 + $0x210] sm:$0xff] }
 0x14d   : > { %v1201_v8 = vadd.f32 %v5226_v47, %v6758_v41  ;;  %v5250_v34 = vpop.f32.mrf.mxu1  ;;  %5537 = vmatmul.mubr.bf16.vlgmr.msra.gmra.mxu1 %v3021_v32  ;;  %5545 = vmatpush3.bf16.msra.mxu0 %v5849_v25  ;;  %v5854_v41 = vld [vmem:[%s7336_s1 + $0x1a8] sm:$0xff]   ;;  %v5864_v25 = vld [vmem:[%s7336_s1 + $0x180] sm:$0xff]   ;;  %v5865_v32 = vld [vmem:[%s7336_s1 + $0x238] sm:$0xff]  }
 0x14e   : > { %5569 = vmatpush3.bf16.msra.mxu1 %v5850_v62  ;;  %v1168_v45 = vpop.f32.mrf.mxu0  ;;  %5546 = vmatprep.subr.bf16.mxu0 %v5851_v13  ;;  %v6914_v62 = vld [vmem:[%s5961_s10 + $0x200] sm:$0xff] }
 0x14f   : > { %v6848_v11 = vadd.f32 %v5250_v34, %v1201_v8  ;;  %v1199_v9 = vadd.f32 %v1168_v45, %v6766_v23  ;;  %v1318_v26 = vpop.f32.mrf.mxu1  ;;  %5570 = vmatprep.subr.bf16.mxu1 %v5852_v42  ;;  %5516 = vmatprep.mubr.bf16.mxu0 %v2872_v39  ;;  %v4632_v23 = vld [vmem:[%s5961_s10 + $0x1e0] sm:$0xff]  ;;  %v3322_v39 = vpack.c.bf16 %v6917_v18, %v6914_v62  ;;  %v5867_v8 = vld [vmem:[%s7336_s1 + $0x230] sm:$0xff]  }
 0x150   : > { %v5227_v46 = vpop.f32.mrf.mxu0  ;;  %5540 = vmatprep.mubr.bf16.mxu1 %v3022_v44  ;;  %v3321_v56 = vpack.c.bf16 %v6861_v29, %v4632_v23  ;;  %v6930_v47 = vld [vmem:[%s5961_s10 + $0x220] sm:$0xff]  ;;  %v6933_v44 = vld [vmem:[%s5961_s10 + $0x230] sm:$0xff] }
 0x151   : > { %v6855_v49 = vadd.f32 %v1318_v26, %v1199_v9  ;;  %v1202_v37 = vadd.f32 %v5227_v46, %v6774_v50  ;;  %v5251_v51 = vpop.f32.mrf.mxu1  ;;  %5547 = vmatpush3.bf16.msra.mxu0 %v5851_v13  ;;  %v3170_v50 = vpack.c.bf16 %v6705_v3, %v6647_v6  ;;  %v5866_v13 = vld [vmem:[%s7336_s1 + $0x438] sm:$0xff]   ;;  %v3323_v43 = vpack.c.bf16 %v6933_v44, %v6930_v47  ;;  %v6954_v26 = vld [vmem:[%s5961_s10 + $0x250] sm:$0xff] }
 0x152   : > { %5571 = vmatpush3.bf16.msra.mxu1 %v5852_v42  ;;  %v1171_v33 = vpop.f32.mrf.mxu0  ;;  %5548 = vmatprep.subr.bf16.mxu0 %v5853_v31  ;;  %v3171_v42 = vpack.c.bf16 %v6727_v15, %v6708_v4  ;;  %v5868_v4 = vld [vmem:[%s7336_s1 + $0x430] sm:$0xff]   ;;  %v3172_v15 = vpack.c.bf16 %v6753_v35, %v6730_v16  ;;  %v5869_v16 = vld [vmem:[%s7336_s1 + $0x228] sm:$0xff]   ;;  %v6951_v35 = vld [vmem:[%s5961_s10 + $0x240] sm:$0xff] }
 0x153   : > { %v6866_v55 = vadd.f32 %v5251_v51, %v1202_v37  ;;  %v1200_v54 = vadd.f32 %v1171_v33, %v6784_v58  ;;  %v1321_v28 = vpop.f32.mrf.mxu1  ;;  %5572 = vmatprep.subr.bf16.mxu1 %v5854_v41  ;;  %v3173_v51 = vpack.c.bf16 %v4607_v2, %v6756_v38  ;;  %v6965_v23 = vld [vmem:[%s5961_s10 + $0x1f1] sm:$0xff]  ;;  %v5871_v38 = vld [vmem:[%s7336_s1 + $0x220] sm:$0xff]  }
 0x154   : > { %v5230_v30 = vpop.f32.mrf.mxu0  ;;  %5517 = vmatmul.mubr.bf16.gmra.mxu0 %v2873_v24  ;;  %v5870_v24 = vld [vmem:[%s7336_s1 + $0x428] sm:$0xff]  }
 0x155   : > { %v6875_v60 = vadd.f32 %v1321_v28, %v1200_v54  ;;  %v1205_v14 = vadd.f32 %v5230_v30, %v6791_v61  ;;  %5549 = vmatpush3.bf16.msra.mxu0 %v5853_v31  ;;  %v5254_v36 = vpop.f32.mrf.mxu1  ;;  %5541 = vmatmul.mubr.bf16.gmra.mxu1 %v3023_v53  ;;  %v5858_v61 = vld [vmem:[%s7336_s1 + $0x198] sm:$0xff]   ;;  %v4664_v53 = vld [vmem:[%s5961_s10 + $0x1e1] sm:$0xff] }
 0x156   : > { %5573 = vmatpush3.bf16.msra.mxu1 %v5854_v41  ;;  %v1184_v58 = vpop.f32.mrf.mxu0  ;;  %5550 = vmatprep.subr.bf16.mxu0 %v5855_v40 }
 0x157   : > { %v1203_v6 = vadd.f32 %v1184_v58, %v6797_v1  ;;  %v6882_v3 = vadd.f32 %v5254_v36, %v1205_v14  ;;  %v1334_v48 = vpop.f32.mrf.mxu1  ;;  %5574 = vmatprep.subr.bf16.mxu1 %v5856_v27  ;;  %5560 = vmatprep.mubr.bf16.mxu0 %v3170_v50  ;;  %v5859_v1 = vld [vmem:[%s7336_s1 + $0x4d0] sm:$0xff]   ;;  %v3622_v36 = vpack.c.bf16 %v6914_v62, %v6861_v29  ;;  %v5874_v29 = vld [vmem:[%s7336_s1 + $0x418] sm:$0xff]   ;;  %v5880_v62 = vld [vmem:[%s7336_s1 + $0x400] sm:$0xff]  }
 0x158   : > { %v5231_v63 = vpop.f32.mrf.mxu0  ;;  %5584 = vmatprep.mubr.bf16.mxu1 %v3321_v56  ;;  %v3471_v56 = vpack.c.bf16 %v6965_v23, %v4664_v53 }
 0x159   : > { %v1206_v5 = vadd.f32 %v5231_v63, %v6803_v10  ;;  %v6888_v7 = vadd.f32 %v1334_v48, %v1203_v6  ;;  %5551 = vmatpush3.bf16.msra.mxu0 %v5855_v40  ;;  %v5255_v52 = vpop.f32.mrf.mxu1  ;;  %v5860_v10 = vld [vmem:[%s7336_s1 + $0x190] sm:$0xff]   ;;  %v5873_v48 = vld [vmem:[%s7336_s1 + $0x218] sm:$0xff]  }
 0x15a   : > { %5575 = vmatpush3.bf16.msra.mxu1 %v5856_v27  ;;  %v1187_v0 = vpop.f32.mrf.mxu0  ;;  %5552 = vmatprep.subr.bf16.mxu0 %v5857_v22 }
 0x15b   : > { %v1204_v17 = vadd.f32 %v1187_v0, %v6808_v19  ;;  %v6894_v57 = vadd.f32 %v5255_v52, %v1206_v5  ;;  %v1337_v20 = vpop.f32.mrf.mxu1  ;;  %5576 = vmatprep.subr.bf16.mxu1 %v5858_v61  ;;  %v5862_v19 = vld [vmem:[%s7336_s1 + $0x188] sm:$0xff]  }
 0x15d   : > { %v6899_v59 = vadd.f32 %v1337_v20, %v1204_v17  ;;  %5553 = vmatpush3.bf16.msra.mxu0 %v5857_v22 }
 0x15e   : > { %5577 = vmatpush3.bf16.msra.mxu1 %v5858_v61  ;;  %5554 = vmatprep.subr.bf16.mxu0 %v5859_v1 }
 0x15f   : > { %5578 = vmatprep.subr.bf16.mxu1 %v5860_v10 }
 0x161   : > { %5555 = vmatpush3.bf16.msra.mxu0 %v5859_v1 }
 0x162   : > { %5579 = vmatpush3.bf16.msra.mxu1 %v5860_v10  ;;  %5556 = vmatprep.subr.bf16.mxu0 %v5861_v21 }
 0x163   : > { %5580 = vmatprep.subr.bf16.mxu1 %v5862_v19 }
 0x165   : > { %5557 = vmatpush3.bf16.msra.mxu0 %v5861_v21 }
 0x166   : > { %5581 = vmatpush3.bf16.msra.mxu1 %v5862_v19  ;;  %5558 = vmatprep.subr.bf16.mxu0 %v5863_v12 }
 0x167   : > { %5582 = vmatprep.subr.bf16.mxu1 %v5864_v25 }
 0x169   : > { %5559 = vmatpush3.bf16.msra.mxu0 %v5863_v12  ;;  %v5877_v12 = vld [vmem:[%s7336_s1 + $0x208] sm:$0xff]  }
 0x16a   : > { %5583 = vmatpush3.bf16.msra.mxu1 %v5864_v25  ;;  %5592 = vmatprep.subr.bf16.mxu0 %v5865_v32  ;;  %v5879_v25 = vld [vmem:[%s7336_s1 + $0x200] sm:$0xff]  }
 0x16b   : > { %5616 = vmatprep.subr.bf16.mxu1 %v5866_v13 }
 0x16c   : > { %v5274_v34 = vpop.f32.mrf.mxu0  ;;  %5561 = vmatmul.mubr.bf16.vlgmr.msra.gmra.mxu0 %v3171_v42  ;;  %v5881_v42 = vld [vmem:[%s7336_s1 + $0x4b8] sm:$0xff]  }
 0x16d   : > { %v1501_v45 = vadd.f32 %v5274_v34, %v6848_v11  ;;  %v5298_v31 = vpop.f32.mrf.mxu1  ;;  %5585 = vmatmul.mubr.bf16.vlgmr.msra.gmra.mxu1 %v3322_v39  ;;  %5593 = vmatpush3.bf16.msra.mxu0 %v5865_v32  ;;  %v7023_v32 = vld [vmem:[%s5961_s10 + $0x201] sm:$0xff]  ;;  %v5882_v34 = vld [vmem:[%s7336_s1 + $0x4b0] sm:$0xff]  }
 0x16e   : > { %5617 = vmatpush3.bf16.msra.mxu1 %v5866_v13  ;;  %v1468_v9 = vpop.f32.mrf.mxu0  ;;  %5594 = vmatprep.subr.bf16.mxu0 %v5867_v8  ;;  %v7026_v13 = vld [vmem:[%s5961_s10 + $0x211] sm:$0xff] }
 0x16f   : > { %v6956_v41 = vadd.f32 %v5298_v31, %v1501_v45  ;;  %v1499_v11 = vadd.f32 %v1468_v9, %v6855_v49  ;;  %v1619_v46 = vpop.f32.mrf.mxu1  ;;  %5618 = vmatprep.subr.bf16.mxu1 %v5868_v4  ;;  %5564 = vmatprep.mubr.bf16.mxu0 %v3172_v15  ;;  %v3324_v49 = vpack.c.bf16 %v6954_v26, %v6951_v35 }
 0x170   : > { %v5275_v37 = vpop.f32.mrf.mxu0  ;;  %5588 = vmatprep.mubr.bf16.mxu1 %v3323_v43  ;;  %v3472_v39 = vpack.c.bf16 %v7026_v13, %v7023_v32  ;;  %v3623_v15 = vpack.c.bf16 %v6930_v47, %v6917_v18  ;;  %v3624_v31 = vpack.c.bf16 %v6951_v35, %v6933_v44  ;;  %v4670_v18 = vld [vmem:[%s5961_s10 + $0x241] sm:$0xff]  ;;  %v7048_v47 = vld [vmem:[%s5961_s10 + $0x251] sm:$0xff] }
 0x171   : > { %v6967_v33 = vadd.f32 %v1619_v46, %v1499_v11  ;;  %v1502_v40 = vadd.f32 %v5275_v37, %v6866_v55  ;;  %v5299_v54 = vpop.f32.mrf.mxu1  ;;  %5595 = vmatpush3.bf16.msra.mxu0 %v5867_v8  ;;  %v5872_v55 = vld [vmem:[%s7336_s1 + $0x420] sm:$0xff]   ;;  %v5883_v11 = vld [vmem:[%s7336_s1 + $0x4a8] sm:$0xff]   ;;  %v3474_v37 = vpack.c.bf16 %v7048_v47, %v4670_v18 }
 0x172   : > { %5619 = vmatpush3.bf16.msra.mxu1 %v5868_v4  ;;  %v1471_v28 = vpop.f32.mrf.mxu0  ;;  %5596 = vmatprep.subr.bf16.mxu0 %v5869_v16  ;;  %v7034_v8 = vld [vmem:[%s5961_s10 + $0x221] sm:$0xff]  ;;  %v4669_v4 = vld [vmem:[%s5961_s10 + $0x231] sm:$0xff] }
 0x173   : > { %v6975_v27 = vadd.f32 %v5299_v54, %v1502_v40  ;;  %v1500_v50 = vadd.f32 %v1471_v28, %v6875_v60  ;;  %v1622_v30 = vpop.f32.mrf.mxu1  ;;  %5620 = vmatprep.subr.bf16.mxu1 %v5870_v24  ;;  %v3473_v43 = vpack.c.bf16 %v4669_v4, %v7034_v8  ;;  %v4703_v46 = vld [vmem:[%s5961_s10 + $0x260] sm:$0xff] }
 0x174   : > { %v5278_v14 = vpop.f32.mrf.mxu0  ;;  %5565 = vmatmul.mubr.bf16.gmra.mxu0 %v3173_v51  ;;  %v3625_v54 = vpack.c.bf16 %v4703_v46, %v6954_v26 }
 0x175   : > { %v6984_v58 = vadd.f32 %v1622_v30, %v1500_v50  ;;  %v1505_v22 = vadd.f32 %v5278_v14, %v6882_v3  ;;  %5597 = vmatpush3.bf16.msra.mxu0 %v5869_v16  ;;  %v5302_v6 = vpop.f32.mrf.mxu1  ;;  %5589 = vmatmul.mubr.bf16.gmra.mxu1 %v3324_v49 }
 0x176   : > { %5621 = vmatpush3.bf16.msra.mxu1 %v5870_v24  ;;  %v1484_v60 = vpop.f32.mrf.mxu0  ;;  %5598 = vmatprep.subr.bf16.mxu0 %v5871_v38 }
 0x177   : > { %v1503_v61 = vadd.f32 %v1484_v60, %v6888_v7  ;;  %v6991_v63 = vadd.f32 %v5302_v6, %v1505_v22  ;;  %v1635_v5 = vpop.f32.mrf.mxu1  ;;  %5622 = vmatprep.subr.bf16.mxu1 %v5872_v55  ;;  %5608 = vmatprep.mubr.bf16.mxu0 %v3471_v56  ;;  %v5875_v7 = vld [vmem:[%s7336_s1 + $0x210] sm:$0xff]  }
 0x178   : > { %v5279_v3 = vpop.f32.mrf.mxu0  ;;  %5632 = vmatprep.mubr.bf16.mxu1 %v3622_v36 }
 0x179   : > { %v1506_v52 = vadd.f32 %v5279_v3, %v6894_v57  ;;  %v6997_v0 = vadd.f32 %v1635_v5, %v1503_v61  ;;  %5599 = vmatpush3.bf16.msra.mxu0 %v5871_v38  ;;  %v5303_v1 = vpop.f32.mrf.mxu1  ;;  %v5876_v57 = vld [vmem:[%s7336_s1 + $0x410] sm:$0xff]  }
 0x17a   : > { %5623 = vmatpush3.bf16.msra.mxu1 %v5872_v55  ;;  %v1487_v17 = vpop.f32.mrf.mxu0  ;;  %5600 = vmatprep.subr.bf16.mxu0 %v5873_v48  ;;  %v3774_v55 = vpack.c.bf16 %v4670_v18, %v4669_v4 }
 0x17b   : > { %v1504_v20 = vadd.f32 %v1487_v17, %v6899_v59  ;;  %v7003_v10 = vadd.f32 %v5303_v1, %v1506_v52  ;;  %v1638_v21 = vpop.f32.mrf.mxu1  ;;  %5624 = vmatprep.subr.bf16.mxu1 %v5874_v29  ;;  %v5878_v59 = vld [vmem:[%s7336_s1 + $0x408] sm:$0xff]  }
 0x17c   : > { %v5887_v17 = vld [vmem:[%s7336_s1 + $0x488] sm:$0xff]  }
 0x17d   : > { %v7008_v19 = vadd.f32 %v1638_v21, %v1504_v20  ;;  %5601 = vmatpush3.bf16.msra.mxu0 %v5873_v48  ;;  %v4735_v20 = vld [vmem:[%s5961_s10 + $0x261] sm:$0xff]  ;;  %s4763_s10 = sshll.u32 %s7376_s13, 6 }
 0x17e   : > { %5625 = vmatpush3.bf16.msra.mxu1 %v5874_v29  ;;  %5602 = vmatprep.subr.bf16.mxu0 %v5875_v7  ;;  %v5886_v29 = vld [vmem:[%s7336_s1 + $0x490] sm:$0xff]   ;;  %v3775_v21 = vpack.c.bf16 %v4735_v20, %v7048_v47  ;;  %s7320_s13 = scalar_lea.vmem %s7338_s3, %s4763_s10 }
 0x17f   : > { %5626 = vmatprep.subr.bf16.mxu1 %v5876_v57 }
 0x181   : > { %5603 = vmatpush3.bf16.msra.mxu0 %v5875_v7  ;;  %v5888_v7 = vld [vmem:[%s7336_s1 + $0x480] sm:$0xff]  }
 0x182   : > { %5627 = vmatpush3.bf16.msra.mxu1 %v5876_v57  ;;  %5604 = vmatprep.subr.bf16.mxu0 %v5877_v12 }
 0x183   : > { %5628 = vmatprep.subr.bf16.mxu1 %v5878_v59 }
 0x185   : > { %5605 = vmatpush3.bf16.msra.mxu0 %v5877_v12 }
 0x186   : > { %5629 = vmatpush3.bf16.msra.mxu1 %v5878_v59  ;;  %5606 = vmatprep.subr.bf16.mxu0 %v5879_v25 }
 0x187   : > { %5630 = vmatprep.subr.bf16.mxu1 %v5880_v62 }
 0x189   : > { %5607 = vmatpush3.bf16.msra.mxu0 %v5879_v25 }
 0x18a   : > { %5631 = vmatpush3.bf16.msra.mxu1 %v5880_v62  ;;  %5640 = vmatprep.subr.bf16.mxu0 %v5881_v42 }
 0x18b   : > { %5664 = vmatprep.subr.bf16.mxu1 %v5881_v42 }
 0x18c   : > { %v5322_v45 = vpop.f32.mrf.mxu0  ;;  %5609 = vmatmul.mubr.bf16.vlgmr.msra.gmra.mxu0 %v3472_v39 }
 0x18d   : > { %v1802_v2 = vadd.f32 %v5322_v45, %v6956_v41  ;;  %v5346_v9 = vpop.f32.mrf.mxu1  ;;  %5633 = vmatmul.mubr.bf16.vlgmr.msra.gmra.mxu1 %v3623_v15  ;;  %5641 = vmatpush3.bf16.msra.mxu0 %v5881_v42 }
 0x18e   : > { %5672 = vmatpush3.bf16.msra.mxu1 %v5881_v42  ;;  %v1769_v16 = vpop.f32.mrf.mxu0  ;;  %5642 = vmatprep.subr.bf16.mxu0 %v5882_v34 }
 0x18f   : > { %v7054_v24 = vadd.f32 %v5346_v9, %v1802_v2  ;;  %v1800_v44 = vadd.f32 %v1769_v16, %v6967_v33  ;;  %v1920_v35 = vpop.f32.mrf.mxu1  ;;  %5665 = vmatprep.subr.bf16.mxu1 %v5882_v34  ;;  %5612 = vmatprep.mubr.bf16.mxu0 %v3473_v43  ;;  %v5884_v33 = vld [vmem:[%s7336_s1 + $0x4a0] sm:$0xff]  }
 0x190   : > { %v5323_v41 = vpop.f32.mrf.mxu0  ;;  %5636 = vmatprep.mubr.bf16.mxu1 %v3624_v31 }
 0x191   : > { %v7058_v51 = vadd.f32 %v1920_v35, %v1800_v44  ;;  %v1803_v53 = vadd.f32 %v5323_v41, %v6975_v27  ;;  %v5347_v40 = vpop.f32.mrf.mxu1  ;;  %5643 = vmatpush3.bf16.msra.mxu0 %v5882_v34  ;;  %v3772_v27 = vpack.c.bf16 %v7023_v32, %v6965_v23 }
 0x192   : > { %5673 = vmatpush3.bf16.msra.mxu1 %v5882_v34  ;;  %v1772_v49 = vpop.f32.mrf.mxu0  ;;  %5644 = vmatprep.subr.bf16.mxu0 %v5883_v11 }
 0x193   : > { %v7065_v28 = vadd.f32 %v5347_v40, %v1803_v53  ;;  %v1801_v38 = vadd.f32 %v1772_v49, %v6984_v58  ;;  %v1923_v50 = vpop.f32.mrf.mxu1  ;;  %5666 = vmatprep.subr.bf16.mxu1 %v5883_v11  ;;  %v5885_v58 = vld [vmem:[%s7336_s1 + $0x498] sm:$0xff]  }
 0x194   : > { %v5326_v30 = vpop.f32.mrf.mxu0  ;;  %5613 = vmatmul.mubr.bf16.gmra.mxu0 %v3474_v37 }
 0x195   : > { %v7070_v26 = vadd.f32 %v1923_v50, %v1801_v38  ;;  %v1806_v56 = vadd.f32 %v5326_v30, %v6991_v63  ;;  %5645 = vmatpush3.bf16.msra.mxu0 %v5883_v11  ;;  %v5350_v14 = vpop.f32.mrf.mxu1  ;;  %5637 = vmatmul.mubr.bf16.gmra.mxu1 %v3625_v54 }
 0x196   : > { %5674 = vmatpush3.bf16.msra.mxu1 %v5883_v11  ;;  %v1785_v36 = vpop.f32.mrf.mxu0  ;;  %5646 = vmatprep.subr.bf16.mxu0 %v5884_v33 }
 0x197   : > { %v1804_v22 = vadd.f32 %v1785_v36, %v6997_v0  ;;  %v1957_v23 = vadd.f32 %v5350_v14, %v1806_v56  ;;  %v1936_v6 = vpop.f32.mrf.mxu1  ;;  %5667 = vmatprep.subr.bf16.mxu1 %v5884_v33  ;;  %5656 = vmatprep.mubr.bf16.mxu0 %v3772_v27 }
 0x198   : > { %v5327_v60 = vpop.f32.mrf.mxu0  ;;  %5660 = vmatprep.mubr.bf16.mxu1 %v3774_v55 }
 0x199   : > { %v1807_v48 = vadd.f32 %v5327_v60, %v7003_v10  ;;  %v1955_v61 = vadd.f32 %v1936_v6, %v1804_v22  ;;  %5647 = vmatpush3.bf16.msra.mxu0 %v5884_v33  ;;  %v5351_v63 = vpop.f32.mrf.mxu1  ;;  %v3773_v10 = vpack.c.bf16 %v7034_v8, %v7026_v13 }
 0x19a   : > { %5675 = vmatpush3.bf16.msra.mxu1 %v5884_v33  ;;  %v1788_v5 = vpop.f32.mrf.mxu0  ;;  %5648 = vmatprep.subr.bf16.mxu0 %v5885_v58 }
 0x19b   : > { %v1805_v3 = vadd.f32 %v1788_v5, %v7008_v19  ;;  %v1958_v52 = vadd.f32 %v5351_v63, %v1807_v48  ;;  %v1939_v0 = vpop.f32.mrf.mxu1  ;;  %5668 = vmatprep.subr.bf16.mxu1 %v5885_v58 }
 0x19d   : > { %v1956_v1 = vadd.f32 %v1939_v0, %v1805_v3  ;;  %5649 = vmatpush3.bf16.msra.mxu0 %v5885_v58 }
 0x19e   : > { %5676 = vmatpush3.bf16.msra.mxu1 %v5885_v58  ;;  %5650 = vmatprep.subr.bf16.mxu0 %v5886_v29 }
 0x19f   : > { %5669 = vmatprep.subr.bf16.mxu1 %v5886_v29 }
 0x1a1   : > { %5651 = vmatpush3.bf16.msra.mxu0 %v5886_v29 }
 0x1a2   : > { %5677 = vmatpush3.bf16.msra.mxu1 %v5886_v29  ;;  %5652 = vmatprep.subr.bf16.mxu0 %v5887_v17 }
 0x1a3   : > { %5670 = vmatprep.subr.bf16.mxu1 %v5887_v17 }
 0x1a5   : > { %5653 = vmatpush3.bf16.msra.mxu0 %v5887_v17 }
 0x1a6   : > { %5678 = vmatpush3.bf16.msra.mxu1 %v5887_v17  ;;  %5654 = vmatprep.subr.bf16.mxu0 %v5888_v7 }
 0x1a7   : > { %5671 = vmatprep.subr.bf16.mxu1 %v5888_v7 }
 0x1a9   : > { %5655 = vmatpush3.bf16.msra.mxu0 %v5888_v7 }
 0x1aa   : > { %5679 = vmatpush3.bf16.msra.mxu1 %v5888_v7 }
 0x1ac   : > { %v5370_v57 = vpop.f32.mrf.mxu0  ;;  %5657 = vmatmul.mubr.bf16.vlgmr.msra.gmra.mxu0 %v3773_v10 }
 0x1ad   : > { %v2103_v19 = vadd.f32 %v5370_v57, %v7054_v24  ;;  %v5394_v12 = vpop.f32.mrf.mxu1  ;;  %5661 = vmatmul.mubr.bf16.vlgmr.msra.gmra.mxu1 %v3775_v21 }
 0x1ae   : > { %v2070_v59 = vpop.f32.mrf.mxu0 }
 0x1af   : > { %v7093_v25 = vadd.f32 %v5394_v12, %v2103_v19  ;;  %v2101_v62 = vadd.f32 %v2070_v59, %v7058_v51  ;;  %v2221_v32 = vpop.f32.mrf.mxu1 }
 0x1b0   : > { %v5371_v42 = vpop.f32.mrf.mxu0 }
 0x1b1   : > { %v7096_v39 = vadd.f32 %v2221_v32, %v2101_v62  ;;  %v2104_v13 = vadd.f32 %v5371_v42, %v7065_v28  ;;  %v5395_v8 = vpop.f32.mrf.mxu1 }
 0x1b2   : > { %v2073_v4 = vpop.f32.mrf.mxu0 }
 0x1b3   : > { %v7099_v15 = vadd.f32 %v5395_v8, %v2104_v13  ;;  %v2102_v34 = vadd.f32 %v2073_v4, %v7070_v26  ;;  %v2224_v43 = vpop.f32.mrf.mxu1 }
 0x1b4   : > { %v5374_v45 = vpop.f32.mrf.mxu0 }
 0x1b5   : > { %v7102_v31 = vadd.f32 %v2224_v43, %v2102_v34  ;;  %v2107_v2 = vadd.f32 %v5374_v45, %v1957_v23  ;;  %v5398_v9 = vpop.f32.mrf.mxu1 }
 0x1b6   : > { %v2086_v18 = vpop.f32.mrf.mxu0 }
 0x1b7   : > { %v2105_v47 = vadd.f32 %v2086_v18, %v1955_v61  ;;  %v7104_v16 = vadd.f32 %v5398_v9, %v2107_v2  ;;  %v2237_v11 = vpop.f32.mrf.mxu1 }
 0x1b8   : > { %v5375_v46 = vpop.f32.mrf.mxu0 }
 0x1b9   : > { %v2108_v24 = vadd.f32 %v5375_v46, %v1958_v52  ;;  %v7106_v44 = vadd.f32 %v2237_v11, %v2105_v47  ;;  %v5399_v35 = vpop.f32.mrf.mxu1 }
 0x1ba   : > { %v2089_v41 = vpop.f32.mrf.mxu0 }
 0x1bb   : > { %v2106_v37 = vadd.f32 %v2089_v41, %v1956_v1  ;;  %v7108_v51 = vadd.f32 %v5399_v35, %v2108_v24  ;;  %v2240_v53 = vpop.f32.mrf.mxu1 }
 0x1bd   : > { %v7110_v40 = vadd.f32 %v2240_v53, %v2106_v37 }
 0x1cc   : > { %v7112_v54 = vpop.f32.mrf.mxu0 }
 0x1cd   : > { %v7118_v28 = vpop.f32.mrf.mxu1 }
 0x1ce   : > { %v7114_v49 = vpop.f32.mrf.mxu0 }
 0x1cf   : > { %v7122_v50 = vpop.f32.mrf.mxu1 }
 0x1d0   : > { %v7116_v33 = vpop.f32.mrf.mxu0 }
 0x1d1   : > { %v7124_v30 = vpop.f32.mrf.mxu1 }
 0x1d2   : > { %v7120_v38 = vpop.f32.mrf.mxu0 }
 0x1d3   : > { %v7126_v26 = vpop.f32.mrf.mxu1 }
 0x1d4   : > { %v5422_v27 = vpop.f32.mrf.mxu0 }
 0x1d5   : > { %v5446_v14 = vpop.f32.mrf.mxu1 }
 0x1d6   : > { %v2387_v55 = vpop.f32.mrf.mxu0 }
 0x1d7   : > { %v7132_v58 = vpop.f32.mrf.mxu1 }
 0x1d8   : > { %v7128_v56 = vpop.f32.mrf.mxu0 }
 0x1d9   : > { %v7136_v23 = vpop.f32.mrf.mxu1 }
 0x1da   : > { %v7130_v36 = vpop.f32.mrf.mxu0 }
 0x1db   : > { %v7140_v60 = vpop.f32.mrf.mxu1 }
 0x1ec   : > { %v7134_v22 = vpop.f32.mrf.mxu0 }
 0x1ed   : > { %v7144_v61 = vpop.f32.mrf.mxu1 }
 0x1ee   : > { %v7138_v6 = vpop.f32.mrf.mxu0 }
 0x1ef   : > { %v7148_v5 = vpop.f32.mrf.mxu1 }
 0x1f0   : > { %v7142_v48 = vpop.f32.mrf.mxu0 }
 0x1f1   : > { %v7150_v3 = vpop.f32.mrf.mxu1 }
 0x1f2   : > { %v7146_v63 = vpop.f32.mrf.mxu0 }
 0x1f3   : > { %v7152_v0 = vpop.f32.mrf.mxu1 }
 0x1f4   : > { %v5470_v29 = vpop.f32.mrf.mxu0 }
 0x1f5   : > { %v7154_v1 = vpop.f32.mrf.mxu1 }
 0x1f6   : > { %v2688_v52 = vpop.f32.mrf.mxu0 }
 0x1f7   : > { %v7158_v7 = vpop.f32.mrf.mxu1 }
 0x1f8   : > { %v7156_v17 = vpop.f32.mrf.mxu0 }
 0x1f9   : > { %v7164_v21 = vpop.f32.mrf.mxu1 }
 0x1fa   : > { %v7160_v20 = vpop.f32.mrf.mxu0 }
 0x1fb   : > { %v7168_v19 = vpop.f32.mrf.mxu1 }
 0x20c   : > { %v7162_v10 = vpop.f32.mrf.mxu0 }
 0x20d   : > { %v7170_v12 = vpop.f32.mrf.mxu1 }
 0x20e   : > { %v7166_v57 = vpop.f32.mrf.mxu0 }
 0x20f   : > { %v7174_v62 = vpop.f32.mrf.mxu1 }
 0x210   : > { %v7172_v59 = vpop.f32.mrf.mxu0 }
 0x211   : > { %v7178_v42 = vpop.f32.mrf.mxu1 }
 0x212   : > { %v7176_v32 = vpop.f32.mrf.mxu0  ;;  %7339 = vst [vmem:[#allocation2_spill] sm:$0xff] %v7178_v42 }
 0x213   : > { %v7180_v8 = vpop.f32.mrf.mxu1 }
 0x214   : > { %v5518_v13 = vpop.f32.mrf.mxu0  ;;  %7340 = vst [vmem:[#allocation3_spill] sm:$0xff] %v7180_v8 }
 0x215   : > { %v7184_v34 = vpop.f32.mrf.mxu1 }
 0x216   : > { %v7182_v4 = vpop.f32.mrf.mxu0 }
 0x217   : > { %v7188_v45 = vpop.f32.mrf.mxu1 }
 0x218   : > { %v7186_v43 = vpop.f32.mrf.mxu0 }
 0x219   : > { %v7192_v9 = vpop.f32.mrf.mxu1 }
 0x21a   : > { %v7190_v2 = vpop.f32.mrf.mxu0  ;;  %7341 = vst [vmem:[#allocation4_spill] sm:$0xff] %v7192_v9 }
 0x21b   : > { %v7196_v47 = vpop.f32.mrf.mxu1 }
 0x21c   : > { %7342 = vst [vmem:[#allocation5_spill] sm:$0xff] %v7196_v47 }
 0x22c   : > { %v7194_v18 = vpop.f32.mrf.mxu0 }
 0x22d   : > { %v7200_v46 = vpop.f32.mrf.mxu1 }
 0x22e   : > { %v7198_v11 = vpop.f32.mrf.mxu0  ;;  %7344 = vst [vmem:[#allocation7_spill] sm:$0xff] %v7200_v46 }
 0x22f   : > { %7343 = vst [vmem:[#allocation6_spill] sm:$0xff] %v7198_v11  ;;  %v7204_v35 = vpop.f32.mrf.mxu1 }
 0x230   : > { %v7202_v24 = vpop.f32.mrf.mxu0  ;;  %7346 = vst [vmem:[#allocation9_spill] sm:$0xff] %v7204_v35 }
 0x231   : > { %7345 = vst [vmem:[#allocation8_spill] sm:$0xff] %v7202_v24  ;;  %v7208_v37 = vpop.f32.mrf.mxu1 }
 0x232   : > { %v7206_v41 = vpop.f32.mrf.mxu0  ;;  %7348 = vst [vmem:[#allocation11_spill] sm:$0xff] %v7208_v37  ;;  %v2404_v37 = vadd.f32 %v7112_v54, %v7093_v25  ;;  %v2409_v25 = vadd.f32 %v7128_v56, %v7108_v51 }
 0x233   : > { %7347 = vst [vmem:[#allocation10_spill] sm:$0xff] %v7206_v41  ;;  %v7212_v8 = vpop.f32.mrf.mxu1 }
 0x234   : > { %v7210_v53 = vpop.f32.mrf.mxu0  ;;  %7349 = vst [vmem:[#allocation12_spill] sm:$0xff] %v7212_v8  ;;  %v2408_v8 = vadd.f32 %v5422_v27, %v7104_v16 }
 0x235   : > { %v7214_v9 = vpop.f32.mrf.mxu1 }
 0x236   : > { %7350 = vst [vmem:[#allocation13_spill] sm:$0xff] %v7214_v9  ;;  %v7216_v42 = vpop.f32.mrf.mxu0  ;;  %v2402_v9 = vadd.f32 %v7114_v49, %v7096_v39  ;;  %v2403_v39 = vadd.f32 %v7120_v38, %v7102_v31 }
 0x237   : > { %7351 = vst [vmem:[#allocation14_spill] sm:$0xff] %v7216_v42  ;;  %v7218_v47 = vpop.f32.mrf.mxu1 }
 0x238   : > { %7352 = vst [vmem:[#allocation15_spill] sm:$0xff] %v7218_v47  ;;  %v7220_v11 = vpop.f32.mrf.mxu0  ;;  %v2406_v47 = vadd.f32 %v2387_v55, %v7106_v44  ;;  %v2553_v16 = vadd.f32 %v7122_v50, %v2402_v9  ;;  %v2560_v50 = vadd.f32 %v7136_v23, %v2409_v25  ;;  %v2554_v31 = vadd.f32 %v7126_v26, %v2403_v39  ;;  %v7361_v25 = vld [vmem:[#allocation3_spill] sm:$0xff]  ;;  %v7363_v39 = vld [vmem:[#allocation8_spill] sm:$0xff] }
 0x239   : > { %7353 = vst [vmem:[#allocation16_spill] sm:$0xff] %v7220_v11  ;;  %v7222_v46 = vpop.f32.mrf.mxu1 }
 0x23a   : > { %7354 = vst [vmem:[#allocation17_spill] sm:$0xff] %v7222_v46  ;;  %v7224_v24 = vpop.f32.mrf.mxu0  ;;  %v2555_v46 = vadd.f32 %v7118_v28, %v2404_v37  ;;  %v2557_v44 = vadd.f32 %v7132_v58, %v2406_v47  ;;  %v2407_v28 = vadd.f32 %v7130_v36, %v7110_v40  ;;  %v2703_v51 = vadd.f32 %v7138_v6, %v2553_v16  ;;  %v7357_v47 = vld [vmem:[#allocation2_spill] sm:$0xff]  ;;  %v7362_v16 = vld [vmem:[#allocation7_spill] sm:$0xff] }
 0x23b   : > { %7355 = vst [vmem:[#allocation18_spill] sm:$0xff] %v7224_v24  ;;  %v7230_v41 = vpop.f32.mrf.mxu1  ;;  %v2405_v24 = vadd.f32 %v7116_v33, %v7099_v15  ;;  %v2710_v58 = vadd.f32 %v7156_v17, %v2560_v50  ;;  %v2704_v23 = vadd.f32 %v7146_v63, %v2554_v31 }
 0x23c   : > { %v2705_v54 = vadd.f32 %v7134_v22, %v2555_v46  ;;  %v2707_v55 = vadd.f32 %v2688_v52, %v2557_v44  ;;  %v2558_v40 = vadd.f32 %v7140_v60, %v2407_v28  ;;  %v2853_v22 = vadd.f32 %v7148_v5, %v2703_v51  ;;  %v7367_v51 = vld [vmem:[#allocation9_spill] sm:$0xff] }
 0x23d   : > { %v2556_v33 = vadd.f32 %v7124_v30, %v2405_v24  ;;  %v2854_v63 = vadd.f32 %v7152_v0, %v2704_v23  ;;  %v7365_v44 = vld [vmem:[#allocation13_spill] sm:$0xff] }
 0x23e   : > { %v2855_v38 = vadd.f32 %v7144_v61, %v2705_v54  ;;  %v2857_v26 = vadd.f32 %v7158_v7, %v2707_v55  ;;  %v2708_v61 = vadd.f32 %v7160_v20, %v2558_v40  ;;  %v3004_v60 = vadd.f32 %v7166_v57, %v2853_v22  ;;  %v7360_v37 = vld [vmem:[#allocation14_spill] sm:$0xff]  ;;  %v7364_v54 = vld [vmem:[#allocation5_spill] sm:$0xff] }
 0x23f   : > { %v2706_v56 = vadd.f32 %v7142_v48, %v2556_v33  ;;  %v7368_v55 = vld [vmem:[#allocation10_spill] sm:$0xff] }
 0x240   : > { %v3006_v6 = vadd.f32 %v7162_v10, %v2855_v38  ;;  %v3008_v17 = vadd.f32 %v7182_v4, %v2857_v26  ;;  %v2858_v20 = vadd.f32 %v7168_v19, %v2708_v61  ;;  %v7358_v19 = vld [vmem:[#allocation6_spill] sm:$0xff]  ;;  %v7366_v28 = vld [vmem:[#allocation16_spill] sm:$0xff]  ;;  %v7372_v26 = vld [vmem:[#allocation11_spill] sm:$0xff] }
 0x242   : > { %v3156_v10 = vadd.f32 %v7170_v12, %v3006_v6  ;;  %v3158_v9 = vadd.f32 %v7188_v45, %v3008_v17  ;;  %v3009_v0 = vadd.f32 %v7190_v2, %v2858_v20  ;;  %v7371_v22 = vld [vmem:[#allocation18_spill] sm:$0xff] }
 0x244   : > { %v3306_v4 = vadd.f32 %v7194_v18, %v3156_v10  ;;  %v3159_v2 = vadd.f32 %v7364_v54, %v3009_v0 }
 0x246   : > { %v3457_v18 = vadd.f32 %v7362_v16, %v3306_v4  ;;  %v3309_v23 = vadd.f32 %v7371_v22, %v3159_v2 }
 0x24c   : > { %v7226_v35 = vpop.f32.mrf.mxu0 }
 0x24d   : > { %7356 = vst [vmem:[#allocation19_spill] sm:$0xff] %v7226_v35  ;;  %v7235_v42 = vpop.f32.mrf.mxu1  ;;  %v2559_v35 = vadd.f32 %v5446_v14, %v2408_v8 }
 0x24e   : > { %v7238_v11 = vpop.f32.mrf.mxu0 }
 0x24f   : > { %v7249_v49 = vpop.f32.mrf.mxu1  ;;  %v2709_v27 = vadd.f32 %v5470_v29, %v2559_v35  ;;  %v2856_v29 = vadd.f32 %v7150_v3, %v2706_v56  ;;  %v7359_v35 = vld [vmem:[#allocation4_spill] sm:$0xff] }
 0x250   : > { %v7254_v15 = vpop.f32.mrf.mxu0 }
 0x251   : > { %v7262_v14 = vpop.f32.mrf.mxu1  ;;  %v2859_v36 = vadd.f32 %v7154_v1, %v2709_v27  ;;  %v2860_v1 = vadd.f32 %v7164_v21, %v2710_v58  ;;  %v3007_v7 = vadd.f32 %v7172_v59, %v2856_v29  ;;  %v3005_v21 = vadd.f32 %v7176_v32, %v2854_v63  ;;  %v7373_v29 = vld [vmem:[#allocation17_spill] sm:$0xff]  ;;  %v7374_v63 = vld [vmem:[#allocation12_spill] sm:$0xff] }
 0x252   : > { %v3577_v30 = vpop.f32.mrf.mxu0 }
 0x253   : > { %v3010_v48 = vadd.f32 %v5518_v13, %v2859_v36  ;;  %v7274_v52 = vpop.f32.mrf.mxu1  ;;  %v3011_v57 = vadd.f32 %v7186_v43, %v2860_v1  ;;  %v3154_v13 = vadd.f32 %v7174_v62, %v3004_v60  ;;  %v3157_v46 = vadd.f32 %v7357_v47, %v3007_v7  ;;  %v7370_v36 = vld [vmem:[#allocation15_spill] sm:$0xff] }
 0x254   : > { %v5614_v5 = vpop.f32.mrf.mxu0  ;;  %v3308_v62 = vadd.f32 %v7360_v37, %v3158_v9  ;;  %v3155_v32 = vadd.f32 %v7361_v25, %v3005_v21  ;;  %v7369_v38 = vld [vmem:[#allocation19_spill] sm:$0xff] }
 0x255   : > { %v5638_v8 = vpop.f32.mrf.mxu1  ;;  %v3160_v3 = vadd.f32 %v7184_v34, %v3010_v48  ;;  %v3304_v24 = vadd.f32 %v7358_v19, %v3154_v13  ;;  %v3161_v43 = vadd.f32 %v7359_v35, %v3011_v57  ;;  %v3307_v45 = vadd.f32 %v7363_v39, %v3157_v46 }
 0x256   : > { %v3590_v59 = vpop.f32.mrf.mxu0  ;;  %v3305_v31 = vadd.f32 %v7368_v55, %v3155_v32  ;;  %v3607_v56 = vadd.f32 %v7369_v38, %v3457_v18  ;;  %v3459_v58 = vadd.f32 %v7370_v36, %v3308_v62  ;;  %v3460_v57 = vadd.f32 %v7230_v41, %v3309_v23 }
 0x257   : > { %v3310_v12 = vadd.f32 %v7210_v53, %v3160_v3  ;;  %v3741_v34 = vpop.f32.mrf.mxu1  ;;  %v3311_v27 = vadd.f32 %v7366_v28, %v3161_v43  ;;  %v3455_v50 = vadd.f32 %v7367_v51, %v3304_v24  ;;  %v3458_v61 = vadd.f32 %v7372_v26, %v3307_v45 }
 0x258   : > { %v5615_v33 = vpop.f32.mrf.mxu0  ;;  %v3609_v1 = vadd.f32 %v3590_v59, %v3459_v58  ;;  %v3456_v10 = vadd.f32 %v7374_v63, %v3305_v31  ;;  %v3758_v7 = vadd.f32 %v7235_v42, %v3607_v56 }
 0x259   : > { %v3461_v53 = vadd.f32 %v7365_v44, %v3310_v12  ;;  %v5639_v40 = vpop.f32.mrf.mxu1  ;;  %v3605_v48 = vadd.f32 %v7238_v11, %v3455_v50  ;;  %v3462_v60 = vadd.f32 %v7373_v29, %v3311_v27  ;;  %v3608_v20 = vadd.f32 %v7254_v15, %v3458_v61  ;;  %v4760_v11 = vld [vmem:[%s7337_s2] ss:$0 sm:$0xff] }
 0x25a   : > { %v3593_v17 = vpop.f32.mrf.mxu0  ;;  %v3606_v9 = vadd.f32 %v3577_v30, %v3456_v10  ;;  %v3760_v59 = vadd.f32 %v3741_v34, %v3609_v1 }
 0x25b   : > { %v3611_v6 = vadd.f32 %v5614_v5, %v3461_v53  ;;  %v3744_v3 = vpop.f32.mrf.mxu1  ;;  %v3612_v5 = vadd.f32 %v5615_v33, %v3462_v60  ;;  %v3756_v4 = vadd.f32 %v7249_v49, %v3605_v48  ;;  %v3610_v42 = vadd.f32 %v3593_v17, %v3460_v57 }
 0x25c   : > { %v3757_v35 = vadd.f32 %v7274_v52, %v3606_v9 }
 0x25d   : > { %v3762_v13 = vadd.f32 %v5638_v8, %v3611_v6  ;;  %v3759_v8 = vadd.f32 %v7262_v14, %v3608_v20  ;;  %v3763_v30 = vadd.f32 %v5639_v40, %v3612_v5  ;;  %v3761_v25 = vadd.f32 %v3744_v3, %v3610_v42 }
 0x26c   : > { %v5658_v21 = vpop.f32.mrf.mxu0 }
 0x26d   : > { %v3908_v0 = vadd.f32 %v5658_v21, %v3758_v7  ;;  %v5662_v12 = vpop.f32.mrf.mxu1 }
 0x26e   : > { %v3912_v41 = vadd.f32 %v5662_v12, %v3762_v13  ;;  %v3875_v15 = vpop.f32.mrf.mxu0 }
 0x26f   : > { %v3923_v47 = vadd.f32 %v4760_v11, %v3908_v0  ;;  %v3906_v46 = vadd.f32 %v3875_v15, %v3756_v4  ;;  %v3891_v49 = vpop.f32.mrf.mxu1 }
 0x270   : > { %v3927_v19 = vadd.f32 %v4760_v11, %v3912_v41  ;;  %v3910_v24 = vadd.f32 %v3891_v49, %v3760_v59  ;;  %v5659_v34 = vpop.f32.mrf.mxu0 }
 0x271   : > { %3931 = vst [vmem:[%s7320_s13 + $0x10] sm:$0xff] %v3923_v47  ;;  %v3921_v43 = vadd.f32 %v4760_v11, %v3906_v46  ;;  %v3909_v37 = vadd.f32 %v5659_v34, %v3759_v8  ;;  %v5663_v62 = vpop.f32.mrf.mxu1 }
 0x272   : > { %3935 = vst [vmem:[%s7320_s13 + $0x30] sm:$0xff] %v3927_v19  ;;  %v3925_v14 = vadd.f32 %v4760_v11, %v3910_v24  ;;  %v3913_v32 = vadd.f32 %v5663_v62, %v3763_v30  ;;  %v3878_v16 = vpop.f32.mrf.mxu0 }
 0x273   : > { %3929 = vst [vmem:[%s7320_s13] sm:$0xff] %v3921_v43  ;;  %v3924_v18 = vadd.f32 %v4760_v11, %v3909_v37  ;;  %v3907_v39 = vadd.f32 %v3878_v16, %v3757_v35  ;;  %v3894_v45 = vpop.f32.mrf.mxu1 }
 0x274   : > { %3933 = vst [vmem:[%s7320_s13 + $0x20] sm:$0xff] %v3925_v14  ;;  %v3928_v54 = vadd.f32 %v4760_v11, %v3913_v32  ;;  %v3911_v52 = vadd.f32 %v3894_v45, %v3761_v25 }
 0x275   : > { %3932 = vst [vmem:[%s7320_s13 + $0x18] sm:$0xff] %v3924_v18  ;;  %v3922_v2 = vadd.f32 %v4760_v11, %v3907_v39 }
 0x276   : > { %3936 = vst [vmem:[%s7320_s13 + $0x38] sm:$0xff] %v3928_v54  ;;  %v3926_v44 = vadd.f32 %v4760_v11, %v3911_v52 }
 0x277   : > { %3930 = vst [vmem:[%s7320_s13 + $0x8] sm:$0xff] %v3922_v2 }
 0x278   : > { %3934 = vst [vmem:[%s7320_s13 + $0x28] sm:$0xff] %v3926_v44 }
 0x279 PF: > { %s13_s12 = sadd.s32 1, %s5895_s12  }
 0x27a   : > { %p10_p4 = scmp.ge.s32.totalorder %s13_s12, 4  }
 0x27c   :  { %12 = sbr.rel (!%p10_p4) target bundleno = 1 (0x1), region = 95 }

</bundles_post_ra>
